<compile_context>
chip_gen: v7x
topology: tpu7x:2x2x1
jax: 0.10.0
libtpu: 0.0.40
codegen_flags: <defaults>
</compile_context>

<pallas_src>
import jax
import jax.numpy as jnp
from jax.experimental import pallas as pl
from jax.experimental.pallas import tpu as pltpu

C_BACKBONE = 2048        # ResNet50 final feature channels (fixed by the backbone)
EMBED_DIM = 256          # small embedding_dim for the synthetic run
BN_EPS = 1e-5
VMEM_LIMIT_BYTES = 32 * 1024 * 1024    # safe on v5e/v6e (128 MiB) and v7x (64 MiB)
FEATS_VMEM_BUDGET = 16 * 1024 * 1024   # budget for the double-buffered feats tile


def _pool_linear_kernel(feat_ref, w_ref, z_ref):
    """Pass 1: global-avg-pool + Linear (no bias), batch-tiled.

    feat_ref : [TILE_N, C, HW]  bf16 backbone features (free reshape of NCHW)
    w_ref    : [C, D]           bf16 Linear weight (x @ W form), grid-resident
    z_ref    : [TILE_N, D]      f32 pre-BN activations (bias added in pass 2)
    """
    # AdaptiveAvgPool2d(1) == mean over the spatial (lane) axis.  Upcast the
    # small VMEM tile to f32 first (keeps v5e off the bf16 VALU path).
    pooled = jnp.mean(feat_ref[...].astype(jnp.float32), axis=-1)   # [TILE_N, C]
    # Linear(2048, D) on the MXU, f32 accumulation.  HBM bytes for W stay
    # bf16; the upcast is a cheap in-VMEM convert.
    z_ref[...] = jnp.dot(pooled, w_ref[...].astype(jnp.float32),
                         preferred_element_type=jnp.float32)


def _bias_bn_relu_kernel(z_ref, p_ref, out_ref):
    """Pass 2: Linear bias + BatchNorm1d (training-mode batch stats) + ReLU.

    z_ref  : [N, D]  f32 pre-BN activations (full batch)
    p_ref  : [3, D]  f32 packed params: row0 = Linear bias, row1 = BN gamma,
                     row2 = BN beta (single DMA)
    out_ref: [N, D]  f32 embeddings
    """
    z = z_ref[...] + p_ref[0:1, :]                                  # Linear bias
    mu = jnp.mean(z, axis=0, keepdims=True)                         # [1, D]
    var = jnp.mean((z - mu) ** 2, axis=0, keepdims=True)            # biased var
    zhat = (z - mu) * jax.lax.rsqrt(var + BN_EPS)
    out_ref[...] = jnp.maximum(zhat * p_ref[1:2, :] + p_ref[2:3, :], 0.0)


def _pick_tile_n(n, c, hw, itemsize, budget_bytes=FEATS_VMEM_BUDGET):
    """Largest batch tile whose double-buffered feats block fits the budget.

    Keeps tile_n == n or a multiple of 8 (so the z output block obeys the
    (8, 128) sublane/lane constraint).
    """
    per_row = 2 * c * hw * itemsize          # x2: BlockSpec double-buffering
    tile = max(1, min(n, budget_bytes // per_row))
    if tile >= n:
        return n
    tile = max(8, (tile // 8) * 8)
    while n % tile:
        tile -= 8
        if tile <= 0:
            return n                         # fallback: whole batch resident
    return tile


def metric_feature_extractor(backbone_feats_nchw, w, params):
    """backbone_feats_nchw: [N, 2048, H, W] (bf16), w: [2048, D] (bf16),
    params: [3, D] f32 packed (bias, gamma, beta)."""
    n, c, h, wd = backbone_feats_nchw.shape
    assert c == C_BACKBONE
    hw = h * wd
    d = w.shape[1]

    # Free reshape (no HBM transpose / extra round trip): NCHW -> [N, C, H*W].
    feats = backbone_feats_nchw.reshape(n, c, hw)

    tile_n = _pick_tile_n(n, c, hw, jnp.dtype(feats.dtype).itemsize)
    grid = (n // tile_n,)

    # Pass 1: batch-tiled pool + Linear.  W's index_map is constant, so it is
    # DMA'd once and stays resident across grid steps.
    z = pl.pallas_call(
        _pool_linear_kernel,
        out_shape=jax.ShapeDtypeStruct((n, d), jnp.float32),
        grid=grid,
        in_specs=[
            pl.BlockSpec((tile_n, c, hw), lambda i: (i, 0, 0)),
            pl.BlockSpec((c, d), lambda i: (0, 0)),
        ],
        out_specs=pl.BlockSpec((tile_n, d), lambda i: (i, 0)),
        compiler_params=pltpu.CompilerParams(
            dimension_semantics=("parallel",),      # shards batch across v7x's 2 TCs
            vmem_limit_bytes=VMEM_LIMIT_BYTES,
        ),
    )(feats, w)

    # Pass 2: bias + full-batch BatchNorm1d + ReLU (tiny, single program).
    out = pl.pallas_call(
        _bias_bn_relu_kernel,
        out_shape=jax.ShapeDtypeStruct((n, d), jnp.float32),
        in_specs=[pl.BlockSpec(memory_space=pltpu.MemorySpace.VMEM)] * 2,
        out_specs=pl.BlockSpec(memory_space=pltpu.MemorySpace.VMEM),
    )(z, params)
    return out


def _reference(backbone_feats_nchw, w, params):
    """Pure-JAX reference of the same forward (same bf16 inputs, f32 math)."""
    f = backbone_feats_nchw.astype(jnp.float32)
    wf = w.astype(jnp.float32)
    b, gamma, beta = params[0], params[1], params[2]
    pooled = jnp.mean(f, axis=(2, 3))                                # [N, C]
    z = jnp.dot(pooled, wf, precision=jax.lax.Precision.HIGHEST) + b[None, :]
    mu = jnp.mean(z, axis=0, keepdims=True)
    var = jnp.mean((z - mu) ** 2, axis=0, keepdims=True)
    zhat = (z - mu) / jnp.sqrt(var + BN_EPS)
    return jnp.maximum(zhat * gamma[None, :] + beta[None, :], 0.0)


if __name__ == "__main__":
    key = jax.random.PRNGKey(0)
    k_feat, k_w, k_b = jax.random.split(key, 3)

    N, H, W = 2, 4, 4  # small spatial extent of the backbone feature map

    # Synthetic backbone output (NCHW).  In a real pipeline the backbone /
    # checkpoint would supply these directly in bf16 (one-time init cost here).
    feats_nchw = jax.random.normal(
        k_feat, (N, C_BACKBONE, H, W), dtype=jnp.float32).astype(jnp.bfloat16)

    # Projection parameters.  Big weight stored in bf16; tiny vectors in f32,
    # packed once at init into a single [3, D] array (one DMA in the kernel).
    lin_w = (jax.random.normal(k_w, (C_BACKBONE, EMBED_DIM), dtype=jnp.float32)
             * (1.0 / jnp.sqrt(jnp.float32(C_BACKBONE)))).astype(jnp.bfloat16)
    lin_b = 0.01 * jax.random.normal(k_b, (EMBED_DIM,), dtype=jnp.float32)
    bn_gamma = jnp.ones((EMBED_DIM,), dtype=jnp.float32)    # PyTorch BN default
    bn_beta = jnp.zeros((EMBED_DIM,), dtype=jnp.float32)    # PyTorch BN default
    params = jnp.stack([lin_b, bn_gamma, bn_beta], axis=0)  # [3, D]

    emb = metric_feature_extractor(feats_nchw, lin_w, params)
    emb = jax.block_until_ready(emb)

    ref = _reference(feats_nchw, lin_w, params)
    assert emb.shape == (N, EMBED_DIM)
    assert jnp.allclose(emb, ref, atol=2e-3, rtol=2e-3), "mismatch vs JAX reference"

    print("KERNEL_OK")
</pallas_src>

<mosaic_0001>
module attributes {stable_mosaic.version = 11 : i64} {
  func.func @_pool_linear_kernel(%arg0: i32, %arg1: memref<2x2048x16xbf16, #tpu.memory_space<vmem>>, %arg2: memref<2048x256xbf16, #tpu.memory_space<vmem>>, %arg3: memref<2x256xf32, #tpu.memory_space<vmem>>) attributes {dimension_semantics = [#tpu.dimension_semantics<parallel>], iteration_bounds = array<i64: 1>, scalar_prefetch = 0 : i64, scratch_operands = 0 : i64, tpu.core_type = #tpu.core_type<tc>, window_params = [{transform_indices = @transform_0, window_bounds = array<i64: 2, 2048, 16>}, {pipeline_mode = #tpu.pipeline_mode<synchronous>, transform_indices = @transform_1, window_bounds = array<i64: 2048, 256>}, {transform_indices = @transform_2, window_bounds = array<i64: 2, 256>}]} {
    %c0 = arith.constant 0 : index
    %c0_0 = arith.constant 0 : index
    %c0_1 = arith.constant 0 : index
    %0 = vector.load %arg1[%c0, %c0_0, %c0_1] : memref<2x2048x16xbf16, #tpu.memory_space<vmem>>, vector<2x2048x16xbf16>
    %1 = arith.extf %0 : vector<2x2048x16xbf16> to vector<2x2048x16xf32>
    %cst = arith.constant dense<0.000000e+00> : vector<2x2048xf32>
    %2 = vector.multi_reduction <add>, %1, %cst [2] : vector<2x2048x16xf32> to vector<2x2048xf32>
    %cst_2 = arith.constant 1.600000e+01 : f32
    %3 = vector.broadcast %cst_2 : f32 to vector<2x2048xf32>
    %4 = arith.divf %2, %3 : vector<2x2048xf32>
    %c0_3 = arith.constant 0 : index
    %c0_4 = arith.constant 0 : index
    %5 = vector.load %arg2[%c0_3, %c0_4] : memref<2048x256xbf16, #tpu.memory_space<vmem>>, vector<2048x256xbf16>
    %6 = arith.extf %5 : vector<2048x256xbf16> to vector<2048x256xf32>
    %cst_5 = arith.constant dense<0.000000e+00> : vector<2x256xf32>
    %7 = tpu.matmul %4, %6, %cst_5 {dimension_numbers = #tpu.dot_dimension_numbers<[1], [0], [0], [1], [0, 0, 1, 1], [], []>} : vector<2x2048xf32>, vector<2048x256xf32>, vector<2x256xf32> -> vector<2x256xf32>
    %c0_6 = arith.constant 0 : index
    %c0_7 = arith.constant 0 : index
    %8 = vector.load %arg3[%c0_6, %c0_7] : memref<2x256xf32, #tpu.memory_space<vmem>>, vector<2x256xf32>
    tpu.vector_store %arg3[%c0_6, %c0_7], %7 {strides = array<i32>} : memref<2x256xf32, #tpu.memory_space<vmem>>, vector<2x256xf32>,
    return
  }
  func.func @transform_0(%arg0: i32) -> (i32, i32, i32) {
    %c0_i32 = arith.constant 0 : i32
    %c0_i32_0 = arith.constant 0 : i32
    %c0_i32_1 = arith.constant 0 : i32
    return %arg0, %c0_i32, %c0_i32_0 : i32, i32, i32
  }
  func.func @transform_1(%arg0: i32) -> (i32, i32) {
    %c0_i32 = arith.constant 0 : i32
    %c0_i32_0 = arith.constant 0 : i32
    %c0_i32_1 = arith.constant 0 : i32
    return %c0_i32, %c0_i32_0 : i32, i32
  }
  func.func @transform_2(%arg0: i32) -> (i32, i32) {
    %c0_i32 = arith.constant 0 : i32
    %c0_i32_0 = arith.constant 0 : i32
    return %arg0, %c0_i32 : i32, i32
  }
}

</mosaic_0001>

<bundles_post_ra>
// kernel: tpu_custom_call.1
= control target key start
LH: loop header
LB: loop body
LE: loop exit
PB: predicated region body
PF: predicated region fallthrough
CT: control target
= control target key end

     0   :  { %vm1036_vm0 = vcmask 130048   ;;  %s13836_s0 = inlined_call_operand.vmem [shape: bf16[2,2048,16], index: 0, kind: input, shape index: {}]   ;;  %s13837_s1 = inlined_call_operand.vmem [shape: bf16[2048,256], index: 1, kind: input, shape index: {}]   ;;  %s13838_s2 = inlined_call_operand.hbm [shape: f32[2,256], index: 2, kind: output, shape index: {}]  }
   0x1   :  { %v8578_v0 = vld [vmem:[%s13836_s0 + $0x8] sm:$0xff]   ;;  %v7555_v1 = vld [vmem:[%s13836_s0] sm:$0xff]   ;;  %v8579_v6 = vld [vmem:[%s13836_s0 + $0x10] sm:$0xff]  }
   0x2   :  { %v7560_v2 = vunpack.c.l.bf16 %v8578_v0  ;;  %v7556_v3 = vunpack.c.l.bf16 %v7555_v1  ;;  %v7561_v4 = vunpack.c.h.bf16 %v8578_v0  ;;  %v7557_v5 = vunpack.c.h.bf16 %v7555_v1  ;;  %v8580_v13 = vld [vmem:[%s13836_s0 + $0x18] sm:$0xff]   ;;  %v8581_v18 = vld [vmem:[%s13836_s0 + $0x20] sm:$0xff]   ;;  %v8582_v23 = vld [vmem:[%s13836_s0 + $0x28] sm:$0xff]  }
   0x3   :  { %v7565_v11 = vunpack.c.h.bf16 %v8579_v6  ;;  %v7564_v12 = vunpack.c.l.bf16 %v8579_v6  ;;  %v7569_v16 = vunpack.c.h.bf16 %v8580_v13  ;;  %v7568_v17 = vunpack.c.l.bf16 %v8580_v13  ;;  %v8583_v24 = vld [vmem:[%s13836_s0 + $0x30] sm:$0xff]   ;;  %v8584_v29 = vld [vmem:[%s13836_s0 + $0x38] sm:$0xff]   ;;  %v8585_v34 = vld [vmem:[%s13836_s0 + $0x40] sm:$0xff]  }
   0x4   :  { %v1043_v7 = vsel %vm1036_vm0, %v7560_v2, 0.0  ;;  %v1037_v8 = vsel %vm1036_vm0, %v7556_v3, 0.0  ;;  %v1046_v9 = vsel %vm1036_vm0, %v7561_v4, 0.0  ;;  %v1040_v10 = vsel %vm1036_vm0, %v7557_v5, 0.0  ;;  %v8586_v39 = vld [vmem:[%s13836_s0 + $0x48] sm:$0xff]   ;;  %v8587_v44 = vld [vmem:[%s13836_s0 + $0x50] sm:$0xff]  }
   0x5   :  { %1044 = vadd.xlane.f32.xlu1 %v1043_v7  ;;  %1038 = vadd.xlane.f32.xlu0 %v1037_v8  ;;  %v1052_v14 = vsel %vm1036_vm0, %v7565_v11, 0.0  ;;  %v1049_v15 = vsel %vm1036_vm0, %v7564_v12, 0.0  ;;  %v1058_v19 = vsel %vm1036_vm0, %v7569_v16, 0.0  ;;  %v1055_v20 = vsel %vm1036_vm0, %v7568_v17, 0.0  ;;  %v8588_v49 = vld [vmem:[%s13836_s0 + $0x58] sm:$0xff]   ;;  %v8589_v54 = vld [vmem:[%s13836_s0 + $0x60] sm:$0xff]  }
   0x6   :  { %v7573_v21 = vunpack.c.h.bf16 %v8581_v18  ;;  %v7572_v22 = vunpack.c.l.bf16 %v8581_v18  ;;  %v7577_v27 = vunpack.c.h.bf16 %v8582_v23  ;;  %v7576_v28 = vunpack.c.l.bf16 %v8582_v23  ;;  %v8590_v59 = vld [vmem:[%s13836_s0 + $0x68] sm:$0xff]   ;;  %v8591_v4 = vld [vmem:[%s13836_s0 + $0x70] sm:$0xff]   ;;  %v8592_v5 = vld [vmem:[%s13836_s0 + $0x78] sm:$0xff]  }
   0x7   :  { %v7581_v32 = vunpack.c.h.bf16 %v8583_v24  ;;  %v7580_v33 = vunpack.c.l.bf16 %v8583_v24  ;;  %v7585_v37 = vunpack.c.h.bf16 %v8584_v29  ;;  %v7584_v38 = vunpack.c.l.bf16 %v8584_v29 }
   0x8   :  { %v1064_v25 = vsel %vm1036_vm0, %v7573_v21, 0.0  ;;  %v1061_v26 = vsel %vm1036_vm0, %v7572_v22, 0.0  ;;  %v1070_v30 = vsel %vm1036_vm0, %v7577_v27, 0.0  ;;  %v1067_v31 = vsel %vm1036_vm0, %v7576_v28, 0.0 }
   0x9   :  { %1047 = vadd.xlane.f32.xlu1 %v1046_v9  ;;  %1041 = vadd.xlane.f32.xlu0 %v1040_v10  ;;  %v1076_v35 = vsel %vm1036_vm0, %v7581_v32, 0.0  ;;  %v1073_v36 = vsel %vm1036_vm0, %v7580_v33, 0.0  ;;  %v1082_v40 = vsel %vm1036_vm0, %v7585_v37, 0.0  ;;  %v1079_v41 = vsel %vm1036_vm0, %v7584_v38, 0.0  ;;  %v8593_v10 = vld [vmem:[%s13836_s0 + $0x80] sm:$0xff]  }
   0xa   :  { %v7589_v42 = vunpack.c.h.bf16 %v8585_v34  ;;  %v7588_v43 = vunpack.c.l.bf16 %v8585_v34  ;;  %v7593_v47 = vunpack.c.h.bf16 %v8586_v39  ;;  %v7592_v48 = vunpack.c.l.bf16 %v8586_v39 }
   0xb   :  { %v7597_v52 = vunpack.c.h.bf16 %v8587_v44  ;;  %v7596_v53 = vunpack.c.l.bf16 %v8587_v44  ;;  %v7601_v57 = vunpack.c.h.bf16 %v8588_v49  ;;  %v7600_v58 = vunpack.c.l.bf16 %v8588_v49 }
   0xc   :  { %v1088_v45 = vsel %vm1036_vm0, %v7589_v42, 0.0  ;;  %v1085_v46 = vsel %vm1036_vm0, %v7588_v43, 0.0  ;;  %v1094_v50 = vsel %vm1036_vm0, %v7593_v47, 0.0  ;;  %v1091_v51 = vsel %vm1036_vm0, %v7592_v48, 0.0 }
   0xd   :  { %1053 = vadd.xlane.f32.xlu1 %v1052_v14  ;;  %1050 = vadd.xlane.f32.xlu0 %v1049_v15  ;;  %v1100_v55 = vsel %vm1036_vm0, %v7597_v52, 0.0  ;;  %v1097_v56 = vsel %vm1036_vm0, %v7596_v53, 0.0  ;;  %v1106_v60 = vsel %vm1036_vm0, %v7601_v57, 0.0  ;;  %v1103_v61 = vsel %vm1036_vm0, %v7600_v58, 0.0  ;;  %v8594_v15 = vld [vmem:[%s13836_s0 + $0x88] sm:$0xff]  }
   0xe   :  { %v7605_v62 = vunpack.c.h.bf16 %v8589_v54  ;;  %v7604_v63 = vunpack.c.l.bf16 %v8589_v54  ;;  %v7609_v2 = vunpack.c.h.bf16 %v8590_v59  ;;  %v7608_v3 = vunpack.c.l.bf16 %v8590_v59 }
   0xf   :  { %v7613_v8 = vunpack.c.h.bf16 %v8591_v4  ;;  %v7612_v9 = vunpack.c.l.bf16 %v8591_v4  ;;  %v7617_v13 = vunpack.c.h.bf16 %v8592_v5  ;;  %v7616_v14 = vunpack.c.l.bf16 %v8592_v5 }
  0x10   :  { %v1112_v0 = vsel %vm1036_vm0, %v7605_v62, 0.0  ;;  %v1109_v1 = vsel %vm1036_vm0, %v7604_v63, 0.0  ;;  %v1118_v6 = vsel %vm1036_vm0, %v7609_v2, 0.0  ;;  %v1115_v7 = vsel %vm1036_vm0, %v7608_v3, 0.0 }
  0x11   :  { %1059 = vadd.xlane.f32.xlu1 %v1058_v19  ;;  %1056 = vadd.xlane.f32.xlu0 %v1055_v20  ;;  %v1124_v11 = vsel %vm1036_vm0, %v7613_v8, 0.0  ;;  %v1121_v12 = vsel %vm1036_vm0, %v7612_v9, 0.0  ;;  %v1130_v16 = vsel %vm1036_vm0, %v7617_v13, 0.0  ;;  %v1127_v17 = vsel %vm1036_vm0, %v7616_v14, 0.0  ;;  %v8595_v20 = vld [vmem:[%s13836_s0 + $0x90] sm:$0xff]  }
  0x12   :  { %v7621_v18 = vunpack.c.h.bf16 %v8593_v10  ;;  %v7620_v19 = vunpack.c.l.bf16 %v8593_v10  ;;  %v7625_v23 = vunpack.c.h.bf16 %v8594_v15  ;;  %v7624_v24 = vunpack.c.l.bf16 %v8594_v15 }
  0x13   :  { %v7629_v28 = vunpack.c.h.bf16 %v8595_v20  ;;  %v7628_v29 = vunpack.c.l.bf16 %v8595_v20 }
  0x14   :  { %v1136_v21 = vsel %vm1036_vm0, %v7621_v18, 0.0  ;;  %v1133_v22 = vsel %vm1036_vm0, %v7620_v19, 0.0  ;;  %v1139_v27 = vsel %vm1036_vm0, %v7624_v24, 0.0 }
  0x15   :  { %1065 = vadd.xlane.f32.xlu1 %v1064_v25  ;;  %1062 = vadd.xlane.f32.xlu0 %v1061_v26  ;;  %v8596_v25 = vld [vmem:[%s13836_s0 + $0x98] sm:$0xff]   ;;  %v1142_v26 = vsel %vm1036_vm0, %v7625_v23, 0.0  ;;  %v1145_v32 = vsel %vm1036_vm0, %v7628_v29, 0.0 }
  0x16   :  { %v7633_v33 = vunpack.c.h.bf16 %v8596_v25  ;;  %v7632_v34 = vunpack.c.l.bf16 %v8596_v25 }
  0x18   :  { %v1151_v37 = vsel %vm1036_vm0, %v7632_v34, 0.0 }
  0x19   :  { %1071 = vadd.xlane.f32.xlu1 %v1070_v30  ;;  %1068 = vadd.xlane.f32.xlu0 %v1067_v31  ;;  %v8597_v30 = vld [vmem:[%s13836_s0 + $0xa0] sm:$0xff]   ;;  %v1148_v31 = vsel %vm1036_vm0, %v7629_v28, 0.0 }
  0x1a   :  { %v7637_v38 = vunpack.c.h.bf16 %v8597_v30  ;;  %v7636_v39 = vunpack.c.l.bf16 %v8597_v30 }
  0x1c   :  { %v1157_v42 = vsel %vm1036_vm0, %v7636_v39, 0.0 }
  0x1d   :  { %1077 = vadd.xlane.f32.xlu1 %v1076_v35  ;;  %1074 = vadd.xlane.f32.xlu0 %v1073_v36  ;;  %v8598_v35 = vld [vmem:[%s13836_s0 + $0xa8] sm:$0xff]   ;;  %v1154_v36 = vsel %vm1036_vm0, %v7633_v33, 0.0 }
  0x1e   :  { %v7641_v43 = vunpack.c.h.bf16 %v8598_v35  ;;  %v7640_v44 = vunpack.c.l.bf16 %v8598_v35 }
  0x20   :  { %v1163_v47 = vsel %vm1036_vm0, %v7640_v44, 0.0 }
  0x21   :  { %1083 = vadd.xlane.f32.xlu1 %v1082_v40  ;;  %1080 = vadd.xlane.f32.xlu0 %v1079_v41  ;;  %v8599_v40 = vld [vmem:[%s13836_s0 + $0xb0] sm:$0xff]   ;;  %v1160_v41 = vsel %vm1036_vm0, %v7637_v38, 0.0 }
  0x22   :  { %v7645_v48 = vunpack.c.h.bf16 %v8599_v40  ;;  %v7644_v49 = vunpack.c.l.bf16 %v8599_v40 }
  0x24   :  { %v1169_v52 = vsel %vm1036_vm0, %v7644_v49, 0.0 }
  0x25   :  { %1089 = vadd.xlane.f32.xlu1 %v1088_v45  ;;  %1086 = vadd.xlane.f32.xlu0 %v1085_v46  ;;  %v8600_v45 = vld [vmem:[%s13836_s0 + $0xb8] sm:$0xff]   ;;  %v1166_v46 = vsel %vm1036_vm0, %v7641_v43, 0.0 }
  0x26   :  { %v7649_v53 = vunpack.c.h.bf16 %v8600_v45  ;;  %v7648_v54 = vunpack.c.l.bf16 %v8600_v45 }
  0x28   :  { %v1175_v57 = vsel %vm1036_vm0, %v7648_v54, 0.0 }
  0x29   :  { %1095 = vadd.xlane.f32.xlu1 %v1094_v50  ;;  %1092 = vadd.xlane.f32.xlu0 %v1091_v51  ;;  %v8601_v50 = vld [vmem:[%s13836_s0 + $0xc0] sm:$0xff]   ;;  %v1172_v51 = vsel %vm1036_vm0, %v7645_v48, 0.0 }
  0x2a   :  { %v7653_v58 = vunpack.c.h.bf16 %v8601_v50  ;;  %v7652_v59 = vunpack.c.l.bf16 %v8601_v50 }
  0x2c   :  { %v1181_v62 = vsel %vm1036_vm0, %v7652_v59, 0.0 }
  0x2d   :  { %1101 = vadd.xlane.f32.xlu1 %v1100_v55  ;;  %1098 = vadd.xlane.f32.xlu0 %v1097_v56  ;;  %v8602_v55 = vld [vmem:[%s13836_s0 + $0xc8] sm:$0xff]   ;;  %v1178_v56 = vsel %vm1036_vm0, %v7649_v53, 0.0 }
  0x2e   :  { %v7657_v63 = vunpack.c.h.bf16 %v8602_v55 }
  0x30   :  { %v1190_v2 = vsel %vm1036_vm0, %v7657_v63, 0.0 }
  0x31   :  { %1107 = vadd.xlane.f32.xlu1 %v1106_v60  ;;  %1104 = vadd.xlane.f32.xlu0 %v1103_v61  ;;  %v8603_v60 = vld [vmem:[%s13836_s0 + $0xd0] sm:$0xff]   ;;  %v1184_v61 = vsel %vm1036_vm0, %v7653_v58, 0.0 }
  0x32   :  { %v7661_v4 = vunpack.c.h.bf16 %v8603_v60  ;;  %v7660_v5 = vunpack.c.l.bf16 %v8603_v60 }
  0x34   :  { %v1193_v8 = vsel %vm1036_vm0, %v7660_v5, 0.0 }
  0x35   :  { %1113 = vadd.xlane.f32.xlu1 %v1112_v0  ;;  %1110 = vadd.xlane.f32.xlu0 %v1109_v1  ;;  %v7656_v0 = vunpack.c.l.bf16 %v8602_v55  ;;  %v8604_v1 = vld [vmem:[%s13836_s0 + $0xd8] sm:$0xff]  }
  0x36   :  { %v7665_v9 = vunpack.c.h.bf16 %v8604_v1  ;;  %v7664_v10 = vunpack.c.l.bf16 %v8604_v1 }
  0x37   :  { %v1187_v3 = vsel %vm1036_vm0, %v7656_v0, 0.0 }
  0x38   :  { %v1199_v13 = vsel %vm1036_vm0, %v7664_v10, 0.0 }
  0x39   :  { %1119 = vadd.xlane.f32.xlu1 %v1118_v6  ;;  %1116 = vadd.xlane.f32.xlu0 %v1115_v7  ;;  %v8605_v6 = vld [vmem:[%s13836_s0 + $0xe0] sm:$0xff]   ;;  %v1196_v7 = vsel %vm1036_vm0, %v7661_v4, 0.0 }
  0x3a   :  { %v7669_v14 = vunpack.c.h.bf16 %v8605_v6  ;;  %v7668_v15 = vunpack.c.l.bf16 %v8605_v6 }
  0x3d   :  { %1125 = vadd.xlane.f32.xlu1 %v1124_v11  ;;  %1122 = vadd.xlane.f32.xlu0 %v1121_v12  ;;  %v8606_v11 = vld [vmem:[%s13836_s0 + $0xe8] sm:$0xff]   ;;  %v1202_v12 = vsel %vm1036_vm0, %v7665_v9, 0.0 }
  0x3e   :  { %v7673_v18 = vunpack.c.h.bf16 %v8606_v11  ;;  %v7672_v19 = vunpack.c.l.bf16 %v8606_v11 }
  0x41   :  { %1131 = vadd.xlane.f32.xlu1 %v1130_v16  ;;  %1128 = vadd.xlane.f32.xlu0 %v1127_v17  ;;  %v1208_v16 = vsel %vm1036_vm0, %v7669_v14, 0.0  ;;  %v1205_v17 = vsel %vm1036_vm0, %v7668_v15, 0.0 }
  0x45   :  { %1137 = vadd.xlane.f32.xlu1 %v1136_v21  ;;  %1134 = vadd.xlane.f32.xlu0 %v1133_v22 }
  0x49   :  { %1143 = vadd.xlane.f32.xlu1 %v1142_v26  ;;  %1140 = vadd.xlane.f32.xlu0 %v1139_v27 }
  0x4d   :  { %1149 = vadd.xlane.f32.xlu1 %v1148_v31  ;;  %1146 = vadd.xlane.f32.xlu0 %v1145_v32 }
  0x51   :  { %1155 = vadd.xlane.f32.xlu1 %v1154_v36  ;;  %1152 = vadd.xlane.f32.xlu0 %v1151_v37 }
  0x55   :  { %1161 = vadd.xlane.f32.xlu1 %v1160_v41  ;;  %1158 = vadd.xlane.f32.xlu0 %v1157_v42 }
  0x59   :  { %1167 = vadd.xlane.f32.xlu1 %v1166_v46  ;;  %1164 = vadd.xlane.f32.xlu0 %v1163_v47 }
  0x5d   :  { %1173 = vadd.xlane.f32.xlu1 %v1172_v51  ;;  %1170 = vadd.xlane.f32.xlu0 %v1169_v52 }
  0x61   :  { %1179 = vadd.xlane.f32.xlu1 %v1178_v56  ;;  %1176 = vadd.xlane.f32.xlu0 %v1175_v57 }
  0x65   :  { %1185 = vadd.xlane.f32.xlu1 %v1184_v61  ;;  %1182 = vadd.xlane.f32.xlu0 %v1181_v62 }
  0x69   :  { %1191 = vadd.xlane.f32.xlu1 %v1190_v2  ;;  %1188 = vadd.xlane.f32.xlu0 %v1187_v3 }
  0x6d   :  { %1197 = vadd.xlane.f32.xlu1 %v1196_v7  ;;  %1194 = vadd.xlane.f32.xlu0 %v1193_v8 }
  0x71   :  { %1203 = vadd.xlane.f32.xlu1 %v1202_v12  ;;  %1200 = vadd.xlane.f32.xlu0 %v1199_v13 }
  0x72   :  { %7 = vsyncpa [#allocation3], 0  ;;  %v8607_v20 = vld [vmem:[%s13836_s0 + $0xf0] sm:$0xff]   ;;  %v1214_v21 = vsel %vm1036_vm0, %v7673_v18, 0.0  ;;  %v1211_v22 = vsel %vm1036_vm0, %v7672_v19, 0.0  ;;  %v8608_v25 = vld [vmem:[%s13836_s0 + $0xf8] sm:$0xff]   ;;  %v4366_v50 = vlaneseq }
  0x73   :  { %v7677_v23 = vunpack.c.h.bf16 %v8607_v20  ;;  %v7676_v24 = vunpack.c.l.bf16 %v8607_v20  ;;  %v7681_v28 = vunpack.c.h.bf16 %v8608_v25  ;;  %v7680_v29 = vunpack.c.l.bf16 %v8608_v25  ;;  %v8609_v30 = vld [vmem:[%s13836_s0 + $0x100] sm:$0xff]   ;;  %v8610_v35 = vld [vmem:[%s13836_s0 + $0x108] sm:$0xff]   ;;  %v8611_v40 = vld [vmem:[%s13836_s0 + $0x110] sm:$0xff]  }
  0x74   :  { %v7685_v33 = vunpack.c.h.bf16 %v8609_v30  ;;  %v7684_v34 = vunpack.c.l.bf16 %v8609_v30  ;;  %v7689_v38 = vunpack.c.h.bf16 %v8610_v35  ;;  %v7688_v39 = vunpack.c.l.bf16 %v8610_v35  ;;  %v8612_v45 = vld [vmem:[%s13836_s0 + $0x118] sm:$0xff]   ;;  %v8613_v51 = vld [vmem:[%s13836_s0 + $0x120] sm:$0xff]   ;;  %v8614_v57 = vld [vmem:[%s13836_s0 + $0x128] sm:$0xff]  }
  0x75   :  { %1209 = vadd.xlane.f32.xlu1 %v1208_v16  ;;  %1206 = vadd.xlane.f32.xlu0 %v1205_v17  ;;  %v1220_v26 = vsel %vm1036_vm0, %v7677_v23, 0.0  ;;  %v1217_v27 = vsel %vm1036_vm0, %v7676_v24, 0.0  ;;  %v1226_v31 = vsel %vm1036_vm0, %v7681_v28, 0.0  ;;  %v1223_v32 = vsel %vm1036_vm0, %v7680_v29, 0.0  ;;  %v8615_v61 = vld [vmem:[%s13836_s0 + $0x130] sm:$0xff]  }
  0x76   :  { %v1232_v36 = vsel %vm1036_vm0, %v7685_v33, 0.0  ;;  %v1229_v37 = vsel %vm1036_vm0, %v7684_v34, 0.0  ;;  %v1238_v41 = vsel %vm1036_vm0, %v7689_v38, 0.0  ;;  %v1235_v42 = vsel %vm1036_vm0, %v7688_v39, 0.0  ;;  %v8617_v39 = vld [vmem:[%s13836_s0 + $0x140] sm:$0xff]  }
  0x77   :  { %v7693_v43 = vunpack.c.h.bf16 %v8611_v40  ;;  %v7692_v44 = vunpack.c.l.bf16 %v8611_v40  ;;  %v7697_v46 = vunpack.c.h.bf16 %v8612_v45  ;;  %v7696_v49 = vunpack.c.l.bf16 %v8612_v45 }
  0x78   :  { %v10223_v54 = vand.u32 127, %v4366_v50  ;;  %v7701_v55 = vunpack.c.h.bf16 %v8613_v51  ;;  %v7700_v56 = vunpack.c.l.bf16 %v8613_v51  ;;  %v10228_v58 = vshrl.u32 %v4366_v50, 7 }
  0x79   :  { %1215 = vadd.xlane.f32.xlu1 %v1214_v21  ;;  %1212 = vadd.xlane.f32.xlu0 %v1211_v22  ;;  %v1244_v47 = vsel %vm1036_vm0, %v7693_v43, 0.0  ;;  %v1241_v48 = vsel %vm1036_vm0, %v7692_v44, 0.0  ;;  %v1250_v52 = vsel %vm1036_vm0, %v7697_v46, 0.0  ;;  %v1247_v53 = vsel %vm1036_vm0, %v7696_v49, 0.0  ;;  %v8616_v21 = vld [vmem:[%s13836_s0 + $0x138] sm:$0xff]  }
  0x7a   :  { %v4372_v59 = vadd.s32 4294967288, %v10223_v54  ;;  %v7705_v60 = vunpack.c.h.bf16 %v8614_v57  ;;  %v4379_v62 = vadd.s32 4294967280, %v10223_v54  ;;  %v1256_v1 = vsel %vm1036_vm0, %v7701_v55, 0.0 }
  0x7b   :  { %v1253_v2 = vsel %vm1036_vm0, %v7700_v56, 0.0  ;;  %v7704_v3 = vunpack.c.l.bf16 %v8614_v57  ;;  %v4386_v4 = vadd.s32 4294967272, %v10223_v54  ;;  %vm4377_vm1 = vcmask 130112  }
  0x7c   :  { %vm4384_vm2 = vcmask 195712   ;;  %v10240_v5 = vsub.s32 %v10223_v54, %v10228_v58  ;;  %v4400_v6 = vadd.s32 4294967256, %v10223_v54  ;;  %vm4391_vm3 = vcmask 261312  }
  0x7d   :  { %1221 = vadd.xlane.f32.xlu1 %v1220_v26  ;;  %1218 = vadd.xlane.f32.xlu0 %v1217_v27  ;;  %v7709_v7 = vunpack.c.h.bf16 %v8615_v61  ;;  %v10244_v9 = vsub.s32 %v4372_v59, %v10228_v58  ;;  %v4393_v10 = vadd.s32 4294967264, %v10223_v54  ;;  %v7708_v11 = vunpack.c.l.bf16 %v8615_v61  ;;  %v8618_v59 = vld [vmem:[%s13836_s0 + $0x148] sm:$0xff]  }
  0x7e   :  { %13870 = vst [vmem:[#allocation5_spill] sm:$0xff] %v10240_v5  ;;  %v10248_v12 = vsub.s32 %v4379_v62, %v10228_v58  ;;  %v1262_v16 = vsel %vm1036_vm0, %v7705_v60, 0.0  ;;  %v1259_v17 = vsel %vm1036_vm0, %v7704_v3, 0.0  ;;  %v10253_v18 = vsub.s32 %v4386_v4, %v10228_v58 }
  0x7f   :  { %13871 = vst [vmem:[#allocation6_spill] sm:$0xff] %v10244_v9  ;;  %vm13869_vm4 = vcmask 326912   ;;  %v10259_v22 = vsub.s32 %v4400_v6, %v10228_v58  ;;  %v1268_v23 = vsel %vm1036_vm0, %v7709_v7, 0.0  ;;  %v4414_v24 = vadd.s32 4294967240, %v10223_v54 }
  0x80   :  { %13872 = vst [vmem:[#allocation7_spill] sm:$0xff] %v10248_v12  ;;  %13873 = vst [vmem:[#allocation8_spill] sm:$0xff] %v10253_v18  ;;  %v4407_v25 = vadd.s32 4294967248, %v10223_v54  ;;  %v10267_v28 = vsub.s32 %v4393_v10, %v10228_v58  ;;  %v1265_v29 = vsel %vm1036_vm0, %v7708_v11, 0.0  ;;  %vm13868_vm5 = vcmask 392512  }
  0x81   :  { %1227 = vadd.xlane.f32.xlu1 %v1226_v31  ;;  %1224 = vadd.xlane.f32.xlu0 %v1223_v32  ;;  %13874 = vst [vmem:[#allocation9_spill] sm:$0xff] %v10259_v22  ;;  %v7713_v33 = vunpack.c.h.bf16 %v8616_v21  ;;  %v7712_v34 = vunpack.c.l.bf16 %v8616_v21  ;;  %v4428_v43 = vadd.s32 4294967224, %v10223_v54  ;;  %vm4412_vm6 = vcmask 458112  }
  0x82   :  { %13875 = vst [vmem:[#allocation10_spill] sm:$0xff] %v10267_v28  ;;  %vm13857_vm7 = vcmask 523712   ;;  %v4442_v62 = vadd.s32 4294967208, %v10223_v54  ;;  %v7720_v10 = vunpack.c.l.bf16 %v8618_v59  ;;  %vm4426_vm8 = vcmask 589312  }
  0x83   :  { %v1274_v50 = vsel %vm1036_vm0, %v7713_v33, 0.0  ;;  %v1271_v51 = vsel %vm1036_vm0, %v7712_v34, 0.0  ;;  %v10296_v61 = vsub.s32 %v4428_v43, %v10228_v58  ;;  %vm4433_vm9 = vcmask 654912  }
  0x84   :  { %vm4440_vm10 = vcmask 720512   ;;  %vm4447_vm11 = vcmask 786112   ;;  %vm4454_vm12 = vcmask 851712   ;;  %vm4461_vm13 = vcmask 917312  }
  0x85   :  { %1233 = vadd.xlane.f32.xlu1 %v1232_v36  ;;  %1230 = vadd.xlane.f32.xlu0 %v1229_v37  ;;  %vm4468_vm14 = vcmask 982912   ;;  %vm4475_vm15 = vcmask 1048512  }
  0x89   :  { %1239 = vadd.xlane.f32.xlu1 %v1238_v41  ;;  %1236 = vadd.xlane.f32.xlu0 %v1235_v42  ;;  %v10278_v41 = vsub.s32 %v4414_v24, %v10228_v58  ;;  %v10281_v42 = vsub.s32 %v4407_v25, %v10228_v58  ;;  %v4449_v24 = vadd.s32 4294967200, %v10223_v54 }
  0x8b   :  { %v10336_v43 = vsub.s32 %v4449_v24, %v10228_v58 }
  0x8d   :  { %1245 = vadd.xlane.f32.xlu1 %v1244_v47  ;;  %1242 = vadd.xlane.f32.xlu0 %v1241_v48  ;;  %v4421_v47 = vadd.s32 4294967232, %v10223_v54 }
  0x91   :  { %1251 = vadd.xlane.f32.xlu1 %v1250_v52  ;;  %1248 = vadd.xlane.f32.xlu0 %v1247_v53  ;;  %v7717_v52 = vunpack.c.h.bf16 %v8617_v39  ;;  %v7716_v53 = vunpack.c.l.bf16 %v8617_v39 }
  0x92   :  { %v1045_v63 = vpop.xlane.xlu1 %1044  ;;  %v1039_v0 = vpop.xlane.xlu0 %1038 }
  0x93   :  { %v2574_v8 = vmul.f32 0.0625, %v1039_v0  ;;  %v2576_v13 = vmul.f32 0.0625, %v1045_v63  ;;  %v1280_v6 = vsel %vm1036_vm0, %v7717_v52, 0.0  ;;  %v1277_v7 = vsel %vm1036_vm0, %v7716_v53, 0.0 }
  0x95   :  { %1257 = vadd.xlane.f32.xlu1 %v1256_v1  ;;  %1254 = vadd.xlane.f32.xlu0 %v1253_v2  ;;  %v4371_v26 = vrot.slane %v2574_v8, %v10240_v5  ;;  %v4383_v30 = vrot.slane %v2576_v13, %v10248_v12  ;;  %v10302_v1 = vsub.s32 %v4421_v47, %v10228_v58  ;;  %v4435_v2 = vadd.s32 4294967216, %v10223_v54 }
  0x96   :  { %v1048_v14 = vpop.xlane.xlu1 %1047  ;;  %v1042_v15 = vpop.xlane.xlu0 %1041  ;;  %v7721_v8 = vunpack.c.h.bf16 %v8618_v59 }
  0x97   :  { %v2577_v19 = vmul.f32 0.0625, %v1048_v14  ;;  %v2575_v20 = vmul.f32 0.0625, %v1042_v15  ;;  %v8619_v15 = vld [vmem:[%s13836_s0 + $0x150] sm:$0xff]  }
  0x99   :  { %v4376_v27 = vrot.slane %v2575_v20, %v10244_v9  ;;  %1263 = vadd.xlane.f32.xlu1 %v1262_v16  ;;  %1260 = vadd.xlane.f32.xlu0 %v1259_v17  ;;  %v4390_v35 = vrot.slane %v2577_v19, %v10253_v18  ;;  %v10313_v17 = vsub.s32 %v4442_v62, %v10228_v58  ;;  %v4456_v19 = vadd.s32 4294967192, %v10223_v54 }
  0x9a   :  { %v1054_v31 = vpop.xlane.xlu1 %1053  ;;  %v1051_v32 = vpop.xlane.xlu0 %1050 }
  0x9b   :  { %v4378_v36 = vsel %vm4377_vm1, %v4376_v27, %v4371_v26  ;;  %v2579_v37 = vmul.f32 0.0625, %v1054_v31  ;;  %v2578_v38 = vmul.f32 0.0625, %v1051_v32  ;;  %v1286_v27 = vsel %vm1036_vm0, %v7721_v8, 0.0 }
  0x9c   :  { %v4385_v40 = vsel %vm4384_vm2, %v4383_v30, %v4378_v36  ;;  %v7725_v30 = vunpack.c.h.bf16 %v8619_v15  ;;  %v7724_v31 = vunpack.c.l.bf16 %v8619_v15 }
  0x9d   :  { %v4404_v44 = vrot.slane %v2579_v37, %v10259_v22  ;;  %v4392_v45 = vsel %vm4391_vm3, %v4390_v35, %v4385_v40  ;;  %v4397_v46 = vrot.slane %v2578_v38, %v10267_v28  ;;  %1269 = vadd.xlane.f32.xlu1 %v1268_v23  ;;  %1266 = vadd.xlane.f32.xlu0 %v1265_v29  ;;  %v1283_v29 = vsel %vm1036_vm0, %v7720_v10, 0.0  ;;  %v8620_v35 = vld [vmem:[%s13836_s0 + $0x158] sm:$0xff]   ;;  %v8622_v10 = vld [vmem:[%s13836_s0 + $0x168] sm:$0xff]  }
  0x9e   :  { %v1060_v48 = vpop.xlane.xlu1 %1059  ;;  %v1057_v49 = vpop.xlane.xlu0 %1056  ;;  %v10319_v23 = vsub.s32 %v4435_v2, %v10228_v58  ;;  %v10330_v37 = vsub.s32 %v4456_v19, %v10228_v58  ;;  %v4470_v38 = vadd.s32 4294967176, %v10223_v54  ;;  %v1292_v47 = vsel %vm1036_vm0, %v7725_v30, 0.0 }
  0x9f   :  { %v4399_v55 = vsel %vm13869_vm4, %v4397_v46, %v4392_v45  ;;  %v2581_v56 = vmul.f32 0.0625, %v1060_v48  ;;  %v2580_v57 = vmul.f32 0.0625, %v1057_v49  ;;  %v1289_v48 = vsel %vm1036_vm0, %v7724_v31, 0.0 }
  0xa0   :  { %v4406_v60 = vsel %vm13868_vm5, %v4404_v44, %v4399_v55  ;;  %v4463_v44 = vadd.s32 4294967184, %v10223_v54  ;;  %v7729_v49 = vunpack.c.h.bf16 %v8620_v35  ;;  %v8621_v55 = vld [vmem:[%s13836_s0 + $0x160] sm:$0xff]   ;;  %v10347_v54 = vsub.s32 %v4470_v38, %v10228_v58 }
  0xa1   :  { %v4418_v63 = vrot.slane %v2581_v56, %v10278_v41  ;;  %v4411_v0 = vrot.slane %v2580_v57, %v10281_v42  ;;  %1275 = vadd.xlane.f32.xlu1 %v1274_v50  ;;  %1272 = vadd.xlane.f32.xlu0 %v1271_v51  ;;  %v7728_v50 = vunpack.c.l.bf16 %v8620_v35 }
  0xa2   :  { %v1066_v3 = vpop.xlane.xlu1 %1065  ;;  %v1063_v4 = vpop.xlane.xlu0 %1062  ;;  %13876 = vst [vmem:[#allocation11_spill] sm:$0xff] %v10347_v54 }
  0xa3   :  { %v4413_v11 = vsel %vm4412_vm6, %v4411_v0, %v4406_v60  ;;  %v2583_v13 = vmul.f32 0.0625, %v1066_v3  ;;  %v2582_v14 = vmul.f32 0.0625, %v1063_v4  ;;  %v10352_v60 = vsub.s32 %v4463_v44, %v10228_v58 }
  0xa4   :  { %v4420_v16 = vsel %vm13857_vm7, %v4418_v63, %v4413_v11  ;;  %v1298_v0 = vsel %vm1036_vm0, %v7729_v49, 0.0  ;;  %v1295_v2 = vsel %vm1036_vm0, %v7728_v50, 0.0  ;;  %v7733_v3 = vunpack.c.h.bf16 %v8621_v55 }
  0xa5   :  { %v4432_v20 = vrot.slane %v2583_v13, %v10296_v61  ;;  %v4425_v21 = vrot.slane %v2582_v14, %v10302_v1  ;;  %1281 = vadd.xlane.f32.xlu1 %v1280_v6  ;;  %1278 = vadd.xlane.f32.xlu0 %v1277_v7  ;;  %13877 = vst [vmem:[#allocation12_spill] sm:$0xff] %v10352_v60  ;;  %v7732_v4 = vunpack.c.l.bf16 %v8621_v55 }
  0xa6   :  { %v1072_v25 = vpop.xlane.xlu1 %1071  ;;  %v1069_v26 = vpop.xlane.xlu0 %1068 }
  0xa7   :  { %v4427_v32 = vsel %vm4426_vm8, %v4425_v21, %v4420_v16  ;;  %v2585_v33 = vmul.f32 0.0625, %v1072_v25  ;;  %v2584_v34 = vmul.f32 0.0625, %v1069_v26  ;;  %v1304_v16 = vsel %vm1036_vm0, %v7733_v3, 0.0  ;;  %v8623_v26 = vld [vmem:[%s13836_s0 + $0x170] sm:$0xff]  }
  0xa8   :  { %v4434_v36 = vsel %vm4433_vm9, %v4432_v20, %v4427_v32  ;;  %v1301_v19 = vsel %vm1036_vm0, %v7732_v4, 0.0  ;;  %v7737_v20 = vunpack.c.h.bf16 %v8622_v10  ;;  %v7736_v21 = vunpack.c.l.bf16 %v8622_v10 }
  0xa9   :  { %v4446_v39 = vrot.slane %v2585_v33, %v10313_v17  ;;  %v4439_v40 = vrot.slane %v2584_v34, %v10319_v23  ;;  %1287 = vadd.xlane.f32.xlu1 %v1286_v27  ;;  %1284 = vadd.xlane.f32.xlu0 %v1283_v29  ;;  %v7740_v38 = vunpack.c.l.bf16 %v8623_v26 }
  0xaa   :  { %v1078_v45 = vpop.xlane.xlu1 %1077  ;;  %v1075_v46 = vpop.xlane.xlu0 %1074  ;;  %v1310_v34 = vsel %vm1036_vm0, %v7737_v20, 0.0  ;;  %v1307_v35 = vsel %vm1036_vm0, %v7736_v21, 0.0 }
  0xab   :  { %v4441_v51 = vsel %vm4440_vm10, %v4439_v40, %v4434_v36  ;;  %v2587_v52 = vmul.f32 0.0625, %v1078_v45  ;;  %v2586_v53 = vmul.f32 0.0625, %v1075_v46  ;;  %v7741_v36 = vunpack.c.h.bf16 %v8623_v26  ;;  %v8624_v45 = vld [vmem:[%s13836_s0 + $0x178] sm:$0xff]  }
  0xac   :  { %v4448_v56 = vsel %vm4447_vm11, %v4446_v39, %v4441_v51  ;;  %v1313_v51 = vsel %vm1036_vm0, %v7740_v38, 0.0 }
  0xad   :  { %v4460_v57 = vrot.slane %v2587_v52, %v10330_v37  ;;  %v4453_v59 = vrot.slane %v2586_v53, %v10336_v43  ;;  %1293 = vadd.xlane.f32.xlu1 %v1292_v47  ;;  %1290 = vadd.xlane.f32.xlu0 %v1289_v48  ;;  %v1316_v50 = vsel %vm1036_vm0, %v7741_v36, 0.0  ;;  %v7745_v52 = vunpack.c.h.bf16 %v8624_v45 }
  0xae   :  { %v1084_v62 = vpop.xlane.xlu1 %1083  ;;  %v1081_v63 = vpop.xlane.xlu0 %1080  ;;  %v7744_v53 = vunpack.c.l.bf16 %v8624_v45 }
  0xaf   :  { %v4455_v6 = vsel %vm4454_vm12, %v4453_v59, %v4448_v56  ;;  %v2589_v7 = vmul.f32 0.0625, %v1084_v62  ;;  %v2588_v8 = vmul.f32 0.0625, %v1081_v63  ;;  %v8625_v59 = vld [vmem:[%s13836_s0 + $0x180] sm:$0xff]   ;;  %v1322_v4 = vsel %vm1036_vm0, %v7745_v52, 0.0 }
  0xb0   :  { %v4462_v58 = vsel %vm4461_vm13, %v4460_v57, %v4455_v6  ;;  %v1319_v6 = vsel %vm1036_vm0, %v7744_v53, 0.0 }
  0xb1   :  { %v4474_v11 = vrot.slane %v2589_v7, %v10347_v54  ;;  %v4467_v13 = vrot.slane %v2588_v8, %v10352_v60  ;;  %1299 = vadd.xlane.f32.xlu1 %v1298_v0  ;;  %1296 = vadd.xlane.f32.xlu0 %v1295_v2  ;;  %v7749_v7 = vunpack.c.h.bf16 %v8625_v59  ;;  %v7748_v8 = vunpack.c.l.bf16 %v8625_v59 }
  0xb2   :  { %v1090_v14 = vpop.xlane.xlu1 %1089  ;;  %v1087_v15 = vpop.xlane.xlu0 %1086 }
  0xb3   :  { %v2591_v24 = vmul.f32 0.0625, %v1090_v14  ;;  %v2590_v25 = vmul.f32 0.0625, %v1087_v15  ;;  %v4469_v27 = vsel %vm4468_vm14, %v4467_v13, %v4462_v58  ;;  %v8626_v13 = vld [vmem:[%s13836_s0 + $0x188] sm:$0xff]   ;;  %v1328_v21 = vsel %vm1036_vm0, %v7749_v7, 0.0 }
  0xb4   :  { %v10370_v29 = vsel %vm4475_vm15, %v4474_v11, %v4469_v27  ;;  %v7752_v26 = vunpack.c.l.bf16 %v8626_v13 }
  0xb5   :  { %13878 = vst [vmem:[#allocation13_spill] sm:$0xff] %v10370_v29  ;;  %v4484_v30 = vrot.slane %v2591_v24, %v10244_v9  ;;  %v4480_v31 = vrot.slane %v2590_v25, %v10240_v5  ;;  %1305 = vadd.xlane.f32.xlu1 %v1304_v16  ;;  %1302 = vadd.xlane.f32.xlu0 %v1301_v19  ;;  %v1325_v24 = vsel %vm1036_vm0, %v7748_v8, 0.0  ;;  %v7753_v25 = vunpack.c.h.bf16 %v8626_v13 }
  0xb6   :  { %v1096_v32 = vpop.xlane.xlu1 %1095  ;;  %v1093_v33 = vpop.xlane.xlu0 %1092 }
  0xb7   :  { %v4485_v39 = vsel %vm4377_vm1, %v4484_v30, %v4480_v31  ;;  %v2593_v40 = vmul.f32 0.0625, %v1096_v32  ;;  %v2592_v44 = vmul.f32 0.0625, %v1093_v33  ;;  %v8627_v32 = vld [vmem:[%s13836_s0 + $0x190] sm:$0xff]  }
  0xb8   :  { %v7756_v45 = vunpack.c.l.bf16 %v8627_v32 }
  0xb9   :  { %v4494_v46 = vrot.slane %v2593_v40, %v10253_v18  ;;  %v4489_v47 = vrot.slane %v2592_v44, %v10248_v12  ;;  %1311 = vadd.xlane.f32.xlu1 %v1310_v34  ;;  %1308 = vadd.xlane.f32.xlu0 %v1307_v35  ;;  %v1331_v40 = vsel %vm1036_vm0, %v7752_v26, 0.0  ;;  %v7757_v44 = vunpack.c.h.bf16 %v8627_v32 }
  0xba   :  { %v1102_v48 = vpop.xlane.xlu1 %1101  ;;  %v1099_v49 = vpop.xlane.xlu0 %1098 }
  0xbb   :  { %v4490_v55 = vsel %vm4384_vm2, %v4489_v47, %v4485_v39  ;;  %v2595_v56 = vmul.f32 0.0625, %v1102_v48  ;;  %v2594_v57 = vmul.f32 0.0625, %v1099_v49  ;;  %v1334_v39 = vsel %vm1036_vm0, %v7753_v25, 0.0  ;;  %v8628_v49 = vld [vmem:[%s13836_s0 + $0x198] sm:$0xff]  }
  0xbc   :  { %v4495_v62 = vsel %vm4391_vm3, %v4494_v46, %v4490_v55  ;;  %v7761_v59 = vunpack.c.h.bf16 %v8628_v49 }
  0xbd   :  { %v4504_v63 = vrot.slane %v2595_v56, %v10259_v22  ;;  %v4499_v0 = vrot.slane %v2594_v57, %v10267_v28  ;;  %1317 = vadd.xlane.f32.xlu1 %v1316_v50  ;;  %1314 = vadd.xlane.f32.xlu0 %v1313_v51  ;;  %v1340_v56 = vsel %vm1036_vm0, %v7757_v44, 0.0  ;;  %v1337_v57 = vsel %vm1036_vm0, %v7756_v45, 0.0 }
  0xbe   :  { %v1108_v2 = vpop.xlane.xlu1 %1107  ;;  %v1105_v3 = vpop.xlane.xlu0 %1104 }
  0xbf   :  { %v4500_v10 = vsel %vm13869_vm4, %v4499_v0, %v4495_v62  ;;  %v2597_v58 = vmul.f32 0.0625, %v1108_v2  ;;  %v2596_v11 = vmul.f32 0.0625, %v1105_v3  ;;  %v7760_v62 = vunpack.c.l.bf16 %v8628_v49  ;;  %v8629_v3 = vld [vmem:[%s13836_s0 + $0x1a0] sm:$0xff]  }
  0xc0   :  { %v4505_v14 = vsel %vm13868_vm5, %v4504_v63, %v4500_v10  ;;  %v7765_v13 = vunpack.c.h.bf16 %v8629_v3 }
  0xc1   :  { %v4514_v15 = vrot.slane %v2597_v58, %v10278_v41  ;;  %v4509_v16 = vrot.slane %v2596_v11, %v10281_v42  ;;  %1323 = vadd.xlane.f32.xlu1 %v1322_v4  ;;  %1320 = vadd.xlane.f32.xlu0 %v1319_v6  ;;  %v1346_v58 = vsel %vm1036_vm0, %v7761_v59, 0.0  ;;  %v1343_v11 = vsel %vm1036_vm0, %v7760_v62, 0.0 }
  0xc2   :  { %v1114_v19 = vpop.xlane.xlu1 %1113  ;;  %v1111_v20 = vpop.xlane.xlu0 %1110 }
  0xc3   :  { %v4510_v27 = vsel %vm4412_vm6, %v4509_v16, %v4505_v14  ;;  %v2599_v30 = vmul.f32 0.0625, %v1114_v19  ;;  %v2598_v31 = vmul.f32 0.0625, %v1111_v20  ;;  %v7764_v14 = vunpack.c.l.bf16 %v8629_v3  ;;  %v8630_v20 = vld [vmem:[%s13836_s0 + $0x1a8] sm:$0xff]  }
  0xc4   :  { %v4515_v33 = vsel %vm13857_vm7, %v4514_v15, %v4510_v27  ;;  %v7769_v32 = vunpack.c.h.bf16 %v8630_v20 }
  0xc5   :  { %v4524_v34 = vrot.slane %v2599_v30, %v10296_v61  ;;  %v4519_v35 = vrot.slane %v2598_v31, %v10302_v1  ;;  %1329 = vadd.xlane.f32.xlu1 %v1328_v21  ;;  %1326 = vadd.xlane.f32.xlu0 %v1325_v24  ;;  %v1352_v30 = vsel %vm1036_vm0, %v7765_v13, 0.0  ;;  %v1349_v31 = vsel %vm1036_vm0, %v7764_v14, 0.0 }
  0xc6   :  { %v1120_v36 = vpop.xlane.xlu1 %1119  ;;  %v1117_v38 = vpop.xlane.xlu0 %1116 }
  0xc7   :  { %v4520_v46 = vsel %vm4426_vm8, %v4519_v35, %v4515_v33  ;;  %v2601_v47 = vmul.f32 0.0625, %v1120_v36  ;;  %v2600_v48 = vmul.f32 0.0625, %v1117_v38  ;;  %v7768_v33 = vunpack.c.l.bf16 %v8630_v20  ;;  %v8631_v36 = vld [vmem:[%s13836_s0 + $0x1b0] sm:$0xff]  }
  0xc8   :  { %v4525_v50 = vsel %vm4433_vm9, %v4524_v34, %v4520_v46  ;;  %v7773_v49 = vunpack.c.h.bf16 %v8631_v36 }
  0xc9   :  { %v4534_v51 = vrot.slane %v2601_v47, %v10313_v17  ;;  %v4529_v52 = vrot.slane %v2600_v48, %v10319_v23  ;;  %1335 = vadd.xlane.f32.xlu1 %v1334_v39  ;;  %1332 = vadd.xlane.f32.xlu0 %v1331_v40  ;;  %v1358_v47 = vsel %vm1036_vm0, %v7769_v32, 0.0  ;;  %v1355_v48 = vsel %vm1036_vm0, %v7768_v33, 0.0 }
  0xca   :  { %v1126_v53 = vpop.xlane.xlu1 %1125  ;;  %v1123_v55 = vpop.xlane.xlu0 %1122 }
  0xcb   :  { %v4530_v63 = vsel %vm4440_vm10, %v4529_v52, %v4525_v50  ;;  %v2603_v0 = vmul.f32 0.0625, %v1126_v53  ;;  %v2602_v2 = vmul.f32 0.0625, %v1123_v55  ;;  %v7772_v50 = vunpack.c.l.bf16 %v8631_v36  ;;  %v8632_v55 = vld [vmem:[%s13836_s0 + $0x1b8] sm:$0xff]  }
  0xcc   :  { %v4535_v4 = vsel %vm4447_vm11, %v4534_v51, %v4530_v63  ;;  %v1364_v63 = vsel %vm1036_vm0, %v7773_v49, 0.0  ;;  %v7776_v3 = vunpack.c.l.bf16 %v8632_v55 }
  0xcd   :  { %v4544_v6 = vrot.slane %v2603_v0, %v10330_v37  ;;  %v4539_v7 = vrot.slane %v2602_v2, %v10336_v43  ;;  %1341 = vadd.xlane.f32.xlu1 %v1340_v56  ;;  %1338 = vadd.xlane.f32.xlu0 %v1337_v57  ;;  %v1361_v0 = vsel %vm1036_vm0, %v7772_v50, 0.0  ;;  %v7777_v2 = vunpack.c.h.bf16 %v8632_v55 }
  0xce   :  { %v1132_v8 = vpop.xlane.xlu1 %1131  ;;  %v1129_v10 = vpop.xlane.xlu0 %1128 }
  0xcf   :  { %v4540_v15 = vsel %vm4454_vm12, %v4539_v7, %v4535_v4  ;;  %v2605_v16 = vmul.f32 0.0625, %v1132_v8  ;;  %v2604_v19 = vmul.f32 0.0625, %v1129_v10  ;;  %v8633_v8 = vld [vmem:[%s13836_s0 + $0x1c0] sm:$0xff]  }
  0xd0   :  { %v4545_v21 = vsel %vm4461_vm13, %v4544_v6, %v4540_v15  ;;  %v1370_v15 = vsel %vm1036_vm0, %v7777_v2, 0.0  ;;  %v7780_v20 = vunpack.c.l.bf16 %v8633_v8 }
  0xd1   :  { %v4554_v24 = vrot.slane %v2605_v16, %v10347_v54  ;;  %v4549_v25 = vrot.slane %v2604_v19, %v10352_v60  ;;  %1347 = vadd.xlane.f32.xlu1 %v1346_v58  ;;  %1344 = vadd.xlane.f32.xlu0 %v1343_v11  ;;  %v1367_v16 = vsel %vm1036_vm0, %v7776_v3, 0.0  ;;  %v7781_v19 = vunpack.c.h.bf16 %v8633_v8 }
  0xd2   :  { %v1138_v26 = vpop.xlane.xlu1 %1137  ;;  %v1135_v27 = vpop.xlane.xlu0 %1134 }
  0xd3   :  { %v2607_v34 = vmul.f32 0.0625, %v1138_v26  ;;  %v2606_v35 = vmul.f32 0.0625, %v1135_v27  ;;  %v4550_v38 = vsel %vm4468_vm14, %v4549_v25, %v4545_v21  ;;  %v8634_v26 = vld [vmem:[%s13836_s0 + $0x1c8] sm:$0xff]  }
  0xd4   :  { %v10443_v39 = vsel %vm4475_vm15, %v4554_v24, %v4550_v38  ;;  %v7785_v36 = vunpack.c.h.bf16 %v8634_v26  ;;  %v7784_v38 = vunpack.c.l.bf16 %v8634_v26 }
  0xd5   :  { %13879 = vst [vmem:[#allocation14_spill] sm:$0xff] %v10443_v39  ;;  %v4563_v40 = vrot.slane %v2607_v34, %v10244_v9  ;;  %v4559_v44 = vrot.slane %v2606_v35, %v10240_v5  ;;  %1353 = vadd.xlane.f32.xlu1 %v1352_v30  ;;  %1350 = vadd.xlane.f32.xlu0 %v1349_v31  ;;  %v1376_v34 = vsel %vm1036_vm0, %v7781_v19, 0.0  ;;  %v1373_v35 = vsel %vm1036_vm0, %v7780_v20, 0.0 }
  0xd6   :  { %v1144_v45 = vpop.xlane.xlu1 %1143  ;;  %v1141_v46 = vpop.xlane.xlu0 %1140 }
  0xd7   :  { %v4564_v51 = vsel %vm4377_vm1, %v4563_v40, %v4559_v44  ;;  %v2609_v52 = vmul.f32 0.0625, %v1144_v45  ;;  %v2608_v53 = vmul.f32 0.0625, %v1141_v46  ;;  %v8635_v46 = vld [vmem:[%s13836_s0 + $0x1d0] sm:$0xff]  }
  0xd8   :  { %v7789_v55 = vunpack.c.h.bf16 %v8635_v46 }
  0xd9   :  { %v4573_v56 = vrot.slane %v2609_v52, %v10253_v18  ;;  %v4568_v57 = vrot.slane %v2608_v53, %v10248_v12  ;;  %1359 = vadd.xlane.f32.xlu1 %v1358_v47  ;;  %1356 = vadd.xlane.f32.xlu0 %v1355_v48  ;;  %v1382_v52 = vsel %vm1036_vm0, %v7785_v36, 0.0  ;;  %v1379_v53 = vsel %vm1036_vm0, %v7784_v38, 0.0 }
  0xda   :  { %v1150_v59 = vpop.xlane.xlu1 %1149  ;;  %v1147_v62 = vpop.xlane.xlu0 %1146 }
  0xdb   :  { %v4569_v4 = vsel %vm4384_vm2, %v4568_v57, %v4564_v51  ;;  %v2611_v6 = vmul.f32 0.0625, %v1150_v59  ;;  %v2610_v7 = vmul.f32 0.0625, %v1147_v62 }
  0xdc   :  { %v4574_v10 = vsel %vm4391_vm3, %v4573_v56, %v4569_v4  ;;  %v7788_v56 = vunpack.c.l.bf16 %v8635_v46 }
  0xdd   :  { %v4583_v58 = vrot.slane %v2611_v6, %v10259_v22  ;;  %v4578_v11 = vrot.slane %v2610_v7, %v10267_v28  ;;  %1365 = vadd.xlane.f32.xlu1 %v1364_v63  ;;  %1362 = vadd.xlane.f32.xlu0 %v1361_v0  ;;  %v8636_v63 = vld [vmem:[%s13836_s0 + $0x1d8] sm:$0xff]   ;;  %v1388_v7 = vsel %vm1036_vm0, %v7789_v55, 0.0 }
  0xde   :  { %v1156_v13 = vpop.xlane.xlu1 %1155  ;;  %v1153_v14 = vpop.xlane.xlu0 %1152  ;;  %v1385_v8 = vsel %vm1036_vm0, %v7788_v56, 0.0 }
  0xdf   :  { %v4579_v21 = vsel %vm13869_vm4, %v4578_v11, %v4574_v10  ;;  %v2613_v24 = vmul.f32 0.0625, %v1156_v13  ;;  %v2612_v25 = vmul.f32 0.0625, %v1153_v14  ;;  %v7793_v10 = vunpack.c.h.bf16 %v8636_v63 }
  0xe0   :  { %v4584_v27 = vsel %vm13868_vm5, %v4583_v58, %v4579_v21  ;;  %v7792_v58 = vunpack.c.l.bf16 %v8636_v63 }
  0xe1   :  { %v4593_v30 = vrot.slane %v2613_v24, %v10278_v41  ;;  %v4588_v31 = vrot.slane %v2612_v25, %v10281_v42  ;;  %1371 = vadd.xlane.f32.xlu1 %v1370_v15  ;;  %1368 = vadd.xlane.f32.xlu0 %v1367_v16  ;;  %v8637_v15 = vld [vmem:[%s13836_s0 + $0x1e0] sm:$0xff]   ;;  %v1394_v25 = vsel %vm1036_vm0, %v7793_v10, 0.0 }
  0xe2   :  { %v1162_v32 = vpop.xlane.xlu1 %1161  ;;  %v1159_v33 = vpop.xlane.xlu0 %1158  ;;  %v1391_v26 = vsel %vm1036_vm0, %v7792_v58, 0.0 }
  0xe3   :  { %v4589_v40 = vsel %vm4412_vm6, %v4588_v31, %v4584_v27  ;;  %v2615_v44 = vmul.f32 0.0625, %v1162_v32  ;;  %v2614_v45 = vmul.f32 0.0625, %v1159_v33  ;;  %v7797_v27 = vunpack.c.h.bf16 %v8637_v15 }
  0xe4   :  { %v4594_v47 = vsel %vm13857_vm7, %v4593_v30, %v4589_v40  ;;  %v7796_v30 = vunpack.c.l.bf16 %v8637_v15 }
  0xe5   :  { %v4603_v48 = vrot.slane %v2615_v44, %v10296_v61  ;;  %v4598_v49 = vrot.slane %v2614_v45, %v10302_v1  ;;  %1377 = vadd.xlane.f32.xlu1 %v1376_v34  ;;  %1374 = vadd.xlane.f32.xlu0 %v1373_v35  ;;  %v8638_v34 = vld [vmem:[%s13836_s0 + $0x1e8] sm:$0xff]   ;;  %v1400_v45 = vsel %vm1036_vm0, %v7797_v27, 0.0 }
  0xe6   :  { %v1168_v50 = vpop.xlane.xlu1 %1167  ;;  %v1165_v51 = vpop.xlane.xlu0 %1164  ;;  %v1397_v46 = vsel %vm1036_vm0, %v7796_v30, 0.0 }
  0xe7   :  { %v4599_v57 = vsel %vm4426_vm8, %v4598_v49, %v4594_v47  ;;  %v2617_v59 = vmul.f32 0.0625, %v1168_v50  ;;  %v2616_v62 = vmul.f32 0.0625, %v1165_v51  ;;  %v7801_v47 = vunpack.c.h.bf16 %v8638_v34  ;;  %v8639_v51 = vld [vmem:[%s13836_s0 + $0x1f0] sm:$0xff]  }
  0xe8   :  { %v4604_v0 = vsel %vm4433_vm9, %v4603_v48, %v4599_v57  ;;  %v7800_v48 = vunpack.c.l.bf16 %v8638_v34 }
  0xe9   :  { %v4613_v2 = vrot.slane %v2617_v59, %v10313_v17  ;;  %v4608_v3 = vrot.slane %v2616_v62, %v10319_v23  ;;  %1383 = vadd.xlane.f32.xlu1 %v1382_v52  ;;  %1380 = vadd.xlane.f32.xlu0 %v1379_v53  ;;  %v1406_v62 = vsel %vm1036_vm0, %v7801_v47, 0.0 }
  0xea   :  { %v1174_v4 = vpop.xlane.xlu1 %1173  ;;  %v1171_v6 = vpop.xlane.xlu0 %1170  ;;  %v1403_v63 = vsel %vm1036_vm0, %v7800_v48, 0.0 }
  0xeb   :  { %v4609_v11 = vsel %vm4440_vm10, %v4608_v3, %v4604_v0  ;;  %v2619_v13 = vmul.f32 0.0625, %v1174_v4  ;;  %v2618_v14 = vmul.f32 0.0625, %v1171_v6  ;;  %v7805_v0 = vunpack.c.h.bf16 %v8639_v51 }
  0xec   :  { %v4614_v16 = vsel %vm4447_vm11, %v4613_v2, %v4609_v11  ;;  %v7804_v2 = vunpack.c.l.bf16 %v8639_v51 }
  0xed   :  { %v4623_v19 = vrot.slane %v2619_v13, %v10330_v37  ;;  %v4618_v20 = vrot.slane %v2618_v14, %v10336_v43  ;;  %1389 = vadd.xlane.f32.xlu1 %v1388_v7  ;;  %1386 = vadd.xlane.f32.xlu0 %v1385_v8  ;;  %v8640_v7 = vld [vmem:[%s13836_s0 + $0x1f8] sm:$0xff]   ;;  %v1412_v13 = vsel %vm1036_vm0, %v7805_v0, 0.0 }
  0xee   :  { %v1180_v21 = vpop.xlane.xlu1 %1179  ;;  %v1177_v24 = vpop.xlane.xlu0 %1176  ;;  %v1409_v14 = vsel %vm1036_vm0, %v7804_v2, 0.0  ;;  %v7809_v15 = vunpack.c.h.bf16 %v8640_v7 }
  0xef   :  { %v4619_v31 = vsel %vm4454_vm12, %v4618_v20, %v4614_v16  ;;  %v2621_v32 = vmul.f32 0.0625, %v1180_v21  ;;  %v2620_v33 = vmul.f32 0.0625, %v1177_v24  ;;  %v7808_v16 = vunpack.c.l.bf16 %v8640_v7  ;;  %v8641_v24 = vld [vmem:[%s13836_s0 + $0x200] sm:$0xff]  }
  0xf0   :  { %v4624_v35 = vsel %vm4461_vm13, %v4623_v19, %v4619_v31  ;;  %v7813_v34 = vunpack.c.h.bf16 %v8641_v24 }
  0xf1   :  { %v4633_v36 = vrot.slane %v2621_v32, %v10347_v54  ;;  %v4628_v38 = vrot.slane %v2620_v33, %v10352_v60  ;;  %1395 = vadd.xlane.f32.xlu1 %v1394_v25  ;;  %1392 = vadd.xlane.f32.xlu0 %v1391_v26  ;;  %v1418_v32 = vsel %vm1036_vm0, %v7809_v15, 0.0  ;;  %v1415_v33 = vsel %vm1036_vm0, %v7808_v16, 0.0 }
  0xf2   :  { %v1186_v40 = vpop.xlane.xlu1 %1185  ;;  %v1183_v44 = vpop.xlane.xlu0 %1182 }
  0xf3   :  { %v2623_v49 = vmul.f32 0.0625, %v1186_v40  ;;  %v2622_v50 = vmul.f32 0.0625, %v1183_v44  ;;  %v4629_v52 = vsel %vm4468_vm14, %v4628_v38, %v4624_v35  ;;  %v7812_v35 = vunpack.c.l.bf16 %v8641_v24  ;;  %v8642_v44 = vld [vmem:[%s13836_s0 + $0x208] sm:$0xff]  }
  0xf4   :  { %v10516_v53 = vsel %vm4475_vm15, %v4633_v36, %v4629_v52  ;;  %v7817_v52 = vunpack.c.h.bf16 %v8642_v44 }
  0xf5   :  { %13880 = vst [vmem:[#allocation15_spill] sm:$0xff] %v10516_v53  ;;  %v4642_v55 = vrot.slane %v2623_v49, %v10244_v9  ;;  %v4638_v56 = vrot.slane %v2622_v50, %v10240_v5  ;;  %1401 = vadd.xlane.f32.xlu1 %v1400_v45  ;;  %1398 = vadd.xlane.f32.xlu0 %v1397_v46  ;;  %v1424_v50 = vsel %vm1036_vm0, %v7813_v34, 0.0  ;;  %v1421_v51 = vsel %vm1036_vm0, %v7812_v35, 0.0 }
  0xf6   :  { %v1192_v57 = vpop.xlane.xlu1 %1191  ;;  %v1189_v59 = vpop.xlane.xlu0 %1188 }
  0xf7   :  { %v4643_v3 = vsel %vm4377_vm1, %v4642_v55, %v4638_v56  ;;  %v2625_v4 = vmul.f32 0.0625, %v1192_v57  ;;  %v2624_v6 = vmul.f32 0.0625, %v1189_v59  ;;  %v7816_v55 = vunpack.c.l.bf16 %v8642_v44 }
  0xf9   :  { %v4652_v8 = vrot.slane %v2625_v4, %v10253_v18  ;;  %v4647_v10 = vrot.slane %v2624_v6, %v10248_v12  ;;  %1407 = vadd.xlane.f32.xlu1 %v1406_v62  ;;  %1404 = vadd.xlane.f32.xlu0 %v1403_v63  ;;  %v8643_v62 = vld [vmem:[%s13836_s0 + $0x210] sm:$0xff]   ;;  %v1430_v6 = vsel %vm1036_vm0, %v7817_v52, 0.0  ;;  %v1427_v7 = vsel %vm1036_vm0, %v7816_v55, 0.0 }
  0xfa   :  { %v1198_v58 = vpop.xlane.xlu1 %1197  ;;  %v1195_v11 = vpop.xlane.xlu0 %1194 }
  0xfb   :  { %v4648_v19 = vsel %vm4384_vm2, %v4647_v10, %v4643_v3  ;;  %v2627_v20 = vmul.f32 0.0625, %v1198_v58  ;;  %v2626_v21 = vmul.f32 0.0625, %v1195_v11  ;;  %v7820_v10 = vunpack.c.l.bf16 %v8643_v62 }
  0xfc   :  { %v4653_v25 = vsel %vm4391_vm3, %v4652_v8, %v4648_v19  ;;  %v7821_v8 = vunpack.c.h.bf16 %v8643_v62 }
  0xfd   :  { %v4662_v26 = vrot.slane %v2627_v20, %v10259_v22  ;;  %v4657_v27 = vrot.slane %v2626_v21, %v10267_v28  ;;  %1413 = vadd.xlane.f32.xlu1 %v1412_v13  ;;  %1410 = vadd.xlane.f32.xlu0 %v1409_v14  ;;  %v8644_v14 = vld [vmem:[%s13836_s0 + $0x218] sm:$0xff]  }
  0xfe   :  { %v1204_v30 = vpop.xlane.xlu1 %1203  ;;  %v1201_v31 = vpop.xlane.xlu0 %1200  ;;  %v1436_v24 = vsel %vm1036_vm0, %v7821_v8, 0.0 }
  0xff   :  { %v4658_v36 = vsel %vm13869_vm4, %v4657_v27, %v4653_v25  ;;  %v2629_v38 = vmul.f32 0.0625, %v1204_v30  ;;  %v2628_v40 = vmul.f32 0.0625, %v1201_v31  ;;  %v1433_v25 = vsel %vm1036_vm0, %v7820_v10, 0.0 }
 0x100   :  { %v4663_v45 = vsel %vm13868_vm5, %v4662_v26, %v4658_v36  ;;  %v7825_v26 = vunpack.c.h.bf16 %v8644_v14  ;;  %v7824_v27 = vunpack.c.l.bf16 %v8644_v14 }
 0x101   :  { %v4672_v46 = vrot.slane %v2629_v38, %v10278_v41  ;;  %v4667_v47 = vrot.slane %v2628_v40, %v10281_v42  ;;  %1419 = vadd.xlane.f32.xlu1 %v1418_v32  ;;  %1416 = vadd.xlane.f32.xlu0 %v1415_v33  ;;  %v8645_v33 = vld [vmem:[%s13836_s0 + $0x220] sm:$0xff]  }
 0x102   :  { %v1210_v48 = vpop.xlane.xlu1 %1209  ;;  %v1207_v49 = vpop.xlane.xlu0 %1206  ;;  %v1442_v44 = vsel %vm1036_vm0, %v7825_v26, 0.0 }
 0x103   :  { %v4668_v56 = vsel %vm4412_vm6, %v4667_v47, %v4663_v45  ;;  %v2631_v57 = vmul.f32 0.0625, %v1210_v48  ;;  %v2630_v59 = vmul.f32 0.0625, %v1207_v49  ;;  %v1439_v45 = vsel %vm1036_vm0, %v7824_v27, 0.0 }
 0x104   :  { %v4673_v63 = vsel %vm13857_vm7, %v4672_v46, %v4668_v56  ;;  %v7829_v46 = vunpack.c.h.bf16 %v8645_v33  ;;  %v7828_v47 = vunpack.c.l.bf16 %v8645_v33 }
 0x105   :  { %v4682_v0 = vrot.slane %v2631_v57, %v10296_v61  ;;  %v4677_v2 = vrot.slane %v2630_v59, %v10302_v1  ;;  %1425 = vadd.xlane.f32.xlu1 %v1424_v50  ;;  %1422 = vadd.xlane.f32.xlu0 %v1421_v51  ;;  %v8646_v51 = vld [vmem:[%s13836_s0 + $0x228] sm:$0xff]  }
 0x106   :  { %v1216_v3 = vpop.xlane.xlu1 %1215  ;;  %v1213_v4 = vpop.xlane.xlu0 %1212  ;;  %v1448_v62 = vsel %vm1036_vm0, %v7829_v46, 0.0 }
 0x107   :  { %v4678_v58 = vsel %vm4426_vm8, %v4677_v2, %v4673_v63  ;;  %v2633_v11 = vmul.f32 0.0625, %v1216_v3  ;;  %v2632_v13 = vmul.f32 0.0625, %v1213_v4  ;;  %v1445_v63 = vsel %vm1036_vm0, %v7828_v47, 0.0 }
 0x108   :  { %v4683_v15 = vsel %vm4433_vm9, %v4682_v0, %v4678_v58  ;;  %v7833_v0 = vunpack.c.h.bf16 %v8646_v51  ;;  %v7832_v2 = vunpack.c.l.bf16 %v8646_v51 }
 0x109   :  { %v4692_v16 = vrot.slane %v2633_v11, %v10313_v17  ;;  %v4687_v19 = vrot.slane %v2632_v13, %v10319_v23  ;;  %1431 = vadd.xlane.f32.xlu1 %v1430_v6  ;;  %1428 = vadd.xlane.f32.xlu0 %v1427_v7  ;;  %v8647_v6 = vld [vmem:[%s13836_s0 + $0x230] sm:$0xff]  }
 0x10a   :  { %v1222_v20 = vpop.xlane.xlu1 %1221  ;;  %v1219_v21 = vpop.xlane.xlu0 %1218  ;;  %v1454_v14 = vsel %vm1036_vm0, %v7833_v0, 0.0 }
 0x10b   :  { %v4688_v30 = vsel %vm4440_vm10, %v4687_v19, %v4683_v15  ;;  %v2635_v31 = vmul.f32 0.0625, %v1222_v20  ;;  %v2634_v32 = vmul.f32 0.0625, %v1219_v21  ;;  %v1451_v15 = vsel %vm1036_vm0, %v7832_v2, 0.0 }
 0x10c   :  { %v4693_v34 = vsel %vm4447_vm11, %v4692_v16, %v4688_v30  ;;  %v7837_v16 = vunpack.c.h.bf16 %v8647_v6  ;;  %v7836_v19 = vunpack.c.l.bf16 %v8647_v6 }
 0x10d   :  { %v4702_v35 = vrot.slane %v2635_v31, %v10330_v37  ;;  %v4697_v36 = vrot.slane %v2634_v32, %v10336_v43  ;;  %1437 = vadd.xlane.f32.xlu1 %v1436_v24  ;;  %1434 = vadd.xlane.f32.xlu0 %v1433_v25  ;;  %v8648_v25 = vld [vmem:[%s13836_s0 + $0x238] sm:$0xff]  }
 0x10e   :  { %v1228_v38 = vpop.xlane.xlu1 %1227  ;;  %v1225_v40 = vpop.xlane.xlu0 %1224  ;;  %v1460_v32 = vsel %vm1036_vm0, %v7837_v16, 0.0  ;;  %v1457_v33 = vsel %vm1036_vm0, %v7836_v19, 0.0 }
 0x10f   :  { %v4698_v48 = vsel %vm4454_vm12, %v4697_v36, %v4693_v34  ;;  %v2637_v49 = vmul.f32 0.0625, %v1228_v38  ;;  %v2636_v50 = vmul.f32 0.0625, %v1225_v40  ;;  %v7841_v34 = vunpack.c.h.bf16 %v8648_v25 }
 0x110   :  { %v4703_v52 = vsel %vm4461_vm13, %v4702_v35, %v4698_v48  ;;  %v7840_v35 = vunpack.c.l.bf16 %v8648_v25 }
 0x111   :  { %v4712_v55 = vrot.slane %v2637_v49, %v10347_v54  ;;  %v4707_v56 = vrot.slane %v2636_v50, %v10352_v60  ;;  %1443 = vadd.xlane.f32.xlu1 %v1442_v44  ;;  %1440 = vadd.xlane.f32.xlu0 %v1439_v45  ;;  %v8649_v44 = vld [vmem:[%s13836_s0 + $0x240] sm:$0xff]   ;;  %v1466_v50 = vsel %vm1036_vm0, %v7841_v34, 0.0  ;;  %v8652_v34 = vld [vmem:[%s13836_s0 + $0x258] sm:$0xff]  }
 0x112   :  { %v1234_v57 = vpop.xlane.xlu1 %1233  ;;  %v1231_v59 = vpop.xlane.xlu0 %1230  ;;  %v1463_v51 = vsel %vm1036_vm0, %v7840_v35, 0.0 }
 0x113   :  { %v2639_v3 = vmul.f32 0.0625, %v1234_v57  ;;  %v2638_v4 = vmul.f32 0.0625, %v1231_v59  ;;  %v4708_v7 = vsel %vm4468_vm14, %v4707_v56, %v4703_v52  ;;  %v7845_v52 = vunpack.c.h.bf16 %v8649_v44 }
 0x114   :  { %v10589_v8 = vsel %vm4475_vm15, %v4712_v55, %v4708_v7  ;;  %v7844_v55 = vunpack.c.l.bf16 %v8649_v44 }
 0x115   :  { %13881 = vst [vmem:[#allocation16_spill] sm:$0xff] %v10589_v8  ;;  %v4721_v10 = vrot.slane %v2639_v3, %v10244_v9  ;;  %v4717_v58 = vrot.slane %v2638_v4, %v10240_v5  ;;  %1449 = vadd.xlane.f32.xlu1 %v1448_v62  ;;  %1446 = vadd.xlane.f32.xlu0 %v1445_v63  ;;  %v8650_v62 = vld [vmem:[%s13836_s0 + $0x248] sm:$0xff]   ;;  %v1472_v6 = vsel %vm1036_vm0, %v7845_v52, 0.0  ;;  %v8653_v52 = vld [vmem:[%s13836_s0 + $0x260] sm:$0xff]  }
 0x116   :  { %v1240_v11 = vpop.xlane.xlu1 %1239  ;;  %v1237_v13 = vpop.xlane.xlu0 %1236  ;;  %v1469_v7 = vsel %vm1036_vm0, %v7844_v55, 0.0 }
 0x117   :  { %v4722_v20 = vsel %vm4377_vm1, %v4721_v10, %v4717_v58  ;;  %v2641_v21 = vmul.f32 0.0625, %v1240_v11  ;;  %v2640_v24 = vmul.f32 0.0625, %v1237_v13  ;;  %v7849_v10 = vunpack.c.h.bf16 %v8650_v62 }
 0x118   :  { %v7848_v58 = vunpack.c.l.bf16 %v8650_v62 }
 0x119   :  { %v4731_v26 = vrot.slane %v2641_v21, %v10253_v18  ;;  %v4726_v27 = vrot.slane %v2640_v24, %v10248_v12  ;;  %1455 = vadd.xlane.f32.xlu1 %v1454_v14  ;;  %1452 = vadd.xlane.f32.xlu0 %v1451_v15  ;;  %v8651_v15 = vld [vmem:[%s13836_s0 + $0x250] sm:$0xff]   ;;  %v1478_v25 = vsel %vm1036_vm0, %v7849_v10, 0.0  ;;  %v8654_v10 = vld [vmem:[%s13836_s0 + $0x268] sm:$0xff]  }
 0x11a   :  { %v1246_v30 = vpop.xlane.xlu1 %1245  ;;  %v1243_v31 = vpop.xlane.xlu0 %1242 }
 0x11b   :  { %v4727_v36 = vsel %vm4384_vm2, %v4726_v27, %v4722_v20  ;;  %v2643_v38 = vmul.f32 0.0625, %v1246_v30  ;;  %v2642_v40 = vmul.f32 0.0625, %v1243_v31  ;;  %v7853_v27 = vunpack.c.h.bf16 %v8651_v15 }
 0x11c   :  { %v4732_v45 = vsel %vm4391_vm3, %v4731_v26, %v4727_v36  ;;  %v1475_v26 = vsel %vm1036_vm0, %v7848_v58, 0.0  ;;  %v7852_v30 = vunpack.c.l.bf16 %v8651_v15 }
 0x11d   :  { %v4741_v46 = vrot.slane %v2643_v38, %v10259_v22  ;;  %v4736_v47 = vrot.slane %v2642_v40, %v10267_v28  ;;  %1461 = vadd.xlane.f32.xlu1 %v1460_v32  ;;  %1458 = vadd.xlane.f32.xlu0 %v1457_v33 }
 0x11e   :  { %v1252_v48 = vpop.xlane.xlu1 %1251  ;;  %v1249_v49 = vpop.xlane.xlu0 %1248 }
 0x11f   :  { %v4737_v56 = vsel %vm13869_vm4, %v4736_v47, %v4732_v45  ;;  %v2645_v57 = vmul.f32 0.0625, %v1252_v48  ;;  %v2644_v59 = vmul.f32 0.0625, %v1249_v49  ;;  %v1484_v45 = vsel %vm1036_vm0, %v7853_v27, 0.0 }
 0x120   :  { %v4742_v63 = vsel %vm13868_vm5, %v4741_v46, %v4737_v56  ;;  %v1481_v46 = vsel %vm1036_vm0, %v7852_v30, 0.0  ;;  %v7857_v47 = vunpack.c.h.bf16 %v8652_v34  ;;  %v7856_v48 = vunpack.c.l.bf16 %v8652_v34 }
 0x121   :  { %v4751_v0 = vrot.slane %v2645_v57, %v10278_v41  ;;  %v4746_v2 = vrot.slane %v2644_v59, %v10281_v42  ;;  %1467 = vadd.xlane.f32.xlu1 %v1466_v50  ;;  %1464 = vadd.xlane.f32.xlu0 %v1463_v51 }
 0x122   :  { %v1258_v3 = vpop.xlane.xlu1 %1257  ;;  %v1255_v4 = vpop.xlane.xlu0 %1254 }
 0x123   :  { %v4747_v11 = vsel %vm4412_vm6, %v4746_v2, %v4742_v63  ;;  %v2647_v13 = vmul.f32 0.0625, %v1258_v3  ;;  %v2646_v14 = vmul.f32 0.0625, %v1255_v4  ;;  %v1490_v63 = vsel %vm1036_vm0, %v7857_v47, 0.0  ;;  %v8656_v47 = vld [vmem:[%s13836_s0 + $0x278] sm:$0xff]  }
 0x124   :  { %v4752_v16 = vsel %vm13857_vm7, %v4751_v0, %v4747_v11  ;;  %v1487_v0 = vsel %vm1036_vm0, %v7856_v48, 0.0  ;;  %v7861_v2 = vunpack.c.h.bf16 %v8653_v52  ;;  %v7860_v3 = vunpack.c.l.bf16 %v8653_v52 }
 0x125   :  { %v4761_v19 = vrot.slane %v2647_v13, %v10296_v61  ;;  %v4756_v20 = vrot.slane %v2646_v14, %v10302_v1  ;;  %1473 = vadd.xlane.f32.xlu1 %v1472_v6  ;;  %1470 = vadd.xlane.f32.xlu0 %v1469_v7 }
 0x126   :  { %v1264_v21 = vpop.xlane.xlu1 %1263  ;;  %v1261_v24 = vpop.xlane.xlu0 %1260 }
 0x127   :  { %v4757_v31 = vsel %vm4426_vm8, %v4756_v20, %v4752_v16  ;;  %v2649_v32 = vmul.f32 0.0625, %v1264_v21  ;;  %v2648_v33 = vmul.f32 0.0625, %v1261_v24  ;;  %v1496_v16 = vsel %vm1036_vm0, %v7861_v2, 0.0 }
 0x128   :  { %v4762_v35 = vsel %vm4433_vm9, %v4761_v19, %v4757_v31  ;;  %v1493_v19 = vsel %vm1036_vm0, %v7860_v3, 0.0  ;;  %v7865_v20 = vunpack.c.h.bf16 %v8654_v10  ;;  %v7864_v21 = vunpack.c.l.bf16 %v8654_v10 }
 0x129   :  { %v4771_v36 = vrot.slane %v2649_v32, %v10313_v17  ;;  %v4766_v38 = vrot.slane %v2648_v33, %v10319_v23  ;;  %1479 = vadd.xlane.f32.xlu1 %v1478_v25  ;;  %1476 = vadd.xlane.f32.xlu0 %v1475_v26  ;;  %v8655_v26 = vld [vmem:[%s13836_s0 + $0x270] sm:$0xff]  }
 0x12a   :  { %v1270_v40 = vpop.xlane.xlu1 %1269  ;;  %v1267_v44 = vpop.xlane.xlu0 %1266 }
 0x12b   :  { %v4767_v49 = vsel %vm4440_vm10, %v4766_v38, %v4762_v35  ;;  %v2651_v50 = vmul.f32 0.0625, %v1270_v40  ;;  %v2650_v51 = vmul.f32 0.0625, %v1267_v44  ;;  %v1502_v35 = vsel %vm1036_vm0, %v7865_v20, 0.0 }
 0x12c   :  { %v4772_v55 = vsel %vm4447_vm11, %v4771_v36, %v4767_v49  ;;  %v1499_v36 = vsel %vm1036_vm0, %v7864_v21, 0.0  ;;  %v7869_v38 = vunpack.c.h.bf16 %v8655_v26  ;;  %v7868_v40 = vunpack.c.l.bf16 %v8655_v26 }
 0x12d   :  { %v4781_v56 = vrot.slane %v2651_v50, %v10330_v37  ;;  %v4776_v57 = vrot.slane %v2650_v51, %v10336_v43  ;;  %1485 = vadd.xlane.f32.xlu1 %v1484_v45  ;;  %1482 = vadd.xlane.f32.xlu0 %v1481_v46 }
 0x12e   :  { %v1276_v59 = vpop.xlane.xlu1 %1275  ;;  %v1273_v62 = vpop.xlane.xlu0 %1272  ;;  %v1508_v52 = vsel %vm1036_vm0, %v7869_v38, 0.0  ;;  %v8659_v38 = vld [vmem:[%s13836_s0 + $0x290] sm:$0xff]  }
 0x12f   :  { %v4777_v4 = vsel %vm4454_vm12, %v4776_v57, %v4772_v55  ;;  %v2653_v6 = vmul.f32 0.0625, %v1276_v59  ;;  %v2652_v7 = vmul.f32 0.0625, %v1273_v62  ;;  %v1505_v55 = vsel %vm1036_vm0, %v7868_v40, 0.0 }
 0x130   :  { %v4782_v58 = vsel %vm4461_vm13, %v4781_v56, %v4777_v4  ;;  %v7873_v56 = vunpack.c.h.bf16 %v8656_v47  ;;  %v7872_v57 = vunpack.c.l.bf16 %v8656_v47 }
 0x131   :  { %v4791_v11 = vrot.slane %v2653_v6, %v10347_v54  ;;  %v4786_v13 = vrot.slane %v2652_v7, %v10352_v60  ;;  %1491 = vadd.xlane.f32.xlu1 %v1490_v63  ;;  %1488 = vadd.xlane.f32.xlu0 %v1487_v0  ;;  %v8657_v0 = vld [vmem:[%s13836_s0 + $0x280] sm:$0xff]  }
 0x132   :  { %v1282_v14 = vpop.xlane.xlu1 %1281  ;;  %v1279_v15 = vpop.xlane.xlu0 %1278  ;;  %v1514_v10 = vsel %vm1036_vm0, %v7873_v56, 0.0 }
 0x133   :  { %v2655_v24 = vmul.f32 0.0625, %v1282_v14  ;;  %v2654_v25 = vmul.f32 0.0625, %v1279_v15  ;;  %v4787_v27 = vsel %vm4468_vm14, %v4786_v13, %v4782_v58  ;;  %v1511_v58 = vsel %vm1036_vm0, %v7872_v57, 0.0  ;;  %v8660_v57 = vld [vmem:[%s13836_s0 + $0x298] sm:$0xff]  }
 0x134   :  { %v10662_v30 = vsel %vm4475_vm15, %v4791_v11, %v4787_v27  ;;  %v7877_v11 = vunpack.c.h.bf16 %v8657_v0  ;;  %v7876_v13 = vunpack.c.l.bf16 %v8657_v0 }
 0x135   :  { %13882 = vst [vmem:[#allocation17_spill] sm:$0xff] %v10662_v30  ;;  %v4800_v31 = vrot.slane %v2655_v24, %v10244_v9  ;;  %v4796_v32 = vrot.slane %v2654_v25, %v10240_v5  ;;  %1497 = vadd.xlane.f32.xlu1 %v1496_v16  ;;  %1494 = vadd.xlane.f32.xlu0 %v1493_v19  ;;  %v8658_v19 = vld [vmem:[%s13836_s0 + $0x288] sm:$0xff]  }
 0x136   :  { %v1288_v33 = vpop.xlane.xlu1 %1287  ;;  %v1285_v34 = vpop.xlane.xlu0 %1284  ;;  %v1520_v27 = vsel %vm1036_vm0, %v7877_v11, 0.0 }
 0x137   :  { %v4801_v44 = vsel %vm4377_vm1, %v4800_v31, %v4796_v32  ;;  %v2657_v45 = vmul.f32 0.0625, %v1288_v33  ;;  %v2656_v46 = vmul.f32 0.0625, %v1285_v34  ;;  %v1517_v31 = vsel %vm1036_vm0, %v7876_v13, 0.0  ;;  %v8661_v13 = vld [vmem:[%s13836_s0 + $0x2a0] sm:$0xff]  }
 0x138   :  { %v7881_v32 = vunpack.c.h.bf16 %v8658_v19  ;;  %v7880_v33 = vunpack.c.l.bf16 %v8658_v19 }
 0x139   :  { %v4810_v48 = vrot.slane %v2657_v45, %v10253_v18  ;;  %v4805_v49 = vrot.slane %v2656_v46, %v10248_v12  ;;  %1503 = vadd.xlane.f32.xlu1 %v1502_v35  ;;  %1500 = vadd.xlane.f32.xlu0 %v1499_v36 }
 0x13a   :  { %v1294_v50 = vpop.xlane.xlu1 %1293  ;;  %v1291_v51 = vpop.xlane.xlu0 %1290 }
 0x13b   :  { %v4806_v59 = vsel %vm4384_vm2, %v4805_v49, %v4801_v44  ;;  %v2659_v62 = vmul.f32 0.0625, %v1294_v50  ;;  %v2658_v63 = vmul.f32 0.0625, %v1291_v51  ;;  %v1523_v49 = vsel %vm1036_vm0, %v7880_v33, 0.0  ;;  %v8662_v33 = vld [vmem:[%s13836_s0 + $0x2a8] sm:$0xff]  }
 0x13c   :  { %v4811_v2 = vsel %vm4391_vm3, %v4810_v48, %v4806_v59  ;;  %v1526_v48 = vsel %vm1036_vm0, %v7881_v32, 0.0  ;;  %v7885_v50 = vunpack.c.h.bf16 %v8659_v38  ;;  %v7884_v51 = vunpack.c.l.bf16 %v8659_v38 }
 0x13d   :  { %v4820_v3 = vrot.slane %v2659_v62, %v10259_v22  ;;  %v4815_v4 = vrot.slane %v2658_v63, %v10267_v28  ;;  %1509 = vadd.xlane.f32.xlu1 %v1508_v52  ;;  %1506 = vadd.xlane.f32.xlu0 %v1505_v55 }
 0x13e   :  { %v1300_v6 = vpop.xlane.xlu1 %1299  ;;  %v1297_v7 = vpop.xlane.xlu0 %1296 }
 0x13f   :  { %v4816_v14 = vsel %vm13869_vm4, %v4815_v4, %v4811_v2  ;;  %v2661_v15 = vmul.f32 0.0625, %v1300_v6  ;;  %v2660_v16 = vmul.f32 0.0625, %v1297_v7  ;;  %v1529_v4 = vsel %vm1036_vm0, %v7884_v51, 0.0 }
 0x140   :  { %v4821_v20 = vsel %vm13868_vm5, %v4820_v3, %v4816_v14  ;;  %v1532_v3 = vsel %vm1036_vm0, %v7885_v50, 0.0  ;;  %v7889_v6 = vunpack.c.h.bf16 %v8660_v57  ;;  %v7888_v7 = vunpack.c.l.bf16 %v8660_v57  ;;  %v8663_v50 = vld [vmem:[%s13836_s0 + $0x2b0] sm:$0xff]  }
 0x141   :  { %v4830_v21 = vrot.slane %v2661_v15, %v10278_v41  ;;  %v4825_v24 = vrot.slane %v2660_v16, %v10281_v42  ;;  %1515 = vadd.xlane.f32.xlu1 %v1514_v10  ;;  %1512 = vadd.xlane.f32.xlu0 %v1511_v58 }
 0x142   :  { %v1306_v25 = vpop.xlane.xlu1 %1305  ;;  %v1303_v26 = vpop.xlane.xlu0 %1302 }
 0x143   :  { %v4826_v34 = vsel %vm4412_vm6, %v4825_v24, %v4821_v20  ;;  %v2663_v35 = vmul.f32 0.0625, %v1306_v25  ;;  %v2662_v36 = vmul.f32 0.0625, %v1303_v26  ;;  %v1535_v24 = vsel %vm1036_vm0, %v7888_v7, 0.0  ;;  %v8664_v7 = vld [vmem:[%s13836_s0 + $0x2b8] sm:$0xff]  }
 0x144   :  { %v4831_v40 = vsel %vm13857_vm7, %v4830_v21, %v4826_v34  ;;  %v1538_v21 = vsel %vm1036_vm0, %v7889_v6, 0.0  ;;  %v7893_v25 = vunpack.c.h.bf16 %v8661_v13  ;;  %v7892_v26 = vunpack.c.l.bf16 %v8661_v13 }
 0x145   :  { %v4840_v44 = vrot.slane %v2663_v35, %v10296_v61  ;;  %v4835_v45 = vrot.slane %v2662_v36, %v10302_v1  ;;  %1521 = vadd.xlane.f32.xlu1 %v1520_v27  ;;  %1518 = vadd.xlane.f32.xlu0 %v1517_v31 }
 0x146   :  { %v1312_v46 = vpop.xlane.xlu1 %1311  ;;  %v1309_v47 = vpop.xlane.xlu0 %1308 }
 0x147   :  { %v4836_v52 = vsel %vm4426_vm8, %v4835_v45, %v4831_v40  ;;  %v2665_v55 = vmul.f32 0.0625, %v1312_v46  ;;  %v2664_v56 = vmul.f32 0.0625, %v1309_v47  ;;  %v1541_v45 = vsel %vm1036_vm0, %v7892_v26, 0.0 }
 0x148   :  { %v4841_v59 = vsel %vm4433_vm9, %v4840_v44, %v4836_v52  ;;  %v1544_v44 = vsel %vm1036_vm0, %v7893_v25, 0.0  ;;  %v7897_v46 = vunpack.c.h.bf16 %v8662_v33  ;;  %v7896_v47 = vunpack.c.l.bf16 %v8662_v33  ;;  %v8665_v25 = vld [vmem:[%s13836_s0 + $0x2c0] sm:$0xff]  }
 0x149   :  { %v4850_v62 = vrot.slane %v2665_v55, %v10313_v17  ;;  %v4845_v63 = vrot.slane %v2664_v56, %v10319_v23  ;;  %1527 = vadd.xlane.f32.xlu1 %v1526_v48  ;;  %1524 = vadd.xlane.f32.xlu0 %v1523_v49 }
 0x14a   :  { %v1318_v0 = vpop.xlane.xlu1 %1317  ;;  %v1315_v2 = vpop.xlane.xlu0 %1314 }
 0x14b   :  { %v4846_v10 = vsel %vm4440_vm10, %v4845_v63, %v4841_v59  ;;  %v2667_v58 = vmul.f32 0.0625, %v1318_v0  ;;  %v2666_v11 = vmul.f32 0.0625, %v1315_v2  ;;  %v1547_v63 = vsel %vm1036_vm0, %v7896_v47, 0.0 }
 0x14c   :  { %v4851_v14 = vsel %vm4447_vm11, %v4850_v62, %v4846_v10  ;;  %v1550_v62 = vsel %vm1036_vm0, %v7897_v46, 0.0  ;;  %v7901_v0 = vunpack.c.h.bf16 %v8663_v50  ;;  %v7900_v2 = vunpack.c.l.bf16 %v8663_v50  ;;  %v8666_v46 = vld [vmem:[%s13836_s0 + $0x2c8] sm:$0xff]  }
 0x14d   :  { %v4860_v15 = vrot.slane %v2667_v58, %v10330_v37  ;;  %v4855_v16 = vrot.slane %v2666_v11, %v10336_v43  ;;  %1533 = vadd.xlane.f32.xlu1 %v1532_v3  ;;  %1530 = vadd.xlane.f32.xlu0 %v1529_v4 }
 0x14e   :  { %v1324_v19 = vpop.xlane.xlu1 %1323  ;;  %v1321_v20 = vpop.xlane.xlu0 %1320 }
 0x14f   :  { %v4856_v27 = vsel %vm4454_vm12, %v4855_v16, %v4851_v14  ;;  %v2669_v31 = vmul.f32 0.0625, %v1324_v19  ;;  %v2668_v32 = vmul.f32 0.0625, %v1321_v20  ;;  %v1556_v14 = vsel %vm1036_vm0, %v7901_v0, 0.0 }
 0x150   :  { %v4861_v34 = vsel %vm4461_vm13, %v4860_v15, %v4856_v27  ;;  %v1553_v15 = vsel %vm1036_vm0, %v7900_v2, 0.0  ;;  %v7905_v16 = vunpack.c.h.bf16 %v8664_v7  ;;  %v7904_v19 = vunpack.c.l.bf16 %v8664_v7  ;;  %v8667_v2 = vld [vmem:[%s13836_s0 + $0x2d0] sm:$0xff]  }
 0x151   :  { %v4870_v35 = vrot.slane %v2669_v31, %v10347_v54  ;;  %v4865_v36 = vrot.slane %v2668_v32, %v10352_v60  ;;  %1539 = vadd.xlane.f32.xlu1 %v1538_v21  ;;  %1536 = vadd.xlane.f32.xlu0 %v1535_v24 }
 0x152   :  { %v1330_v38 = vpop.xlane.xlu1 %1329  ;;  %v1327_v40 = vpop.xlane.xlu0 %1326 }
 0x153   :  { %v2671_v48 = vmul.f32 0.0625, %v1330_v38  ;;  %v2670_v49 = vmul.f32 0.0625, %v1327_v40  ;;  %v4866_v51 = vsel %vm4468_vm14, %v4865_v36, %v4861_v34  ;;  %v1562_v34 = vsel %vm1036_vm0, %v7905_v16, 0.0 }
 0x154   :  { %v10735_v52 = vsel %vm4475_vm15, %v4870_v35, %v4866_v51  ;;  %v1559_v35 = vsel %vm1036_vm0, %v7904_v19, 0.0  ;;  %v7909_v36 = vunpack.c.h.bf16 %v8665_v25  ;;  %v7908_v38 = vunpack.c.l.bf16 %v8665_v25 }
 0x155   :  { %13883 = vst [vmem:[#allocation18_spill] sm:$0xff] %v10735_v52  ;;  %v4879_v55 = vrot.slane %v2671_v48, %v10244_v9  ;;  %v4875_v56 = vrot.slane %v2670_v49, %v10240_v5  ;;  %1545 = vadd.xlane.f32.xlu1 %v1544_v44  ;;  %1542 = vadd.xlane.f32.xlu0 %v1541_v45 }
 0x156   :  { %v1336_v57 = vpop.xlane.xlu1 %1335  ;;  %v1333_v59 = vpop.xlane.xlu0 %1332 }
 0x157   :  { %v4880_v3 = vsel %vm4377_vm1, %v4879_v55, %v4875_v56  ;;  %v2673_v4 = vmul.f32 0.0625, %v1336_v57  ;;  %v2672_v6 = vmul.f32 0.0625, %v1333_v59  ;;  %v1568_v55 = vsel %vm1036_vm0, %v7909_v36, 0.0 }
 0x158   :  { %v1565_v56 = vsel %vm1036_vm0, %v7908_v38, 0.0  ;;  %v7913_v57 = vunpack.c.h.bf16 %v8666_v46  ;;  %v7912_v59 = vunpack.c.l.bf16 %v8666_v46 }
 0x159   :  { %v4889_v10 = vrot.slane %v2673_v4, %v10253_v18  ;;  %v4884_v58 = vrot.slane %v2672_v6, %v10248_v12  ;;  %1551 = vadd.xlane.f32.xlu1 %v1550_v62  ;;  %1548 = vadd.xlane.f32.xlu0 %v1547_v63 }
 0x15a   :  { %v1342_v11 = vpop.xlane.xlu1 %1341  ;;  %v1339_v13 = vpop.xlane.xlu0 %1338 }
 0x15b   :  { %v4885_v20 = vsel %vm4384_vm2, %v4884_v58, %v4880_v3  ;;  %v2675_v21 = vmul.f32 0.0625, %v1342_v11  ;;  %v2674_v24 = vmul.f32 0.0625, %v1339_v13  ;;  %v1574_v58 = vsel %vm1036_vm0, %v7913_v57, 0.0 }
 0x15c   :  { %v4890_v26 = vsel %vm4391_vm3, %v4889_v10, %v4885_v20  ;;  %v1571_v11 = vsel %vm1036_vm0, %v7912_v59, 0.0  ;;  %v7917_v13 = vunpack.c.h.bf16 %v8667_v2  ;;  %v8668_v20 = vld [vmem:[%s13836_s0 + $0x2d8] sm:$0xff]  }
 0x15d   :  { %v4899_v27 = vrot.slane %v2675_v21, %v10259_v22  ;;  %v4894_v31 = vrot.slane %v2674_v24, %v10267_v28  ;;  %1557 = vadd.xlane.f32.xlu1 %v1556_v14  ;;  %1554 = vadd.xlane.f32.xlu0 %v1553_v15  ;;  %v7916_v14 = vunpack.c.l.bf16 %v8667_v2 }
 0x15e   :  { %v1348_v32 = vpop.xlane.xlu1 %1347  ;;  %v1345_v33 = vpop.xlane.xlu0 %1344 }
 0x15f   :  { %v4895_v40 = vsel %vm13869_vm4, %v4894_v31, %v4890_v26  ;;  %v2677_v44 = vmul.f32 0.0625, %v1348_v32  ;;  %v2676_v45 = vmul.f32 0.0625, %v1345_v33  ;;  %v1580_v31 = vsel %vm1036_vm0, %v7917_v13, 0.0 }
 0x160   :  { %v4900_v47 = vsel %vm13868_vm5, %v4899_v27, %v4895_v40  ;;  %v1577_v32 = vsel %vm1036_vm0, %v7916_v14, 0.0  ;;  %v7921_v33 = vunpack.c.h.bf16 %v8668_v20  ;;  %v8669_v40 = vld [vmem:[%s13836_s0 + $0x2e0] sm:$0xff]   ;;  %v8671_v14 = vld [vmem:[%s13836_s0 + $0x2f0] sm:$0xff]  }
 0x161   :  { %v4909_v48 = vrot.slane %v2677_v44, %v10278_v41  ;;  %v4904_v49 = vrot.slane %v2676_v45, %v10281_v42  ;;  %1563 = vadd.xlane.f32.xlu1 %v1562_v34  ;;  %1560 = vadd.xlane.f32.xlu0 %v1559_v35  ;;  %v7920_v34 = vunpack.c.l.bf16 %v8668_v20 }
 0x162   :  { %v1354_v50 = vpop.xlane.xlu1 %1353  ;;  %v1351_v51 = vpop.xlane.xlu0 %1350 }
 0x163   :  { %v4905_v62 = vsel %vm4412_vm6, %v4904_v49, %v4900_v47  ;;  %v2679_v63 = vmul.f32 0.0625, %v1354_v50  ;;  %v2678_v0 = vmul.f32 0.0625, %v1351_v51  ;;  %v1586_v49 = vsel %vm1036_vm0, %v7921_v33, 0.0 }
 0x164   :  { %v4910_v3 = vsel %vm13857_vm7, %v4909_v48, %v4905_v62  ;;  %v1583_v50 = vsel %vm1036_vm0, %v7920_v34, 0.0  ;;  %v7925_v51 = vunpack.c.h.bf16 %v8669_v40  ;;  %v8670_v62 = vld [vmem:[%s13836_s0 + $0x2e8] sm:$0xff]  }
 0x165   :  { %v4919_v4 = vrot.slane %v2679_v63, %v10296_v61  ;;  %v4914_v6 = vrot.slane %v2678_v0, %v10302_v1  ;;  %1569 = vadd.xlane.f32.xlu1 %v1568_v55  ;;  %1566 = vadd.xlane.f32.xlu0 %v1565_v56  ;;  %v7924_v55 = vunpack.c.l.bf16 %v8669_v40 }
 0x166   :  { %v1360_v7 = vpop.xlane.xlu1 %1359  ;;  %v1357_v10 = vpop.xlane.xlu0 %1356 }
 0x167   :  { %v4915_v15 = vsel %vm4426_vm8, %v4914_v6, %v4910_v3  ;;  %v2681_v16 = vmul.f32 0.0625, %v1360_v7  ;;  %v2680_v19 = vmul.f32 0.0625, %v1357_v10  ;;  %v1592_v6 = vsel %vm1036_vm0, %v7925_v51, 0.0 }
 0x168   :  { %v4920_v21 = vsel %vm4433_vm9, %v4919_v4, %v4915_v15  ;;  %v1589_v7 = vsel %vm1036_vm0, %v7924_v55, 0.0  ;;  %v7929_v10 = vunpack.c.h.bf16 %v8670_v62  ;;  %v8673_v55 = vld [vmem:[%s13836_s0 + $0x300] sm:$0xff]  }
 0x169   :  { %v4929_v24 = vrot.slane %v2681_v16, %v10313_v17  ;;  %v4924_v25 = vrot.slane %v2680_v19, %v10319_v23  ;;  %1575 = vadd.xlane.f32.xlu1 %v1574_v58  ;;  %1572 = vadd.xlane.f32.xlu0 %v1571_v11  ;;  %v7928_v58 = vunpack.c.l.bf16 %v8670_v62 }
 0x16a   :  { %v1366_v26 = vpop.xlane.xlu1 %1365  ;;  %v1363_v27 = vpop.xlane.xlu0 %1362 }
 0x16b   :  { %v4925_v35 = vsel %vm4440_vm10, %v4924_v25, %v4920_v21  ;;  %v2683_v36 = vmul.f32 0.0625, %v1366_v26  ;;  %v2682_v38 = vmul.f32 0.0625, %v1363_v27  ;;  %v1598_v25 = vsel %vm1036_vm0, %v7929_v10, 0.0 }
 0x16c   :  { %v4930_v44 = vsel %vm4447_vm11, %v4929_v24, %v4925_v35  ;;  %v1595_v26 = vsel %vm1036_vm0, %v7928_v58, 0.0  ;;  %v7933_v27 = vunpack.c.h.bf16 %v8671_v14  ;;  %v8672_v35 = vld [vmem:[%s13836_s0 + $0x2f8] sm:$0xff]   ;;  %v8674_v58 = vld [vmem:[%s13836_s0 + $0x308] sm:$0xff]  }
 0x16d   :  { %v4939_v45 = vrot.slane %v2683_v36, %v10330_v37  ;;  %v4934_v46 = vrot.slane %v2682_v38, %v10336_v43  ;;  %1581 = vadd.xlane.f32.xlu1 %v1580_v31  ;;  %1578 = vadd.xlane.f32.xlu0 %v1577_v32  ;;  %v7932_v31 = vunpack.c.l.bf16 %v8671_v14 }
 0x16e   :  { %v1372_v47 = vpop.xlane.xlu1 %1371  ;;  %v1369_v48 = vpop.xlane.xlu0 %1368 }
 0x16f   :  { %v4935_v56 = vsel %vm4454_vm12, %v4934_v46, %v4930_v44  ;;  %v2685_v57 = vmul.f32 0.0625, %v1372_v47  ;;  %v2684_v59 = vmul.f32 0.0625, %v1369_v48  ;;  %v1601_v46 = vsel %vm1036_vm0, %v7932_v31, 0.0 }
 0x170   :  { %v4940_v63 = vsel %vm4461_vm13, %v4939_v45, %v4935_v56  ;;  %v1604_v45 = vsel %vm1036_vm0, %v7933_v27, 0.0  ;;  %v7937_v47 = vunpack.c.h.bf16 %v8672_v35  ;;  %v7936_v48 = vunpack.c.l.bf16 %v8672_v35 }
 0x171   :  { %v4949_v0 = vrot.slane %v2685_v57, %v10347_v54  ;;  %v4944_v2 = vrot.slane %v2684_v59, %v10352_v60  ;;  %1587 = vadd.xlane.f32.xlu1 %v1586_v49  ;;  %1584 = vadd.xlane.f32.xlu0 %v1583_v50 }
 0x172   :  { %v1378_v3 = vpop.xlane.xlu1 %1377  ;;  %v1375_v4 = vpop.xlane.xlu0 %1374 }
 0x173   :  { %v2687_v11 = vmul.f32 0.0625, %v1378_v3  ;;  %v2686_v13 = vmul.f32 0.0625, %v1375_v4  ;;  %v4945_v15 = vsel %vm4468_vm14, %v4944_v2, %v4940_v63  ;;  %v1607_v2 = vsel %vm1036_vm0, %v7936_v48, 0.0 }
 0x174   :  { %v10808_v16 = vsel %vm4475_vm15, %v4949_v0, %v4945_v15  ;;  %v1610_v0 = vsel %vm1036_vm0, %v7937_v47, 0.0  ;;  %v7941_v3 = vunpack.c.h.bf16 %v8673_v55  ;;  %v7940_v4 = vunpack.c.l.bf16 %v8673_v55 }
 0x175   :  { %13884 = vst [vmem:[#allocation19_spill] sm:$0xff] %v10808_v16  ;;  %v4958_v19 = vrot.slane %v2687_v11, %v10244_v9  ;;  %v4954_v20 = vrot.slane %v2686_v13, %v10240_v5  ;;  %1593 = vadd.xlane.f32.xlu1 %v1592_v6  ;;  %1590 = vadd.xlane.f32.xlu0 %v1589_v7 }
 0x176   :  { %v1384_v21 = vpop.xlane.xlu1 %1383  ;;  %v1381_v24 = vpop.xlane.xlu0 %1380 }
 0x177   :  { %v4959_v32 = vsel %vm4377_vm1, %v4958_v19, %v4954_v20  ;;  %v2689_v33 = vmul.f32 0.0625, %v1384_v21  ;;  %v2688_v34 = vmul.f32 0.0625, %v1381_v24  ;;  %v1616_v20 = vsel %vm1036_vm0, %v7941_v3, 0.0 }
 0x178   :  { %v1613_v21 = vsel %vm1036_vm0, %v7940_v4, 0.0  ;;  %v7945_v24 = vunpack.c.h.bf16 %v8674_v58 }
 0x179   :  { %v4968_v36 = vrot.slane %v2689_v33, %v10253_v18  ;;  %v4963_v38 = vrot.slane %v2688_v34, %v10248_v12  ;;  %1599 = vadd.xlane.f32.xlu1 %v1598_v25  ;;  %1596 = vadd.xlane.f32.xlu0 %v1595_v26  ;;  %v7944_v25 = vunpack.c.l.bf16 %v8674_v58 }
 0x17a   :  { %v1390_v40 = vpop.xlane.xlu1 %1389  ;;  %v1387_v44 = vpop.xlane.xlu0 %1386 }
 0x17b   :  { %v4964_v49 = vsel %vm4384_vm2, %v4963_v38, %v4959_v32  ;;  %v2691_v50 = vmul.f32 0.0625, %v1390_v40  ;;  %v2690_v51 = vmul.f32 0.0625, %v1387_v44  ;;  %v8675_v32 = vld [vmem:[%s13836_s0 + $0x310] sm:$0xff]   ;;  %v1622_v40 = vsel %vm1036_vm0, %v7945_v24, 0.0 }
 0x17c   :  { %v4969_v56 = vsel %vm4391_vm3, %v4968_v36, %v4964_v49  ;;  %v1619_v44 = vsel %vm1036_vm0, %v7944_v25, 0.0 }
 0x17d   :  { %v4978_v57 = vrot.slane %v2691_v50, %v10259_v22  ;;  %v4973_v59 = vrot.slane %v2690_v51, %v10267_v28  ;;  %1605 = vadd.xlane.f32.xlu1 %v1604_v45  ;;  %1602 = vadd.xlane.f32.xlu0 %v1601_v46  ;;  %v7949_v45 = vunpack.c.h.bf16 %v8675_v32  ;;  %v7948_v46 = vunpack.c.l.bf16 %v8675_v32  ;;  %v8676_v50 = vld [vmem:[%s13836_s0 + $0x318] sm:$0xff]  }
 0x17e   :  { %v1396_v62 = vpop.xlane.xlu1 %1395  ;;  %v1393_v63 = vpop.xlane.xlu0 %1392 }
 0x17f   :  { %v4974_v6 = vsel %vm13869_vm4, %v4973_v59, %v4969_v56  ;;  %v2693_v7 = vmul.f32 0.0625, %v1396_v62  ;;  %v2692_v10 = vmul.f32 0.0625, %v1393_v63  ;;  %v1628_v62 = vsel %vm1036_vm0, %v7949_v45, 0.0 }
 0x180   :  { %v4979_v11 = vsel %vm13868_vm5, %v4978_v57, %v4974_v6  ;;  %v1625_v63 = vsel %vm1036_vm0, %v7948_v46, 0.0 }
 0x181   :  { %v4988_v13 = vrot.slane %v2693_v7, %v10278_v41  ;;  %v4983_v14 = vrot.slane %v2692_v10, %v10281_v42  ;;  %1611 = vadd.xlane.f32.xlu1 %v1610_v0  ;;  %1608 = vadd.xlane.f32.xlu0 %v1607_v2  ;;  %v7953_v0 = vunpack.c.h.bf16 %v8676_v50  ;;  %v7952_v2 = vunpack.c.l.bf16 %v8676_v50  ;;  %v8677_v7 = vld [vmem:[%s13836_s0 + $0x320] sm:$0xff]  }
 0x182   :  { %v1402_v15 = vpop.xlane.xlu1 %1401  ;;  %v1399_v19 = vpop.xlane.xlu0 %1398 }
 0x183   :  { %v4984_v26 = vsel %vm4412_vm6, %v4983_v14, %v4979_v11  ;;  %v2695_v27 = vmul.f32 0.0625, %v1402_v15  ;;  %v2694_v31 = vmul.f32 0.0625, %v1399_v19  ;;  %v1634_v15 = vsel %vm1036_vm0, %v7953_v0, 0.0 }
 0x184   :  { %v4989_v33 = vsel %vm13857_vm7, %v4988_v13, %v4984_v26  ;;  %v1631_v19 = vsel %vm1036_vm0, %v7952_v2, 0.0 }
 0x185   :  { %v4998_v34 = vrot.slane %v2695_v27, %v10296_v61  ;;  %v4993_v35 = vrot.slane %v2694_v31, %v10302_v1  ;;  %1617 = vadd.xlane.f32.xlu1 %v1616_v20  ;;  %1614 = vadd.xlane.f32.xlu0 %v1613_v21  ;;  %v7957_v20 = vunpack.c.h.bf16 %v8677_v7  ;;  %v7956_v21 = vunpack.c.l.bf16 %v8677_v7  ;;  %v8678_v27 = vld [vmem:[%s13836_s0 + $0x328] sm:$0xff]  }
 0x186   :  { %v1408_v36 = vpop.xlane.xlu1 %1407  ;;  %v1405_v38 = vpop.xlane.xlu0 %1404 }
 0x187   :  { %v4994_v47 = vsel %vm4426_vm8, %v4993_v35, %v4989_v33  ;;  %v2697_v48 = vmul.f32 0.0625, %v1408_v36  ;;  %v2696_v49 = vmul.f32 0.0625, %v1405_v38  ;;  %v1640_v36 = vsel %vm1036_vm0, %v7957_v20, 0.0 }
 0x188   :  { %v4999_v51 = vsel %vm4433_vm9, %v4998_v34, %v4994_v47  ;;  %v1637_v38 = vsel %vm1036_vm0, %v7956_v21, 0.0  ;;  %v8679_v47 = vld [vmem:[%s13836_s0 + $0x330] sm:$0xff]  }
 0x189   :  { %v5008_v55 = vrot.slane %v2697_v48, %v10313_v17  ;;  %v5003_v56 = vrot.slane %v2696_v49, %v10319_v23  ;;  %1623 = vadd.xlane.f32.xlu1 %v1622_v40  ;;  %1620 = vadd.xlane.f32.xlu0 %v1619_v44  ;;  %v7961_v40 = vunpack.c.h.bf16 %v8678_v27  ;;  %v7960_v44 = vunpack.c.l.bf16 %v8678_v27 }
 0x18a   :  { %v1414_v57 = vpop.xlane.xlu1 %1413  ;;  %v1411_v59 = vpop.xlane.xlu0 %1410 }
 0x18b   :  { %v5004_v3 = vsel %vm4440_vm10, %v5003_v56, %v4999_v51  ;;  %v2699_v4 = vmul.f32 0.0625, %v1414_v57  ;;  %v2698_v6 = vmul.f32 0.0625, %v1411_v59  ;;  %v1646_v57 = vsel %vm1036_vm0, %v7961_v40, 0.0 }
 0x18c   :  { %v5009_v10 = vsel %vm4447_vm11, %v5008_v55, %v5004_v3  ;;  %v1643_v59 = vsel %vm1036_vm0, %v7960_v44, 0.0 }
 0x18d   :  { %v5018_v58 = vrot.slane %v2699_v4, %v10330_v37  ;;  %v5013_v11 = vrot.slane %v2698_v6, %v10336_v43  ;;  %1629 = vadd.xlane.f32.xlu1 %v1628_v62  ;;  %1626 = vadd.xlane.f32.xlu0 %v1625_v63  ;;  %v7965_v62 = vunpack.c.h.bf16 %v8679_v47  ;;  %v7964_v63 = vunpack.c.l.bf16 %v8679_v47  ;;  %v8680_v4 = vld [vmem:[%s13836_s0 + $0x338] sm:$0xff]  }
 0x18e   :  { %v1420_v13 = vpop.xlane.xlu1 %1419  ;;  %v1417_v14 = vpop.xlane.xlu0 %1416 }
 0x18f   :  { %v5014_v24 = vsel %vm4454_vm12, %v5013_v11, %v5009_v10  ;;  %v2701_v25 = vmul.f32 0.0625, %v1420_v13  ;;  %v2700_v26 = vmul.f32 0.0625, %v1417_v14  ;;  %v1652_v11 = vsel %vm1036_vm0, %v7965_v62, 0.0 }
 0x190   :  { %v5019_v31 = vsel %vm4461_vm13, %v5018_v58, %v5014_v24  ;;  %v1649_v13 = vsel %vm1036_vm0, %v7964_v63, 0.0  ;;  %v7969_v14 = vunpack.c.h.bf16 %v8680_v4  ;;  %v8681_v24 = vld [vmem:[%s13836_s0 + $0x340] sm:$0xff]  }
 0x191   :  { %v5028_v32 = vrot.slane %v2701_v25, %v10347_v54  ;;  %v5023_v33 = vrot.slane %v2700_v26, %v10352_v60  ;;  %1635 = vadd.xlane.f32.xlu1 %v1634_v15  ;;  %1632 = vadd.xlane.f32.xlu0 %v1631_v19  ;;  %v7968_v15 = vunpack.c.l.bf16 %v8680_v4 }
 0x192   :  { %v1426_v34 = vpop.xlane.xlu1 %1425  ;;  %v1423_v35 = vpop.xlane.xlu0 %1422 }
 0x193   :  { %v2703_v45 = vmul.f32 0.0625, %v1426_v34  ;;  %v2702_v46 = vmul.f32 0.0625, %v1423_v35  ;;  %v5024_v48 = vsel %vm4468_vm14, %v5023_v33, %v5019_v31  ;;  %v1658_v33 = vsel %vm1036_vm0, %v7969_v14, 0.0 }
 0x194   :  { %v10881_v49 = vsel %vm4475_vm15, %v5028_v32, %v5024_v48  ;;  %v1655_v34 = vsel %vm1036_vm0, %v7968_v15, 0.0  ;;  %v7973_v35 = vunpack.c.h.bf16 %v8681_v24 }
 0x195   :  { %13885 = vst [vmem:[#allocation20_spill] sm:$0xff] %v10881_v49  ;;  %v5037_v50 = vrot.slane %v2703_v45, %v10244_v9  ;;  %v5033_v51 = vrot.slane %v2702_v46, %v10240_v5  ;;  %1641 = vadd.xlane.f32.xlu1 %v1640_v36  ;;  %1638 = vadd.xlane.f32.xlu0 %v1637_v38  ;;  %v7972_v36 = vunpack.c.l.bf16 %v8681_v24  ;;  %v8682_v45 = vld [vmem:[%s13836_s0 + $0x348] sm:$0xff]  }
 0x196   :  { %v1432_v55 = vpop.xlane.xlu1 %1431  ;;  %v1429_v56 = vpop.xlane.xlu0 %1428 }
 0x197   :  { %v5038_v0 = vsel %vm4377_vm1, %v5037_v50, %v5033_v51  ;;  %v2705_v2 = vmul.f32 0.0625, %v1432_v55  ;;  %v2704_v3 = vmul.f32 0.0625, %v1429_v56  ;;  %v1664_v55 = vsel %vm1036_vm0, %v7973_v35, 0.0 }
 0x198   :  { %v1661_v56 = vsel %vm1036_vm0, %v7972_v36, 0.0 }
 0x199   :  { %v5047_v6 = vrot.slane %v2705_v2, %v10253_v18  ;;  %v5042_v7 = vrot.slane %v2704_v3, %v10248_v12  ;;  %1647 = vadd.xlane.f32.xlu1 %v1646_v57  ;;  %1644 = vadd.xlane.f32.xlu0 %v1643_v59  ;;  %v7977_v57 = vunpack.c.h.bf16 %v8682_v45  ;;  %v7976_v59 = vunpack.c.l.bf16 %v8682_v45  ;;  %v8683_v2 = vld [vmem:[%s13836_s0 + $0x350] sm:$0xff]  }
 0x19a   :  { %v1438_v10 = vpop.xlane.xlu1 %1437  ;;  %v1435_v58 = vpop.xlane.xlu0 %1434  ;;  %v7980_v14 = vunpack.c.l.bf16 %v8683_v2 }
 0x19b   :  { %v5043_v19 = vsel %vm4384_vm2, %v5042_v7, %v5038_v0  ;;  %v2707_v20 = vmul.f32 0.0625, %v1438_v10  ;;  %v2706_v21 = vmul.f32 0.0625, %v1435_v58  ;;  %v1670_v58 = vsel %vm1036_vm0, %v7977_v57, 0.0 }
 0x19c   :  { %v5048_v25 = vsel %vm4391_vm3, %v5047_v6, %v5043_v19 }
 0x19d   :  { %v5057_v26 = vrot.slane %v2707_v20, %v10259_v22  ;;  %v5052_v27 = vrot.slane %v2706_v21, %v10267_v28  ;;  %1653 = vadd.xlane.f32.xlu1 %v1652_v11  ;;  %1650 = vadd.xlane.f32.xlu0 %v1649_v13  ;;  %v1667_v11 = vsel %vm1036_vm0, %v7976_v59, 0.0  ;;  %v7981_v13 = vunpack.c.h.bf16 %v8683_v2  ;;  %v8684_v21 = vld [vmem:[%s13836_s0 + $0x358] sm:$0xff]  }
 0x19e   :  { %v1444_v31 = vpop.xlane.xlu1 %1443  ;;  %v1441_v32 = vpop.xlane.xlu0 %1440  ;;  %v7984_v35 = vunpack.c.l.bf16 %v8684_v21 }
 0x19f   :  { %v5053_v38 = vsel %vm13869_vm4, %v5052_v27, %v5048_v25  ;;  %v2709_v40 = vmul.f32 0.0625, %v1444_v31  ;;  %v2708_v44 = vmul.f32 0.0625, %v1441_v32  ;;  %v1676_v32 = vsel %vm1036_vm0, %v7981_v13, 0.0 }
 0x1a0   :  { %v5058_v46 = vsel %vm13868_vm5, %v5057_v26, %v5053_v38 }
 0x1a1   :  { %v5067_v47 = vrot.slane %v2709_v40, %v10278_v41  ;;  %v5062_v48 = vrot.slane %v2708_v44, %v10281_v42  ;;  %1659 = vadd.xlane.f32.xlu1 %v1658_v33  ;;  %1656 = vadd.xlane.f32.xlu0 %v1655_v34  ;;  %v1673_v33 = vsel %vm1036_vm0, %v7980_v14, 0.0  ;;  %v7985_v34 = vunpack.c.h.bf16 %v8684_v21  ;;  %v8685_v44 = vld [vmem:[%s13836_s0 + $0x360] sm:$0xff]  }
 0x1a2   :  { %v1450_v50 = vpop.xlane.xlu1 %1449  ;;  %v1447_v51 = vpop.xlane.xlu0 %1446  ;;  %v7988_v57 = vunpack.c.l.bf16 %v8685_v44 }
 0x1a3   :  { %v5063_v62 = vsel %vm4412_vm6, %v5062_v48, %v5058_v46  ;;  %v2711_v63 = vmul.f32 0.0625, %v1450_v50  ;;  %v2710_v0 = vmul.f32 0.0625, %v1447_v51  ;;  %v1682_v51 = vsel %vm1036_vm0, %v7985_v34, 0.0 }
 0x1a4   :  { %v5068_v3 = vsel %vm13857_vm7, %v5067_v47, %v5063_v62 }
 0x1a5   :  { %v5077_v4 = vrot.slane %v2711_v63, %v10296_v61  ;;  %v5072_v6 = vrot.slane %v2710_v0, %v10302_v1  ;;  %1665 = vadd.xlane.f32.xlu1 %v1664_v55  ;;  %1662 = vadd.xlane.f32.xlu0 %v1661_v56  ;;  %v1679_v55 = vsel %vm1036_vm0, %v7984_v35, 0.0  ;;  %v7989_v56 = vunpack.c.h.bf16 %v8685_v44  ;;  %v8686_v0 = vld [vmem:[%s13836_s0 + $0x368] sm:$0xff]  }
 0x1a6   :  { %v1456_v7 = vpop.xlane.xlu1 %1455  ;;  %v1453_v10 = vpop.xlane.xlu0 %1452  ;;  %v7992_v13 = vunpack.c.l.bf16 %v8686_v0 }
 0x1a7   :  { %v5073_v15 = vsel %vm4426_vm8, %v5072_v6, %v5068_v3  ;;  %v2713_v19 = vmul.f32 0.0625, %v1456_v7  ;;  %v2712_v20 = vmul.f32 0.0625, %v1453_v10  ;;  %v1688_v10 = vsel %vm1036_vm0, %v7989_v56, 0.0 }
 0x1a8   :  { %v5078_v24 = vsel %vm4433_vm9, %v5077_v4, %v5073_v15 }
 0x1a9   :  { %v5087_v25 = vrot.slane %v2713_v19, %v10313_v17  ;;  %v5082_v26 = vrot.slane %v2712_v20, %v10319_v23  ;;  %1671 = vadd.xlane.f32.xlu1 %v1670_v58  ;;  %1668 = vadd.xlane.f32.xlu0 %v1667_v11  ;;  %v1685_v58 = vsel %vm1036_vm0, %v7988_v57, 0.0  ;;  %v7993_v11 = vunpack.c.h.bf16 %v8686_v0  ;;  %v8687_v19 = vld [vmem:[%s13836_s0 + $0x370] sm:$0xff]  }
 0x1aa   :  { %v1462_v27 = vpop.xlane.xlu1 %1461  ;;  %v1459_v31 = vpop.xlane.xlu0 %1458  ;;  %v7996_v34 = vunpack.c.l.bf16 %v8687_v19 }
 0x1ab   :  { %v5083_v36 = vsel %vm4440_vm10, %v5082_v26, %v5078_v24  ;;  %v2715_v38 = vmul.f32 0.0625, %v1462_v27  ;;  %v2714_v40 = vmul.f32 0.0625, %v1459_v31  ;;  %v1694_v31 = vsel %vm1036_vm0, %v7993_v11, 0.0 }
 0x1ac   :  { %v5088_v45 = vsel %vm4447_vm11, %v5087_v25, %v5083_v36 }
 0x1ad   :  { %v5097_v46 = vrot.slane %v2715_v38, %v10330_v37  ;;  %v5092_v47 = vrot.slane %v2714_v40, %v10336_v43  ;;  %1677 = vadd.xlane.f32.xlu1 %v1676_v32  ;;  %1674 = vadd.xlane.f32.xlu0 %v1673_v33  ;;  %v1691_v32 = vsel %vm1036_vm0, %v7992_v13, 0.0  ;;  %v7997_v33 = vunpack.c.h.bf16 %v8687_v19  ;;  %v8688_v40 = vld [vmem:[%s13836_s0 + $0x378] sm:$0xff]  }
 0x1ae   :  { %v1468_v48 = vpop.xlane.xlu1 %1467  ;;  %v1465_v50 = vpop.xlane.xlu0 %1464 }
 0x1af   :  { %v5093_v59 = vsel %vm4454_vm12, %v5092_v47, %v5088_v45  ;;  %v2717_v62 = vmul.f32 0.0625, %v1468_v48  ;;  %v2716_v63 = vmul.f32 0.0625, %v1465_v50  ;;  %v1700_v48 = vsel %vm1036_vm0, %v7997_v33, 0.0 }
 0x1b0   :  { %v5098_v2 = vsel %vm4461_vm13, %v5097_v46, %v5093_v59  ;;  %v1697_v50 = vsel %vm1036_vm0, %v7996_v34, 0.0 }
 0x1b1   :  { %v5107_v3 = vrot.slane %v2717_v62, %v10347_v54  ;;  %v5102_v4 = vrot.slane %v2716_v63, %v10352_v60  ;;  %1683 = vadd.xlane.f32.xlu1 %v1682_v51  ;;  %1680 = vadd.xlane.f32.xlu0 %v1679_v55  ;;  %v8001_v51 = vunpack.c.h.bf16 %v8688_v40  ;;  %v8000_v55 = vunpack.c.l.bf16 %v8688_v40  ;;  %v8689_v62 = vld [vmem:[%s13836_s0 + $0x380] sm:$0xff]  }
 0x1b2   :  { %v1474_v6 = vpop.xlane.xlu1 %1473  ;;  %v1471_v7 = vpop.xlane.xlu0 %1470 }
 0x1b3   :  { %v2719_v14 = vmul.f32 0.0625, %v1474_v6  ;;  %v2718_v15 = vmul.f32 0.0625, %v1471_v7  ;;  %v5103_v20 = vsel %vm4468_vm14, %v5102_v4, %v5098_v2  ;;  %v1706_v6 = vsel %vm1036_vm0, %v8001_v51, 0.0 }
 0x1b4   :  { %v10954_v21 = vsel %vm4475_vm15, %v5107_v3, %v5103_v20  ;;  %v1703_v7 = vsel %vm1036_vm0, %v8000_v55, 0.0 }
 0x1b5   :  { %13886 = vst [vmem:[#allocation21_spill] sm:$0xff] %v10954_v21  ;;  %v5116_v24 = vrot.slane %v2719_v14, %v10244_v9  ;;  %v5112_v25 = vrot.slane %v2718_v15, %v10240_v5  ;;  %1689 = vadd.xlane.f32.xlu1 %v1688_v10  ;;  %1686 = vadd.xlane.f32.xlu0 %v1685_v58  ;;  %v8005_v10 = vunpack.c.h.bf16 %v8689_v62  ;;  %v8004_v58 = vunpack.c.l.bf16 %v8689_v62  ;;  %v8690_v15 = vld [vmem:[%s13836_s0 + $0x388] sm:$0xff]   ;;  %v8692_v62 = vld [vmem:[%s13836_s0 + $0x398] sm:$0xff]  }
 0x1b6   :  { %v1480_v26 = vpop.xlane.xlu1 %1479  ;;  %v1477_v27 = vpop.xlane.xlu0 %1476  ;;  %v8008_v33 = vunpack.c.l.bf16 %v8690_v15 }
 0x1b7   :  { %v5117_v35 = vsel %vm4377_vm1, %v5116_v24, %v5112_v25  ;;  %v2721_v36 = vmul.f32 0.0625, %v1480_v26  ;;  %v2720_v38 = vmul.f32 0.0625, %v1477_v27  ;;  %v1712_v27 = vsel %vm1036_vm0, %v8005_v10, 0.0 }
 0x1b8   :  { %v8017_v10 = vunpack.c.h.bf16 %v8692_v62 }
 0x1b9   :  { %v5126_v44 = vrot.slane %v2721_v36, %v10253_v18  ;;  %v5121_v45 = vrot.slane %v2720_v38, %v10248_v12  ;;  %1695 = vadd.xlane.f32.xlu1 %v1694_v31  ;;  %1692 = vadd.xlane.f32.xlu0 %v1691_v32  ;;  %v1709_v31 = vsel %vm1036_vm0, %v8004_v58, 0.0  ;;  %v8009_v32 = vunpack.c.h.bf16 %v8690_v15  ;;  %v8691_v38 = vld [vmem:[%s13836_s0 + $0x390] sm:$0xff]   ;;  %v8693_v15 = vld [vmem:[%s13836_s0 + $0x3a0] sm:$0xff]  }
 0x1ba   :  { %v1486_v46 = vpop.xlane.xlu1 %1485  ;;  %v1483_v47 = vpop.xlane.xlu0 %1482  ;;  %v8013_v51 = vunpack.c.h.bf16 %v8691_v38  ;;  %v8012_v55 = vunpack.c.l.bf16 %v8691_v38  ;;  %v8016_v58 = vunpack.c.l.bf16 %v8692_v62  ;;  %v8694_v38 = vld [vmem:[%s13836_s0 + $0x3a8] sm:$0xff]  }
 0x1bb   :  { %v5122_v56 = vsel %vm4384_vm2, %v5121_v45, %v5117_v35  ;;  %v2723_v57 = vmul.f32 0.0625, %v1486_v46  ;;  %v2722_v59 = vmul.f32 0.0625, %v1483_v47 }
 0x1bc   :  { %v5127_v63 = vsel %vm4391_vm3, %v5126_v44, %v5122_v56 }
 0x1bd   :  { %v5136_v0 = vrot.slane %v2723_v57, %v10259_v22  ;;  %v5131_v2 = vrot.slane %v2722_v59, %v10267_v28  ;;  %1701 = vadd.xlane.f32.xlu1 %v1700_v48  ;;  %1698 = vadd.xlane.f32.xlu0 %v1697_v50  ;;  %v1718_v48 = vsel %vm1036_vm0, %v8009_v32, 0.0  ;;  %v1715_v50 = vsel %vm1036_vm0, %v8008_v33, 0.0 }
 0x1be   :  { %v1492_v3 = vpop.xlane.xlu1 %1491  ;;  %v1489_v4 = vpop.xlane.xlu0 %1488  ;;  %v8021_v32 = vunpack.c.h.bf16 %v8693_v15  ;;  %v8020_v33 = vunpack.c.l.bf16 %v8693_v15  ;;  %v8696_v15 = vld [vmem:[%s13836_s0 + $0x3b8] sm:$0xff]  }
 0x1bf   :  { %v5132_v11 = vsel %vm13869_vm4, %v5131_v2, %v5127_v63  ;;  %v2725_v13 = vmul.f32 0.0625, %v1492_v3  ;;  %v2724_v14 = vmul.f32 0.0625, %v1489_v4 }
 0x1c0   :  { %v5137_v19 = vsel %vm13868_vm5, %v5136_v0, %v5132_v11 }
 0x1c1   :  { %v5146_v20 = vrot.slane %v2725_v13, %v10278_v41  ;;  %v5141_v24 = vrot.slane %v2724_v14, %v10281_v42  ;;  %1707 = vadd.xlane.f32.xlu1 %v1706_v6  ;;  %1704 = vadd.xlane.f32.xlu0 %v1703_v7  ;;  %v1724_v6 = vsel %vm1036_vm0, %v8013_v51, 0.0  ;;  %v1721_v7 = vsel %vm1036_vm0, %v8012_v55, 0.0 }
 0x1c2   :  { %v1498_v25 = vpop.xlane.xlu1 %1497  ;;  %v1495_v26 = vpop.xlane.xlu0 %1494  ;;  %v8025_v51 = vunpack.c.h.bf16 %v8694_v38  ;;  %v8024_v55 = vunpack.c.l.bf16 %v8694_v38 }
 0x1c3   :  { %v5142_v34 = vsel %vm4412_vm6, %v5141_v24, %v5137_v19  ;;  %v2727_v35 = vmul.f32 0.0625, %v1498_v25  ;;  %v2726_v36 = vmul.f32 0.0625, %v1495_v26 }
 0x1c4   :  { %v5147_v40 = vsel %vm13857_vm7, %v5146_v20, %v5142_v34 }
 0x1c5   :  { %v5156_v44 = vrot.slane %v2727_v35, %v10296_v61  ;;  %v5151_v45 = vrot.slane %v2726_v36, %v10302_v1  ;;  %1713 = vadd.xlane.f32.xlu1 %v1712_v27  ;;  %1710 = vadd.xlane.f32.xlu0 %v1709_v31  ;;  %v1730_v27 = vsel %vm1036_vm0, %v8017_v10, 0.0  ;;  %v1727_v31 = vsel %vm1036_vm0, %v8016_v58, 0.0 }
 0x1c6   :  { %v1504_v46 = vpop.xlane.xlu1 %1503  ;;  %v1501_v47 = vpop.xlane.xlu0 %1500 }
 0x1c7   :  { %v5152_v56 = vsel %vm4426_vm8, %v5151_v45, %v5147_v40  ;;  %v2729_v57 = vmul.f32 0.0625, %v1504_v46  ;;  %v2728_v59 = vmul.f32 0.0625, %v1501_v47 }
 0x1c8   :  { %v5157_v63 = vsel %vm4433_vm9, %v5156_v44, %v5152_v56 }
 0x1c9   :  { %v5166_v0 = vrot.slane %v2729_v57, %v10313_v17  ;;  %v5161_v2 = vrot.slane %v2728_v59, %v10319_v23  ;;  %1719 = vadd.xlane.f32.xlu1 %v1718_v48  ;;  %1716 = vadd.xlane.f32.xlu0 %v1715_v50  ;;  %v1736_v48 = vsel %vm1036_vm0, %v8021_v32, 0.0  ;;  %v1733_v50 = vsel %vm1036_vm0, %v8020_v33, 0.0  ;;  %v8695_v59 = vld [vmem:[%s13836_s0 + $0x3b0] sm:$0xff]  }
 0x1ca   :  { %v1510_v3 = vpop.xlane.xlu1 %1509  ;;  %v1507_v4 = vpop.xlane.xlu0 %1506  ;;  %v8029_v10 = vunpack.c.h.bf16 %v8695_v59  ;;  %v8028_v58 = vunpack.c.l.bf16 %v8695_v59  ;;  %v8032_v32 = vunpack.c.l.bf16 %v8696_v15  ;;  %v8698_v59 = vld [vmem:[%s13836_s0 + $0x3c8] sm:$0xff]  }
 0x1cb   :  { %v5162_v11 = vsel %vm4440_vm10, %v5161_v2, %v5157_v63  ;;  %v2731_v13 = vmul.f32 0.0625, %v1510_v3  ;;  %v2730_v14 = vmul.f32 0.0625, %v1507_v4 }
 0x1cc   :  { %v5167_v19 = vsel %vm4447_vm11, %v5166_v0, %v5162_v11 }
 0x1cd   :  { %v5176_v20 = vrot.slane %v2731_v13, %v10330_v37  ;;  %v5171_v24 = vrot.slane %v2730_v14, %v10336_v43  ;;  %1725 = vadd.xlane.f32.xlu1 %v1724_v6  ;;  %1722 = vadd.xlane.f32.xlu0 %v1721_v7  ;;  %v1742_v6 = vsel %vm1036_vm0, %v8025_v51, 0.0  ;;  %v1739_v7 = vsel %vm1036_vm0, %v8024_v55, 0.0 }
 0x1ce   :  { %v1516_v25 = vpop.xlane.xlu1 %1515  ;;  %v1513_v26 = vpop.xlane.xlu0 %1512 }
 0x1cf   :  { %v5172_v34 = vsel %vm4454_vm12, %v5171_v24, %v5167_v19  ;;  %v2733_v35 = vmul.f32 0.0625, %v1516_v25  ;;  %v2732_v36 = vmul.f32 0.0625, %v1513_v26  ;;  %v1748_v26 = vsel %vm1036_vm0, %v8029_v10, 0.0 }
 0x1d0   :  { %v5177_v40 = vsel %vm4461_vm13, %v5176_v20, %v5172_v34  ;;  %v8041_v10 = vunpack.c.h.bf16 %v8698_v59 }
 0x1d1   :  { %v5186_v44 = vrot.slane %v2733_v35, %v10347_v54  ;;  %v5181_v45 = vrot.slane %v2732_v36, %v10352_v60  ;;  %1731 = vadd.xlane.f32.xlu1 %v1730_v27  ;;  %1728 = vadd.xlane.f32.xlu0 %v1727_v31  ;;  %v1745_v27 = vsel %vm1036_vm0, %v8028_v58, 0.0  ;;  %v8033_v31 = vunpack.c.h.bf16 %v8696_v15  ;;  %v8697_v36 = vld [vmem:[%s13836_s0 + $0x3c0] sm:$0xff]   ;;  %v8699_v15 = vld [vmem:[%s13836_s0 + $0x3d0] sm:$0xff]  }
 0x1d2   :  { %v1522_v46 = vpop.xlane.xlu1 %1521  ;;  %v1519_v47 = vpop.xlane.xlu0 %1518  ;;  %v8036_v51 = vunpack.c.l.bf16 %v8697_v36  ;;  %v8040_v58 = vunpack.c.l.bf16 %v8698_v59 }
 0x1d3   :  { %v2735_v56 = vmul.f32 0.0625, %v1522_v46  ;;  %v2734_v57 = vmul.f32 0.0625, %v1519_v47  ;;  %v5182_v62 = vsel %vm4468_vm14, %v5181_v45, %v5177_v40  ;;  %v1754_v47 = vsel %vm1036_vm0, %v8033_v31, 0.0 }
 0x1d4   :  { %v11027_v63 = vsel %vm4475_vm15, %v5186_v44, %v5182_v62  ;;  %v1763_v31 = vsel %vm1036_vm0, %v8040_v58, 0.0 }
 0x1d5   :  { %13887 = vst [vmem:[#allocation22_spill] sm:$0xff] %v11027_v63  ;;  %v5195_v0 = vrot.slane %v2735_v56, %v10244_v9  ;;  %v5191_v2 = vrot.slane %v2734_v57, %v10240_v5  ;;  %1737 = vadd.xlane.f32.xlu1 %v1736_v48  ;;  %1734 = vadd.xlane.f32.xlu0 %v1733_v50  ;;  %v1751_v48 = vsel %vm1036_vm0, %v8032_v32, 0.0  ;;  %v8037_v50 = vunpack.c.h.bf16 %v8697_v36 }
 0x1d6   :  { %v1528_v3 = vpop.xlane.xlu1 %1527  ;;  %v1525_v4 = vpop.xlane.xlu0 %1524  ;;  %v8045_v32 = vunpack.c.h.bf16 %v8699_v15 }
 0x1d7   :  { %v5196_v11 = vsel %vm4377_vm1, %v5195_v0, %v5191_v2  ;;  %v2737_v13 = vmul.f32 0.0625, %v1528_v3  ;;  %v2736_v14 = vmul.f32 0.0625, %v1525_v4 }
 0x1d9   :  { %v5205_v19 = vrot.slane %v2737_v13, %v10253_v18  ;;  %v5200_v20 = vrot.slane %v2736_v14, %v10248_v12  ;;  %1743 = vadd.xlane.f32.xlu1 %v1742_v6  ;;  %1740 = vadd.xlane.f32.xlu0 %v1739_v7  ;;  %v1760_v6 = vsel %vm1036_vm0, %v8037_v50, 0.0  ;;  %v1757_v7 = vsel %vm1036_vm0, %v8036_v51, 0.0 }
 0x1da   :  { %v1534_v24 = vpop.xlane.xlu1 %1533  ;;  %v1531_v25 = vpop.xlane.xlu0 %1530 }
 0x1db   :  { %v5201_v33 = vsel %vm4384_vm2, %v5200_v20, %v5196_v11  ;;  %v2739_v34 = vmul.f32 0.0625, %v1534_v24  ;;  %v2738_v35 = vmul.f32 0.0625, %v1531_v25 }
 0x1dc   :  { %v5206_v38 = vsel %vm4391_vm3, %v5205_v19, %v5201_v33  ;;  %v8044_v33 = vunpack.c.l.bf16 %v8699_v15 }
 0x1dd   :  { %v5215_v40 = vrot.slane %v2739_v34, %v10259_v22  ;;  %v5210_v44 = vrot.slane %v2738_v35, %v10267_v28  ;;  %1749 = vadd.xlane.f32.xlu1 %v1748_v26  ;;  %1746 = vadd.xlane.f32.xlu0 %v1745_v27  ;;  %v1766_v27 = vsel %vm1036_vm0, %v8041_v10, 0.0 }
 0x1de   :  { %v1540_v45 = vpop.xlane.xlu1 %1539  ;;  %v1537_v46 = vpop.xlane.xlu0 %1536  ;;  %v1769_v50 = vsel %vm1036_vm0, %v8044_v33, 0.0 }
 0x1df   :  { %v5211_v55 = vsel %vm13869_vm4, %v5210_v44, %v5206_v38  ;;  %v2741_v56 = vmul.f32 0.0625, %v1540_v45  ;;  %v2740_v57 = vmul.f32 0.0625, %v1537_v46  ;;  %v8700_v38 = vld [vmem:[%s13836_s0 + $0x3d8] sm:$0xff]  }
 0x1e0   :  { %v5216_v62 = vsel %vm13868_vm5, %v5215_v40, %v5211_v55  ;;  %v8049_v51 = vunpack.c.h.bf16 %v8700_v38  ;;  %v8048_v55 = vunpack.c.l.bf16 %v8700_v38  ;;  %v8703_v38 = vld [vmem:[%s13836_s0 + $0x3f0] sm:$0xff]  }
 0x1e1   :  { %v5225_v0 = vrot.slane %v2741_v56, %v10278_v41  ;;  %v5220_v2 = vrot.slane %v2740_v57, %v10281_v42  ;;  %1755 = vadd.xlane.f32.xlu1 %v1754_v47  ;;  %1752 = vadd.xlane.f32.xlu0 %v1751_v48  ;;  %v1772_v48 = vsel %vm1036_vm0, %v8045_v32, 0.0 }
 0x1e2   :  { %v1546_v3 = vpop.xlane.xlu1 %1545  ;;  %v1543_v4 = vpop.xlane.xlu0 %1542  ;;  %v1775_v10 = vsel %vm1036_vm0, %v8048_v55, 0.0  ;;  %v8061_v55 = vunpack.c.h.bf16 %v8703_v38 }
 0x1e3   :  { %v5221_v11 = vsel %vm4412_vm6, %v5220_v2, %v5216_v62  ;;  %v2743_v13 = vmul.f32 0.0625, %v1546_v3  ;;  %v2742_v14 = vmul.f32 0.0625, %v1543_v4  ;;  %v8701_v62 = vld [vmem:[%s13836_s0 + $0x3e0] sm:$0xff]  }
 0x1e4   :  { %v5226_v19 = vsel %vm13857_vm7, %v5225_v0, %v5221_v11  ;;  %v8053_v58 = vunpack.c.h.bf16 %v8701_v62  ;;  %v8052_v11 = vunpack.c.l.bf16 %v8701_v62 }
 0x1e5   :  { %v5235_v20 = vrot.slane %v2743_v13, %v10296_v61  ;;  %v5230_v24 = vrot.slane %v2742_v14, %v10302_v1  ;;  %1761 = vadd.xlane.f32.xlu1 %v1760_v6  ;;  %1758 = vadd.xlane.f32.xlu0 %v1757_v7  ;;  %v1778_v7 = vsel %vm1036_vm0, %v8049_v51, 0.0 }
 0x1e6   :  { %v1552_v25 = vpop.xlane.xlu1 %1551  ;;  %v1549_v26 = vpop.xlane.xlu0 %1548  ;;  %v1781_v32 = vsel %vm1036_vm0, %v8052_v11, 0.0 }
 0x1e7   :  { %v5231_v34 = vsel %vm4426_vm8, %v5230_v24, %v5226_v19  ;;  %v2745_v35 = vmul.f32 0.0625, %v1552_v25  ;;  %v2744_v36 = vmul.f32 0.0625, %v1549_v26  ;;  %v8702_v19 = vld [vmem:[%s13836_s0 + $0x3e8] sm:$0xff]  }
 0x1e8   :  { %v5236_v40 = vsel %vm4433_vm9, %v5235_v20, %v5231_v34  ;;  %v8057_v33 = vunpack.c.h.bf16 %v8702_v19  ;;  %v8056_v34 = vunpack.c.l.bf16 %v8702_v19  ;;  %v8705_v19 = vld [vmem:[%s13836_s0 + $0x400] sm:$0xff]  }
 0x1e9   :  { %v5245_v44 = vrot.slane %v2745_v35, %v10313_v17  ;;  %v5240_v45 = vrot.slane %v2744_v36, %v10319_v23  ;;  %1767 = vadd.xlane.f32.xlu1 %v1766_v27  ;;  %1764 = vadd.xlane.f32.xlu0 %v1763_v31  ;;  %v1784_v31 = vsel %vm1036_vm0, %v8053_v58, 0.0 }
 0x1ea   :  { %v1558_v46 = vpop.xlane.xlu1 %1557  ;;  %v1555_v47 = vpop.xlane.xlu0 %1554  ;;  %v1787_v51 = vsel %vm1036_vm0, %v8056_v34, 0.0  ;;  %v8068_v34 = vunpack.c.l.bf16 %v8705_v19 }
 0x1eb   :  { %v5241_v56 = vsel %vm4440_vm10, %v5240_v45, %v5236_v40  ;;  %v2747_v57 = vmul.f32 0.0625, %v1558_v46  ;;  %v2746_v59 = vmul.f32 0.0625, %v1555_v47 }
 0x1ec   :  { %v5246_v0 = vsel %vm4447_vm11, %v5245_v44, %v5241_v56  ;;  %v8060_v56 = vunpack.c.l.bf16 %v8703_v38 }
 0x1ed   :  { %v5255_v2 = vrot.slane %v2747_v57, %v10330_v37  ;;  %v5250_v3 = vrot.slane %v2746_v59, %v10336_v43  ;;  %1773 = vadd.xlane.f32.xlu1 %v1772_v48  ;;  %1770 = vadd.xlane.f32.xlu0 %v1769_v50  ;;  %v1790_v50 = vsel %vm1036_vm0, %v8057_v33, 0.0  ;;  %v8069_v33 = vunpack.c.h.bf16 %v8705_v19 }
 0x1ee   :  { %v1564_v4 = vpop.xlane.xlu1 %1563  ;;  %v1561_v6 = vpop.xlane.xlu0 %1560 }
 0x1ef   :  { %v5251_v13 = vsel %vm4454_vm12, %v5250_v3, %v5246_v0  ;;  %v2749_v14 = vmul.f32 0.0625, %v1564_v4  ;;  %v2748_v15 = vmul.f32 0.0625, %v1561_v6  ;;  %v8704_v0 = vld [vmem:[%s13836_s0 + $0x3f8] sm:$0xff]  }
 0x1f0   :  { %v5256_v20 = vsel %vm4461_vm13, %v5255_v2, %v5251_v13  ;;  %v8065_v58 = vunpack.c.h.bf16 %v8704_v0  ;;  %v8064_v11 = vunpack.c.l.bf16 %v8704_v0 }
 0x1f1   :  { %v5265_v24 = vrot.slane %v2749_v14, %v10347_v54  ;;  %v5260_v25 = vrot.slane %v2748_v15, %v10352_v60  ;;  %1779 = vadd.xlane.f32.xlu1 %v1778_v7  ;;  %1776 = vadd.xlane.f32.xlu0 %v1775_v10  ;;  %v1796_v7 = vsel %vm1036_vm0, %v8061_v55, 0.0  ;;  %v1793_v10 = vsel %vm1036_vm0, %v8060_v56, 0.0 }
 0x1f2   :  { %v1570_v26 = vpop.xlane.xlu1 %1569  ;;  %v1567_v27 = vpop.xlane.xlu0 %1566  ;;  %v1805_v55 = vsel %vm1036_vm0, %v8068_v34, 0.0 }
 0x1f3   :  { %v2751_v35 = vmul.f32 0.0625, %v1570_v26  ;;  %v2750_v36 = vmul.f32 0.0625, %v1567_v27  ;;  %v5261_v40 = vsel %vm4468_vm14, %v5260_v25, %v5256_v20 }
 0x1f4   :  { %v11100_v44 = vsel %vm4475_vm15, %v5265_v24, %v5261_v40  ;;  %v8706_v40 = vld [vmem:[%s13836_s0 + $0x408] sm:$0xff]  }
 0x1f5   :  { %13888 = vst [vmem:[#allocation23_spill] sm:$0xff] %v11100_v44  ;;  %v5274_v45 = vrot.slane %v2751_v35, %v10244_v9  ;;  %v5270_v46 = vrot.slane %v2750_v36, %v10240_v5  ;;  %1785 = vadd.xlane.f32.xlu1 %v1784_v31  ;;  %1782 = vadd.xlane.f32.xlu0 %v1781_v32  ;;  %v1802_v31 = vsel %vm1036_vm0, %v8065_v58, 0.0  ;;  %v1799_v32 = vsel %vm1036_vm0, %v8064_v11, 0.0 }
 0x1f6   :  { %v1576_v47 = vpop.xlane.xlu1 %1575  ;;  %v1573_v48 = vpop.xlane.xlu0 %1572  ;;  %v8073_v56 = vunpack.c.h.bf16 %v8706_v40 }
 0x1f7   :  { %v5275_v57 = vsel %vm4377_vm1, %v5274_v45, %v5270_v46  ;;  %v2753_v59 = vmul.f32 0.0625, %v1576_v47  ;;  %v2752_v62 = vmul.f32 0.0625, %v1573_v48 }
 0x1f8   :  { %v1814_v11 = vsel %vm1036_vm0, %v8073_v56, 0.0 }
 0x1f9   :  { %v5284_v2 = vrot.slane %v2753_v59, %v10253_v18  ;;  %v5279_v3 = vrot.slane %v2752_v62, %v10248_v12  ;;  %1791 = vadd.xlane.f32.xlu1 %v1790_v50  ;;  %1788 = vadd.xlane.f32.xlu0 %v1787_v51  ;;  %v1808_v51 = vsel %vm1036_vm0, %v8069_v33, 0.0 }
 0x1fa   :  { %v1582_v4 = vpop.xlane.xlu1 %1581  ;;  %v1579_v6 = vpop.xlane.xlu0 %1578 }
 0x1fb   :  { %v5280_v13 = vsel %vm4384_vm2, %v5279_v3, %v5275_v57  ;;  %v2755_v14 = vmul.f32 0.0625, %v1582_v4  ;;  %v2754_v15 = vmul.f32 0.0625, %v1579_v6  ;;  %v8072_v57 = vunpack.c.l.bf16 %v8706_v40  ;;  %v11139_v3 = vld [vmem:[%s13836_s0 + $0x410] sm:$0xff]  }
 0x1fc   :  { %v5285_v20 = vsel %vm4391_vm3, %v5284_v2, %v5280_v13  ;;  %v8713_v2 = vld [vmem:[%s13836_s0 + $0x440] sm:$0xff]  }
 0x1fd   :  { %v5294_v24 = vrot.slane %v2755_v14, %v10259_v22  ;;  %v5289_v25 = vrot.slane %v2754_v15, %v10267_v28  ;;  %1797 = vadd.xlane.f32.xlu1 %v1796_v7  ;;  %1794 = vadd.xlane.f32.xlu0 %v1793_v10  ;;  %v1811_v13 = vsel %vm1036_vm0, %v8072_v57, 0.0  ;;  %v8100_v14 = vunpack.c.l.bf16 %v8713_v2 }
 0x1fe   :  { %v1588_v26 = vpop.xlane.xlu1 %1587  ;;  %v1585_v27 = vpop.xlane.xlu0 %1584  ;;  %v8076_v15 = vunpack.c.l.bf16 %v11139_v3 }
 0x1ff   :  { %v5290_v35 = vsel %vm13869_vm4, %v5289_v25, %v5285_v20  ;;  %v2757_v36 = vmul.f32 0.0625, %v1588_v26  ;;  %v2756_v38 = vmul.f32 0.0625, %v1585_v27  ;;  %v8777_v25 = vld [vmem:[%s13836_s0 + $0x640] sm:$0xff]   ;;  %v1853_v34 = vsel %vm1036_vm0, %v8100_v14, 0.0 }
 0x200   :  { %v5295_v45 = vsel %vm13868_vm5, %v5294_v24, %v5290_v35  ;;  %v1817_v35 = vsel %vm1036_vm0, %v8076_v15, 0.0 }
 0x201   :  { %v5304_v46 = vrot.slane %v2757_v36, %v10278_v41  ;;  %v5299_v47 = vrot.slane %v2756_v38, %v10281_v42  ;;  %1803 = vadd.xlane.f32.xlu1 %v1802_v31  ;;  %1800 = vadd.xlane.f32.xlu0 %v1799_v32  ;;  %v8356_v36 = vunpack.c.l.bf16 %v8777_v25  ;;  %v8101_v38 = vunpack.c.h.bf16 %v8713_v2 }
 0x202   :  { %v1594_v48 = vpop.xlane.xlu1 %1593  ;;  %v1591_v50 = vpop.xlane.xlu0 %1590 }
 0x203   :  { %v5300_v59 = vsel %vm4412_vm6, %v5299_v47, %v5295_v45  ;;  %v2759_v62 = vmul.f32 0.0625, %v1594_v48  ;;  %v2758_v0 = vmul.f32 0.0625, %v1591_v50  ;;  %v8714_v47 = vld [vmem:[%s13836_s0 + $0x448] sm:$0xff]   ;;  %v2237_v57 = vsel %vm1036_vm0, %v8356_v36, 0.0 }
 0x204   :  { %v5305_v4 = vsel %vm13857_vm7, %v5304_v46, %v5300_v59  ;;  %v1856_v59 = vsel %vm1036_vm0, %v8101_v38, 0.0 }
 0x205   :  { %v5314_v6 = vrot.slane %v2759_v62, %v10296_v61  ;;  %v5309_v7 = vrot.slane %v2758_v0, %v10302_v1  ;;  %1809 = vadd.xlane.f32.xlu1 %v1808_v51  ;;  %1806 = vadd.xlane.f32.xlu0 %v1805_v55  ;;  %v8104_v62 = vunpack.c.l.bf16 %v8714_v47  ;;  %v8357_v0 = vunpack.c.h.bf16 %v8777_v25 }
 0x206   :  { %v1600_v10 = vpop.xlane.xlu1 %1599  ;;  %v1597_v58 = vpop.xlane.xlu0 %1596 }
 0x207   :  { %v5310_v19 = vsel %vm4426_vm8, %v5309_v7, %v5305_v4  ;;  %v2761_v20 = vmul.f32 0.0625, %v1600_v10  ;;  %v2760_v24 = vmul.f32 0.0625, %v1597_v58  ;;  %v8769_v7 = vld [vmem:[%s13836_s0 + $0x600] sm:$0xff]   ;;  %v1859_v15 = vsel %vm1036_vm0, %v8104_v62, 0.0 }
 0x208   :  { %v5315_v26 = vsel %vm4433_vm9, %v5314_v6, %v5310_v19  ;;  %v2240_v19 = vsel %vm1036_vm0, %v8357_v0, 0.0 }
 0x209   :  { %v5324_v27 = vrot.slane %v2761_v20, %v10313_v17  ;;  %v5319_v31 = vrot.slane %v2760_v24, %v10319_v23  ;;  %1815 = vadd.xlane.f32.xlu1 %v1814_v11  ;;  %1812 = vadd.xlane.f32.xlu0 %v1811_v13  ;;  %v8325_v20 = vunpack.c.h.bf16 %v8769_v7  ;;  %v8324_v24 = vunpack.c.l.bf16 %v8769_v7 }
 0x20a   :  { %v1606_v32 = vpop.xlane.xlu1 %1605  ;;  %v1603_v33 = vpop.xlane.xlu0 %1602 }
 0x20b   :  { %v5320_v40 = vsel %vm4440_vm10, %v5319_v31, %v5315_v26  ;;  %v2763_v45 = vmul.f32 0.0625, %v1606_v32  ;;  %v2762_v46 = vmul.f32 0.0625, %v1603_v33  ;;  %v2192_v38 = vsel %vm1036_vm0, %v8325_v20, 0.0 }
 0x20c   :  { %v5325_v48 = vsel %vm4447_vm11, %v5324_v27, %v5320_v40  ;;  %v8778_v27 = vld [vmem:[%s13836_s0 + $0x648] sm:$0xff]   ;;  %v2189_v40 = vsel %vm1036_vm0, %v8324_v24, 0.0 }
 0x20d   :  { %v5334_v50 = vrot.slane %v2763_v45, %v10330_v37  ;;  %v5329_v51 = vrot.slane %v2762_v46, %v10336_v43  ;;  %1854 = vadd.xlane.f32.xlu1 %v1853_v34  ;;  %1818 = vadd.xlane.f32.xlu0 %v1817_v35  ;;  %v8105_v45 = vunpack.c.h.bf16 %v8714_v47  ;;  %v8360_v46 = vunpack.c.l.bf16 %v8778_v27 }
 0x20e   :  { %v1612_v55 = vpop.xlane.xlu1 %1611  ;;  %v1609_v56 = vpop.xlane.xlu0 %1608 }
 0x20f   :  { %v5330_v2 = vsel %vm4454_vm12, %v5329_v51, %v5325_v48  ;;  %v2765_v4 = vmul.f32 0.0625, %v1612_v55  ;;  %v2764_v6 = vmul.f32 0.0625, %v1609_v56  ;;  %v8770_v55 = vld [vmem:[%s13836_s0 + $0x608] sm:$0xff]   ;;  %v1862_v0 = vsel %vm1036_vm0, %v8105_v45, 0.0 }
 0x210   :  { %v5335_v10 = vsel %vm4461_vm13, %v5334_v50, %v5330_v2  ;;  %v2243_v47 = vsel %vm1036_vm0, %v8360_v46, 0.0  ;;  %v8361_v2 = vunpack.c.h.bf16 %v8778_v27 }
 0x211   :  { %v5344_v58 = vrot.slane %v2765_v4, %v10347_v54  ;;  %v5339_v11 = vrot.slane %v2764_v6, %v10352_v60  ;;  %2238 = vadd.xlane.f32.xlu1 %v2237_v57  ;;  %1857 = vadd.xlane.f32.xlu0 %v1856_v59  ;;  %v8328_v4 = vunpack.c.l.bf16 %v8770_v55 }
 0x212   :  { %v1618_v13 = vpop.xlane.xlu1 %1617  ;;  %v1615_v14 = vpop.xlane.xlu0 %1614  ;;  %v2246_v20 = vsel %vm1036_vm0, %v8361_v2, 0.0 }
 0x213   :  { %v2767_v25 = vmul.f32 0.0625, %v1618_v13  ;;  %v2766_v26 = vmul.f32 0.0625, %v1615_v14  ;;  %v5340_v31 = vsel %vm4468_vm14, %v5339_v11, %v5335_v10  ;;  %v2195_v24 = vsel %vm1036_vm0, %v8328_v4, 0.0 }
 0x214   :  { %v11179_v32 = vsel %vm4475_vm15, %v5344_v58, %v5340_v31  ;;  %v8715_v58 = vld [vmem:[%s13836_s0 + $0x450] sm:$0xff]  }
 0x215   :  { %13889 = vst [vmem:[#allocation24_spill] sm:$0xff] %v11179_v32  ;;  %v5353_v33 = vrot.slane %v2767_v25, %v10244_v9  ;;  %v5349_v34 = vrot.slane %v2766_v26, %v10240_v5  ;;  %1860 = vadd.xlane.f32.xlu1 %v1859_v15  ;;  %2241 = vadd.xlane.f32.xlu0 %v2240_v19  ;;  %v8329_v25 = vunpack.c.h.bf16 %v8770_v55  ;;  %v8108_v26 = vunpack.c.l.bf16 %v8715_v58 }
 0x216   :  { %v1624_v35 = vpop.xlane.xlu1 %1623  ;;  %v1621_v36 = vpop.xlane.xlu0 %1620 }
 0x217   :  { %v5354_v48 = vsel %vm4377_vm1, %v5353_v33, %v5349_v34  ;;  %v2769_v50 = vmul.f32 0.0625, %v1624_v35  ;;  %v2768_v51 = vmul.f32 0.0625, %v1621_v36  ;;  %v8779_v34 = vld [vmem:[%s13836_s0 + $0x650] sm:$0xff]   ;;  %v2198_v46 = vsel %vm1036_vm0, %v8329_v25, 0.0 }
 0x219   :  { %v5363_v56 = vrot.slane %v2769_v50, %v10253_v18  ;;  %v5358_v57 = vrot.slane %v2768_v51, %v10248_v12  ;;  %2193 = vadd.xlane.f32.xlu1 %v2192_v38  ;;  %2190 = vadd.xlane.f32.xlu0 %v2189_v40  ;;  %v8109_v50 = vunpack.c.h.bf16 %v8715_v58  ;;  %v8364_v51 = vunpack.c.l.bf16 %v8779_v34 }
 0x21a   :  { %v1630_v59 = vpop.xlane.xlu1 %1629  ;;  %v1627_v62 = vpop.xlane.xlu0 %1626 }
 0x21b   :  { %v5359_v6 = vsel %vm4384_vm2, %v5358_v57, %v5354_v48  ;;  %v2771_v7 = vmul.f32 0.0625, %v1630_v59  ;;  %v2770_v10 = vmul.f32 0.0625, %v1627_v62  ;;  %v1865_v48 = vsel %vm1036_vm0, %v8108_v26, 0.0  ;;  %v8771_v59 = vld [vmem:[%s13836_s0 + $0x610] sm:$0xff]  }
 0x21c   :  { %v5364_v11 = vsel %vm4391_vm3, %v5363_v56, %v5359_v6  ;;  %v1868_v6 = vsel %vm1036_vm0, %v8109_v50, 0.0  ;;  %v8332_v58 = vunpack.c.l.bf16 %v8771_v59 }
 0x21d   :  { %v5373_v13 = vrot.slane %v2771_v7, %v10259_v22  ;;  %v5368_v14 = vrot.slane %v2770_v10, %v10267_v28  ;;  %1863 = vadd.xlane.f32.xlu1 %v1862_v0  ;;  %2244 = vadd.xlane.f32.xlu0 %v2243_v47  ;;  %v2249_v7 = vsel %vm1036_vm0, %v8364_v51, 0.0  ;;  %v8365_v10 = vunpack.c.h.bf16 %v8779_v34 }
 0x21e   :  { %v1636_v15 = vpop.xlane.xlu1 %1635  ;;  %v1633_v19 = vpop.xlane.xlu0 %1632  ;;  %v8077_v34 = vunpack.c.h.bf16 %v11139_v3 }
 0x21f   :  { %v5369_v27 = vsel %vm13869_vm4, %v5368_v14, %v5364_v11  ;;  %v2773_v31 = vmul.f32 0.0625, %v1636_v15  ;;  %v2772_v33 = vmul.f32 0.0625, %v1633_v19  ;;  %v8716_v15 = vld [vmem:[%s13836_s0 + $0x458] sm:$0xff]  }
 0x220   :  { %v5374_v35 = vsel %vm13868_vm5, %v5373_v13, %v5369_v27  ;;  %v2252_v27 = vsel %vm1036_vm0, %v8365_v10, 0.0 }
 0x221   :  { %v5383_v36 = vrot.slane %v2773_v31, %v10278_v41  ;;  %v5378_v38 = vrot.slane %v2772_v33, %v10281_v42  ;;  %2247 = vadd.xlane.f32.xlu1 %v2246_v20  ;;  %2196 = vadd.xlane.f32.xlu0 %v2195_v24  ;;  %v2201_v31 = vsel %vm1036_vm0, %v8332_v58, 0.0  ;;  %v8112_v33 = vunpack.c.l.bf16 %v8716_v15 }
 0x222   :  { %v1642_v40 = vpop.xlane.xlu1 %1641  ;;  %v1639_v45 = vpop.xlane.xlu0 %1638 }
 0x223   :  { %v5379_v55 = vsel %vm4412_vm6, %v5378_v38, %v5374_v35  ;;  %v2775_v56 = vmul.f32 0.0625, %v1642_v40  ;;  %v2774_v57 = vmul.f32 0.0625, %v1639_v45  ;;  %v8780_v40 = vld [vmem:[%s13836_s0 + $0x658] sm:$0xff]   ;;  %v1871_v3 = vsel %vm1036_vm0, %v8112_v33, 0.0 }
 0x224   :  { %v5384_v62 = vsel %vm13857_vm7, %v5383_v36, %v5379_v55  ;;  %v1820_v55 = vsel %vm1036_vm0, %v8077_v34, 0.0 }
 0x225   :  { %v5393_v0 = vrot.slane %v2775_v56, %v10296_v61  ;;  %v5388_v47 = vrot.slane %v2774_v57, %v10302_v1  ;;  %2199 = vadd.xlane.f32.xlu1 %v2198_v46  ;;  %1866 = vadd.xlane.f32.xlu0 %v1865_v48  ;;  %v8368_v56 = vunpack.c.l.bf16 %v8780_v40  ;;  %v8333_v57 = vunpack.c.h.bf16 %v8771_v59 }
 0x226   :  { %v1648_v2 = vpop.xlane.xlu1 %1647  ;;  %v1645_v4 = vpop.xlane.xlu0 %1644 }
 0x227   :  { %v5389_v11 = vsel %vm4426_vm8, %v5388_v47, %v5384_v62  ;;  %v2777_v13 = vmul.f32 0.0625, %v1648_v2  ;;  %v2776_v14 = vmul.f32 0.0625, %v1645_v4  ;;  %v8708_v2 = vld [vmem:[%s13836_s0 + $0x418] sm:$0xff]   ;;  %v2255_v59 = vsel %vm1036_vm0, %v8368_v56, 0.0 }
 0x228   :  { %v5394_v19 = vsel %vm4433_vm9, %v5393_v0, %v5389_v11  ;;  %v2204_v11 = vsel %vm1036_vm0, %v8333_v57, 0.0 }
 0x229   :  { %v5403_v20 = vrot.slane %v2777_v13, %v10313_v17  ;;  %v5398_v24 = vrot.slane %v2776_v14, %v10319_v23  ;;  %1869 = vadd.xlane.f32.xlu1 %v1868_v6  ;;  %2250 = vadd.xlane.f32.xlu0 %v2249_v7  ;;  %v8113_v13 = vunpack.c.h.bf16 %v8716_v15  ;;  %v8080_v14 = vunpack.c.l.bf16 %v8708_v2 }
 0x22a   :  { %v1654_v25 = vpop.xlane.xlu1 %1653  ;;  %v1651_v26 = vpop.xlane.xlu0 %1650 }
 0x22b   :  { %v5399_v35 = vsel %vm4440_vm10, %v5398_v24, %v5394_v19  ;;  %v2779_v36 = vmul.f32 0.0625, %v1654_v25  ;;  %v2778_v38 = vmul.f32 0.0625, %v1651_v26  ;;  %v8772_v24 = vld [vmem:[%s13836_s0 + $0x618] sm:$0xff]   ;;  %v1874_v34 = vsel %vm1036_vm0, %v8113_v13, 0.0 }
 0x22c   :  { %v5404_v45 = vsel %vm4447_vm11, %v5403_v20, %v5399_v35  ;;  %v1823_v35 = vsel %vm1036_vm0, %v8080_v14, 0.0 }
 0x22d   :  { %v5413_v46 = vrot.slane %v2779_v36, %v10330_v37  ;;  %v5408_v48 = vrot.slane %v2778_v38, %v10336_v43  ;;  %2253 = vadd.xlane.f32.xlu1 %v2252_v27  ;;  %2202 = vadd.xlane.f32.xlu0 %v2201_v31  ;;  %v8369_v36 = vunpack.c.h.bf16 %v8780_v40  ;;  %v8336_v38 = vunpack.c.l.bf16 %v8772_v24 }
 0x22e   :  { %v1660_v50 = vpop.xlane.xlu1 %1659  ;;  %v1657_v51 = vpop.xlane.xlu0 %1656 }
 0x22f   :  { %v5409_v62 = vsel %vm4454_vm12, %v5408_v48, %v5404_v45  ;;  %v2781_v0 = vmul.f32 0.0625, %v1660_v50  ;;  %v2780_v47 = vmul.f32 0.0625, %v1657_v51  ;;  %v8717_v50 = vld [vmem:[%s13836_s0 + $0x460] sm:$0xff]   ;;  %v2258_v57 = vsel %vm1036_vm0, %v8369_v36, 0.0 }
 0x230   :  { %v5414_v4 = vsel %vm4461_vm13, %v5413_v46, %v5409_v62  ;;  %v2207_v40 = vsel %vm1036_vm0, %v8336_v38, 0.0  ;;  %v8116_v62 = vunpack.c.l.bf16 %v8717_v50 }
 0x231   :  { %v5423_v6 = vrot.slane %v2781_v0, %v10347_v54  ;;  %v5418_v7 = vrot.slane %v2780_v47, %v10352_v60  ;;  %1872 = vadd.xlane.f32.xlu1 %v1871_v3  ;;  %1821 = vadd.xlane.f32.xlu0 %v1820_v55  ;;  %v8081_v0 = vunpack.c.h.bf16 %v8708_v2 }
 0x232   :  { %v1666_v10 = vpop.xlane.xlu1 %1665  ;;  %v1663_v58 = vpop.xlane.xlu0 %1662  ;;  %v1877_v2 = vsel %vm1036_vm0, %v8116_v62, 0.0 }
 0x233   :  { %v2783_v19 = vmul.f32 0.0625, %v1666_v10  ;;  %v2782_v20 = vmul.f32 0.0625, %v1663_v58  ;;  %v5419_v25 = vsel %vm4468_vm14, %v5418_v7, %v5414_v4  ;;  %v8781_v7 = vld [vmem:[%s13836_s0 + $0x660] sm:$0xff]   ;;  %v1826_v14 = vsel %vm1036_vm0, %v8081_v0, 0.0 }
 0x234   :  { %v11253_v26 = vsel %vm4475_vm15, %v5423_v6, %v5419_v25 }
 0x235   :  { %13890 = vst [vmem:[#allocation25_spill] sm:$0xff] %v11253_v26  ;;  %v5432_v27 = vrot.slane %v2783_v19, %v10244_v9  ;;  %v5428_v31 = vrot.slane %v2782_v20, %v10240_v5  ;;  %2256 = vadd.xlane.f32.xlu1 %v2255_v59  ;;  %2205 = vadd.xlane.f32.xlu0 %v2204_v11  ;;  %v8372_v19 = vunpack.c.l.bf16 %v8781_v7  ;;  %v8337_v20 = vunpack.c.h.bf16 %v8772_v24 }
 0x236   :  { %v1672_v33 = vpop.xlane.xlu1 %1671  ;;  %v1669_v15 = vpop.xlane.xlu0 %1668 }
 0x237   :  { %v5433_v45 = vsel %vm4377_vm1, %v5432_v27, %v5428_v31  ;;  %v2785_v46 = vmul.f32 0.0625, %v1672_v33  ;;  %v2784_v48 = vmul.f32 0.0625, %v1669_v15  ;;  %v8709_v33 = vld [vmem:[%s13836_s0 + $0x420] sm:$0xff]   ;;  %v2261_v24 = vsel %vm1036_vm0, %v8372_v19, 0.0 }
 0x239   :  { %v5442_v51 = vrot.slane %v2785_v46, %v10253_v18  ;;  %v5437_v3 = vrot.slane %v2784_v48, %v10248_v12  ;;  %1875 = vadd.xlane.f32.xlu1 %v1874_v34  ;;  %1824 = vadd.xlane.f32.xlu0 %v1823_v35  ;;  %v8117_v46 = vunpack.c.h.bf16 %v8717_v50  ;;  %v8084_v48 = vunpack.c.l.bf16 %v8709_v33 }
 0x23a   :  { %v1678_v55 = vpop.xlane.xlu1 %1677  ;;  %v1675_v56 = vpop.xlane.xlu0 %1674 }
 0x23b   :  { %v5438_v47 = vsel %vm4384_vm2, %v5437_v3, %v5433_v45  ;;  %v2787_v4 = vmul.f32 0.0625, %v1678_v55  ;;  %v2786_v6 = vmul.f32 0.0625, %v1675_v56  ;;  %v2210_v45 = vsel %vm1036_vm0, %v8337_v20, 0.0  ;;  %v8773_v56 = vld [vmem:[%s13836_s0 + $0x620] sm:$0xff]  }
 0x23c   :  { %v5443_v10 = vsel %vm4391_vm3, %v5442_v51, %v5438_v47  ;;  %v1880_v50 = vsel %vm1036_vm0, %v8117_v46, 0.0 }
 0x23d   :  { %v5452_v58 = vrot.slane %v2787_v4, %v10259_v22  ;;  %v5447_v59 = vrot.slane %v2786_v6, %v10267_v28  ;;  %2259 = vadd.xlane.f32.xlu1 %v2258_v57  ;;  %2208 = vadd.xlane.f32.xlu0 %v2207_v40  ;;  %v1829_v4 = vsel %vm1036_vm0, %v8084_v48, 0.0  ;;  %v8373_v6 = vunpack.c.h.bf16 %v8781_v7 }
 0x23e   :  { %v1684_v11 = vpop.xlane.xlu1 %1683  ;;  %v1681_v13 = vpop.xlane.xlu0 %1680 }
 0x23f   :  { %v5448_v25 = vsel %vm13869_vm4, %v5447_v59, %v5443_v10  ;;  %v2789_v27 = vmul.f32 0.0625, %v1684_v11  ;;  %v2788_v31 = vmul.f32 0.0625, %v1681_v13  ;;  %v8340_v10 = vunpack.c.l.bf16 %v8773_v56  ;;  %v8718_v13 = vld [vmem:[%s13836_s0 + $0x468] sm:$0xff]  }
 0x240   :  { %v5453_v15 = vsel %vm13868_vm5, %v5452_v58, %v5448_v25  ;;  %v2264_v7 = vsel %vm1036_vm0, %v8373_v6, 0.0 }
 0x241   :  { %v5462_v34 = vrot.slane %v2789_v27, %v10278_v41  ;;  %v5457_v35 = vrot.slane %v2788_v31, %v10281_v42  ;;  %1878 = vadd.xlane.f32.xlu1 %v1877_v2  ;;  %1827 = vadd.xlane.f32.xlu0 %v1826_v14  ;;  %v2213_v27 = vsel %vm1036_vm0, %v8340_v10, 0.0  ;;  %v8120_v31 = vunpack.c.l.bf16 %v8718_v13 }
 0x242   :  { %v1690_v36 = vpop.xlane.xlu1 %1689  ;;  %v1687_v38 = vpop.xlane.xlu0 %1686 }
 0x243   :  { %v5458_v51 = vsel %vm4412_vm6, %v5457_v35, %v5453_v15  ;;  %v2791_v3 = vmul.f32 0.0625, %v1690_v36  ;;  %v2790_v55 = vmul.f32 0.0625, %v1687_v38  ;;  %v8085_v15 = vunpack.c.h.bf16 %v8709_v33  ;;  %v11307_v38 = vld [vmem:[%s13836_s0 + $0x668] sm:$0xff]  }
 0x244   :  { %v5463_v57 = vsel %vm13857_vm7, %v5462_v34, %v5458_v51  ;;  %v1883_v33 = vsel %vm1036_vm0, %v8120_v31, 0.0  ;;  %v9621_v31 = vld [vmem:[%s13837_s1 + $0x400] ss:$8 sps:$4 sm:$0xff]  }
 0x245   :  { %v5472_v40 = vrot.slane %v2791_v3, %v10296_v61  ;;  %v5467_v62 = vrot.slane %v2790_v55, %v10302_v1  ;;  %2262 = vadd.xlane.f32.xlu1 %v2261_v24  ;;  %2211 = vadd.xlane.f32.xlu0 %v2210_v45  ;;  %v1832_v3 = vsel %vm1036_vm0, %v8085_v15, 0.0  ;;  %v8376_v55 = vunpack.c.l.bf16 %v11307_v38 }
 0x246   :  { %v1696_v0 = vpop.xlane.xlu1 %1695  ;;  %v1693_v47 = vpop.xlane.xlu0 %1692 }
 0x247   :  { %v5468_v58 = vsel %vm4426_vm8, %v5467_v62, %v5463_v57  ;;  %v2793_v59 = vmul.f32 0.0625, %v1696_v0  ;;  %v2792_v11 = vmul.f32 0.0625, %v1693_v47  ;;  %v8341_v57 = vunpack.c.h.bf16 %v8773_v56  ;;  %v11319_v47 = vld [vmem:[%s13836_s0 + $0x428] sm:$0xff]  }
 0x248   :  { %v5473_v2 = vsel %vm4433_vm9, %v5472_v40, %v5468_v58  ;;  %v2267_v56 = vsel %vm1036_vm0, %v8376_v55, 0.0 }
 0x249   :  { %v5482_v14 = vrot.slane %v2793_v59, %v10313_v17  ;;  %v5477_v19 = vrot.slane %v2792_v11, %v10319_v23  ;;  %1881 = vadd.xlane.f32.xlu1 %v1880_v50  ;;  %1830 = vadd.xlane.f32.xlu0 %v1829_v4  ;;  %v2216_v59 = vsel %vm1036_vm0, %v8341_v57, 0.0  ;;  %v8121_v11 = vunpack.c.h.bf16 %v8718_v13  ;;  %v9620_v13 = vld [vmem:[%s13837_s1] ss:$8 sps:$4 sm:$0xff]  }
 0x24a   :  { %v1702_v20 = vpop.xlane.xlu1 %1701  ;;  %v1699_v25 = vpop.xlane.xlu0 %1698 }
 0x24b   :  { %v5478_v34 = vsel %vm4440_vm10, %v5477_v19, %v5473_v2  ;;  %v2795_v35 = vmul.f32 0.0625, %v1702_v20  ;;  %v2794_v36 = vmul.f32 0.0625, %v1699_v25  ;;  %v8088_v2 = vunpack.c.l.bf16 %v11319_v47  ;;  %v9616_v25 = vld [vmem:[%s13837_s1 + $0x4] ss:$8 sps:$4 sm:$0xff]  }
 0x24c   :  { %v5483_v24 = vsel %vm4447_vm11, %v5482_v14, %v5478_v34  ;;  %v11330_v14 = vld [vmem:[%s13836_s0 + $0x628] sm:$0xff]   ;;  %8834 = vmatprep.subr.bf16.mxu1 %v9616_v25 }
 0x24d   :  { %v5492_v45 = vrot.slane %v2795_v35, %v10330_v37  ;;  %v5487_v46 = vrot.slane %v2794_v36, %v10336_v43  ;;  %2265 = vadd.xlane.f32.xlu1 %v2264_v7  ;;  %2214 = vadd.xlane.f32.xlu0 %v2213_v27  ;;  %v9618_v7 = vld [vmem:[%s13837_s1 + $0x404] ss:$8 sps:$4 sm:$0xff]  }
 0x24e   :  { %v1708_v48 = vpop.xlane.xlu1 %1707  ;;  %v1705_v51 = vpop.xlane.xlu0 %1704  ;;  %9090 = vmatprep.subr.bf16.mxu0 %v9618_v7  ;;  %8836 = vmatpush1.bf16.msra.mxu1 %v9620_v13  ;;  %v9628_v7 = vld [vmem:[%s13837_s1 + $0x24] ss:$8 sps:$4 sm:$0xff]   ;;  %v9632_v13 = vld [vmem:[%s13837_s1 + $0x20] ss:$8 sps:$4 sm:$0xff]  }
 0x24f   :  { %v5488_v40 = vsel %vm4454_vm12, %v5487_v46, %v5483_v24  ;;  %v2797_v62 = vmul.f32 0.0625, %v1708_v48  ;;  %v2796_v0 = vmul.f32 0.0625, %v1705_v51  ;;  %v1835_v46 = vsel %vm1036_vm0, %v8088_v2, 0.0  ;;  %9092 = vmatpush1.bf16.msra.mxu0 %v9621_v31  ;;  %v11381_v2 = vld [vmem:[%s13836_s0 + $0x670] sm:$0xff]   ;;  %v9633_v31 = vld [vmem:[%s13837_s1 + $0x420] ss:$8 sps:$4 sm:$0xff]  }
 0x250   :  { %v5493_v50 = vsel %vm4461_vm13, %v5492_v45, %v5488_v40  ;;  %v1886_v45 = vsel %vm1036_vm0, %v8121_v11, 0.0  ;;  %v8377_v48 = vunpack.c.h.bf16 %v11307_v38  ;;  %v8344_v51 = vunpack.c.l.bf16 %v11330_v14  ;;  %v9622_v40 = vld [vmem:[%s13837_s1 + $0x14] ss:$8 sps:$4 sm:$0xff]  }
 0x251   :  { %v5502_v4 = vrot.slane %v2797_v62, %v10347_v54  ;;  %v5497_v6 = vrot.slane %v2796_v0, %v10352_v60  ;;  %1884 = vadd.xlane.f32.xlu1 %v1883_v33  ;;  %1833 = vadd.xlane.f32.xlu0 %v1832_v3  ;;  %v11357_v33 = vld [vmem:[%s13836_s0 + $0x470] sm:$0xff]   ;;  %v8089_v11 = vunpack.c.h.bf16 %v11319_v47  ;;  %v9630_v47 = vld [vmem:[%s13837_s1 + $0x424] ss:$8 sps:$4 sm:$0xff]  }
 0x252   :  { %v1714_v10 = vpop.xlane.xlu1 %1713  ;;  %v1711_v58 = vpop.xlane.xlu0 %1710  ;;  %v9624_v38 = vld [vmem:[%s13837_s1 + $0x414] ss:$8 sps:$4 sm:$0xff]   ;;  %v9626_v62 = vld [vmem:[%s13837_s1 + $0x10] ss:$8 sps:$4 sm:$0xff]   ;;  %8838 = vmatprep.subr.bf16.mxu1 %v9622_v40 }
 0x253   :  { %v2799_v19 = vmul.f32 0.0625, %v1714_v10  ;;  %v2798_v20 = vmul.f32 0.0625, %v1711_v58  ;;  %v5498_v27 = vsel %vm4468_vm14, %v5497_v6, %v5493_v50  ;;  %v9627_v0 = vld [vmem:[%s13837_s1 + $0x410] ss:$8 sps:$4 sm:$0xff]   ;;  %v2270_v58 = vsel %vm1036_vm0, %v8377_v48, 0.0  ;;  %9094 = vmatprep.subr.bf16.mxu0 %v9624_v38  ;;  %8840 = vmatpush1.bf16.msra.mxu1 %v9626_v62 }
 0x254   :  { %v11346_v15 = vsel %vm4475_vm15, %v5502_v4, %v5498_v27  ;;  %9096 = vmatpush1.bf16.msra.mxu0 %v9627_v0  ;;  %v8380_v48 = vunpack.c.l.bf16 %v11381_v2  ;;  %8842 = vmatprep.subr.bf16.mxu1 %v9628_v7  ;;  %v9634_v38 = vld [vmem:[%s13837_s1 + $0x34] ss:$8 sps:$4 sm:$0xff]   ;;  %v9638_v0 = vld [vmem:[%s13837_s1 + $0x30] ss:$8 sps:$4 sm:$0xff]  }
 0x255   :  { %13891 = vst [vmem:[#allocation26_spill] sm:$0xff] %v11346_v15  ;;  %v5511_v34 = vrot.slane %v2799_v19, %v10244_v9  ;;  %v5507_v35 = vrot.slane %v2798_v20, %v10240_v5  ;;  %2268 = vadd.xlane.f32.xlu1 %v2267_v56  ;;  %2217 = vadd.xlane.f32.xlu0 %v2216_v59  ;;  %v2219_v56 = vsel %vm1036_vm0, %v8344_v51, 0.0  ;;  %v8124_v59 = vunpack.c.l.bf16 %v11357_v33 }
 0x256   :  { %v1720_v36 = vpop.xlane.xlu1 %1719  ;;  %v1717_v24 = vpop.xlane.xlu0 %1716  ;;  %v8345_v51 = vunpack.c.h.bf16 %v11330_v14  ;;  %9098 = vmatprep.subr.bf16.mxu0 %v9630_v47  ;;  %v9636_v14 = vld [vmem:[%s13837_s1 + $0x434] ss:$8 sps:$4 sm:$0xff]  }
 0x257   :  { %v5512_v3 = vsel %vm4377_vm1, %v5511_v34, %v5507_v35  ;;  %v2801_v55 = vmul.f32 0.0625, %v1720_v36  ;;  %v2800_v57 = vmul.f32 0.0625, %v1717_v24  ;;  %8844 = vmatpush1.bf16.msra.mxu1 %v9632_v13 }
 0x258   :  { %9100 = vmatpush1.bf16.msra.mxu0 %v9633_v31  ;;  %8846 = vmatprep.subr.bf16.mxu1 %v9634_v38  ;;  %v9644_v31 = vld [vmem:[%s13837_s1 + $0x40] ss:$8 sps:$4 sm:$0xff]  }
 0x259   :  { %v5521_v50 = vrot.slane %v2801_v55, %v10253_v18  ;;  %v5516_v4 = vrot.slane %v2800_v57, %v10248_v12  ;;  %1887 = vadd.xlane.f32.xlu1 %v1886_v45  ;;  %1836 = vadd.xlane.f32.xlu0 %v1835_v46  ;;  %v1889_v45 = vsel %vm1036_vm0, %v8124_v59, 0.0  ;;  %v1838_v46 = vsel %vm1036_vm0, %v8089_v11, 0.0 }
 0x25a   :  { %v1726_v6 = vpop.xlane.xlu1 %1725  ;;  %v1723_v10 = vpop.xlane.xlu0 %1722  ;;  %v2222_v59 = vsel %vm1036_vm0, %v8345_v51, 0.0  ;;  %v8125_v11 = vunpack.c.h.bf16 %v11357_v33  ;;  %9102 = vmatprep.subr.bf16.mxu0 %v9636_v14  ;;  %v9642_v33 = vld [vmem:[%s13837_s1 + $0x444] ss:$8 sps:$4 sm:$0xff]   ;;  %v8381_v51 = vunpack.c.h.bf16 %v11381_v2  ;;  %v9648_v2 = vld [vmem:[%s13837_s1 + $0x454] ss:$8 sps:$4 sm:$0xff]  }
 0x25b   :  { %v5517_v19 = vsel %vm4384_vm2, %v5516_v4, %v5512_v3  ;;  %v2803_v20 = vmul.f32 0.0625, %v1726_v6  ;;  %v2802_v25 = vmul.f32 0.0625, %v1723_v10  ;;  %v11406_v3 = vld [vmem:[%s13836_s0 + $0x430] sm:$0xff]   ;;  %8848 = vmatpush1.bf16.msra.mxu1 %v9638_v0 }
 0x25c   :  { %v5522_v27 = vsel %vm4391_vm3, %v5521_v50, %v5517_v19  ;;  %v9639_v50 = vld [vmem:[%s13837_s1 + $0x430] ss:$8 sps:$4 sm:$0xff]   ;;  %v8092_v19 = vunpack.c.l.bf16 %v11406_v3 }
 0x25d   :  { %v5531_v34 = vrot.slane %v2803_v20, %v10259_v22  ;;  %v5526_v35 = vrot.slane %v2802_v25, %v10267_v28  ;;  %2271 = vadd.xlane.f32.xlu1 %v2270_v58  ;;  %2220 = vadd.xlane.f32.xlu0 %v2219_v56  ;;  %v2273_v56 = vsel %vm1036_vm0, %v8380_v48, 0.0  ;;  %v11431_v20 = vld [vmem:[%s13836_s0 + $0x630] sm:$0xff]  }
 0x25e   :  { %v1732_v36 = vpop.xlane.xlu1 %1731  ;;  %v1729_v24 = vpop.xlane.xlu0 %1728  ;;  %9104 = vmatpush1.bf16.msra.mxu0 %v9639_v50  ;;  %v1841_v48 = vsel %vm1036_vm0, %v8092_v19, 0.0  ;;  %v9650_v50 = vld [vmem:[%s13837_s1 + $0x50] ss:$8 sps:$4 sm:$0xff]  }
 0x25f   :  { %v5527_v55 = vsel %vm13869_vm4, %v5526_v35, %v5522_v27  ;;  %v2805_v57 = vmul.f32 0.0625, %v1732_v36  ;;  %v2804_v40 = vmul.f32 0.0625, %v1729_v24  ;;  %v9640_v27 = vld [vmem:[%s13837_s1 + $0x44] ss:$8 sps:$4 sm:$0xff]   ;;  %9106 = vmatprep.subr.bf16.mxu0 %v9642_v33 }
 0x260   :  { %v5532_v62 = vsel %vm13868_vm5, %v5531_v34, %v5527_v55  ;;  %v9645_v34 = vld [vmem:[%s13837_s1 + $0x440] ss:$8 sps:$4 sm:$0xff]   ;;  %v8348_v55 = vunpack.c.l.bf16 %v11431_v20  ;;  %8850 = vmatprep.subr.bf16.mxu1 %v9640_v27 }
 0x261   :  { %v5541_v4 = vrot.slane %v2805_v57, %v10278_v41  ;;  %v5536_v6 = vrot.slane %v2804_v40, %v10281_v42  ;;  %1890 = vadd.xlane.f32.xlu1 %v1889_v45  ;;  %1839 = vadd.xlane.f32.xlu0 %v1838_v46  ;;  %v1892_v46 = vsel %vm1036_vm0, %v8125_v11, 0.0  ;;  %v11456_v57 = vld [vmem:[%s13836_s0 + $0x478] sm:$0xff]  }
 0x262   :  { %v1738_v10 = vpop.xlane.xlu1 %1737  ;;  %v1735_v58 = vpop.xlane.xlu0 %1734  ;;  %8852 = vmatpush1.bf16.msra.mxu1 %v9644_v31  ;;  %9108 = vmatpush1.bf16.msra.mxu0 %v9645_v34  ;;  %v2225_v11 = vsel %vm1036_vm0, %v8348_v55, 0.0  ;;  %v8128_v19 = vunpack.c.l.bf16 %v11456_v57  ;;  %v9656_v34 = vld [vmem:[%s13837_s1 + $0x60] ss:$8 sps:$4 sm:$0xff]  }
 0x263   :  { %v5537_v25 = vsel %vm4412_vm6, %v5536_v6, %v5532_v62  ;;  %v2807_v7 = vmul.f32 0.0625, %v1738_v10  ;;  %v2806_v47 = vmul.f32 0.0625, %v1735_v58  ;;  %v9646_v62 = vld [vmem:[%s13837_s1 + $0x54] ss:$8 sps:$4 sm:$0xff]   ;;  %9110 = vmatprep.subr.bf16.mxu0 %v9648_v2 }
 0x264   :  { %v5542_v13 = vsel %vm13857_vm7, %v5541_v4, %v5537_v25  ;;  %v9651_v4 = vld [vmem:[%s13837_s1 + $0x450] ss:$8 sps:$4 sm:$0xff]   ;;  %v8093_v25 = vunpack.c.h.bf16 %v11406_v3  ;;  %8854 = vmatprep.subr.bf16.mxu1 %v9646_v62  ;;  %v9654_v3 = vld [vmem:[%s13837_s1 + $0x464] ss:$8 sps:$4 sm:$0xff]  }
 0x265   :  { %v5551_v35 = vrot.slane %v2807_v7, %v10296_v61  ;;  %v5546_v36 = vrot.slane %v2806_v47, %v10302_v1  ;;  %2274 = vadd.xlane.f32.xlu1 %v2273_v56  ;;  %2223 = vadd.xlane.f32.xlu0 %v2222_v59  ;;  %v2276_v59 = vsel %vm1036_vm0, %v8381_v51, 0.0  ;;  %v11481_v7 = vld [vmem:[%s13836_s0 + $0x678] sm:$0xff]  }
 0x266   :  { %v1744_v24 = vpop.xlane.xlu1 %1743  ;;  %v1741_v45 = vpop.xlane.xlu0 %1740  ;;  %8856 = vmatpush1.bf16.msra.mxu1 %v9650_v50  ;;  %9112 = vmatpush1.bf16.msra.mxu0 %v9651_v4  ;;  %v1844_v51 = vsel %vm1036_vm0, %v8093_v25, 0.0  ;;  %v8384_v55 = vunpack.c.l.bf16 %v11481_v7  ;;  %v9662_v50 = vld [vmem:[%s13837_s1 + $0x70] ss:$8 sps:$4 sm:$0xff]   ;;  %v8129_v25 = vunpack.c.h.bf16 %v11456_v57  ;;  %v9666_v57 = vld [vmem:[%s13837_s1 + $0x484] ss:$8 sps:$4 sm:$0xff]  }
 0x267   :  { %v5547_v40 = vsel %vm4426_vm8, %v5546_v36, %v5542_v13  ;;  %v2809_v38 = vmul.f32 0.0625, %v1744_v24  ;;  %v2808_v14 = vmul.f32 0.0625, %v1741_v45  ;;  %v9652_v13 = vld [vmem:[%s13837_s1 + $0x64] ss:$8 sps:$4 sm:$0xff]   ;;  %9114 = vmatprep.subr.bf16.mxu0 %v9654_v3  ;;  %v9663_v4 = vld [vmem:[%s13837_s1 + $0x470] ss:$8 sps:$4 sm:$0xff]  }
 0x268   :  { %v5552_v0 = vsel %vm4433_vm9, %v5551_v35, %v5547_v40  ;;  %v9657_v35 = vld [vmem:[%s13837_s1 + $0x460] ss:$8 sps:$4 sm:$0xff]   ;;  %v8349_v40 = vunpack.c.h.bf16 %v11431_v20  ;;  %8858 = vmatprep.subr.bf16.mxu1 %v9652_v13  ;;  %v9660_v20 = vld [vmem:[%s13837_s1 + $0x474] ss:$8 sps:$4 sm:$0xff]   ;;  %v9664_v3 = vld [vmem:[%s13837_s1 + $0x84] ss:$8 sps:$4 sm:$0xff]  }
 0x269   :  { %v5561_v6 = vrot.slane %v2809_v38, %v10313_v17  ;;  %v5556_v10 = vrot.slane %v2808_v14, %v10319_v23  ;;  %1893 = vadd.xlane.f32.xlu1 %v1892_v46  ;;  %1842 = vadd.xlane.f32.xlu0 %v1841_v48  ;;  %v1895_v48 = vsel %vm1036_vm0, %v8128_v19, 0.0  ;;  %v11506_v38 = vld [vmem:[%s13836_s0 + $0x438] sm:$0xff]  }
 0x26a   :  { %v1750_v58 = vpop.xlane.xlu1 %1749  ;;  %v1747_v56 = vpop.xlane.xlu0 %1746  ;;  %8860 = vmatpush1.bf16.msra.mxu1 %v9656_v34  ;;  %9116 = vmatpush1.bf16.msra.mxu0 %v9657_v35  ;;  %v2228_v19 = vsel %vm1036_vm0, %v8349_v40, 0.0  ;;  %v9668_v34 = vld [vmem:[%s13837_s1 + $0x80] ss:$8 sps:$4 sm:$0xff]   ;;  %v8385_v40 = vunpack.c.h.bf16 %v11481_v7  ;;  %v9674_v7 = vld [vmem:[%s13837_s1 + $0x90] ss:$8 sps:$4 sm:$0xff]  }
 0x26b   :  { %v5557_v47 = vsel %vm4440_vm10, %v5556_v10, %v5552_v0  ;;  %v2811_v27 = vmul.f32 0.0625, %v1750_v58  ;;  %v2810_v33 = vmul.f32 0.0625, %v1747_v56  ;;  %v9658_v0 = vld [vmem:[%s13837_s1 + $0x74] ss:$8 sps:$4 sm:$0xff]   ;;  %9118 = vmatprep.subr.bf16.mxu0 %v9660_v20  ;;  %v9669_v35 = vld [vmem:[%s13837_s1 + $0x480] ss:$8 sps:$4 sm:$0xff]  }
 0x26c   :  { %v5562_v31 = vsel %vm4447_vm11, %v5561_v6, %v5557_v47  ;;  %v8096_v47 = vunpack.c.l.bf16 %v11506_v38  ;;  %8862 = vmatprep.subr.bf16.mxu1 %v9658_v0  ;;  %v9670_v20 = vld [vmem:[%s13837_s1 + $0x94] ss:$8 sps:$4 sm:$0xff]  }
 0x26d   :  { %v5571_v36 = vrot.slane %v2811_v27, %v10330_v37  ;;  %v5566_v24 = vrot.slane %v2810_v33, %v10336_v43  ;;  %2277 = vadd.xlane.f32.xlu1 %v2276_v59  ;;  %2226 = vadd.xlane.f32.xlu0 %v2225_v11  ;;  %v2279_v11 = vsel %vm1036_vm0, %v8384_v55, 0.0  ;;  %v11531_v27 = vld [vmem:[%s13836_s0 + $0x638] sm:$0xff]  }
 0x26e   :  { %v1756_v45 = vpop.xlane.xlu1 %1755  ;;  %v1753_v46 = vpop.xlane.xlu0 %1752  ;;  %8864 = vmatpush1.bf16.msra.mxu1 %v9662_v50  ;;  %9120 = vmatpush1.bf16.msra.mxu0 %v9663_v4  ;;  %v1847_v55 = vsel %vm1036_vm0, %v8096_v47, 0.0  ;;  %v9672_v50 = vld [vmem:[%s13837_s1 + $0x494] ss:$8 sps:$4 sm:$0xff]   ;;  %v9675_v4 = vld [vmem:[%s13837_s1 + $0x490] ss:$8 sps:$4 sm:$0xff]   ;;  %v8729_v47 = vld [vmem:[%s13836_s0 + $0x4c0] sm:$0xff]  }
 0x26f   :  { %v5567_v14 = vsel %vm4454_vm12, %v5566_v24, %v5562_v31  ;;  %v2813_v62 = vmul.f32 0.0625, %v1756_v45  ;;  %v2812_v2 = vmul.f32 0.0625, %v1753_v46  ;;  %8866 = vmatprep.subr.bf16.mxu1 %v9664_v3  ;;  %9122 = vmatprep.subr.bf16.mxu0 %v9666_v57  ;;  %v9676_v57 = vld [vmem:[%s13837_s1 + $0xa4] ss:$8 sps:$4 sm:$0xff]  }
 0x270   :  { %v5572_v6 = vsel %vm4461_vm13, %v5571_v36, %v5567_v14  ;;  %v8352_v14 = vunpack.c.l.bf16 %v11531_v27 }
 0x271   :  { %v5581_v10 = vrot.slane %v2813_v62, %v10347_v54  ;;  %v5576_v58 = vrot.slane %v2812_v2, %v10352_v60  ;;  %1896 = vadd.xlane.f32.xlu1 %v1895_v48  ;;  %1845 = vadd.xlane.f32.xlu0 %v1844_v51  ;;  %v1898_v51 = vsel %vm1036_vm0, %v8129_v25, 0.0  ;;  %v8097_v25 = vunpack.c.h.bf16 %v11506_v38  ;;  %v9678_v38 = vld [vmem:[%s13837_s1 + $0x4a4] ss:$8 sps:$4 sm:$0xff]  }
 0x272   :  { %v1762_v56 = vpop.xlane.xlu1 %1761  ;;  %v1759_v59 = vpop.xlane.xlu0 %1758  ;;  %8868 = vmatpush1.bf16.msra.mxu1 %v9668_v34  ;;  %9124 = vmatpush1.bf16.msra.mxu0 %v9669_v35  ;;  %v9681_v34 = vld [vmem:[%s13837_s1 + $0x4a0] ss:$8 sps:$4 sm:$0xff]  }
 0x273   :  { %v2815_v33 = vmul.f32 0.0625, %v1762_v56  ;;  %v2814_v13 = vmul.f32 0.0625, %v1759_v59  ;;  %v5577_v31 = vsel %vm4468_vm14, %v5576_v58, %v5572_v6  ;;  %v2282_v59 = vsel %vm1036_vm0, %v8385_v40, 0.0  ;;  %8870 = vmatprep.subr.bf16.mxu1 %v9670_v20  ;;  %9126 = vmatprep.subr.bf16.mxu0 %v9672_v50  ;;  %v9682_v20 = vld [vmem:[%s13837_s1 + $0xb4] ss:$8 sps:$4 sm:$0xff]  }
 0x274   :  { %v11547_v36 = vsel %vm4475_vm15, %v5581_v10, %v5577_v31  ;;  %v9680_v31 = vld [vmem:[%s13837_s1 + $0xa0] ss:$8 sps:$4 sm:$0xff]   ;;  %v8164_v40 = vunpack.c.l.bf16 %v8729_v47  ;;  %v9684_v50 = vld [vmem:[%s13837_s1 + $0x4b4] ss:$8 sps:$4 sm:$0xff]  }
 0x275   :  { %13892 = vst [vmem:[#allocation27_spill] sm:$0xff] %v11547_v36  ;;  %v5590_v24 = vrot.slane %v2815_v33, %v10244_v9  ;;  %v5586_v45 = vrot.slane %v2814_v13, %v10240_v5  ;;  %2280 = vadd.xlane.f32.xlu1 %v2279_v11  ;;  %2229 = vadd.xlane.f32.xlu0 %v2228_v19  ;;  %v2231_v11 = vsel %vm1036_vm0, %v8352_v14, 0.0  ;;  %v8353_v19 = vunpack.c.h.bf16 %v11531_v27  ;;  %v8793_v14 = vld [vmem:[%s13836_s0 + $0x6c0] sm:$0xff]  }
 0x276   :  { %v1768_v46 = vpop.xlane.xlu1 %1767  ;;  %v1765_v48 = vpop.xlane.xlu0 %1764  ;;  %8872 = vmatpush1.bf16.msra.mxu1 %v9674_v7  ;;  %9128 = vmatpush1.bf16.msra.mxu0 %v9675_v4  ;;  %v9686_v4 = vld [vmem:[%s13837_s1 + $0xb0] ss:$8 sps:$4 sm:$0xff]  }
 0x277   :  { %v5591_v62 = vsel %vm4377_vm1, %v5590_v24, %v5586_v45  ;;  %v2817_v2 = vmul.f32 0.0625, %v1768_v46  ;;  %v2816_v0 = vmul.f32 0.0625, %v1765_v48  ;;  %v2234_v48 = vsel %vm1036_vm0, %v8353_v19, 0.0  ;;  %8874 = vmatprep.subr.bf16.mxu1 %v9676_v57  ;;  %9130 = vmatprep.subr.bf16.mxu0 %v9678_v38  ;;  %v9688_v38 = vld [vmem:[%s13837_s1 + $0xc4] ss:$8 sps:$4 sm:$0xff]  }
 0x278   :  { %v1949_v19 = vsel %vm1036_vm0, %v8164_v40, 0.0 }
 0x279   :  { %v5600_v6 = vrot.slane %v2817_v2, %v10253_v18  ;;  %v5595_v10 = vrot.slane %v2816_v0, %v10248_v12  ;;  %1899 = vadd.xlane.f32.xlu1 %v1898_v51  ;;  %1848 = vadd.xlane.f32.xlu0 %v1847_v55  ;;  %v1850_v51 = vsel %vm1036_vm0, %v8097_v25, 0.0  ;;  %v8165_v55 = vunpack.c.h.bf16 %v8729_v47 }
 0x27a   :  { %v1774_v58 = vpop.xlane.xlu1 %1773  ;;  %v1771_v56 = vpop.xlane.xlu0 %1770  ;;  %8876 = vmatpush1.bf16.msra.mxu1 %v9680_v31  ;;  %9132 = vmatpush1.bf16.msra.mxu0 %v9681_v34  ;;  %v8421_v25 = vunpack.c.h.bf16 %v8793_v14  ;;  %v8420_v47 = vunpack.c.l.bf16 %v8793_v14  ;;  %v9692_v34 = vld [vmem:[%s13837_s1 + $0xc0] ss:$8 sps:$4 sm:$0xff]  }
 0x27b   :  { %v5596_v33 = vsel %vm4384_vm2, %v5595_v10, %v5591_v62  ;;  %v2819_v13 = vmul.f32 0.0625, %v1774_v58  ;;  %v2818_v3 = vmul.f32 0.0625, %v1771_v56  ;;  %8878 = vmatprep.subr.bf16.mxu1 %v9682_v20  ;;  %9134 = vmatprep.subr.bf16.mxu0 %v9684_v50 }
 0x27c   :  { %v5601_v27 = vsel %vm4391_vm3, %v5600_v6, %v5596_v33  ;;  %v9687_v6 = vld [vmem:[%s13837_s1 + $0x4b0] ss:$8 sps:$4 sm:$0xff]   ;;  %v8721_v33 = vld [vmem:[%s13836_s0 + $0x480] sm:$0xff]  }
 0x27d   :  { %v5610_v35 = vrot.slane %v2819_v13, %v10259_v22  ;;  %v5605_v24 = vrot.slane %v2818_v3, %v10267_v28  ;;  %2283 = vadd.xlane.f32.xlu1 %v2282_v59  ;;  %2232 = vadd.xlane.f32.xlu0 %v2231_v11  ;;  %v1952_v11 = vsel %vm1036_vm0, %v8165_v55, 0.0  ;;  %v2333_v55 = vsel %vm1036_vm0, %v8420_v47, 0.0 }
 0x27e   :  { %v1780_v45 = vpop.xlane.xlu1 %1779  ;;  %v1777_v46 = vpop.xlane.xlu0 %1776  ;;  %8880 = vmatpush1.bf16.msra.mxu1 %v9686_v4  ;;  %9136 = vmatpush1.bf16.msra.mxu0 %v9687_v6  ;;  %v8133_v40 = vunpack.c.h.bf16 %v8721_v33  ;;  %v8132_v14 = vunpack.c.l.bf16 %v8721_v33  ;;  %v9696_v4 = vld [vmem:[%s13837_s1 + $0x4d4] ss:$8 sps:$4 sm:$0xff]  }
 0x27f   :  { %v5606_v62 = vsel %vm13869_vm4, %v5605_v24, %v5601_v27  ;;  %v2821_v2 = vmul.f32 0.0625, %v1780_v45  ;;  %v2820_v0 = vmul.f32 0.0625, %v1777_v46  ;;  %v9690_v27 = vld [vmem:[%s13837_s1 + $0x4c4] ss:$8 sps:$4 sm:$0xff]   ;;  %8882 = vmatprep.subr.bf16.mxu1 %v9688_v38 }
 0x280   :  { %v5611_v7 = vsel %vm13868_vm5, %v5610_v35, %v5606_v62  ;;  %v9693_v35 = vld [vmem:[%s13837_s1 + $0x4c0] ss:$8 sps:$4 sm:$0xff]   ;;  %9138 = vmatprep.subr.bf16.mxu0 %v9690_v27  ;;  %v1901_v47 = vsel %vm1036_vm0, %v8132_v14, 0.0 }
 0x281   :  { %v5620_v10 = vrot.slane %v2821_v2, %v10278_v41  ;;  %v5615_v58 = vrot.slane %v2820_v0, %v10281_v42  ;;  %2235 = vadd.xlane.f32.xlu1 %v2234_v48  ;;  %1851 = vadd.xlane.f32.xlu0 %v1850_v51  ;;  %v2336_v51 = vsel %vm1036_vm0, %v8421_v25, 0.0  ;;  %v11640_v62 = vld [vmem:[%s13836_s0 + $0x680] sm:$0xff]   ;;  %v11645_v2 = vld [vmem:[%s13836_s0 + $0x4c8] sm:$0xff]   ;;  %v1904_v25 = vsel %vm1036_vm0, %v8133_v40, 0.0 }
 0x282   :  { %v1786_v56 = vpop.xlane.xlu1 %1785  ;;  %v1783_v59 = vpop.xlane.xlu0 %1782  ;;  %8884 = vmatpush1.bf16.msra.mxu1 %v9692_v34  ;;  %9140 = vmatpush1.bf16.msra.mxu0 %v9693_v35  ;;  %v8388_v33 = vunpack.c.l.bf16 %v11640_v62  ;;  %v9702_v34 = vld [vmem:[%s13837_s1 + $0x4e4] ss:$8 sps:$4 sm:$0xff]  }
 0x283   :  { %v5616_v13 = vsel %vm4412_vm6, %v5615_v58, %v5611_v7  ;;  %v2823_v3 = vmul.f32 0.0625, %v1786_v56  ;;  %v2822_v57 = vmul.f32 0.0625, %v1783_v59  ;;  %v9694_v7 = vld [vmem:[%s13837_s1 + $0xd4] ss:$8 sps:$4 sm:$0xff]   ;;  %v9699_v58 = vld [vmem:[%s13837_s1 + $0x4d0] ss:$8 sps:$4 sm:$0xff]   ;;  %9142 = vmatprep.subr.bf16.mxu0 %v9696_v4 }
 0x284   :  { %v5621_v31 = vsel %vm13857_vm7, %v5620_v10, %v5616_v13  ;;  %v9698_v10 = vld [vmem:[%s13837_s1 + $0xd0] ss:$8 sps:$4 sm:$0xff]   ;;  %v8168_v13 = vunpack.c.l.bf16 %v11645_v2  ;;  %8886 = vmatprep.subr.bf16.mxu1 %v9694_v7  ;;  %v2285_v40 = vsel %vm1036_vm0, %v8388_v33, 0.0 }
 0x285   :  { %v5630_v24 = vrot.slane %v2823_v3, %v10296_v61  ;;  %v5625_v45 = vrot.slane %v2822_v57, %v10302_v1  ;;  %1953 = vadd.xlane.f32.xlu1 %v1952_v11  ;;  %1950 = vadd.xlane.f32.xlu0 %v1949_v19  ;;  %v11670_v3 = vld [vmem:[%s13836_s0 + $0x6c8] sm:$0xff]  }
 0x286   :  { %v1792_v46 = vpop.xlane.xlu1 %1791  ;;  %v1789_v48 = vpop.xlane.xlu0 %1788  ;;  %8888 = vmatpush1.bf16.msra.mxu1 %v9698_v10  ;;  %9144 = vmatpush1.bf16.msra.mxu0 %v9699_v58  ;;  %v1955_v14 = vsel %vm1036_vm0, %v8168_v13, 0.0  ;;  %v9706_v10 = vld [vmem:[%s13837_s1 + $0xf4] ss:$8 sps:$4 sm:$0xff]  }
 0x287   :  { %v5626_v0 = vsel %vm4426_vm8, %v5625_v45, %v5621_v31  ;;  %v2825_v20 = vmul.f32 0.0625, %v1792_v46  ;;  %v2824_v50 = vmul.f32 0.0625, %v1789_v48  ;;  %v9700_v31 = vld [vmem:[%s13837_s1 + $0xe4] ss:$8 sps:$4 sm:$0xff]   ;;  %v9704_v46 = vld [vmem:[%s13837_s1 + $0xe0] ss:$8 sps:$4 sm:$0xff]   ;;  %9146 = vmatprep.subr.bf16.mxu0 %v9702_v34 }
 0x288   :  { %v5631_v6 = vsel %vm4433_vm9, %v5630_v24, %v5626_v0  ;;  %v9705_v48 = vld [vmem:[%s13837_s1 + $0x4e0] ss:$8 sps:$4 sm:$0xff]   ;;  %v8424_v0 = vunpack.c.l.bf16 %v11670_v3  ;;  %8890 = vmatprep.subr.bf16.mxu1 %v9700_v31 }
 0x289   :  { %v5640_v56 = vrot.slane %v2825_v20, %v10313_v17  ;;  %v5635_v59 = vrot.slane %v2824_v50, %v10319_v23  ;;  %2337 = vadd.xlane.f32.xlu1 %v2336_v51  ;;  %2334 = vadd.xlane.f32.xlu0 %v2333_v55  ;;  %v8389_v20 = vunpack.c.h.bf16 %v11640_v62  ;;  %v9708_v62 = vld [vmem:[%s13837_s1 + $0x4f4] ss:$8 sps:$4 sm:$0xff]   ;;  %v8786_v31 = vld [vmem:[%s13836_s0 + $0x688] sm:$0xff]  }
 0x28a   :  { %v1798_v11 = vpop.xlane.xlu1 %1797  ;;  %v1795_v19 = vpop.xlane.xlu0 %1794  ;;  %8892 = vmatpush1.bf16.msra.mxu1 %v9704_v46  ;;  %9148 = vmatpush1.bf16.msra.mxu0 %v9705_v48  ;;  %v2339_v13 = vsel %vm1036_vm0, %v8424_v0, 0.0 }
 0x28b   :  { %v5636_v57 = vsel %vm4440_vm10, %v5635_v59, %v5631_v6  ;;  %v2827_v38 = vmul.f32 0.0625, %v1798_v11  ;;  %v2826_v27 = vmul.f32 0.0625, %v1795_v19  ;;  %v11696_v6 = vld [vmem:[%s13836_s0 + $0x488] sm:$0xff]   ;;  %v8169_v59 = vunpack.c.h.bf16 %v11645_v2  ;;  %v9710_v11 = vld [vmem:[%s13837_s1 + $0xf0] ss:$8 sps:$4 sm:$0xff]   ;;  %8894 = vmatprep.subr.bf16.mxu1 %v9706_v10  ;;  %9150 = vmatprep.subr.bf16.mxu0 %v9708_v62 }
 0x28c   :  { %v5641_v35 = vsel %vm4447_vm11, %v5640_v56, %v5636_v57  ;;  %v9711_v19 = vld [vmem:[%s13837_s1 + $0x4f0] ss:$8 sps:$4 sm:$0xff]   ;;  %v2288_v57 = vsel %vm1036_vm0, %v8389_v20, 0.0 }
 0x28d   :  { %v5650_v24 = vrot.slane %v2827_v38, %v10330_v37  ;;  %v5645_v45 = vrot.slane %v2826_v27, %v10336_v43  ;;  %1905 = vadd.xlane.f32.xlu1 %v1904_v25  ;;  %1902 = vadd.xlane.f32.xlu0 %v1901_v47  ;;  %v8136_v38 = vunpack.c.l.bf16 %v11696_v6 }
 0x28e   :  { %v1804_v51 = vpop.xlane.xlu1 %1803  ;;  %v1801_v55 = vpop.xlane.xlu0 %1800  ;;  %8896 = vmatpush1.bf16.msra.mxu1 %v9710_v11  ;;  %9152 = vmatpush1.bf16.msra.mxu0 %v9711_v19  ;;  %v8137_v11 = vunpack.c.h.bf16 %v11696_v6 }
 0x28f   :  { %v5646_v50 = vsel %vm4454_vm12, %v5645_v45, %v5641_v35  ;;  %v2829_v7 = vmul.f32 0.0625, %v1804_v51  ;;  %v2828_v4 = vmul.f32 0.0625, %v1801_v55  ;;  %v1958_v45 = vsel %vm1036_vm0, %v8169_v59, 0.0 }
 0x290   :  { %v5651_v58 = vsel %vm4461_vm13, %v5650_v24, %v5646_v50  ;;  %v1907_v51 = vsel %vm1036_vm0, %v8136_v38, 0.0  ;;  %v8425_v55 = vunpack.c.h.bf16 %v11670_v3  ;;  %v1910_v6 = vsel %vm1036_vm0, %v8137_v11, 0.0 }
 0x291   :  { %v5655_v56 = vrot.slane %v2828_v4, %v10352_v60  ;;  %2286 = vadd.xlane.f32.xlu1 %v2285_v40  ;;  %1956 = vadd.xlane.f32.xlu0 %v1955_v14  ;;  %v5660_v25 = vrot.slane %v2829_v7, %v10347_v54  ;;  %v8392_v40 = vunpack.c.l.bf16 %v8786_v31  ;;  %v8731_v7 = vld [vmem:[%s13836_s0 + $0x4d0] sm:$0xff]  }
 0x292   :  { %v1810_v47 = vpop.xlane.xlu1 %1809  ;;  %v1807_v33 = vpop.xlane.xlu0 %1806  ;;  %v8172_v59 = vunpack.c.l.bf16 %v8731_v7 }
 0x293   :  { %v2831_v2 = vmul.f32 0.0625, %v1810_v47  ;;  %v2830_v27 = vmul.f32 0.0625, %v1807_v33  ;;  %v5656_v34 = vsel %vm4468_vm14, %v5655_v56, %v5651_v58  ;;  %v2342_v58 = vsel %vm1036_vm0, %v8425_v55, 0.0  ;;  %v8795_v47 = vld [vmem:[%s13836_s0 + $0x6d0] sm:$0xff]  }
 0x294   :  { %v11727_v14 = vsel %vm4475_vm15, %v5660_v25, %v5656_v34  ;;  %v2291_v56 = vsel %vm1036_vm0, %v8392_v40, 0.0  ;;  %v8428_v34 = vunpack.c.l.bf16 %v8795_v47 }
 0x295   :  { %v5669_v35 = vrot.slane %v2831_v2, %v10244_v9  ;;  %v5665_v24 = vrot.slane %v2830_v27, %v10240_v5  ;;  %2340 = vadd.xlane.f32.xlu1 %v2339_v13  ;;  %2289 = vadd.xlane.f32.xlu0 %v2288_v57  ;;  %13893 = vst [vmem:[#allocation28_spill] sm:$0xff] %v11727_v14  ;;  %v1961_v27 = vsel %vm1036_vm0, %v8172_v59, 0.0 }
 0x296   :  { %v1816_v46 = vpop.xlane.xlu1 %1815  ;;  %v1813_v48 = vpop.xlane.xlu0 %1812 }
 0x297   :  { %v5670_v0 = vsel %vm4377_vm1, %v5669_v35, %v5665_v24  ;;  %v2833_v20 = vmul.f32 0.0625, %v1816_v46  ;;  %v2832_v50 = vmul.f32 0.0625, %v1813_v48  ;;  %v8393_v35 = vunpack.c.h.bf16 %v8786_v31  ;;  %v8723_v46 = vld [vmem:[%s13836_s0 + $0x490] sm:$0xff]  }
 0x299   :  { %v5679_v4 = vrot.slane %v2833_v20, %v10253_v18  ;;  %v5674_v10 = vrot.slane %v2832_v50, %v10248_v12  ;;  %1959 = vadd.xlane.f32.xlu1 %v1958_v45  ;;  %1908 = vadd.xlane.f32.xlu0 %v1907_v51  ;;  %v2345_v20 = vsel %vm1036_vm0, %v8428_v34, 0.0  ;;  %v2294_v31 = vsel %vm1036_vm0, %v8393_v35, 0.0  ;;  %v8732_v34 = vld [vmem:[%s13836_s0 + $0x4d8] sm:$0xff]  }
 0x29a   :  { %v1855_v62 = vpop.xlane.xlu1 %1854  ;;  %v1819_v3 = vpop.xlane.xlu0 %1818  ;;  %v8173_v50 = vunpack.c.h.bf16 %v8731_v7 }
 0x29b   :  { %v5675_v19 = vsel %vm4384_vm2, %v5674_v10, %v5670_v0  ;;  %v2834_v25 = vmul.f32 0.0625, %v1819_v3  ;;  %v2846_v13 = vmul.f32 0.0625, %v1855_v62 }
 0x29c   :  { %v5680_v33 = vsel %vm4391_vm3, %v5679_v4, %v5675_v19  ;;  %v8140_v4 = vunpack.c.l.bf16 %v8723_v46  ;;  %v1964_v7 = vsel %vm1036_vm0, %v8173_v50, 0.0 }
 0x29d   :  { %v5684_v57 = vrot.slane %v2834_v25, %v10267_v28  ;;  %2343 = vadd.xlane.f32.xlu1 %v2342_v58  ;;  %2292 = vadd.xlane.f32.xlu0 %v2291_v56  ;;  %v5744_v48 = vrot.slane %v2846_v13, %v10240_v5  ;;  %v8787_v58 = vld [vmem:[%s13836_s0 + $0x690] sm:$0xff]   ;;  %v8429_v13 = vunpack.c.h.bf16 %v8795_v47 }
 0x29e   :  { %v2239_v38 = vpop.xlane.xlu1 %2238  ;;  %v1858_v2 = vpop.xlane.xlu0 %1857 }
 0x29f   :  { %v11747_v24 = vsel %vm13869_vm4, %v5684_v57, %v5680_v33  ;;  %v2847_v45 = vmul.f32 0.0625, %v1858_v2  ;;  %v2974_v51 = vmul.f32 0.0625, %v2239_v38  ;;  %v1913_v33 = vsel %vm1036_vm0, %v8140_v4, 0.0  ;;  %v8796_v4 = vld [vmem:[%s13836_s0 + $0x6d8] sm:$0xff]  }
 0x2a0   :  { %v8396_v57 = vunpack.c.l.bf16 %v8787_v58  ;;  %v2348_v47 = vsel %vm1036_vm0, %v8429_v13, 0.0 }
 0x2a1   :  { %v5748_v55 = vrot.slane %v2847_v45, %v10244_v9  ;;  %1962 = vadd.xlane.f32.xlu1 %v1961_v27  ;;  %1911 = vadd.xlane.f32.xlu0 %v1910_v6  ;;  %v6376_v56 = vrot.slane %v2974_v51, %v10240_v5 }
 0x2a2   :  { %v1861_v40 = vpop.xlane.xlu1 %1860  ;;  %v2242_v0 = vpop.xlane.xlu0 %2241 }
 0x2a3   :  { %v5749_v10 = vsel %vm4377_vm1, %v5748_v55, %v5744_v48  ;;  %v2848_v62 = vmul.f32 0.0625, %v1861_v40  ;;  %v2975_v3 = vmul.f32 0.0625, %v2242_v0  ;;  %v2297_v55 = vsel %vm1036_vm0, %v8396_v57, 0.0  ;;  %v8724_v57 = vld [vmem:[%s13836_s0 + $0x498] sm:$0xff]  }
 0x2a4   :  { %v8176_v40 = vunpack.c.l.bf16 %v8732_v34  ;;  %v8141_v0 = vunpack.c.h.bf16 %v8723_v46 }
 0x2a5   :  { %v5753_v59 = vrot.slane %v2848_v62, %v10248_v12  ;;  %v6380_v11 = vrot.slane %v2975_v3, %v10244_v9  ;;  %2346 = vadd.xlane.f32.xlu1 %v2345_v20  ;;  %2295 = vadd.xlane.f32.xlu0 %v2294_v31 }
 0x2a6   :  { %v2194_v19 = vpop.xlane.xlu1 %2193  ;;  %v2191_v25 = vpop.xlane.xlu0 %2190  ;;  %v1916_v46 = vsel %vm1036_vm0, %v8141_v0, 0.0  ;;  %v8788_v0 = vld [vmem:[%s13836_s0 + $0x698] sm:$0xff]  }
 0x2a7   :  { %v5754_v38 = vsel %vm4384_vm2, %v5753_v59, %v5749_v10  ;;  %v6381_v2 = vsel %vm4377_vm1, %v6380_v11, %v6376_v56  ;;  %v2959_v27 = vmul.f32 0.0625, %v2194_v19  ;;  %v2958_v6 = vmul.f32 0.0625, %v2191_v25 }
 0x2a8   :  { %v1967_v59 = vsel %vm1036_vm0, %v8176_v40, 0.0  ;;  %v8432_v11 = vunpack.c.l.bf16 %v8796_v4  ;;  %v8397_v19 = vunpack.c.h.bf16 %v8787_v58 }
 0x2a9   :  { %v6301_v35 = vrot.slane %v2959_v27, %v10244_v9  ;;  %v6297_v45 = vrot.slane %v2958_v6, %v10240_v5  ;;  %1965 = vadd.xlane.f32.xlu1 %v1964_v7  ;;  %1914 = vadd.xlane.f32.xlu0 %v1913_v33 }
 0x2aa   :  { %v1864_v48 = vpop.xlane.xlu1 %1863  ;;  %v2245_v51 = vpop.xlane.xlu0 %2244  ;;  %v2351_v58 = vsel %vm1036_vm0, %v8432_v11, 0.0 }
 0x2ab   :  { %v6302_v20 = vsel %vm4377_vm1, %v6301_v35, %v6297_v45  ;;  %v2849_v31 = vmul.f32 0.0625, %v1864_v48  ;;  %v2976_v50 = vmul.f32 0.0625, %v2245_v51  ;;  %v8177_v48 = vunpack.c.h.bf16 %v8732_v34 }
 0x2ad   :  { %v5758_v10 = vrot.slane %v2849_v31, %v10253_v18  ;;  %v6385_v62 = vrot.slane %v2976_v50, %v10248_v12  ;;  %2349 = vadd.xlane.f32.xlu1 %v2348_v47  ;;  %2298 = vadd.xlane.f32.xlu0 %v2297_v55  ;;  %v1970_v34 = vsel %vm1036_vm0, %v8177_v48, 0.0 }
 0x2ae   :  { %v2248_v3 = vpop.xlane.xlu1 %2247  ;;  %v2197_v56 = vpop.xlane.xlu0 %2196 }
 0x2af   :  { %v5759_v25 = vsel %vm4391_vm3, %v5758_v10, %v5754_v38  ;;  %v6386_v7 = vsel %vm4384_vm2, %v6385_v62, %v6381_v2  ;;  %v2977_v33 = vmul.f32 0.0625, %v2248_v3  ;;  %v2960_v13 = vmul.f32 0.0625, %v2197_v56 }
 0x2b0   :  { %v2300_v38 = vsel %vm1036_vm0, %v8397_v19, 0.0  ;;  %v8144_v2 = vunpack.c.l.bf16 %v8724_v57  ;;  %v8433_v56 = vunpack.c.h.bf16 %v8796_v4 }
 0x2b1   :  { %v6390_v27 = vrot.slane %v2977_v33, %v10253_v18  ;;  %v6306_v6 = vrot.slane %v2960_v13, %v10248_v12  ;;  %1968 = vadd.xlane.f32.xlu1 %v1967_v59  ;;  %1917 = vadd.xlane.f32.xlu0 %v1916_v46 }
 0x2b2   :  { %v2200_v35 = vpop.xlane.xlu1 %2199  ;;  %v1867_v45 = vpop.xlane.xlu0 %1866  ;;  %v1919_v3 = vsel %vm1036_vm0, %v8144_v2, 0.0  ;;  %v2354_v4 = vsel %vm1036_vm0, %v8433_v56, 0.0 }
 0x2b3   :  { %v6391_v51 = vsel %vm4391_vm3, %v6390_v27, %v6386_v7  ;;  %v6307_v47 = vsel %vm4384_vm2, %v6306_v6, %v6302_v20  ;;  %v2961_v55 = vmul.f32 0.0625, %v2200_v35  ;;  %v2850_v40 = vmul.f32 0.0625, %v1867_v45  ;;  %v8733_v7 = vld [vmem:[%s13836_s0 + $0x4e0] sm:$0xff]  }
 0x2b4   :  { %v8400_v20 = vunpack.c.l.bf16 %v8788_v0  ;;  %v8180_v45 = vunpack.c.l.bf16 %v8733_v7 }
 0x2b5   :  { %v6311_v31 = vrot.slane %v2961_v55, %v10253_v18  ;;  %v5763_v50 = vrot.slane %v2850_v40, %v10267_v28  ;;  %2352 = vadd.xlane.f32.xlu1 %v2351_v58  ;;  %2301 = vadd.xlane.f32.xlu0 %v2300_v38 }
 0x2b6   :  { %v1870_v10 = vpop.xlane.xlu1 %1869  ;;  %v2251_v62 = vpop.xlane.xlu0 %2250  ;;  %v2303_v35 = vsel %vm1036_vm0, %v8400_v20, 0.0  ;;  %v8725_v20 = vld [vmem:[%s13836_s0 + $0x4a0] sm:$0xff]  }
 0x2b7   :  { %v6312_v59 = vsel %vm4391_vm3, %v6311_v31, %v6307_v47  ;;  %v5764_v46 = vsel %vm13869_vm4, %v5763_v50, %v5759_v25  ;;  %v2851_v11 = vmul.f32 0.0625, %v1870_v10  ;;  %v2978_v19 = vmul.f32 0.0625, %v2251_v62  ;;  %v8797_v47 = vld [vmem:[%s13836_s0 + $0x6e0] sm:$0xff]  }
 0x2b8   :  { %v8145_v25 = vunpack.c.h.bf16 %v8724_v57  ;;  %v1973_v50 = vsel %vm1036_vm0, %v8180_v45, 0.0  ;;  %v8401_v62 = vunpack.c.h.bf16 %v8788_v0 }
 0x2b9   :  { %v5768_v33 = vrot.slane %v2851_v11, %v10259_v22  ;;  %v6395_v13 = vrot.slane %v2978_v19, %v10267_v28  ;;  %1971 = vadd.xlane.f32.xlu1 %v1970_v34  ;;  %1920 = vadd.xlane.f32.xlu0 %v1919_v3 }
 0x2ba   :  { %v2254_v27 = vpop.xlane.xlu1 %2253  ;;  %v2203_v6 = vpop.xlane.xlu0 %2202  ;;  %v1922_v10 = vsel %vm1036_vm0, %v8145_v25, 0.0  ;;  %v2306_v0 = vsel %vm1036_vm0, %v8401_v62, 0.0  ;;  %v8798_v62 = vld [vmem:[%s13836_s0 + $0x6e8] sm:$0xff]  }
 0x2bb   :  { %v11810_v58 = vsel %vm13868_vm5, %v5768_v33, %v5764_v46  ;;  %v6396_v38 = vsel %vm13869_vm4, %v6395_v13, %v6391_v51  ;;  %v2979_v48 = vmul.f32 0.0625, %v2254_v27  ;;  %v2962_v2 = vmul.f32 0.0625, %v2203_v6 }
 0x2bc   :  { %v8436_v51 = vunpack.c.l.bf16 %v8797_v47  ;;  %v8181_v13 = vunpack.c.h.bf16 %v8733_v7  ;;  %v8148_v27 = vunpack.c.l.bf16 %v8725_v20 }
 0x2bd   :  { %v6400_v55 = vrot.slane %v2979_v48, %v10259_v22  ;;  %v6316_v40 = vrot.slane %v2962_v2, %v10267_v28  ;;  %2355 = vadd.xlane.f32.xlu1 %v2354_v4  ;;  %2304 = vadd.xlane.f32.xlu0 %v2303_v35  ;;  %v8789_v4 = vld [vmem:[%s13836_s0 + $0x6a0] sm:$0xff]   ;;  %v8437_v48 = vunpack.c.h.bf16 %v8797_v47  ;;  %v8149_v47 = vunpack.c.h.bf16 %v8725_v20  ;;  %v8726_v20 = vld [vmem:[%s13836_s0 + $0x4a8] sm:$0xff]  }
 0x2be   :  { %v11818_v31 = vpop.xlane.xlu1 %1872  ;;  %v1822_v57 = vpop.xlane.xlu0 %1821  ;;  %v2357_v33 = vsel %vm1036_vm0, %v8436_v51, 0.0  ;;  %v1976_v7 = vsel %vm1036_vm0, %v8181_v13, 0.0 }
 0x2bf   :  { %v11823_v34 = vsel %vm13868_vm5, %v6400_v55, %v6396_v38  ;;  %v6317_v3 = vsel %vm13869_vm4, %v6316_v40, %v6312_v59  ;;  %v2835_v56 = vmul.f32 0.0625, %v1822_v57  ;;  %v1925_v38 = vsel %vm1036_vm0, %v8148_v27, 0.0  ;;  %v8734_v55 = vld [vmem:[%s13836_s0 + $0x4e8] sm:$0xff]  }
 0x2c0   :  { %v8184_v51 = vunpack.c.l.bf16 %v8734_v55 }
 0x2c1   :  { %v5689_v46 = vrot.slane %v2835_v56, %v10259_v22  ;;  %1974 = vadd.xlane.f32.xlu1 %v1973_v50  ;;  %1923 = vadd.xlane.f32.xlu0 %v1922_v10  ;;  %v2360_v50 = vsel %vm1036_vm0, %v8437_v48, 0.0  ;;  %v9712_v48 = vld [vmem:[%s13837_s1 + $0x104] ss:$8 sps:$4 sm:$0xff]  }
 0x2c2   :  { %v11830_v11 = vpop.xlane.xlu1 %2256  ;;  %v2206_v19 = vpop.xlane.xlu0 %2205  ;;  %8898 = vmatprep.subr.bf16.mxu1 %v9712_v48 }
 0x2c3   :  { %v11836_v59 = vsel %vm13868_vm5, %v5689_v46, %v11747_v24  ;;  %v2963_v6 = vmul.f32 0.0625, %v2206_v19  ;;  %v8404_v24 = vunpack.c.l.bf16 %v8789_v4  ;;  %v1979_v46 = vsel %vm1036_vm0, %v8184_v51, 0.0 }
 0x2c4   :  { %v1928_v19 = vsel %vm1036_vm0, %v8149_v47, 0.0  ;;  %v8441_v47 = vunpack.c.h.bf16 %v8798_v62 }
 0x2c5   :  { %v6321_v35 = vrot.slane %v2963_v6, %v10259_v22  ;;  %2358 = vadd.xlane.f32.xlu1 %v2357_v33  ;;  %2307 = vadd.xlane.f32.xlu0 %v2306_v0  ;;  %v2309_v10 = vsel %vm1036_vm0, %v8404_v24, 0.0  ;;  %v8440_v33 = vunpack.c.l.bf16 %v8798_v62  ;;  %v8405_v0 = vunpack.c.h.bf16 %v8789_v4  ;;  %v8790_v4 = vld [vmem:[%s13836_s0 + $0x6a8] sm:$0xff]   ;;  %v8799_v62 = vld [vmem:[%s13836_s0 + $0x6f0] sm:$0xff]   ;;  %v8745_v22 = vld [vmem:[%s13836_s0 + $0x540] sm:$0xff]  }
 0x2c6   :  { %v11842_v45 = vpop.xlane.xlu1 %1875  ;;  %v11844_v25 = vpop.xlane.xlu0 %1824  ;;  %v9715_v24 = vld [vmem:[%s13837_s1 + $0x504] ss:$8 sps:$4 sm:$0xff]   ;;  %v8444_v16 = vunpack.c.l.bf16 %v8799_v62  ;;  %v8228_v9 = vunpack.c.l.bf16 %v8745_v22 }
 0x2c7   :  { %v11849_v2 = vsel %vm13868_vm5, %v6321_v35, %v6317_v3  ;;  %v2363_v6 = vsel %vm1036_vm0, %v8440_v33, 0.0  ;;  %v2312_v35 = vsel %vm1036_vm0, %v8405_v0, 0.0  ;;  %9154 = vmatprep.subr.bf16.mxu0 %v9715_v24  ;;  %v2836_v21 = vmul.f32 0.0625, %v11844_v25 }
 0x2c8   :  { %v12001_v63 = vsel %vm1036_vm0, %v8228_v9, 0.0 }
 0x2c9   :  { %1977 = vadd.xlane.f32.xlu1 %v1976_v7  ;;  %1926 = vadd.xlane.f32.xlu0 %v1925_v38  ;;  %v8185_v7 = vunpack.c.h.bf16 %v8734_v55  ;;  %v8152_v38 = vunpack.c.l.bf16 %v8726_v20 }
 0x2ca   :  { %v11854_v40 = vpop.xlane.xlu1 %2259  ;;  %v11856_v57 = vpop.xlane.xlu0 %2208 }
 0x2cb   :  { %v1982_v55 = vsel %vm1036_vm0, %v8185_v7, 0.0  ;;  %v1931_v51 = vsel %vm1036_vm0, %v8152_v38, 0.0  ;;  %v8153_v38 = vunpack.c.h.bf16 %v8726_v20  ;;  %v8727_v20 = vld [vmem:[%s13836_s0 + $0x4b0] sm:$0xff]   ;;  %v2964_v25 = vmul.f32 0.0625, %v11856_v57  ;;  %v12019_v57 = vld [vmem:[%s13836_s0 + $0x748] sm:$0xff]  }
 0x2cd   :  { %2361 = vadd.xlane.f32.xlu1 %v2360_v50  ;;  %2310 = vadd.xlane.f32.xlu0 %v2309_v10 }
 0x2ce   :  { %v11863_v3 = vpop.xlane.xlu1 %1878  ;;  %v11865_v56 = vpop.xlane.xlu0 %1827 }
 0x2cf   :  { %v2837_v60 = vmul.f32 0.0625, %v11865_v56 }
 0x2d1   :  { %1980 = vadd.xlane.f32.xlu1 %v1979_v46  ;;  %1929 = vadd.xlane.f32.xlu0 %v1928_v19  ;;  %v8408_v46 = vunpack.c.l.bf16 %v8790_v4  ;;  %v8735_v19 = vld [vmem:[%s13836_s0 + $0x4f0] sm:$0xff]  }
 0x2d2   :  { %v11872_v13 = vpop.xlane.xlu1 %2262  ;;  %v11874_v27 = vpop.xlane.xlu0 %2211  ;;  %v8188_v7 = vunpack.c.l.bf16 %v8735_v19  ;;  %v8189_v14 = vunpack.c.h.bf16 %v8735_v19  ;;  %v8736_v19 = vld [vmem:[%s13836_s0 + $0x4f8] sm:$0xff]  }
 0x2d3   :  { %v8193_v32 = vunpack.c.h.bf16 %v8736_v19 }
 0x2d5   :  { %2364 = vadd.xlane.f32.xlu1 %v2363_v6  ;;  %2313 = vadd.xlane.f32.xlu0 %v2312_v35  ;;  %v2366_v6 = vsel %vm1036_vm0, %v8441_v47, 0.0  ;;  %v2315_v35 = vsel %vm1036_vm0, %v8408_v46, 0.0  ;;  %v8409_v47 = vunpack.c.h.bf16 %v8790_v4  ;;  %v8791_v4 = vld [vmem:[%s13836_s0 + $0x6b0] sm:$0xff]  }
 0x2d6   :  { %v11887_v50 = vpop.xlane.xlu1 %1881  ;;  %v11889_v10 = vpop.xlane.xlu0 %1830  ;;  %v8413_v53 = vunpack.c.h.bf16 %v8791_v4 }
 0x2d7   :  { %v2318_v36 = vsel %vm1036_vm0, %v8409_v47, 0.0  ;;  %v8800_v47 = vld [vmem:[%s13836_s0 + $0x6f8] sm:$0xff]  }
 0x2d8   :  { %v8448_v26 = vunpack.c.l.bf16 %v8800_v47 }
 0x2d9   :  { %1983 = vadd.xlane.f32.xlu1 %v1982_v55  ;;  %1932 = vadd.xlane.f32.xlu0 %v1931_v51  ;;  %v1985_v55 = vsel %vm1036_vm0, %v8188_v7, 0.0  ;;  %v1934_v51 = vsel %vm1036_vm0, %v8153_v38, 0.0  ;;  %v8156_v7 = vunpack.c.l.bf16 %v8727_v20  ;;  %v8445_v38 = vunpack.c.h.bf16 %v8799_v62  ;;  %v8792_v62 = vld [vmem:[%s13836_s0 + $0x6b8] sm:$0xff]  }
 0x2da   :  { %v11896_v33 = vpop.xlane.xlu1 %2265  ;;  %v11898_v0 = vpop.xlane.xlu0 %2214  ;;  %v8417_v28 = vunpack.c.h.bf16 %v8792_v62 }
 0x2db   :  { %v1937_v30 = vsel %vm1036_vm0, %v8156_v7, 0.0  ;;  %v8157_v7 = vunpack.c.h.bf16 %v8727_v20  ;;  %v8809_v20 = vld [vmem:[%s13836_s0 + $0x740] sm:$0xff]  }
 0x2dd   :  { %2367 = vadd.xlane.f32.xlu1 %v2366_v6  ;;  %2316 = vadd.xlane.f32.xlu0 %v2315_v35  ;;  %v2369_v35 = vsel %vm1036_vm0, %v8444_v16, 0.0  ;;  %v8412_v16 = vunpack.c.l.bf16 %v8791_v4  ;;  %v1940_v4 = vsel %vm1036_vm0, %v8157_v7, 0.0  ;;  %v8485_v7 = vunpack.c.h.bf16 %v8809_v20 }
 0x2de   :  { %v11905_v48 = vpop.xlane.xlu1 %1884  ;;  %v11907_v24 = vpop.xlane.xlu0 %1833 }
 0x2df   :  { %v2321_v44 = vsel %vm1036_vm0, %v8412_v16, 0.0  ;;  %v2375_v16 = vsel %vm1036_vm0, %v8448_v26, 0.0 }
 0x2e1   :  { %1986 = vadd.xlane.f32.xlu1 %v1985_v55  ;;  %1935 = vadd.xlane.f32.xlu0 %v1934_v51  ;;  %v1988_v51 = vsel %vm1036_vm0, %v8189_v14, 0.0  ;;  %v2372_v14 = vsel %vm1036_vm0, %v8445_v38, 0.0 }
 0x2e2   :  { %v11914_v46 = vpop.xlane.xlu1 %2268  ;;  %v11916_v6 = vpop.xlane.xlu0 %2217 }
 0x2e5   :  { %2370 = vadd.xlane.f32.xlu1 %v2369_v35  ;;  %2319 = vadd.xlane.f32.xlu0 %v2318_v36  ;;  %v8728_v36 = vld [vmem:[%s13836_s0 + $0x4b8] sm:$0xff]   ;;  %v8192_v35 = vunpack.c.l.bf16 %v8736_v19  ;;  %v8229_v19 = vunpack.c.h.bf16 %v8745_v22  ;;  %v2852_v22 = vmul.f32 0.0625, %v11818_v31 }
 0x2e6   :  { %v11923_v49 = vpop.xlane.xlu1 %1887  ;;  %v11925_v55 = vpop.xlane.xlu0 %1836  ;;  %v8160_v8 = vunpack.c.l.bf16 %v8728_v36  ;;  %v8161_v38 = vunpack.c.h.bf16 %v8728_v36  ;;  %v1994_v36 = vsel %vm1036_vm0, %v8193_v32, 0.0 }
 0x2e7   :  { %v1991_v18 = vsel %vm1036_vm0, %v8192_v35, 0.0  ;;  %v11973_v35 = vsel %vm1036_vm0, %v8417_v28, 0.0  ;;  %v2853_v28 = vmul.f32 0.0625, %v11842_v45  ;;  %v11993_v29 = vsel %vm1036_vm0, %v8229_v19, 0.0 }
 0x2e8   :  { %v11983_v32 = vsel %vm1036_vm0, %v8161_v38, 0.0 }
 0x2e9   :  { %1989 = vadd.xlane.f32.xlu1 %v1988_v51  ;;  %1938 = vadd.xlane.f32.xlu0 %v1937_v30  ;;  %v8449_v51 = vunpack.c.h.bf16 %v8800_v47  ;;  %v8416_v30 = vunpack.c.l.bf16 %v8792_v62  ;;  %v2324_v47 = vsel %vm1036_vm0, %v8413_v53, 0.0  ;;  %v1943_v62 = vsel %vm1036_vm0, %v8160_v8, 0.0  ;;  %v11978_v53 = vld [vmem:[%s13836_s0 + $0x700] sm:$0xff]  }
 0x2ea   :  { %v11942_v15 = vpop.xlane.xlu1 %2271  ;;  %v11944_v52 = vpop.xlane.xlu0 %2220  ;;  %13894 = vst [vmem:[#allocation29_spill] sm:$0xff] %v11978_v53  ;;  %v2980_v8 = vmul.f32 0.0625, %v11830_v11  ;;  %v2981_v11 = vmul.f32 0.0625, %v11854_v40  ;;  %v8452_v45 = vunpack.c.l.bf16 %v11978_v53  ;;  %v5773_v40 = vrot.slane %v2852_v22, %v10281_v42 }
 0x2eb   :  { %v11970_v26 = vsel %vm1036_vm0, %v8416_v30, 0.0  ;;  %v11988_v30 = vld [vmem:[%s13836_s0 + $0x548] sm:$0xff]  }
 0x2ec   :  { %13895 = vst [vmem:[#allocation30_spill] sm:$0xff] %v11988_v30  ;;  %v8232_v19 = vunpack.c.l.bf16 %v11988_v30  ;;  %v6405_v54 = vrot.slane %v2980_v8, %v10281_v42  ;;  %v6410_v56 = vrot.slane %v2981_v11, %v10278_v41  ;;  %v2965_v8 = vmul.f32 0.0625, %v11874_v27 }
 0x2ed   :  { %2373 = vadd.xlane.f32.xlu1 %v2372_v14  ;;  %2322 = vadd.xlane.f32.xlu0 %v2321_v44  ;;  %v8737_v44 = vld [vmem:[%s13836_s0 + $0x500] sm:$0xff]   ;;  %v11967_v14 = vsel %vm1036_vm0, %v8449_v51, 0.0  ;;  %v8484_v51 = vunpack.c.l.bf16 %v8809_v20  ;;  %v5774_v27 = vsel %vm4412_vm6, %v5773_v40, %v11810_v58  ;;  %v2855_v11 = vmul.f32 0.0625, %v11887_v50 }
 0x2ee   :  { %v11956_v12 = vpop.xlane.xlu1 %1890  ;;  %v11958_v5 = vpop.xlane.xlu0 %1839  ;;  %v8197_v31 = vunpack.c.h.bf16 %v8737_v44  ;;  %v8196_v39 = vunpack.c.l.bf16 %v8737_v44  ;;  %v5694_v44 = vrot.slane %v2836_v21, %v10281_v42  ;;  %v6326_v21 = vrot.slane %v2964_v25, %v10281_v42 }
 0x2ef   :  { %v12014_v9 = vsel %vm1036_vm0, %v8484_v51, 0.0  ;;  %v6331_v40 = vrot.slane %v2965_v8, %v10278_v41  ;;  %v2840_v8 = vmul.f32 0.0625, %v11925_v55  ;;  %v2968_v55 = vmul.f32 0.0625, %v11944_v52 }
 0x2f0   :  { %v12025_v22 = vsel %vm1036_vm0, %v8197_v31, 0.0  ;;  %v12032_v53 = vsel %vm1036_vm0, %v8196_v39, 0.0  ;;  %v6406_v31 = vsel %vm4412_vm6, %v6405_v54, %v11823_v34  ;;  %v5699_v39 = vrot.slane %v2837_v60, %v10278_v41 }
 0x2f1   :  { %1992 = vadd.xlane.f32.xlu1 %v1991_v18  ;;  %1941 = vadd.xlane.f32.xlu0 %v1940_v4  ;;  %v2854_v18 = vmul.f32 0.0625, %v11863_v3  ;;  %v12007_v4 = vsel %vm1036_vm0, %v8485_v7, 0.0  ;;  %v5778_v3 = vrot.slane %v2853_v28, %v10278_v41  ;;  %v2982_v7 = vmul.f32 0.0625, %v11872_v13 }
 0x2f2   :  { %v11996_v38 = vpop.xlane.xlu1 %2274  ;;  %v11998_v20 = vpop.xlane.xlu0 %2223  ;;  %v12035_v28 = vsel %vm1036_vm0, %v8452_v45, 0.0  ;;  %v5695_v25 = vsel %vm4412_vm6, %v5694_v44, %v11836_v59  ;;  %v6411_v58 = vsel %vm13857_vm7, %v6410_v56, %v6406_v31  ;;  %v2983_v54 = vmul.f32 0.0625, %v11896_v33 }
 0x2f3   :  { %v5783_v13 = vrot.slane %v2854_v18, %v10302_v1  ;;  %v5779_v45 = vsel %vm13857_vm7, %v5778_v3, %v5774_v27  ;;  %v6415_v18 = vrot.slane %v2982_v7, %v10302_v1  ;;  %v2966_v60 = vmul.f32 0.0625, %v11898_v0 }
 0x2f4   :  { %v6327_v59 = vsel %vm4412_vm6, %v6326_v21, %v11849_v2  ;;  %v5788_v44 = vrot.slane %v2855_v11, %v10296_v61  ;;  %v2984_v33 = vmul.f32 0.0625, %v11914_v46  ;;  %v2967_v0 = vmul.f32 0.0625, %v11916_v6 }
 0x2f5   :  { %2376 = vadd.xlane.f32.xlu1 %v2375_v16  ;;  %2325 = vadd.xlane.f32.xlu0 %v2324_v47  ;;  %v12040_v16 = vsel %vm1036_vm0, %v8232_v19, 0.0  ;;  %v8488_v47 = vunpack.c.l.bf16 %v12019_v57  ;;  %v2838_v19 = vmul.f32 0.0625, %v11889_v10  ;;  %v5784_v3 = vsel %vm4426_vm8, %v5783_v13, %v5779_v45 }
 0x2f6   :  { %v1894_v51 = vpop.xlane.xlu1 %1893  ;;  %v12029_v30 = vpop.xlane.xlu0 %1842  ;;  %v2856_v10 = vmul.f32 0.0625, %v11905_v48  ;;  %v6416_v7 = vsel %vm4426_vm8, %v6415_v18, %v6411_v58  ;;  %v2857_v2 = vmul.f32 0.0625, %v11923_v49  ;;  %v6332_v48 = vsel %vm13857_vm7, %v6331_v40, %v6327_v59 }
 0x2f7   :  { %v5704_v56 = vrot.slane %v2838_v19, %v10302_v1  ;;  %v6336_v46 = vrot.slane %v2966_v60, %v10302_v1  ;;  %v2985_v6 = vmul.f32 0.0625, %v11942_v15  ;;  %v6425_v31 = vrot.slane %v2984_v33, %v10319_v23 }
 0x2f8   :  { %v5793_v27 = vrot.slane %v2856_v10, %v10319_v23  ;;  %v2841_v11 = vmul.f32 0.0625, %v11958_v5  ;;  %v5798_v45 = vrot.slane %v2857_v2, %v10313_v17  ;;  %v2859_v18 = vmul.f32 0.0625, %v1894_v51 }
 0x2f9   :  { %1995 = vadd.xlane.f32.xlu1 %v1994_v36  ;;  %1944 = vadd.xlane.f32.xlu0 %v1943_v62  ;;  %v2839_v36 = vmul.f32 0.0625, %v11907_v24  ;;  %v5700_v62 = vsel %vm13857_vm7, %v5699_v39, %v5695_v25  ;;  %v6420_v24 = vrot.slane %v2983_v54, %v10296_v61  ;;  %v6341_v39 = vrot.slane %v2967_v0, %v10296_v61 }
 0x2fa   :  { %v2278_v34 = vpop.xlane.xlu1 %2277  ;;  %v12058_v50 = vpop.xlane.xlu0 %2226  ;;  %v5705_v15 = vsel %vm4426_vm8, %v5704_v56, %v5700_v62  ;;  %v5714_v25 = vrot.slane %v2840_v8, %v10319_v23  ;;  %vm6926_vm7 = vcmask 1041409   ;;  %v6337_v52 = vsel %vm4426_vm8, %v6336_v46, %v6332_v48  ;;  %v13896_v56 = vld [vmem:[#allocation12_spill] sm:$0xff] }
 0x2fb   :  { %v5709_v49 = vrot.slane %v2839_v36, %v10296_v61  ;;  %v6430_v19 = vrot.slane %v2985_v6, %v10313_v17  ;;  %v6346_v51 = vrot.slane %v2968_v55, %v10319_v23  ;;  %v6342_v59 = vsel %vm4433_vm9, %v6341_v39, %v6337_v52  ;;  %v13897_v55 = vld [vmem:[#allocation11_spill] sm:$0xff]  ;;  %v13898_v52 = vld [vmem:[#allocation14_spill] sm:$0xff] }
 0x2fc   :  { %v2986_v10 = vmul.f32 0.0625, %v11996_v38  ;;  %v2987_v33 = vmul.f32 0.0625, %v2278_v34  ;;  %v2842_v6 = vmul.f32 0.0625, %v12029_v30 }
 0x2fd   :  { %2379 = vadd.xlane.f32.xlu1 %v11967_v14  ;;  %2328 = vadd.xlane.f32.xlu0 %v11970_v26  ;;  %v2858_v14 = vmul.f32 0.0625, %v11956_v12  ;;  %v5789_v26 = vsel %vm4433_vm9, %v5788_v44, %v5784_v3  ;;  %v6421_v12 = vsel %vm4433_vm9, %v6420_v24, %v6416_v7  ;;  %v5710_v60 = vsel %vm4433_vm9, %v5709_v49, %v5705_v15 }
 0x2fe   :  { %v1897_v21 = vpop.xlane.xlu1 %1896  ;;  %v1846_v13 = vpop.xlane.xlu0 %1845  ;;  %v5794_v54 = vsel %vm4440_vm10, %v5793_v27, %v5789_v26  ;;  %v5719_v3 = vrot.slane %v2841_v11, %v10313_v17  ;;  %v5715_v62 = vsel %vm4440_vm10, %v5714_v25, %v5710_v60  ;;  %v5808_v44 = vrot.slane %v2859_v18, %v10330_v37 }
 0x2ff   :  { %v2860_v58 = vmul.f32 0.0625, %v1897_v21  ;;  %v5799_v36 = vsel %vm4447_vm11, %v5798_v45, %v5794_v54  ;;  %v2969_v7 = vmul.f32 0.0625, %v11998_v20  ;;  %v6347_v24 = vsel %vm4440_vm10, %v6346_v51, %v6342_v59  ;;  %v13899_v54 = vld [vmem:[#allocation29_spill] sm:$0xff] }
 0x300   :  { %v2970_v21 = vmul.f32 0.0625, %v12058_v50  ;;  %v2843_v27 = vmul.f32 0.0625, %v1846_v13  ;;  %v6440_v20 = vrot.slane %v2987_v33, %v10330_v37  ;;  %v5724_v13 = vrot.slane %v2842_v6, %v10336_v43  ;;  %v12147_v33 = vld [vmem:[%s13836_s0 + $0x508] sm:$0xff]  }
 0x301   :  { %2331 = vadd.xlane.f32.xlu1 %v11973_v35  ;;  %1947 = vadd.xlane.f32.xlu0 %v11983_v32  ;;  %v5803_v35 = vrot.slane %v2858_v14, %v10336_v43  ;;  %v6426_v32 = vsel %vm4440_vm10, %v6425_v31, %v6421_v12  ;;  %v5813_v2 = vrot.slane %v2860_v58, %v13896_v56  ;;  %v8453_v60 = vunpack.c.h.bf16 %v13899_v54 }
 0x302   :  { %v2281_v5 = vpop.xlane.xlu1 %2280  ;;  %v2230_v40 = vpop.xlane.xlu0 %2229  ;;  %v6431_v0 = vsel %vm4447_vm11, %v6430_v19, %v6426_v32  ;;  %v6351_v30 = vrot.slane %v2969_v7, %v10313_v17  ;;  %v5729_v12 = vrot.slane %v2843_v27, %v10330_v37  ;;  %v8200_v27 = vunpack.c.l.bf16 %v12147_v33 }
 0x303   :  { %v2988_v8 = vmul.f32 0.0625, %v2281_v5  ;;  %v5804_v46 = vsel %vm4454_vm12, %v5803_v35, %v5799_v36  ;;  %v2971_v49 = vmul.f32 0.0625, %v2230_v40 }
 0x304   :  { %v5809_v26 = vsel %vm4461_vm13, %v5808_v44, %v5804_v46  ;;  %v6352_v51 = vsel %vm4447_vm11, %v6351_v30, %v6347_v24  ;;  %v2384_v46 = vsel %vm1036_vm0, %v8453_v60, 0.0  ;;  %v9717_v30 = vld [vmem:[%s13837_s1 + $0x500] ss:$8 sps:$4 sm:$0xff]  }
 0x305   :  { %2049 = vadd.xlane.f32.xlu1 %v11993_v29  ;;  %2046 = vadd.xlane.f32.xlu0 %v12001_v63  ;;  %v5720_v29 = vsel %vm4447_vm11, %v5719_v3, %v5715_v62  ;;  %v6435_v63 = vrot.slane %v2986_v10, %v10336_v43  ;;  %v6445_v31 = vrot.slane %v2988_v8, %v13896_v56  ;;  %v2435_v8 = vsel %vm1036_vm0, %v8488_v47, 0.0  ;;  %v13901_v47 = vld [vmem:[#allocation30_spill] sm:$0xff] }
 0x306   :  { %v1900_v48 = vpop.xlane.xlu1 %1899  ;;  %v1849_v38 = vpop.xlane.xlu0 %1848  ;;  %v5814_v50 = vsel %vm4468_vm14, %v5813_v2, %v5809_v26  ;;  %v6361_v58 = vrot.slane %v2971_v49, %v10330_v37  ;;  %v5725_v36 = vsel %vm4454_vm12, %v5724_v13, %v5720_v29  ;;  %v9714_v26 = vld [vmem:[%s13837_s1 + $0x100] ss:$8 sps:$4 sm:$0xff]   ;;  %v9721_v13 = vld [vmem:[%s13837_s1 + $0x514] ss:$8 sps:$4 sm:$0xff]  }
 0x307   :  { %v2861_v34 = vmul.f32 0.0625, %v1900_v48  ;;  %v2844_v39 = vmul.f32 0.0625, %v1849_v38  ;;  %v5730_v7 = vsel %vm4461_vm13, %v5729_v12, %v5725_v36 }
 0x309   :  { %v5818_v14 = vrot.slane %v2861_v34, %v13897_v55  ;;  %2433 = vadd.xlane.f32.xlu1 %v12007_v4  ;;  %2430 = vadd.xlane.f32.xlu0 %v12014_v9  ;;  %v6436_v4 = vsel %vm4454_vm12, %v6435_v63, %v6431_v0  ;;  %v6356_v9 = vrot.slane %v2970_v21, %v10336_v43  ;;  %v8233_v21 = vunpack.c.h.bf16 %v13901_v47 }
 0x30a   :  { %v2284_v11 = vpop.xlane.xlu1 %2283  ;;  %v2233_v15 = vpop.xlane.xlu0 %2232  ;;  %v6441_v40 = vsel %vm4461_vm13, %v6440_v20, %v6436_v4  ;;  %v5734_v35 = vrot.slane %v2844_v39, %v13896_v56  ;;  %v12169_v20 = vld [vmem:[%s13836_s0 + $0x708] sm:$0xff]  }
 0x30b   :  { %v2989_v45 = vmul.f32 0.0625, %v2284_v11  ;;  %v2972_v25 = vmul.f32 0.0625, %v2233_v15  ;;  %v5819_v18 = vsel %vm4475_vm15, %v5818_v14, %v5814_v50  ;;  %v6446_v10 = vsel %vm4468_vm14, %v6445_v31, %v6441_v40  ;;  %v13902_v31 = vld [vmem:[#allocation13_spill] sm:$0xff]  ;;  %v9718_v50 = vld [vmem:[%s13837_s1 + $0x114] ss:$8 sps:$4 sm:$0xff]  }
 0x30c   :  { %v6928_v19 = vsel %vm6926_vm7, %v5819_v18, %v13898_v52  ;;  %v6357_v0 = vsel %vm4454_vm12, %v6356_v9, %v6352_v51  ;;  %v5735_v29 = vsel %vm4468_vm14, %v5734_v35, %v5730_v7  ;;  %v13903_v11 = vld [vmem:[#allocation21_spill] sm:$0xff]  ;;  %v2054_v52 = vsel %vm1036_vm0, %v8233_v21, 0.0  ;;  %v12198_v40 = vld [vmem:[%s13836_s0 + $0x550] sm:$0xff]  }
 0x30d   :  { %v6450_v5 = vrot.slane %v2989_v45, %v13897_v55  ;;  %2001 = vadd.xlane.f32.xlu1 %v12025_v22  ;;  %7023 = vmatprep.mubr.f32.mxu1 %v6928_v19  ;;  %v6366_v32 = vrot.slane %v2972_v25, %v13896_v56  ;;  %v6362_v48 = vsel %vm4461_vm13, %v6361_v58, %v6357_v0  ;;  %v13904_v45 = vld [vmem:[#allocation6_spill] sm:$0xff]  ;;  %v13905_v18 = vld [vmem:[#allocation5_spill] sm:$0xff]  ;;  %v2003_v19 = vsel %vm1036_vm0, %v8200_v27, 0.0 }
 0x30e   :  { %1998 = vadd.xlane.f32.xlu0 %v12032_v53  ;;  %v2236_v59 = vpop.xlane.xlu1 %2235  ;;  %v1852_v3 = vpop.xlane.xlu0 %1851  ;;  %v13900_v53 = vld [vmem:[#allocation22_spill] sm:$0xff]  ;;  %v8489_v58 = vunpack.c.h.bf16 %v12019_v57  ;;  %v8236_v0 = vunpack.c.l.bf16 %v12198_v40  ;;  %v8201_v7 = vunpack.c.h.bf16 %v12147_v33  ;;  %v9729_v33 = vld [vmem:[%s13837_s1 + $0x520] ss:$8 sps:$4 sm:$0xff]  }
 0x30f   :  { %v2973_v22 = vmul.f32 0.0625, %v2236_v59  ;;  %v2845_v62 = vmul.f32 0.0625, %v1852_v3  ;;  %v6451_v44 = vsel %vm4475_vm15, %v6450_v5, %v6446_v10  ;;  %v6367_v63 = vsel %vm4468_vm14, %v6366_v32, %v6362_v48  ;;  %v9720_v35 = vld [vmem:[%s13837_s1 + $0x110] ss:$8 sps:$4 sm:$0xff]   ;;  %v9724_v32 = vld [vmem:[%s13837_s1 + $0x124] ss:$8 sps:$4 sm:$0xff]  }
 0x310   :  { %v6936_v2 = vsel %vm6926_vm7, %v6451_v44, %v13900_v53  ;;  %v8456_v5 = vunpack.c.l.bf16 %v12169_v20  ;;  %v9723_v57 = vld [vmem:[%s13837_s1 + $0x510] ss:$8 sps:$4 sm:$0xff]   ;;  %v9727_v59 = vld [vmem:[%s13837_s1 + $0x524] ss:$8 sps:$4 sm:$0xff]   ;;  %v2057_v47 = vsel %vm1036_vm0, %v8236_v0, 0.0  ;;  %v2006_v21 = vsel %vm1036_vm0, %v8201_v7, 0.0 }
 0x311   :  { %v6371_v38 = vrot.slane %v2973_v22, %v13897_v55  ;;  %v5739_v24 = vrot.slane %v2845_v62, %v13897_v55  ;;  %2382 = vadd.xlane.f32.xlu1 %v12035_v28  ;;  %7307 = vmatprep.mubr.f32.mxu0 %v6936_v2  ;;  %v2438_v62 = vsel %vm1036_vm0, %v8489_v58, 0.0  ;;  %v12224_v53 = vld [vmem:[%s13836_s0 + $0x750] sm:$0xff]  }
 0x312   :  { %2052 = vadd.xlane.f32.xlu0 %v12040_v16  ;;  %v1954_v6 = vpop.xlane.xlu1 %1953  ;;  %v1951_v34 = vpop.xlane.xlu0 %1950  ;;  %v2387_v44 = vsel %vm1036_vm0, %v8456_v5, 0.0  ;;  %v8492_v27 = vunpack.c.l.bf16 %v12224_v53 }
 0x313   :  { %v2879_v28 = vmul.f32 0.0625, %v1954_v6  ;;  %v2878_v49 = vmul.f32 0.0625, %v1951_v34  ;;  %v5740_v14 = vsel %vm4475_vm15, %v5739_v24, %v5735_v29  ;;  %v6372_v16 = vsel %vm4475_vm15, %v6371_v38, %v6367_v63  ;;  %v9726_v38 = vld [vmem:[%s13837_s1 + $0x120] ss:$8 sps:$4 sm:$0xff]   ;;  %v9730_v24 = vld [vmem:[%s13837_s1 + $0x134] ss:$8 sps:$4 sm:$0xff]  }
 0x314   :  { %v6927_v39 = vsel %vm6926_vm7, %v5740_v14, %v13902_v31  ;;  %v6935_v15 = vsel %vm6926_vm7, %v6372_v16, %v13903_v11  ;;  %v12253_v16 = vld [vmem:[%s13836_s0 + $0x510] sm:$0xff]   ;;  %v9739_v31 = vld [vmem:[%s13837_s1 + $0x544] ss:$8 sps:$4 sm:$0xff]  }
 0x315   :  { %v5906_v25 = vrot.slane %v2879_v28, %v13904_v45  ;;  %v5902_v4 = vrot.slane %v2878_v49, %v13905_v18  ;;  %2436 = vadd.xlane.f32.xlu1 %v2435_v8  ;;  %7024 = vmatmul.mubr.f32.vlgmr.msra.gmra.mrb[0].mxu1 %v6927_v39  ;;  %v8457_v28 = vunpack.c.h.bf16 %v12169_v20  ;;  %v9736_v20 = vld [vmem:[%s13837_s1 + $0x144] ss:$8 sps:$4 sm:$0xff]   ;;  %v13906_v11 = vld [vmem:[#allocation7_spill] sm:$0xff] }
 0x316   :  { %2385 = vadd.xlane.f32.xlu0 %v2384_v46  ;;  %7308 = vmatmul.mubr.f32.vlgmr.msra.gmra.mrb[0].mxu0 %v6935_v15  ;;  %v2338_v9 = vpop.xlane.xlu1 %2337  ;;  %v2335_v12 = vpop.xlane.xlu0 %2334  ;;  %v9733_v46 = vld [vmem:[%s13837_s1 + $0x534] ss:$8 sps:$4 sm:$0xff]  }
 0x317   :  { %v12201_v54 = vsel %vm4377_vm1, %v5906_v25, %v5902_v4  ;;  %v3007_v60 = vmul.f32 0.0625, %v2338_v9  ;;  %v3006_v51 = vmul.f32 0.0625, %v2335_v12  ;;  %8900 = vmatpush1.bf16.msra.mxu1 %v9714_v26  ;;  %9156 = vmatpush1.bf16.msra.mxu0 %v9717_v30  ;;  %v9732_v26 = vld [vmem:[%s13837_s1 + $0x130] ss:$8 sps:$4 sm:$0xff]   ;;  %v2441_v25 = vsel %vm1036_vm0, %v8492_v27, 0.0 }
 0x318   :  { %8902 = vmatprep.subr.bf16.mxu1 %v9718_v50  ;;  %9158 = vmatprep.subr.bf16.mxu0 %v9721_v13  ;;  %v9735_v30 = vld [vmem:[%s13837_s1 + $0x530] ss:$8 sps:$4 sm:$0xff]   ;;  %v2390_v4 = vsel %vm1036_vm0, %v8457_v28, 0.0  ;;  %v8237_v9 = vunpack.c.h.bf16 %v12198_v40  ;;  %v8204_v12 = vunpack.c.l.bf16 %v12253_v16  ;;  %v9741_v40 = vld [vmem:[%s13837_s1 + $0x540] ss:$8 sps:$4 sm:$0xff]   ;;  %v8205_v27 = vunpack.c.h.bf16 %v12253_v16 }
 0x319   :  { %v6538_v3 = vrot.slane %v3007_v60, %v13904_v45  ;;  %v6534_v10 = vrot.slane %v3006_v51, %v13905_v18  ;;  %2055 = vadd.xlane.f32.xlu1 %v2054_v52  ;;  %v12275_v52 = vld [vmem:[%s13836_s0 + $0x710] sm:$0xff]   ;;  %v9738_v60 = vld [vmem:[%s13837_s1 + $0x140] ss:$8 sps:$4 sm:$0xff]   ;;  %v12327_v28 = vld [vmem:[%s13836_s0 + $0x758] sm:$0xff]  }
 0x31a   :  { %2004 = vadd.xlane.f32.xlu0 %v2003_v19  ;;  %v1906_v36 = vpop.xlane.xlu1 %1905  ;;  %v1903_v22 = vpop.xlane.xlu0 %1902  ;;  %v9742_v51 = vld [vmem:[%s13837_s1 + $0x154] ss:$8 sps:$4 sm:$0xff]   ;;  %v9753_v16 = vld [vmem:[%s13837_s1 + $0x560] ss:$8 sps:$4 sm:$0xff]  }
 0x31b   :  { %v12227_v2 = vsel %vm4377_vm1, %v6538_v3, %v6534_v10  ;;  %v2863_v8 = vmul.f32 0.0625, %v1906_v36  ;;  %v2862_v48 = vmul.f32 0.0625, %v1903_v22  ;;  %8904 = vmatpush1.bf16.msra.mxu1 %v9720_v35  ;;  %9160 = vmatpush1.bf16.msra.mxu0 %v9723_v57  ;;  %v2060_v10 = vsel %vm1036_vm0, %v8237_v9, 0.0 }
 0x31c   :  { %8906 = vmatprep.subr.bf16.mxu1 %v9724_v32  ;;  %9162 = vmatprep.subr.bf16.mxu0 %v9727_v59  ;;  %v2009_v36 = vsel %vm1036_vm0, %v8204_v12, 0.0  ;;  %v8493_v22 = vunpack.c.h.bf16 %v12224_v53  ;;  %v9744_v53 = vld [vmem:[%s13837_s1 + $0x150] ss:$8 sps:$4 sm:$0xff]   ;;  %v2012_v9 = vsel %vm1036_vm0, %v8205_v27, 0.0  ;;  %v8496_v12 = vunpack.c.l.bf16 %v12327_v28 }
 0x31d   :  { %v5827_v6 = vrot.slane %v2863_v8, %v13904_v45  ;;  %v5823_v34 = vrot.slane %v2862_v48, %v13905_v18  ;;  %2439 = vadd.xlane.f32.xlu1 %v2438_v62  ;;  %v8460_v62 = vunpack.c.l.bf16 %v12275_v52 }
 0x31e   :  { %2388 = vadd.xlane.f32.xlu0 %v2387_v44  ;;  %v2287_v29 = vpop.xlane.xlu1 %2286  ;;  %v1957_v63 = vpop.xlane.xlu0 %1956  ;;  %v12301_v44 = vld [vmem:[%s13836_s0 + $0x558] sm:$0xff]  }
 0x31f   :  { %v12248_v49 = vsel %vm4377_vm1, %v5827_v6, %v5823_v34  ;;  %v2880_v14 = vmul.f32 0.0625, %v1957_v63  ;;  %8908 = vmatpush1.bf16.msra.mxu1 %v9726_v38  ;;  %9164 = vmatpush1.bf16.msra.mxu0 %v9729_v33  ;;  %v2990_v39 = vmul.f32 0.0625, %v2287_v29  ;;  %v9747_v38 = vld [vmem:[%s13837_s1 + $0x550] ss:$8 sps:$4 sm:$0xff]   ;;  %v9751_v33 = vld [vmem:[%s13837_s1 + $0x564] ss:$8 sps:$4 sm:$0xff]  }
 0x320   :  { %8910 = vmatprep.subr.bf16.mxu1 %v9730_v24  ;;  %9166 = vmatprep.subr.bf16.mxu0 %v9733_v46  ;;  %v13907_v24 = vld [vmem:[#allocation8_spill] sm:$0xff]  ;;  %v2444_v63 = vsel %vm1036_vm0, %v8493_v22, 0.0  ;;  %v2447_v22 = vsel %vm1036_vm0, %v8496_v12, 0.0 }
 0x321   :  { %v5911_v15 = vrot.slane %v2880_v14, %v13906_v11  ;;  %2058 = vadd.xlane.f32.xlu1 %v2057_v47  ;;  %v6455_v35 = vrot.slane %v2990_v39, %v13905_v18  ;;  %v2393_v47 = vsel %vm1036_vm0, %v8460_v62, 0.0  ;;  %v9754_v39 = vld [vmem:[%s13837_s1 + $0x174] ss:$8 sps:$4 sm:$0xff]  }
 0x322   :  { %2007 = vadd.xlane.f32.xlu0 %v2006_v21  ;;  %v2341_v50 = vpop.xlane.xlu1 %2340  ;;  %v2290_v13 = vpop.xlane.xlu0 %2289  ;;  %v8240_v21 = vunpack.c.l.bf16 %v12301_v44 }
 0x323   :  { %v5912_v19 = vsel %vm4384_vm2, %v5911_v15, %v12201_v54  ;;  %v3008_v58 = vmul.f32 0.0625, %v2341_v50  ;;  %v2991_v5 = vmul.f32 0.0625, %v2290_v13  ;;  %8912 = vmatpush1.bf16.msra.mxu1 %v9732_v26  ;;  %9168 = vmatpush1.bf16.msra.mxu0 %v9735_v30  ;;  %v9745_v54 = vld [vmem:[%s13837_s1 + $0x554] ss:$8 sps:$4 sm:$0xff]  }
 0x324   :  { %8914 = vmatprep.subr.bf16.mxu1 %v9736_v20  ;;  %9170 = vmatprep.subr.bf16.mxu0 %v9739_v31  ;;  %v9750_v31 = vld [vmem:[%s13837_s1 + $0x160] ss:$8 sps:$4 sm:$0xff]  }
 0x325   :  { %v6543_v57 = vrot.slane %v3008_v58, %v13906_v11  ;;  %v6459_v32 = vrot.slane %v2991_v5, %v13904_v45  ;;  %2442 = vadd.xlane.f32.xlu1 %v2441_v25  ;;  %v12353_v58 = vld [vmem:[%s13836_s0 + $0x518] sm:$0xff]  }
 0x326   :  { %2391 = vadd.xlane.f32.xlu0 %v2390_v4  ;;  %v1960_v59 = vpop.xlane.xlu1 %1959  ;;  %v1909_v3 = vpop.xlane.xlu0 %1908  ;;  %v2063_v4 = vsel %vm1036_vm0, %v8240_v21, 0.0 }
 0x327   :  { %v6544_v0 = vsel %vm4384_vm2, %v6543_v57, %v12227_v2  ;;  %v6460_v7 = vsel %vm4377_vm1, %v6459_v32, %v6455_v35  ;;  %v2881_v8 = vmul.f32 0.0625, %v1960_v59  ;;  %v2864_v48 = vmul.f32 0.0625, %v1909_v3  ;;  %8916 = vmatpush1.bf16.msra.mxu1 %v9738_v60  ;;  %9172 = vmatpush1.bf16.msra.mxu0 %v9741_v40  ;;  %v9748_v2 = vld [vmem:[%s13837_s1 + $0x164] ss:$8 sps:$4 sm:$0xff]  }
 0x328   :  { %8918 = vmatprep.subr.bf16.mxu1 %v9742_v51  ;;  %9174 = vmatprep.subr.bf16.mxu0 %v9745_v54  ;;  %v9756_v54 = vld [vmem:[%s13837_s1 + $0x170] ss:$8 sps:$4 sm:$0xff]   ;;  %v9760_v35 = vld [vmem:[%s13837_s1 + $0x184] ss:$8 sps:$4 sm:$0xff]  }
 0x329   :  { %v5916_v46 = vrot.slane %v2881_v8, %v13907_v24  ;;  %v5832_v6 = vrot.slane %v2864_v48, %v13906_v11  ;;  %2061 = vadd.xlane.f32.xlu1 %v2060_v10  ;;  %v9763_v57 = vld [vmem:[%s13837_s1 + $0x584] ss:$8 sps:$4 sm:$0xff]   ;;  %v12378_v8 = vld [vmem:[%s13836_s0 + $0x718] sm:$0xff]  }
 0x32a   :  { %2010 = vadd.xlane.f32.xlu0 %v2009_v36  ;;  %v2344_v34 = vpop.xlane.xlu1 %2343  ;;  %v2293_v29 = vpop.xlane.xlu0 %2292  ;;  %v13908_v32 = vld [vmem:[#allocation10_spill] sm:$0xff] }
 0x32b   :  { %v5917_v14 = vsel %vm4391_vm3, %v5916_v46, %v5912_v19  ;;  %v5833_v26 = vsel %vm4384_vm2, %v5832_v6, %v12248_v49  ;;  %v3009_v30 = vmul.f32 0.0625, %v2344_v34  ;;  %v2992_v20 = vmul.f32 0.0625, %v2293_v29  ;;  %8920 = vmatpush1.bf16.msra.mxu1 %v9744_v53  ;;  %9176 = vmatpush1.bf16.msra.mxu0 %v9747_v38  ;;  %v9757_v49 = vld [vmem:[%s13837_s1 + $0x574] ss:$8 sps:$4 sm:$0xff]  }
 0x32c   :  { %8922 = vmatprep.subr.bf16.mxu1 %v9748_v2  ;;  %9178 = vmatprep.subr.bf16.mxu0 %v9751_v33  ;;  %v8461_v19 = vunpack.c.h.bf16 %v12275_v52  ;;  %v9759_v52 = vld [vmem:[%s13837_s1 + $0x570] ss:$8 sps:$4 sm:$0xff]   ;;  %v9762_v33 = vld [vmem:[%s13837_s1 + $0x180] ss:$8 sps:$4 sm:$0xff]   ;;  %v9766_v46 = vld [vmem:[%s13837_s1 + $0x194] ss:$8 sps:$4 sm:$0xff]  }
 0x32d   :  { %v6548_v15 = vrot.slane %v3009_v30, %v13907_v24  ;;  %v6464_v50 = vrot.slane %v2992_v20, %v13906_v11  ;;  %2445 = vadd.xlane.f32.xlu1 %v2444_v63  ;;  %v9769_v6 = vld [vmem:[%s13837_s1 + $0x594] ss:$8 sps:$4 sm:$0xff]   ;;  %v12403_v30 = vld [vmem:[%s13836_s0 + $0x560] sm:$0xff]  }
 0x32e   :  { %2394 = vadd.xlane.f32.xlu0 %v2393_v47  ;;  %v1963_v13 = vpop.xlane.xlu1 %1962  ;;  %v1912_v25 = vpop.xlane.xlu0 %1911  ;;  %v2396_v62 = vsel %vm1036_vm0, %v8461_v19, 0.0 }
 0x32f   :  { %v6549_v5 = vsel %vm4391_vm3, %v6548_v15, %v6544_v0  ;;  %v6465_v60 = vsel %vm4384_vm2, %v6464_v50, %v6460_v7  ;;  %v2882_v40 = vmul.f32 0.0625, %v1963_v13  ;;  %v2865_v51 = vmul.f32 0.0625, %v1912_v25  ;;  %8924 = vmatpush1.bf16.msra.mxu1 %v9750_v31  ;;  %9180 = vmatpush1.bf16.msra.mxu0 %v9753_v16  ;;  %v9772_v15 = vld [vmem:[%s13837_s1 + $0x1a4] ss:$8 sps:$4 sm:$0xff]  }
 0x330   :  { %8926 = vmatprep.subr.bf16.mxu1 %v9754_v39  ;;  %9182 = vmatprep.subr.bf16.mxu0 %v9757_v49  ;;  %v8241_v0 = vunpack.c.h.bf16 %v12301_v44  ;;  %v8208_v7 = vunpack.c.l.bf16 %v12353_v58  ;;  %v9765_v44 = vld [vmem:[%s13837_s1 + $0x580] ss:$8 sps:$4 sm:$0xff]   ;;  %v9768_v49 = vld [vmem:[%s13837_s1 + $0x190] ss:$8 sps:$4 sm:$0xff]   ;;  %v9775_v50 = vld [vmem:[%s13837_s1 + $0x5a4] ss:$8 sps:$4 sm:$0xff]  }
 0x331   :  { %v5921_v59 = vrot.slane %v2882_v40, %v13908_v32  ;;  %v5837_v3 = vrot.slane %v2865_v51, %v13907_v24  ;;  %2064 = vadd.xlane.f32.xlu1 %v2063_v4  ;;  %v13909_v13 = vld [vmem:[#allocation9_spill] sm:$0xff]  ;;  %v8209_v40 = vunpack.c.h.bf16 %v12353_v58 }
 0x332   :  { %2013 = vadd.xlane.f32.xlu0 %v2012_v9  ;;  %v2347_v10 = vpop.xlane.xlu1 %2346  ;;  %v2296_v36 = vpop.xlane.xlu0 %2295  ;;  %v2066_v21 = vsel %vm1036_vm0, %v8241_v0, 0.0  ;;  %v2015_v27 = vsel %vm1036_vm0, %v8208_v7, 0.0  ;;  %v12428_v51 = vld [vmem:[%s13836_s0 + $0x760] sm:$0xff]  }
 0x333   :  { %v5922_v48 = vsel %vm13869_vm4, %v5921_v59, %v5917_v14  ;;  %v5838_v53 = vsel %vm4391_vm3, %v5837_v3, %v5833_v26  ;;  %v3010_v38 = vmul.f32 0.0625, %v2347_v10  ;;  %v2993_v2 = vmul.f32 0.0625, %v2296_v36  ;;  %8928 = vmatpush1.bf16.msra.mxu1 %v9756_v54  ;;  %9184 = vmatpush1.bf16.msra.mxu0 %v9759_v52  ;;  %v9774_v59 = vld [vmem:[%s13837_s1 + $0x1a0] ss:$8 sps:$4 sm:$0xff]   ;;  %v9778_v3 = vld [vmem:[%s13837_s1 + $0x1b4] ss:$8 sps:$4 sm:$0xff]  }
 0x334   :  { %8930 = vmatprep.subr.bf16.mxu1 %v9760_v35  ;;  %9186 = vmatprep.subr.bf16.mxu0 %v9763_v57  ;;  %v8497_v14 = vunpack.c.h.bf16 %v12327_v28  ;;  %v8464_v26 = vunpack.c.l.bf16 %v12378_v8  ;;  %v9771_v28 = vld [vmem:[%s13837_s1 + $0x590] ss:$8 sps:$4 sm:$0xff]   ;;  %v9777_v58 = vld [vmem:[%s13837_s1 + $0x5a0] ss:$8 sps:$4 sm:$0xff]   ;;  %v9781_v10 = vld [vmem:[%s13837_s1 + $0x5b4] ss:$8 sps:$4 sm:$0xff]  }
 0x335   :  { %v6553_v34 = vrot.slane %v3010_v38, %v13908_v32  ;;  %v6469_v29 = vrot.slane %v2993_v2, %v13907_v24  ;;  %2448 = vadd.xlane.f32.xlu1 %v2447_v22 }
 0x336   :  { %2397 = vadd.xlane.f32.xlu0 %v2396_v62  ;;  %v1966_v63 = vpop.xlane.xlu1 %1965  ;;  %v1915_v47 = vpop.xlane.xlu0 %1914  ;;  %v2450_v19 = vsel %vm1036_vm0, %v8497_v14, 0.0  ;;  %v8245_v14 = vunpack.c.h.bf16 %v12403_v30 }
 0x337   :  { %v6554_v20 = vsel %vm13869_vm4, %v6553_v34, %v6549_v5  ;;  %v6470_v31 = vsel %vm4391_vm3, %v6469_v29, %v6465_v60  ;;  %v2883_v16 = vmul.f32 0.0625, %v1966_v63  ;;  %v2866_v39 = vmul.f32 0.0625, %v1915_v47  ;;  %8932 = vmatpush1.bf16.msra.mxu1 %v9762_v33  ;;  %9188 = vmatpush1.bf16.msra.mxu0 %v9765_v44  ;;  %v12467_v34 = vld [vmem:[%s13836_s0 + $0x520] sm:$0xff]  }
 0x338   :  { %8934 = vmatprep.subr.bf16.mxu1 %v9766_v46  ;;  %9190 = vmatprep.subr.bf16.mxu0 %v9769_v6  ;;  %v2399_v5 = vsel %vm1036_vm0, %v8464_v26, 0.0  ;;  %v8244_v60 = vunpack.c.l.bf16 %v12403_v30  ;;  %v8465_v44 = vunpack.c.h.bf16 %v12378_v8  ;;  %v9780_v46 = vld [vmem:[%s13837_s1 + $0x1b0] ss:$8 sps:$4 sm:$0xff]   ;;  %v9784_v8 = vld [vmem:[%s13837_s1 + $0x1c4] ss:$8 sps:$4 sm:$0xff]  }
 0x339   :  { %v5926_v25 = vrot.slane %v2883_v16, %v13909_v13  ;;  %v5842_v4 = vrot.slane %v2866_v39, %v13908_v32  ;;  %2067 = vadd.xlane.f32.xlu1 %v2066_v21  ;;  %v9783_v6 = vld [vmem:[%s13837_s1 + $0x5b0] ss:$8 sps:$4 sm:$0xff]   ;;  %v9787_v29 = vld [vmem:[%s13837_s1 + $0x5c4] ss:$8 sps:$4 sm:$0xff]   ;;  %v8212_v16 = vunpack.c.l.bf16 %v12467_v34  ;;  %v9786_v39 = vld [vmem:[%s13837_s1 + $0x1c0] ss:$8 sps:$4 sm:$0xff]  }
 0x33a   :  { %2016 = vadd.xlane.f32.xlu0 %v2015_v27  ;;  %v2350_v9 = vpop.xlane.xlu1 %2349  ;;  %v2299_v12 = vpop.xlane.xlu0 %2298  ;;  %v2069_v7 = vsel %vm1036_vm0, %v8244_v60, 0.0  ;;  %v12494_v30 = vld [vmem:[%s13836_s0 + $0x720] sm:$0xff]  }
 0x33b   :  { %v12431_v54 = vsel %vm13868_vm5, %v5926_v25, %v5922_v48  ;;  %v5843_v52 = vsel %vm13869_vm4, %v5842_v4, %v5838_v53  ;;  %v3011_v35 = vmul.f32 0.0625, %v2350_v9  ;;  %v2994_v57 = vmul.f32 0.0625, %v2299_v12  ;;  %8936 = vmatpush1.bf16.msra.mxu1 %v9768_v49  ;;  %9192 = vmatpush1.bf16.msra.mxu0 %v9771_v28  ;;  %v9789_v49 = vld [vmem:[%s13837_s1 + $0x5c0] ss:$8 sps:$4 sm:$0xff]   ;;  %v9790_v28 = vld [vmem:[%s13837_s1 + $0x1d4] ss:$8 sps:$4 sm:$0xff]  }
 0x33c   :  { %8938 = vmatprep.subr.bf16.mxu1 %v9772_v15  ;;  %9194 = vmatprep.subr.bf16.mxu0 %v9775_v50  ;;  %v2018_v48 = vsel %vm1036_vm0, %v8209_v40, 0.0  ;;  %v8500_v53 = vunpack.c.l.bf16 %v12428_v51  ;;  %v9793_v15 = vld [vmem:[%s13837_s1 + $0x5d4] ss:$8 sps:$4 sm:$0xff]   ;;  %v2072_v9 = vsel %vm1036_vm0, %v8245_v14, 0.0  ;;  %v8501_v12 = vunpack.c.h.bf16 %v12428_v51  ;;  %v8750_v40 = vld [vmem:[%s13836_s0 + $0x568] sm:$0xff]  }
 0x33d   :  { %v6558_v36 = vrot.slane %v3011_v35, %v13909_v13  ;;  %v6474_v22 = vrot.slane %v2994_v57, %v13908_v32  ;;  %2451 = vadd.xlane.f32.xlu1 %v2450_v19  ;;  %v8468_v60 = vunpack.c.l.bf16 %v12494_v30  ;;  %v9795_v51 = vld [vmem:[%s13837_s1 + $0x5d0] ss:$8 sps:$4 sm:$0xff]   ;;  %v9796_v35 = vld [vmem:[%s13837_s1 + $0x1e4] ss:$8 sps:$4 sm:$0xff]  }
 0x33e   :  { %2400 = vadd.xlane.f32.xlu0 %v2399_v5  ;;  %v12448_v62 = vpop.xlane.xlu1 %1968  ;;  %v1918_v0 = vpop.xlane.xlu0 %1917  ;;  %v2453_v27 = vsel %vm1036_vm0, %v8500_v53, 0.0  ;;  %v2021_v5 = vsel %vm1036_vm0, %v8212_v16, 0.0  ;;  %v9799_v57 = vld [vmem:[%s13837_s1 + $0x5e4] ss:$8 sps:$4 sm:$0xff]   ;;  %v9802_v53 = vld [vmem:[%s13837_s1 + $0x1f4] ss:$8 sps:$4 sm:$0xff]  }
 0x33f   :  { %v12454_v38 = vsel %vm13868_vm5, %v6558_v36, %v6554_v20  ;;  %v6475_v2 = vsel %vm13869_vm4, %v6474_v22, %v6470_v31  ;;  %v2867_v33 = vmul.f32 0.0625, %v1918_v0  ;;  %8940 = vmatpush1.bf16.msra.mxu1 %v9774_v59  ;;  %9196 = vmatpush1.bf16.msra.mxu0 %v9777_v58  ;;  %v2402_v31 = vsel %vm1036_vm0, %v8465_v44, 0.0  ;;  %v8814_v0 = vld [vmem:[%s13836_s0 + $0x768] sm:$0xff]  }
 0x340   :  { %8942 = vmatprep.subr.bf16.mxu1 %v9778_v3  ;;  %9198 = vmatprep.subr.bf16.mxu0 %v9781_v10  ;;  %v2456_v3 = vsel %vm1036_vm0, %v8501_v12, 0.0  ;;  %v8248_v10 = vunpack.c.l.bf16 %v8750_v40  ;;  %v2405_v36 = vsel %vm1036_vm0, %v8468_v60, 0.0  ;;  %v8213_v22 = vunpack.c.h.bf16 %v12467_v34 }
 0x341   :  { %v5847_v63 = vrot.slane %v2867_v33, %v13909_v13  ;;  %2070 = vadd.xlane.f32.xlu1 %v2069_v7  ;;  %v9798_v7 = vld [vmem:[%s13837_s1 + $0x1e0] ss:$8 sps:$4 sm:$0xff]   ;;  %v8505_v12 = vunpack.c.h.bf16 %v8814_v0 }
 0x342   :  { %2019 = vadd.xlane.f32.xlu0 %v2018_v48  ;;  %v12476_v47 = vpop.xlane.xlu1 %2352  ;;  %v2302_v21 = vpop.xlane.xlu0 %2301  ;;  %v9801_v48 = vld [vmem:[%s13837_s1 + $0x5e0] ss:$8 sps:$4 sm:$0xff]   ;;  %v2024_v34 = vsel %vm1036_vm0, %v8213_v22, 0.0 }
 0x343   :  { %v12481_v26 = vsel %vm13868_vm5, %v5847_v63, %v5843_v52  ;;  %v2995_v20 = vmul.f32 0.0625, %v2302_v21  ;;  %8944 = vmatpush1.bf16.msra.mxu1 %v9780_v46  ;;  %9200 = vmatpush1.bf16.msra.mxu0 %v9783_v6  ;;  %v9792_v52 = vld [vmem:[%s13837_s1 + $0x1d0] ss:$8 sps:$4 sm:$0xff]   ;;  %v2075_v46 = vsel %vm1036_vm0, %v8248_v10, 0.0  ;;  %v8504_v6 = vunpack.c.l.bf16 %v8814_v0  ;;  %v8742_v21 = vld [vmem:[%s13836_s0 + $0x528] sm:$0xff]  }
 0x344   :  { %8946 = vmatprep.subr.bf16.mxu1 %v9784_v8  ;;  %9202 = vmatprep.subr.bf16.mxu0 %v9787_v29  ;;  %v8469_v8 = vunpack.c.h.bf16 %v12494_v30  ;;  %v9804_v29 = vld [vmem:[%s13837_s1 + $0x1f0] ss:$8 sps:$4 sm:$0xff]   ;;  %v9808_v30 = vld [vmem:[%s13837_s1 + $0x204] ss:$8 sps:$4 sm:$0xff]   ;;  %v8217_v10 = vunpack.c.h.bf16 %v8742_v21 }
 0x345   :  { %v6479_v50 = vrot.slane %v2995_v20, %v13909_v13  ;;  %2454 = vadd.xlane.f32.xlu1 %v2453_v27  ;;  %v9807_v63 = vld [vmem:[%s13837_s1 + $0x5f0] ss:$8 sps:$4 sm:$0xff]   ;;  %v2459_v20 = vsel %vm1036_vm0, %v8504_v6, 0.0 }
 0x346   :  { %2403 = vadd.xlane.f32.xlu0 %v2402_v31  ;;  %v12503_v25 = vpop.xlane.xlu1 %1971  ;;  %v12505_v4 = vpop.xlane.xlu0 %1920  ;;  %v8249_v31 = vunpack.c.h.bf16 %v8750_v40  ;;  %v2408_v16 = vsel %vm1036_vm0, %v8469_v8, 0.0  ;;  %v8751_v40 = vld [vmem:[%s13836_s0 + $0x570] sm:$0xff]  }
 0x347   :  { %v12510_v19 = vsel %vm13868_vm5, %v6479_v50, %v6475_v2  ;;  %8948 = vmatpush1.bf16.msra.mxu1 %v9786_v39  ;;  %9204 = vmatpush1.bf16.msra.mxu0 %v9789_v49  ;;  %v9805_v2 = vld [vmem:[%s13837_s1 + $0x5f4] ss:$8 sps:$4 sm:$0xff]   ;;  %v8216_v39 = vunpack.c.l.bf16 %v8742_v21  ;;  %v8806_v49 = vld [vmem:[%s13836_s0 + $0x728] sm:$0xff]   ;;  %v2868_v24 = vmul.f32 0.0625, %v12505_v4  ;;  %vm13912_vm5 = vcmask 523712  }
 0x348   :  { %8950 = vmatprep.subr.bf16.mxu1 %v9790_v28  ;;  %9206 = vmatprep.subr.bf16.mxu0 %v9793_v15  ;;  %v9811_v28 = vld [vmem:[%s13837_s1 + $0x604] ss:$8 sps:$4 sm:$0xff]   ;;  %v8472_v60 = vunpack.c.l.bf16 %v8806_v49  ;;  %vm13913_vm4 = vmmov %vm13912_vm5 }
 0x349   :  { %2073 = vadd.xlane.f32.xlu1 %v2072_v9  ;;  %v2078_v9 = vsel %vm1036_vm0, %v8249_v31, 0.0 }
 0x34a   :  { %2022 = vadd.xlane.f32.xlu0 %v2021_v5  ;;  %v12529_v59 = vpop.xlane.xlu1 %2355  ;;  %v12531_v58 = vpop.xlane.xlu0 %2304  ;;  %v2027_v5 = vsel %vm1036_vm0, %v8216_v39, 0.0 }
 0x34b   :  { %8952 = vmatpush1.bf16.msra.mxu1 %v9792_v52  ;;  %9208 = vmatpush1.bf16.msra.mxu0 %v9795_v51  ;;  %v2996_v4 = vmul.f32 0.0625, %v12531_v58  ;;  %v12714_v58 = vld [vmem:[%s13836_s0 + $0x7c8] sm:$0xff]  }
 0x34c   :  { %8954 = vmatprep.subr.bf16.mxu1 %v9796_v35  ;;  %9210 = vmatprep.subr.bf16.mxu0 %v9799_v57  ;;  %v2462_v35 = vsel %vm1036_vm0, %v8505_v12, 0.0  ;;  %v8252_v57 = vunpack.c.l.bf16 %v8751_v40 }
 0x34d   :  { %2457 = vadd.xlane.f32.xlu1 %v2456_v3  ;;  %v2411_v3 = vsel %vm1036_vm0, %v8472_v60, 0.0  ;;  %v8808_v60 = vld [vmem:[%s13836_s0 + $0x738] sm:$0xff]  }
 0x34e   :  { %2406 = vadd.xlane.f32.xlu0 %v2405_v36  ;;  %v12551_v33 = vpop.xlane.xlu1 %1974  ;;  %v12553_v44 = vpop.xlane.xlu0 %1923  ;;  %v8815_v36 = vld [vmem:[%s13836_s0 + $0x770] sm:$0xff]  }
 0x34f   :  { %8956 = vmatpush1.bf16.msra.mxu1 %v9798_v7  ;;  %9212 = vmatpush1.bf16.msra.mxu0 %v9801_v48  ;;  %v2081_v7 = vsel %vm1036_vm0, %v8252_v57, 0.0  ;;  %v8508_v48 = vunpack.c.l.bf16 %v8815_v36  ;;  %v2869_v56 = vmul.f32 0.0625, %v12553_v44 }
 0x350   :  { %8958 = vmatprep.subr.bf16.mxu1 %v9802_v53  ;;  %9214 = vmatprep.subr.bf16.mxu0 %v9805_v2  ;;  %v2030_v53 = vsel %vm1036_vm0, %v8217_v10, 0.0  ;;  %v8473_v2 = vunpack.c.h.bf16 %v8806_v49  ;;  %v8509_v49 = vunpack.c.h.bf16 %v8815_v36 }
 0x351   :  { %2076 = vadd.xlane.f32.xlu1 %v2075_v46  ;;  %v8743_v46 = vld [vmem:[%s13836_s0 + $0x530] sm:$0xff]   ;;  %v2465_v8 = vsel %vm1036_vm0, %v8508_v48, 0.0 }
 0x352   :  { %2025 = vadd.xlane.f32.xlu0 %v2024_v34  ;;  %v12567_v27 = vpop.xlane.xlu1 %2358  ;;  %v12569_v14 = vpop.xlane.xlu0 %2307  ;;  %v8220_v21 = vunpack.c.l.bf16 %v8743_v46  ;;  %v2468_v36 = vsel %vm1036_vm0, %v8509_v49, 0.0 }
 0x353   :  { %8960 = vmatpush1.bf16.msra.mxu1 %v9804_v29  ;;  %9216 = vmatpush1.bf16.msra.mxu0 %v9807_v63  ;;  %v8253_v29 = vunpack.c.h.bf16 %v8751_v40  ;;  %v2414_v63 = vsel %vm1036_vm0, %v8473_v2, 0.0  ;;  %v8761_v2 = vld [vmem:[%s13836_s0 + $0x5c0] sm:$0xff]  }
 0x354   :  { %8962 = vmatprep.subr.bf16.mxu1 %v9808_v30  ;;  %9218 = vmatprep.subr.bf16.mxu0 %v9811_v28  ;;  %v8752_v30 = vld [vmem:[%s13836_s0 + $0x578] sm:$0xff]   ;;  %v8292_v32 = vunpack.c.l.bf16 %v8761_v2 }
 0x355   :  { %2460 = vadd.xlane.f32.xlu1 %v2459_v20  ;;  %v8807_v20 = vld [vmem:[%s13836_s0 + $0x730] sm:$0xff]   ;;  %v2084_v39 = vsel %vm1036_vm0, %v8253_v29, 0.0  ;;  %v8816_v28 = vld [vmem:[%s13836_s0 + $0x778] sm:$0xff]   ;;  %v8256_v40 = vunpack.c.l.bf16 %v8752_v30  ;;  %v8257_v48 = vunpack.c.h.bf16 %v8752_v30 }
 0x356   :  { %2409 = vadd.xlane.f32.xlu0 %v2408_v16  ;;  %v12582_v15 = vpop.xlane.xlu1 %1977  ;;  %v12584_v50 = vpop.xlane.xlu0 %1926  ;;  %v8476_v12 = vunpack.c.l.bf16 %v8807_v20  ;;  %v8512_v57 = vunpack.c.l.bf16 %v8816_v28  ;;  %v8513_v29 = vunpack.c.h.bf16 %v8816_v28  ;;  %v12696_v18 = vsel %vm1036_vm0, %v8292_v32, 0.0 }
 0x357   :  { %v2087_v49 = vsel %vm1036_vm0, %v8256_v40, 0.0  ;;  %v8753_v40 = vld [vmem:[%s13836_s0 + $0x580] sm:$0xff]  }
 0x358   :  { %v2471_v30 = vsel %vm1036_vm0, %v8512_v57, 0.0  ;;  %v8260_v45 = vunpack.c.l.bf16 %v8753_v40 }
 0x359   :  { %2079 = vadd.xlane.f32.xlu1 %v2078_v9  ;;  %v2033_v9 = vsel %vm1036_vm0, %v8220_v21, 0.0 }
 0x35a   :  { %2028 = vadd.xlane.f32.xlu0 %v2027_v5  ;;  %v12591_v52 = vpop.xlane.xlu1 %2361  ;;  %v12593_v51 = vpop.xlane.xlu0 %2310  ;;  %v8744_v5 = vld [vmem:[%s13836_s0 + $0x538] sm:$0xff]  }
 0x35b   :  { %v8225_v21 = vunpack.c.h.bf16 %v8744_v5 }
 0x35d   :  { %2463 = vadd.xlane.f32.xlu1 %v2462_v35  ;;  %v8221_v35 = vunpack.c.h.bf16 %v8743_v46  ;;  %v8481_v46 = vunpack.c.h.bf16 %v8808_v60 }
 0x35e   :  { %2412 = vadd.xlane.f32.xlu0 %v2411_v3  ;;  %v12600_v22 = vpop.xlane.xlu1 %1980  ;;  %v12602_v0 = vpop.xlane.xlu0 %1929 }
 0x361   :  { %2082 = vadd.xlane.f32.xlu1 %v2081_v7  ;;  %v8477_v7 = vunpack.c.h.bf16 %v8807_v20  ;;  %v2036_v20 = vsel %vm1036_vm0, %v8221_v35, 0.0  ;;  %v12662_v35 = vsel %vm1036_vm0, %v8513_v29, 0.0 }
 0x362   :  { %2031 = vadd.xlane.f32.xlu0 %v2030_v53  ;;  %v12609_v6 = vpop.xlane.xlu1 %2364  ;;  %v12611_v34 = vpop.xlane.xlu0 %2313  ;;  %v8224_v53 = vunpack.c.l.bf16 %v8744_v5  ;;  %v2090_v5 = vsel %vm1036_vm0, %v8257_v48, 0.0  ;;  %v2884_v48 = vmul.f32 0.0625, %v12448_v62  ;;  %v8261_v62 = vunpack.c.h.bf16 %v8753_v40 }
 0x363   :  { %v2420_v28 = vsel %vm1036_vm0, %v8477_v7, 0.0  ;;  %v12673_v7 = vld [vmem:[%s13836_s0 + $0x780] sm:$0xff]   ;;  %v5852_v40 = vrot.slane %v2868_v24, %v10281_v42  ;;  %v6484_v24 = vrot.slane %v2996_v4, %v10281_v42 }
 0x364   :  { %13910 = vst [vmem:[#allocation14_spill] sm:$0xff] %v12673_v7 }
 0x365   :  { %2466 = vadd.xlane.f32.xlu1 %v2465_v8  ;;  %v2417_v8 = vsel %vm1036_vm0, %v8476_v12, 0.0  ;;  %v5853_v4 = vsel %vm4412_vm6, %v5852_v40, %v12481_v26  ;;  %v6485_v26 = vsel %vm4412_vm6, %v6484_v24, %v12510_v19 }
 0x366   :  { %2415 = vadd.xlane.f32.xlu0 %v2414_v63  ;;  %v12618_v31 = vpop.xlane.xlu1 %1983  ;;  %v12620_v16 = vpop.xlane.xlu0 %1932  ;;  %v8480_v63 = vunpack.c.l.bf16 %v8808_v60  ;;  %v2039_v60 = vsel %vm1036_vm0, %v8224_v53, 0.0  ;;  %v3012_v53 = vmul.f32 0.0625, %v12476_v47  ;;  %v3013_v47 = vmul.f32 0.0625, %v12529_v59 }
 0x367   :  { %v2889_v19 = vmul.f32 0.0625, %v12618_v31 }
 0x368   :  { %v12665_v57 = vsel %vm1036_vm0, %v8480_v63, 0.0  ;;  %v12683_v63 = vld [vmem:[%s13836_s0 + $0x5c8] sm:$0xff]   ;;  %v6563_v55 = vrot.slane %v3012_v53, %v10281_v42  ;;  %v6568_v44 = vrot.slane %v3013_v47, %v10278_v41  ;;  %v2997_v53 = vmul.f32 0.0625, %v12569_v14 }
 0x369   :  { %2085 = vadd.xlane.f32.xlu1 %v2084_v39  ;;  %v8825_v39 = vld [vmem:[%s13836_s0 + $0x7c0] sm:$0xff]   ;;  %13911 = vst [vmem:[#allocation29_spill] sm:$0xff] %v12683_v63  ;;  %v8296_v59 = vunpack.c.l.bf16 %v12683_v63  ;;  %v2887_v47 = vmul.f32 0.0625, %v12582_v15 }
 0x36a   :  { %2034 = vadd.xlane.f32.xlu0 %v2033_v9  ;;  %v12636_v3 = vpop.xlane.xlu1 %2367  ;;  %v12638_v10 = vpop.xlane.xlu0 %2316  ;;  %v8293_v9 = vunpack.c.h.bf16 %v8761_v2  ;;  %v12678_v2 = vsel %vm1036_vm0, %v8225_v21, 0.0  ;;  %v8548_v29 = vunpack.c.l.bf16 %v8825_v39 }
 0x36b   :  { %v5946_v40 = vrot.slane %v2887_v47, %v10296_v61 }
 0x36c   :  { %v12688_v11 = vsel %vm1036_vm0, %v8293_v9, 0.0  ;;  %v12709_v32 = vsel %vm1036_vm0, %v8548_v29, 0.0 }
 0x36d   :  { %2469 = vadd.xlane.f32.xlu1 %v2468_v36  ;;  %v12668_v36 = vsel %vm1036_vm0, %v8481_v46, 0.0  ;;  %v2885_v46 = vmul.f32 0.0625, %v12503_v25  ;;  %v8516_v25 = vunpack.c.l.bf16 %v12673_v7  ;;  %v12727_v7 = vsel %vm1036_vm0, %v8260_v45, 0.0 }
 0x36e   :  { %2418 = vadd.xlane.f32.xlu0 %v2417_v8  ;;  %v12651_v13 = vpop.xlane.xlu1 %1986  ;;  %v12653_v12 = vpop.xlane.xlu0 %1935  ;;  %v8549_v8 = vunpack.c.h.bf16 %v8825_v39  ;;  %v5857_v45 = vrot.slane %v2869_v56, %v10278_v41  ;;  %v2998_v56 = vmul.f32 0.0625, %v12593_v51  ;;  %v2999_v51 = vmul.f32 0.0625, %v12611_v34 }
 0x370   :  { %v12702_v9 = vsel %vm1036_vm0, %v8549_v8, 0.0  ;;  %v3014_v8 = vmul.f32 0.0625, %v12567_v27 }
 0x371   :  { %2088 = vadd.xlane.f32.xlu1 %v2087_v49  ;;  %v2886_v49 = vmul.f32 0.0625, %v12551_v33  ;;  %v5936_v33 = vrot.slane %v2885_v46, %v10278_v41  ;;  %v12730_v46 = vsel %vm1036_vm0, %v8516_v25, 0.0 }
 0x372   :  { %2037 = vadd.xlane.f32.xlu0 %v2036_v20  ;;  %v12691_v21 = vpop.xlane.xlu1 %2370  ;;  %v12693_v39 = vpop.xlane.xlu0 %2319  ;;  %v5931_v20 = vrot.slane %v2884_v48, %v10281_v42  ;;  %v12720_v48 = vsel %vm1036_vm0, %v8261_v62, 0.0 }
 0x373   :  { %v5941_v27 = vrot.slane %v2886_v49, %v10302_v1  ;;  %v6573_v49 = vrot.slane %v3014_v8, %v10302_v1 }
 0x374   :  { %v5932_v14 = vsel %vm4412_vm6, %v5931_v20, %v12431_v54  ;;  %v6489_v54 = vrot.slane %v2997_v53, %v10278_v41  ;;  %v6494_v53 = vrot.slane %v2998_v56, %v10302_v1 }
 0x375   :  { %2472 = vadd.xlane.f32.xlu1 %v2471_v30  ;;  %v12735_v30 = vsel %vm1036_vm0, %v8296_v59, 0.0  ;;  %v5937_v25 = vsel %vm13912_vm5, %v5936_v33, %v5932_v14  ;;  %v2870_v59 = vmul.f32 0.0625, %v12584_v50  ;;  %v2888_v50 = vmul.f32 0.0625, %v12600_v22  ;;  %vm13914_vm5 = vmmov %vm13913_vm4 }
 0x376   :  { %2421 = vadd.xlane.f32.xlu0 %v2420_v28  ;;  %v1990_v29 = vpop.xlane.xlu1 %1989  ;;  %v12724_v63 = vpop.xlane.xlu0 %1938  ;;  %v6564_v28 = vsel %vm4412_vm6, %v6563_v55, %v12454_v38  ;;  %v3015_v55 = vmul.f32 0.0625, %v12591_v52  ;;  %v5942_v20 = vsel %vm4426_vm8, %v5941_v27, %v5937_v25  ;;  %v5858_v33 = vsel %vm13913_vm4, %v5857_v45, %v5853_v4 }
 0x377   :  { %v6569_v62 = vsel %vm13913_vm4, %v6568_v44, %v6564_v28  ;;  %v3016_v52 = vmul.f32 0.0625, %v12609_v6  ;;  %v5862_v8 = vrot.slane %v2870_v59, %v10302_v1  ;;  %v2872_v44 = vmul.f32 0.0625, %v12620_v16 }
 0x378   :  { %v6490_v22 = vsel %vm13914_vm5, %v6489_v54, %v6485_v26  ;;  %v3017_v6 = vmul.f32 0.0625, %v12636_v3  ;;  %v5951_v27 = vrot.slane %v2888_v50, %v10319_v23  ;;  %v3000_v16 = vmul.f32 0.0625, %v12638_v10 }
 0x379   :  { %2091 = vadd.xlane.f32.xlu1 %v2090_v5  ;;  %v2871_v5 = vmul.f32 0.0625, %v12602_v0  ;;  %v6578_v0 = vrot.slane %v3015_v55, %v10296_v61  ;;  %v6583_v14 = vrot.slane %v3016_v52, %v10319_v23  ;;  %v6499_v28 = vrot.slane %v2999_v51, %v10296_v61 }
 0x37a   :  { %2040 = vadd.xlane.f32.xlu0 %v2039_v60  ;;  %v2374_v38 = vpop.xlane.xlu1 %2373  ;;  %v12753_v15 = vpop.xlane.xlu0 %2322  ;;  %v6574_v60 = vsel %vm4426_vm8, %v6573_v49, %v6569_v62  ;;  %v5947_v62 = vsel %vm4433_vm9, %v5946_v40, %v5942_v20  ;;  %v2873_v3 = vmul.f32 0.0625, %v12653_v12  ;;  %v5956_v45 = vrot.slane %v2889_v19, %v10313_v17 }
 0x37b   :  { %v5867_v31 = vrot.slane %v2871_v5, %v10296_v61  ;;  %v5872_v47 = vrot.slane %v2872_v44, %v10319_v23  ;;  %v2891_v25 = vmul.f32 0.0625, %v1990_v29  ;;  %v6579_v10 = vsel %vm4433_vm9, %v6578_v0, %v6574_v60  ;;  %v13915_v60 = vld [vmem:[#allocation12_spill] sm:$0xff] }
 0x37c   :  { %v6588_v4 = vrot.slane %v3017_v6, %v10313_v17  ;;  %v5952_v54 = vsel %vm4440_vm10, %v5951_v27, %v5947_v62  ;;  %v6504_v56 = vrot.slane %v3000_v16, %v10319_v23  ;;  %v5877_v20 = vrot.slane %v2873_v3, %v10313_v17  ;;  %v13916_v16 = vld [vmem:[#allocation11_spill] sm:$0xff] }
 0x37d   :  { %2475 = vadd.xlane.f32.xlu1 %v12662_v35  ;;  %v2890_v35 = vmul.f32 0.0625, %v12651_v13  ;;  %v6495_v13 = vsel %vm4426_vm8, %v6494_v53, %v6490_v22  ;;  %v3018_v50 = vmul.f32 0.0625, %v12691_v21  ;;  %v3019_v40 = vmul.f32 0.0625, %v2374_v38 }
 0x37e   :  { %2424 = vadd.xlane.f32.xlu0 %v12665_v57  ;;  %v1993_v34 = vpop.xlane.xlu1 %1992  ;;  %v1942_v24 = vpop.xlane.xlu0 %1941  ;;  %v5863_v57 = vsel %vm4426_vm8, %v5862_v8, %v5858_v33  ;;  %v6500_v26 = vsel %vm4433_vm9, %v6499_v28, %v6495_v13  ;;  %v5966_v33 = vrot.slane %v2891_v25, %v10330_v37  ;;  %v3001_v51 = vmul.f32 0.0625, %v12693_v39  ;;  %v13917_v13 = vld [vmem:[#allocation16_spill] sm:$0xff] }
 0x37f   :  { %v2892_v49 = vmul.f32 0.0625, %v1993_v34  ;;  %v5868_v55 = vsel %vm4433_vm9, %v5867_v31, %v5863_v57  ;;  %v5961_v29 = vrot.slane %v2890_v35, %v10336_v43  ;;  %v6505_v22 = vsel %vm4440_vm10, %v6504_v56, %v6500_v26 }
 0x380   :  { %v5873_v5 = vsel %vm4440_vm10, %v5872_v47, %v5868_v55  ;;  %v2874_v53 = vmul.f32 0.0625, %v12724_v63  ;;  %v6593_v6 = vrot.slane %v3018_v50, %v10336_v43  ;;  %v3002_v39 = vmul.f32 0.0625, %v12753_v15 }
 0x381   :  { %2427 = vadd.xlane.f32.xlu1 %v12668_v36  ;;  %v6584_v36 = vsel %vm4440_vm10, %v6583_v14, %v6579_v10  ;;  %v5971_v8 = vrot.slane %v2892_v49, %v13915_v60  ;;  %v2875_v34 = vmul.f32 0.0625, %v1942_v24  ;;  %v6509_v62 = vrot.slane %v3001_v51, %v10313_v17 }
 0x382   :  { %2043 = vadd.xlane.f32.xlu0 %v12678_v2  ;;  %v2377_v59 = vpop.xlane.xlu1 %2376  ;;  %v2326_v12 = vpop.xlane.xlu0 %2325  ;;  %v5957_v2 = vsel %vm4447_vm11, %v5956_v45, %v5952_v54  ;;  %v6589_v52 = vsel %vm4447_vm11, %v6588_v4, %v6584_v36  ;;  %v5882_v24 = vrot.slane %v2874_v53, %v10336_v43  ;;  %vm13929_vm4 = vcmask 326912  }
 0x383   :  { %v3020_v19 = vmul.f32 0.0625, %v2377_v59  ;;  %v5962_v0 = vsel %vm4454_vm12, %v5961_v29, %v5957_v2  ;;  %v3003_v31 = vmul.f32 0.0625, %v2326_v12  ;;  %v6594_v25 = vsel %vm4454_vm12, %v6593_v6, %v6589_v52  ;;  %v13918_v12 = vld [vmem:[#allocation14_spill] sm:$0xff]  ;;  %vm13930_vm5 = vmmov %vm13929_vm4 }
 0x384   :  { %v5967_v27 = vsel %vm4461_vm13, %v5966_v33, %v5962_v0  ;;  %v5887_v10 = vrot.slane %v2875_v34, %v10330_v37  ;;  %v8517_v54 = vunpack.c.h.bf16 %v13918_v12  ;;  %v6510_v55 = vsel %vm4447_vm11, %v6509_v62, %v6505_v22  ;;  %v12842_v33 = vld [vmem:[%s13836_s0 + $0x588] sm:$0xff]   ;;  %v12893_v12 = vld [vmem:[%s13836_s0 + $0x5d0] sm:$0xff]  }
 0x385   :  { %2145 = vadd.xlane.f32.xlu1 %v12688_v11  ;;  %v5878_v11 = vsel %vm4447_vm11, %v5877_v20, %v5873_v5  ;;  %v6603_v63 = vrot.slane %v3020_v19, %v13915_v60  ;;  %v5972_v15 = vsel %vm4468_vm14, %v5971_v8, %v5967_v27  ;;  %v6519_v49 = vrot.slane %v3003_v31, %v10330_v37  ;;  %v9810_v62 = vld [vmem:[%s13837_s1 + $0x200] ss:$8 sps:$4 sm:$0xff]  }
 0x386   :  { %2142 = vadd.xlane.f32.xlu0 %v12696_v18  ;;  %v1996_v44 = vpop.xlane.xlu1 %1995  ;;  %v1945_v21 = vpop.xlane.xlu0 %1944  ;;  %v6598_v18 = vrot.slane %v3019_v40, %v10330_v37  ;;  %v5883_v50 = vsel %vm4454_vm12, %v5882_v24, %v5878_v11  ;;  %v13920_v8 = vunpack.c.l.bf16 %v12714_v58  ;;  %v2480_v0 = vsel %vm1036_vm0, %v8517_v54, 0.0  ;;  %v9814_v24 = vld [vmem:[%s13837_s1 + $0x214] ss:$8 sps:$4 sm:$0xff]  }
 0x387   :  { %v2893_v38 = vmul.f32 0.0625, %v1996_v44  ;;  %v2876_v14 = vmul.f32 0.0625, %v1945_v21  ;;  %v5888_v52 = vsel %vm4461_vm13, %v5887_v10, %v5883_v50  ;;  %v8264_v27 = vunpack.c.l.bf16 %v12842_v33 }
 0x388   :  { %v2531_v19 = vsel %vm1036_vm0, %v13920_v8, 0.0  ;;  %v8265_v8 = vunpack.c.h.bf16 %v12842_v33  ;;  %v9826_v33 = vld [vmem:[%s13837_s1 + $0x234] ss:$8 sps:$4 sm:$0xff]  }
 0x389   :  { %v5976_v35 = vrot.slane %v2893_v38, %v13916_v16  ;;  %2529 = vadd.xlane.f32.xlu1 %v12702_v9  ;;  %v6514_v9 = vrot.slane %v3002_v39, %v10336_v43  ;;  %v5892_v56 = vrot.slane %v2876_v14, %v13915_v60  ;;  %v13921_v39 = vld [vmem:[#allocation29_spill] sm:$0xff]  ;;  %v13922_v14 = vld [vmem:[#allocation15_spill] sm:$0xff] }
 0x38a   :  { %2526 = vadd.xlane.f32.xlu0 %v12709_v32  ;;  %v2380_v28 = vpop.xlane.xlu1 %2379  ;;  %v2329_v3 = vpop.xlane.xlu0 %2328  ;;  %v6599_v32 = vsel %vm4461_vm13, %v6598_v18, %v6594_v25  ;;  %v8297_v34 = vunpack.c.h.bf16 %v13921_v39  ;;  %v12864_v18 = vld [vmem:[%s13836_s0 + $0x788] sm:$0xff]  }
 0x38b   :  { %v3021_v57 = vmul.f32 0.0625, %v2380_v28  ;;  %v3004_v45 = vmul.f32 0.0625, %v2329_v3  ;;  %v5977_v47 = vsel %vm4475_vm15, %v5976_v35, %v5972_v15  ;;  %v6604_v20 = vsel %vm4468_vm14, %v6603_v63, %v6599_v32  ;;  %v9813_v63 = vld [vmem:[%s13837_s1 + $0x600] ss:$8 sps:$4 sm:$0xff]   ;;  %v13923_v3 = vld [vmem:[#allocation23_spill] sm:$0xff] }
 0x38c   :  { %v6930_v4 = vsel %vm6926_vm7, %v5977_v47, %v13917_v13  ;;  %v6515_v40 = vsel %vm4454_vm12, %v6514_v9, %v6510_v55  ;;  %v5893_v11 = vsel %vm4468_vm14, %v5892_v56, %v5888_v52  ;;  %v13925_v25 = vld [vmem:[#allocation5_spill] sm:$0xff]  ;;  %v2099_v32 = vsel %vm1036_vm0, %v8264_v27, 0.0 }
 0x38d   :  { %v6608_v59 = vrot.slane %v3021_v57, %v13916_v16  ;;  %2097 = vadd.xlane.f32.xlu1 %v12720_v48  ;;  %7094 = vmatprep.mubr.f32.mxu1 %v6930_v4  ;;  %v6524_v29 = vrot.slane %v3004_v45, %v13915_v60  ;;  %v6520_v44 = vsel %vm4461_vm13, %v6519_v49, %v6515_v40  ;;  %v9817_v57 = vld [vmem:[%s13837_s1 + $0x614] ss:$8 sps:$4 sm:$0xff]   ;;  %v13924_v45 = vld [vmem:[#allocation6_spill] sm:$0xff]  ;;  %v2150_v4 = vsel %vm1036_vm0, %v8297_v34, 0.0 }
 0x38e   :  { %2094 = vadd.xlane.f32.xlu0 %v12727_v7  ;;  %v2332_v36 = vpop.xlane.xlu1 %2331  ;;  %v1948_v26 = vpop.xlane.xlu0 %1947  ;;  %v13919_v7 = vld [vmem:[#allocation24_spill] sm:$0xff]  ;;  %v8553_v49 = vunpack.c.h.bf16 %v12714_v58  ;;  %v9819_v58 = vld [vmem:[%s13837_s1 + $0x610] ss:$8 sps:$4 sm:$0xff]   ;;  %v8300_v40 = vunpack.c.l.bf16 %v12893_v12  ;;  %v8521_v34 = vunpack.c.h.bf16 %v12864_v18 }
 0x38f   :  { %v3005_v2 = vmul.f32 0.0625, %v2332_v36  ;;  %v2877_v5 = vmul.f32 0.0625, %v1948_v26  ;;  %v6609_v48 = vsel %vm4475_vm15, %v6608_v59, %v6604_v20  ;;  %v6525_v6 = vsel %vm4468_vm14, %v6524_v29, %v6520_v44  ;;  %v9816_v29 = vld [vmem:[%s13837_s1 + $0x210] ss:$8 sps:$4 sm:$0xff]   ;;  %v9820_v36 = vld [vmem:[%s13837_s1 + $0x224] ss:$8 sps:$4 sm:$0xff]  }
 0x390   :  { %v6938_v51 = vsel %vm6926_vm7, %v6609_v48, %v13919_v7  ;;  %v8520_v59 = vunpack.c.l.bf16 %v12864_v18  ;;  %v9823_v26 = vld [vmem:[%s13837_s1 + $0x624] ss:$8 sps:$4 sm:$0xff]   ;;  %v9822_v44 = vld [vmem:[%s13837_s1 + $0x220] ss:$8 sps:$4 sm:$0xff]   ;;  %v12954_v18 = vld [vmem:[%s13836_s0 + $0x590] sm:$0xff]  }
 0x391   :  { %v6529_v21 = vrot.slane %v3005_v2, %v13916_v16  ;;  %v5897_v22 = vrot.slane %v2877_v5, %v13916_v16  ;;  %2478 = vadd.xlane.f32.xlu1 %v12730_v46  ;;  %7378 = vmatprep.mubr.f32.mxu0 %v6938_v51  ;;  %v2534_v5 = vsel %vm1036_vm0, %v8553_v49, 0.0  ;;  %v9834_v49 = vld [vmem:[%s13837_s1 + $0x240] ss:$8 sps:$4 sm:$0xff]  }
 0x392   :  { %2148 = vadd.xlane.f32.xlu0 %v12735_v30  ;;  %v2050_v53 = vpop.xlane.xlu1 %2049  ;;  %v2047_v38 = vpop.xlane.xlu0 %2046  ;;  %v2483_v48 = vsel %vm1036_vm0, %v8520_v59, 0.0  ;;  %v9837_v59 = vld [vmem:[%s13837_s1 + $0x640] ss:$8 sps:$4 sm:$0xff]  }
 0x393   :  { %v2911_v46 = vmul.f32 0.0625, %v2050_v53  ;;  %v2910_v31 = vmul.f32 0.0625, %v2047_v38  ;;  %v5898_v35 = vsel %vm4475_vm15, %v5897_v22, %v5893_v11  ;;  %v6530_v30 = vsel %vm4475_vm15, %v6529_v21, %v6525_v6  ;;  %v9825_v21 = vld [vmem:[%s13837_s1 + $0x620] ss:$8 sps:$4 sm:$0xff]  }
 0x394   :  { %v6929_v28 = vsel %vm6926_vm7, %v5898_v35, %v13922_v14  ;;  %v6937_v15 = vsel %vm6926_vm7, %v6530_v30, %v13923_v3  ;;  %v2153_v6 = vsel %vm1036_vm0, %v8300_v40, 0.0  ;;  %v9831_v35 = vld [vmem:[%s13837_s1 + $0x630] ss:$8 sps:$4 sm:$0xff]   ;;  %v9835_v14 = vld [vmem:[%s13837_s1 + $0x644] ss:$8 sps:$4 sm:$0xff]  }
 0x395   :  { %v6064_v47 = vrot.slane %v2911_v46, %v13924_v45  ;;  %v6060_v9 = vrot.slane %v2910_v31, %v13925_v25  ;;  %2532 = vadd.xlane.f32.xlu1 %v2531_v19  ;;  %7095 = vmatmul.mubr.f32.vlgmr.msra.gmra.mrb[0].mxu1 %v6929_v28  ;;  %v12922_v19 = vld [vmem:[%s13836_s0 + $0x7d0] sm:$0xff]   ;;  %v2102_v46 = vsel %vm1036_vm0, %v8265_v8, 0.0  ;;  %v8301_v28 = vunpack.c.h.bf16 %v12893_v12 }
 0x396   :  { %2481 = vadd.xlane.f32.xlu0 %v2480_v0  ;;  %7379 = vmatmul.mubr.f32.vlgmr.msra.gmra.mrb[0].mxu0 %v6937_v15  ;;  %v2434_v10 = vpop.xlane.xlu1 %2433  ;;  %v2431_v13 = vpop.xlane.xlu0 %2430  ;;  %v9829_v0 = vld [vmem:[%s13837_s1 + $0x634] ss:$8 sps:$4 sm:$0xff]   ;;  %v8556_v39 = vunpack.c.l.bf16 %v12922_v19  ;;  %v9828_v31 = vld [vmem:[%s13837_s1 + $0x230] ss:$8 sps:$4 sm:$0xff]  }
 0x397   :  { %v12896_v54 = vsel %vm4377_vm1, %v6064_v47, %v6060_v9  ;;  %v3039_v55 = vmul.f32 0.0625, %v2434_v10  ;;  %v3038_v56 = vmul.f32 0.0625, %v2431_v13  ;;  %8964 = vmatpush1.bf16.msra.mxu1 %v9810_v62  ;;  %9220 = vmatpush1.bf16.msra.mxu0 %v9813_v63  ;;  %v9832_v63 = vld [vmem:[%s13837_s1 + $0x244] ss:$8 sps:$4 sm:$0xff]   ;;  %v13926_v15 = vld [vmem:[#allocation7_spill] sm:$0xff]  ;;  %v2486_v9 = vsel %vm1036_vm0, %v8521_v34, 0.0 }
 0x398   :  { %8966 = vmatprep.subr.bf16.mxu1 %v9814_v24  ;;  %9222 = vmatprep.subr.bf16.mxu0 %v9817_v57  ;;  %v2537_v47 = vsel %vm1036_vm0, %v8556_v39, 0.0  ;;  %v9840_v8 = vld [vmem:[%s13837_s1 + $0x250] ss:$8 sps:$4 sm:$0xff]   ;;  %v8269_v34 = vunpack.c.h.bf16 %v12954_v18 }
 0x399   :  { %v6696_v20 = vrot.slane %v3039_v55, %v13924_v45  ;;  %v6692_v50 = vrot.slane %v3038_v56, %v13925_v25  ;;  %2151 = vadd.xlane.f32.xlu1 %v2150_v4  ;;  %v8268_v4 = vunpack.c.l.bf16 %v12954_v18  ;;  %v9838_v56 = vld [vmem:[%s13837_s1 + $0x254] ss:$8 sps:$4 sm:$0xff]  }
 0x39a   :  { %2100 = vadd.xlane.f32.xlu0 %v2099_v32  ;;  %v2002_v2 = vpop.xlane.xlu1 %2001  ;;  %v12970_v32 = vld [vmem:[%s13836_s0 + $0x790] sm:$0xff]  }
 0x39b   :  { %v12916_v52 = vsel %vm4377_vm1, %v6696_v20, %v6692_v50  ;;  %v2895_v7 = vmul.f32 0.0625, %v2002_v2  ;;  %v1999_v51 = vpop.xlane.xlu0 %1998  ;;  %8968 = vmatpush1.bf16.msra.mxu1 %v9816_v29  ;;  %9224 = vmatpush1.bf16.msra.mxu0 %v9819_v58  ;;  %v9841_v29 = vld [vmem:[%s13837_s1 + $0x654] ss:$8 sps:$4 sm:$0xff]   ;;  %v8557_v50 = vunpack.c.h.bf16 %v12922_v19  ;;  %v8524_v2 = vunpack.c.l.bf16 %v12970_v32  ;;  %v9843_v19 = vld [vmem:[%s13837_s1 + $0x650] ss:$8 sps:$4 sm:$0xff]  }
 0x39c   :  { %v2894_v22 = vmul.f32 0.0625, %v1999_v51  ;;  %8970 = vmatprep.subr.bf16.mxu1 %v9820_v36  ;;  %9226 = vmatprep.subr.bf16.mxu0 %v9823_v26  ;;  %v2156_v36 = vsel %vm1036_vm0, %v8301_v28, 0.0  ;;  %v2105_v51 = vsel %vm1036_vm0, %v8268_v4, 0.0  ;;  %v9850_v28 = vld [vmem:[%s13837_s1 + $0x274] ss:$8 sps:$4 sm:$0xff]  }
 0x39d   :  { %v5985_v53 = vrot.slane %v2895_v7, %v13924_v45  ;;  %2535 = vadd.xlane.f32.xlu1 %v2534_v5  ;;  %v12995_v5 = vld [vmem:[%s13836_s0 + $0x5d8] sm:$0xff]   ;;  %v2489_v39 = vsel %vm1036_vm0, %v8524_v2, 0.0 }
 0x39e   :  { %v5981_v38 = vrot.slane %v2894_v22, %v13925_v25  ;;  %2484 = vadd.xlane.f32.xlu0 %v2483_v48  ;;  %v2383_v11 = vpop.xlane.xlu1 %2382  ;;  %v9847_v22 = vld [vmem:[%s13837_s1 + $0x664] ss:$8 sps:$4 sm:$0xff]  }
 0x39f   :  { %v2053_v27 = vpop.xlane.xlu0 %2052  ;;  %8972 = vmatpush1.bf16.msra.mxu1 %v9822_v44  ;;  %9228 = vmatpush1.bf16.msra.mxu0 %v9825_v21  ;;  %v3022_v3 = vmul.f32 0.0625, %v2383_v11 }
 0x3a0   :  { %v12949_v30 = vsel %vm4377_vm1, %v5985_v53, %v5981_v38  ;;  %v2912_v62 = vmul.f32 0.0625, %v2053_v27  ;;  %8974 = vmatprep.subr.bf16.mxu1 %v9826_v33  ;;  %9230 = vmatprep.subr.bf16.mxu0 %v9829_v0  ;;  %v13927_v33 = vld [vmem:[#allocation8_spill] sm:$0xff]  ;;  %v8304_v53 = vunpack.c.l.bf16 %v12995_v5 }
 0x3a1   :  { %2154 = vadd.xlane.f32.xlu1 %v2153_v6  ;;  %v6613_v26 = vrot.slane %v3022_v3, %v13925_v25  ;;  %v2540_v6 = vsel %vm1036_vm0, %v8557_v50, 0.0  ;;  %v9853_v3 = vld [vmem:[%s13837_s1 + $0x674] ss:$8 sps:$4 sm:$0xff]  }
 0x3a2   :  { %v6069_v24 = vrot.slane %v2912_v62, %v13926_v15  ;;  %2103 = vadd.xlane.f32.xlu0 %v2102_v46  ;;  %v2437_v57 = vpop.xlane.xlu1 %2436  ;;  %v9846_v62 = vld [vmem:[%s13837_s1 + $0x260] ss:$8 sps:$4 sm:$0xff]  }
 0x3a3   :  { %v3040_v10 = vmul.f32 0.0625, %v2437_v57  ;;  %v2386_v13 = vpop.xlane.xlu0 %2385  ;;  %8976 = vmatpush1.bf16.msra.mxu1 %v9828_v31  ;;  %9232 = vmatpush1.bf16.msra.mxu0 %v9831_v35  ;;  %v13023_v35 = vld [vmem:[%s13836_s0 + $0x7d8] sm:$0xff]   ;;  %v2159_v57 = vsel %vm1036_vm0, %v8304_v53, 0.0 }
 0x3a4   :  { %v6070_v12 = vsel %vm4384_vm2, %v6069_v24, %v12896_v54  ;;  %v3023_v55 = vmul.f32 0.0625, %v2386_v13  ;;  %8978 = vmatprep.subr.bf16.mxu1 %v9832_v63  ;;  %9234 = vmatprep.subr.bf16.mxu0 %v9835_v14  ;;  %v9849_v63 = vld [vmem:[%s13837_s1 + $0x660] ss:$8 sps:$4 sm:$0xff]   ;;  %v8525_v13 = vunpack.c.h.bf16 %v12970_v32  ;;  %v9865_v53 = vld [vmem:[%s13837_s1 + $0x694] ss:$8 sps:$4 sm:$0xff]  }
 0x3a5   :  { %v6701_v58 = vrot.slane %v3040_v10, %v13926_v15  ;;  %2538 = vadd.xlane.f32.xlu1 %v2537_v47  ;;  %v8560_v10 = vunpack.c.l.bf16 %v13023_v35 }
 0x3a6   :  { %v6617_v54 = vrot.slane %v3023_v55, %v13924_v45  ;;  %2487 = vadd.xlane.f32.xlu0 %v2486_v9  ;;  %v2056_v20 = vpop.xlane.xlu1 %2055  ;;  %v2108_v9 = vsel %vm1036_vm0, %v8269_v34, 0.0  ;;  %v9852_v55 = vld [vmem:[%s13837_s1 + $0x270] ss:$8 sps:$4 sm:$0xff]  }
 0x3a7   :  { %v6702_v48 = vsel %vm4384_vm2, %v6701_v58, %v12916_v52  ;;  %v2913_v40 = vmul.f32 0.0625, %v2056_v20  ;;  %v2005_v7 = vpop.xlane.xlu0 %2004  ;;  %8980 = vmatpush1.bf16.msra.mxu1 %v9834_v49  ;;  %9236 = vmatpush1.bf16.msra.mxu0 %v9837_v59  ;;  %v9844_v52 = vld [vmem:[%s13837_s1 + $0x264] ss:$8 sps:$4 sm:$0xff]   ;;  %v8305_v20 = vunpack.c.h.bf16 %v12995_v5  ;;  %v9858_v5 = vld [vmem:[%s13837_s1 + $0x280] ss:$8 sps:$4 sm:$0xff]  }
 0x3a8   :  { %v6618_v44 = vsel %vm4377_vm1, %v6617_v54, %v6613_v26  ;;  %v2896_v21 = vmul.f32 0.0625, %v2005_v7  ;;  %8982 = vmatprep.subr.bf16.mxu1 %v9838_v56  ;;  %9238 = vmatprep.subr.bf16.mxu0 %v9841_v29  ;;  %v9855_v56 = vld [vmem:[%s13837_s1 + $0x670] ss:$8 sps:$4 sm:$0xff]   ;;  %v9856_v58 = vld [vmem:[%s13837_s1 + $0x284] ss:$8 sps:$4 sm:$0xff]  }
 0x3a9   :  { %v6074_v0 = vrot.slane %v2913_v40, %v13927_v33  ;;  %2157 = vadd.xlane.f32.xlu1 %v2156_v36  ;;  %v9859_v36 = vld [vmem:[%s13837_s1 + $0x684] ss:$8 sps:$4 sm:$0xff]   ;;  %v2492_v40 = vsel %vm1036_vm0, %v8525_v13, 0.0 }
 0x3aa   :  { %v5990_v38 = vrot.slane %v2896_v21, %v13926_v15  ;;  %2106 = vadd.xlane.f32.xlu0 %v2105_v51  ;;  %v2440_v11 = vpop.xlane.xlu1 %2439  ;;  %v13928_v26 = vld [vmem:[#allocation10_spill] sm:$0xff]  ;;  %v9861_v21 = vld [vmem:[%s13837_s1 + $0x680] ss:$8 sps:$4 sm:$0xff]  }
 0x3ab   :  { %v6075_v27 = vsel %vm4391_vm3, %v6074_v0, %v6070_v12  ;;  %v3041_v46 = vmul.f32 0.0625, %v2440_v11  ;;  %v2389_v31 = vpop.xlane.xlu0 %2388  ;;  %8984 = vmatpush1.bf16.msra.mxu1 %v9840_v8  ;;  %9240 = vmatpush1.bf16.msra.mxu0 %v9843_v19  ;;  %v13049_v12 = vld [vmem:[%s13836_s0 + $0x598] sm:$0xff]   ;;  %v2162_v11 = vsel %vm1036_vm0, %v8305_v20, 0.0 }
 0x3ac   :  { %v5991_v18 = vsel %vm4384_vm2, %v5990_v38, %v12949_v30  ;;  %v3024_v14 = vmul.f32 0.0625, %v2389_v31  ;;  %8986 = vmatprep.subr.bf16.mxu1 %v9844_v52  ;;  %9242 = vmatprep.subr.bf16.mxu0 %v9847_v22  ;;  %v8272_v7 = vunpack.c.l.bf16 %v13049_v12  ;;  %v9862_v0 = vld [vmem:[%s13837_s1 + $0x294] ss:$8 sps:$4 sm:$0xff]  }
 0x3ad   :  { %v6706_v24 = vrot.slane %v3041_v46, %v13927_v33  ;;  %2541 = vadd.xlane.f32.xlu1 %v2540_v6 }
 0x3ae   :  { %v6622_v47 = vrot.slane %v3024_v14, %v13926_v15  ;;  %2490 = vadd.xlane.f32.xlu0 %v2489_v39  ;;  %v2059_v30 = vpop.xlane.xlu1 %2058  ;;  %v2111_v34 = vsel %vm1036_vm0, %v8272_v7, 0.0  ;;  %v9864_v14 = vld [vmem:[%s13837_s1 + $0x290] ss:$8 sps:$4 sm:$0xff]  }
 0x3af   :  { %v6707_v4 = vsel %vm4391_vm3, %v6706_v24, %v6702_v48  ;;  %v2914_v49 = vmul.f32 0.0625, %v2059_v30  ;;  %v2008_v59 = vpop.xlane.xlu0 %2007  ;;  %8988 = vmatpush1.bf16.msra.mxu1 %v9846_v62  ;;  %9244 = vmatpush1.bf16.msra.mxu0 %v9849_v63  ;;  %v2543_v48 = vsel %vm1036_vm0, %v8560_v10, 0.0  ;;  %v9868_v24 = vld [vmem:[%s13837_s1 + $0x2a4] ss:$8 sps:$4 sm:$0xff]  }
 0x3b0   :  { %v6623_v32 = vsel %vm4384_vm2, %v6622_v47, %v6618_v44  ;;  %v2897_v29 = vmul.f32 0.0625, %v2008_v59  ;;  %8990 = vmatprep.subr.bf16.mxu1 %v9850_v28  ;;  %9246 = vmatprep.subr.bf16.mxu0 %v9853_v3  ;;  %v13074_v44 = vld [vmem:[%s13836_s0 + $0x798] sm:$0xff]   ;;  %v13931_v47 = vld [vmem:[#allocation9_spill] sm:$0xff] }
 0x3b1   :  { %v6079_v54 = vrot.slane %v2914_v49, %v13928_v26  ;;  %2160 = vadd.xlane.f32.xlu1 %v2159_v57  ;;  %v8528_v46 = vunpack.c.l.bf16 %v13074_v44  ;;  %v9871_v57 = vld [vmem:[%s13837_s1 + $0x6a4] ss:$8 sps:$4 sm:$0xff]  }
 0x3b2   :  { %v5995_v50 = vrot.slane %v2897_v29, %v13927_v33  ;;  %2109 = vadd.xlane.f32.xlu0 %v2108_v9  ;;  %v2443_v2 = vpop.xlane.xlu1 %2442  ;;  %v13126_v29 = vld [vmem:[%s13836_s0 + $0x7e0] sm:$0xff]  }
 0x3b3   :  { %v6080_v51 = vsel %vm13929_vm4, %v6079_v54, %v6075_v27  ;;  %v3042_v8 = vmul.f32 0.0625, %v2443_v2  ;;  %v2392_v19 = vpop.xlane.xlu0 %2391  ;;  %8992 = vmatpush1.bf16.msra.mxu1 %v9852_v55  ;;  %9248 = vmatpush1.bf16.msra.mxu0 %v9855_v56  ;;  %v8561_v27 = vunpack.c.h.bf16 %v13023_v35  ;;  %v9867_v35 = vld [vmem:[%s13837_s1 + $0x690] ss:$8 sps:$4 sm:$0xff]   ;;  %vm13932_vm4 = vcmask 392512  }
 0x3b4   :  { %v5996_v52 = vsel %vm4391_vm3, %v5995_v50, %v5991_v18  ;;  %v3025_v22 = vmul.f32 0.0625, %v2392_v19  ;;  %8994 = vmatprep.subr.bf16.mxu1 %v9856_v58  ;;  %9250 = vmatprep.subr.bf16.mxu0 %v9859_v36  ;;  %v13099_v18 = vld [vmem:[%s13836_s0 + $0x5e0] sm:$0xff]   ;;  %v9877_v50 = vld [vmem:[%s13837_s1 + $0x6b4] ss:$8 sps:$4 sm:$0xff]  }
 0x3b5   :  { %v6711_v38 = vrot.slane %v3042_v8, %v13928_v26  ;;  %2544 = vadd.xlane.f32.xlu1 %v2543_v48  ;;  %v2546_v13 = vsel %vm1036_vm0, %v8561_v27, 0.0  ;;  %v8308_v49 = vunpack.c.l.bf16 %v13099_v18  ;;  %v9870_v58 = vld [vmem:[%s13837_s1 + $0x2a0] ss:$8 sps:$4 sm:$0xff]   ;;  %v8309_v27 = vunpack.c.h.bf16 %v13099_v18 }
 0x3b6   :  { %v6627_v6 = vrot.slane %v3025_v22, %v13927_v33  ;;  %2493 = vadd.xlane.f32.xlu0 %v2492_v40  ;;  %v2062_v39 = vpop.xlane.xlu1 %2061  ;;  %v9873_v36 = vld [vmem:[%s13837_s1 + $0x6a0] ss:$8 sps:$4 sm:$0xff]   ;;  %v9879_v22 = vld [vmem:[%s13837_s1 + $0x6b0] ss:$8 sps:$4 sm:$0xff]  }
 0x3b7   :  { %v6712_v31 = vsel %vm13930_vm5, %v6711_v38, %v6707_v4  ;;  %v2915_v62 = vmul.f32 0.0625, %v2062_v39  ;;  %v2011_v63 = vpop.xlane.xlu0 %2010  ;;  %8996 = vmatpush1.bf16.msra.mxu1 %v9858_v5  ;;  %9252 = vmatpush1.bf16.msra.mxu0 %v9861_v21  ;;  %v2495_v4 = vsel %vm1036_vm0, %v8528_v46, 0.0  ;;  %v2165_v7 = vsel %vm1036_vm0, %v8308_v49, 0.0  ;;  %v13162_v38 = vld [vmem:[%s13836_s0 + $0x5a0] sm:$0xff]  }
 0x3b8   :  { %v6628_v28 = vsel %vm4391_vm3, %v6627_v6, %v6623_v32  ;;  %v2898_v3 = vmul.f32 0.0625, %v2011_v63  ;;  %8998 = vmatprep.subr.bf16.mxu1 %v9862_v0  ;;  %9254 = vmatprep.subr.bf16.mxu0 %v9865_v53  ;;  %v8273_v32 = vunpack.c.h.bf16 %v13049_v12  ;;  %v9874_v12 = vld [vmem:[%s13837_s1 + $0x2b4] ss:$8 sps:$4 sm:$0xff]   ;;  %v8529_v21 = vunpack.c.h.bf16 %v13074_v44  ;;  %v9880_v44 = vld [vmem:[%s13837_s1 + $0x2c4] ss:$8 sps:$4 sm:$0xff]  }
 0x3b9   :  { %v6084_v30 = vrot.slane %v2915_v62, %v13931_v47  ;;  %2163 = vadd.xlane.f32.xlu1 %v2162_v11  ;;  %v9883_v11 = vld [vmem:[%s13837_s1 + $0x6c4] ss:$8 sps:$4 sm:$0xff]   ;;  %v8276_v62 = vunpack.c.l.bf16 %v13162_v38  ;;  %v9882_v63 = vld [vmem:[%s13837_s1 + $0x2c0] ss:$8 sps:$4 sm:$0xff]  }
 0x3ba   :  { %v6000_v9 = vrot.slane %v2898_v3, %v13928_v26  ;;  %2112 = vadd.xlane.f32.xlu0 %v2111_v34  ;;  %v2446_v10 = vpop.xlane.xlu1 %2445  ;;  %v2114_v5 = vsel %vm1036_vm0, %v8273_v32, 0.0  ;;  %v13189_v18 = vld [vmem:[%s13836_s0 + $0x7a0] sm:$0xff]   ;;  %v9886_v3 = vld [vmem:[%s13837_s1 + $0x2d4] ss:$8 sps:$4 sm:$0xff]   ;;  %v9891_v32 = vld [vmem:[%s13837_s1 + $0x6d0] ss:$8 sps:$4 sm:$0xff]  }
 0x3bb   :  { %v13120_v59 = vsel %vm13932_vm4, %v6084_v30, %v6080_v51  ;;  %v3043_v55 = vmul.f32 0.0625, %v2446_v10  ;;  %v2395_v56 = vpop.xlane.xlu0 %2394  ;;  %9000 = vmatpush1.bf16.msra.mxu1 %v9864_v14  ;;  %9256 = vmatpush1.bf16.msra.mxu0 %v9867_v35  ;;  %v8564_v51 = vunpack.c.l.bf16 %v13126_v29  ;;  %v9885_v14 = vld [vmem:[%s13837_s1 + $0x6c0] ss:$8 sps:$4 sm:$0xff]   ;;  %v8565_v10 = vunpack.c.h.bf16 %v13126_v29 }
 0x3bc   :  { %v6001_v54 = vsel %vm13930_vm5, %v6000_v9, %v5996_v52  ;;  %v3026_v20 = vmul.f32 0.0625, %v2395_v56  ;;  %9002 = vmatprep.subr.bf16.mxu1 %v9868_v24  ;;  %9258 = vmatprep.subr.bf16.mxu0 %v9871_v57  ;;  %v9876_v52 = vld [vmem:[%s13837_s1 + $0x2b0] ss:$8 sps:$4 sm:$0xff]   ;;  %v9889_v24 = vld [vmem:[%s13837_s1 + $0x6d4] ss:$8 sps:$4 sm:$0xff]   ;;  %v2168_v9 = vsel %vm1036_vm0, %v8309_v27, 0.0  ;;  %v8532_v49 = vunpack.c.l.bf16 %v13189_v18 }
 0x3bd   :  { %v6716_v2 = vrot.slane %v3043_v55, %v13931_v47  ;;  %2547 = vadd.xlane.f32.xlu1 %v2546_v13  ;;  %v2549_v34 = vsel %vm1036_vm0, %v8564_v51, 0.0  ;;  %v8766_v55 = vld [vmem:[%s13836_s0 + $0x5e8] sm:$0xff]   ;;  %v9888_v56 = vld [vmem:[%s13837_s1 + $0x2d0] ss:$8 sps:$4 sm:$0xff]  }
 0x3be   :  { %v6632_v48 = vrot.slane %v3026_v20, %v13928_v26  ;;  %2496 = vadd.xlane.f32.xlu0 %v2495_v4  ;;  %v13143_v40 = vpop.xlane.xlu1 %2064  ;;  %v2117_v4 = vsel %vm1036_vm0, %v8276_v62, 0.0  ;;  %v2552_v20 = vsel %vm1036_vm0, %v8565_v10, 0.0  ;;  %v9894_v51 = vld [vmem:[%s13837_s1 + $0x2e0] ss:$8 sps:$4 sm:$0xff]  }
 0x3bf   :  { %v13148_v8 = vsel %vm13932_vm4, %v6716_v2, %v6712_v31  ;;  %v2014_v19 = vpop.xlane.xlu0 %2013  ;;  %9004 = vmatpush1.bf16.msra.mxu1 %v9870_v58  ;;  %9260 = vmatpush1.bf16.msra.mxu0 %v9873_v36  ;;  %v2498_v31 = vsel %vm1036_vm0, %v8529_v21, 0.0  ;;  %v9892_v58 = vld [vmem:[%s13837_s1 + $0x2e4] ss:$8 sps:$4 sm:$0xff]   ;;  %v2501_v2 = vsel %vm1036_vm0, %v8532_v49, 0.0  ;;  %v9901_v21 = vld [vmem:[%s13837_s1 + $0x6f4] ss:$8 sps:$4 sm:$0xff]  }
 0x3c0   :  { %v6633_v0 = vsel %vm13930_vm5, %v6632_v48, %v6628_v28  ;;  %v2899_v53 = vmul.f32 0.0625, %v2014_v19  ;;  %9006 = vmatprep.subr.bf16.mxu1 %v9874_v12  ;;  %9262 = vmatprep.subr.bf16.mxu0 %v9877_v50  ;;  %vm13933_vm5 = vmmov %vm13932_vm4  ;;  %v9895_v36 = vld [vmem:[%s13837_s1 + $0x6e4] ss:$8 sps:$4 sm:$0xff]   ;;  %v8312_v12 = vunpack.c.l.bf16 %v8766_v55  ;;  %v8277_v48 = vunpack.c.h.bf16 %v13162_v38  ;;  %v9897_v19 = vld [vmem:[%s13837_s1 + $0x6e0] ss:$8 sps:$4 sm:$0xff]  }
 0x3c1   :  { %2166 = vadd.xlane.f32.xlu1 %v2165_v7  ;;  %v8830_v7 = vld [vmem:[%s13836_s0 + $0x7e8] sm:$0xff]  }
 0x3c2   :  { %v6005_v6 = vrot.slane %v2899_v53, %v13931_v47  ;;  %2115 = vadd.xlane.f32.xlu0 %v2114_v5  ;;  %v13171_v39 = vpop.xlane.xlu1 %2448  ;;  %v9898_v5 = vld [vmem:[%s13837_s1 + $0x2f4] ss:$8 sps:$4 sm:$0xff]   ;;  %v2120_v38 = vsel %vm1036_vm0, %v8277_v48, 0.0 }
 0x3c3   :  { %v2398_v46 = vpop.xlane.xlu0 %2397  ;;  %9008 = vmatpush1.bf16.msra.mxu1 %v9876_v52  ;;  %9264 = vmatpush1.bf16.msra.mxu0 %v9879_v22  ;;  %v2171_v22 = vsel %vm1036_vm0, %v8312_v12, 0.0 }
 0x3c4   :  { %v13184_v35 = vsel %vm13932_vm4, %v6005_v6, %v6001_v54  ;;  %v3027_v28 = vmul.f32 0.0625, %v2398_v46  ;;  %9010 = vmatprep.subr.bf16.mxu1 %v9880_v44  ;;  %9266 = vmatprep.subr.bf16.mxu0 %v9883_v11  ;;  %v8533_v44 = vunpack.c.h.bf16 %v13189_v18  ;;  %v9900_v11 = vld [vmem:[%s13837_s1 + $0x2f0] ss:$8 sps:$4 sm:$0xff]   ;;  %v9904_v18 = vld [vmem:[%s13837_s1 + $0x304] ss:$8 sps:$4 sm:$0xff]   ;;  %vm13934_vm4 = vcmask 523712  }
 0x3c5   :  { %2550 = vadd.xlane.f32.xlu1 %v2549_v34  ;;  %v9903_v6 = vld [vmem:[%s13837_s1 + $0x6f0] ss:$8 sps:$4 sm:$0xff]   ;;  %v8758_v34 = vld [vmem:[%s13836_s0 + $0x5a8] sm:$0xff]  }
 0x3c6   :  { %v6637_v57 = vrot.slane %v3027_v28, %v13931_v47  ;;  %2499 = vadd.xlane.f32.xlu0 %v2498_v31  ;;  %v13198_v30 = vpop.xlane.xlu1 %2067  ;;  %v8313_v31 = vunpack.c.h.bf16 %v8766_v55  ;;  %v8822_v28 = vld [vmem:[%s13836_s0 + $0x7a8] sm:$0xff]   ;;  %v8767_v55 = vld [vmem:[%s13836_s0 + $0x5f0] sm:$0xff]   ;;  %v8281_v12 = vunpack.c.h.bf16 %v8758_v34 }
 0x3c7   :  { %v13202_v13 = vpop.xlane.xlu0 %2016  ;;  %9012 = vmatpush1.bf16.msra.mxu1 %v9882_v63  ;;  %9268 = vmatpush1.bf16.msra.mxu0 %v9885_v14  ;;  %v2504_v63 = vsel %vm1036_vm0, %v8533_v44, 0.0  ;;  %v8280_v14 = vunpack.c.l.bf16 %v8758_v34  ;;  %v8536_v49 = vunpack.c.l.bf16 %v8822_v28  ;;  %v8317_v44 = vunpack.c.h.bf16 %v8767_v55 }
 0x3c8   :  { %v13216_v29 = vsel %vm13933_vm5, %v6637_v57, %v6633_v0  ;;  %9014 = vmatprep.subr.bf16.mxu1 %v9886_v3  ;;  %9270 = vmatprep.subr.bf16.mxu0 %v9889_v24  ;;  %v8568_v0 = vunpack.c.l.bf16 %v8830_v7  ;;  %v9907_v3 = vld [vmem:[%s13837_s1 + $0x704] ss:$8 sps:$4 sm:$0xff]   ;;  %v2174_v57 = vsel %vm1036_vm0, %v8313_v31, 0.0 }
 0x3c9   :  { %2169 = vadd.xlane.f32.xlu1 %v2168_v9  ;;  %v8569_v9 = vunpack.c.h.bf16 %v8830_v7 }
 0x3ca   :  { %2118 = vadd.xlane.f32.xlu0 %v2117_v4  ;;  %v13224_v54 = vpop.xlane.xlu1 %2451  ;;  %v2555_v46 = vsel %vm1036_vm0, %v8568_v0, 0.0  ;;  %v2123_v4 = vsel %vm1036_vm0, %v8280_v14, 0.0 }
 0x3cb   :  { %v13227_v50 = vpop.xlane.xlu0 %2400  ;;  %9016 = vmatpush1.bf16.msra.mxu1 %v9888_v56  ;;  %9272 = vmatpush1.bf16.msra.mxu0 %v9891_v32  ;;  %v2558_v32 = vsel %vm1036_vm0, %v8569_v9, 0.0 }
 0x3cc   :  { %9018 = vmatprep.subr.bf16.mxu1 %v9892_v58  ;;  %9274 = vmatprep.subr.bf16.mxu0 %v9895_v36  ;;  %v8316_v58 = vunpack.c.l.bf16 %v8767_v55 }
 0x3cd   :  { %2553 = vadd.xlane.f32.xlu1 %v2552_v20  ;;  %v2507_v20 = vsel %vm1036_vm0, %v8536_v49, 0.0 }
 0x3ce   :  { %2502 = vadd.xlane.f32.xlu0 %v2501_v2  ;;  %v13246_v52 = vpop.xlane.xlu1 %2070  ;;  %v8831_v2 = vld [vmem:[%s13836_s0 + $0x7f0] sm:$0xff]   ;;  %v2177_v7 = vsel %vm1036_vm0, %v8316_v58, 0.0 }
 0x3cf   :  { %v13249_v53 = vpop.xlane.xlu0 %2019  ;;  %9020 = vmatpush1.bf16.msra.mxu1 %v9894_v51  ;;  %9276 = vmatpush1.bf16.msra.mxu0 %v9897_v19  ;;  %v8572_v51 = vunpack.c.l.bf16 %v8831_v2  ;;  %v8573_v14 = vunpack.c.h.bf16 %v8831_v2 }
 0x3d0   :  { %9022 = vmatprep.subr.bf16.mxu1 %v9898_v5  ;;  %9278 = vmatprep.subr.bf16.mxu0 %v9901_v21  ;;  %v2126_v5 = vsel %vm1036_vm0, %v8281_v12, 0.0  ;;  %v8537_v21 = vunpack.c.h.bf16 %v8822_v28 }
 0x3d1   :  { %2172 = vadd.xlane.f32.xlu1 %v2171_v22  ;;  %v8759_v22 = vld [vmem:[%s13836_s0 + $0x5b0] sm:$0xff]  }
 0x3d2   :  { %2121 = vadd.xlane.f32.xlu0 %v2120_v38  ;;  %v13262_v27 = vpop.xlane.xlu1 %2454  ;;  %v2561_v38 = vsel %vm1036_vm0, %v8572_v51, 0.0  ;;  %v8284_v34 = vunpack.c.l.bf16 %v8759_v22  ;;  %v8285_v58 = vunpack.c.h.bf16 %v8759_v22  ;;  %v8760_v22 = vld [vmem:[%s13836_s0 + $0x5b8] sm:$0xff]  }
 0x3d3   :  { %v13265_v62 = vpop.xlane.xlu0 %2403  ;;  %9024 = vmatpush1.bf16.msra.mxu1 %v9900_v11  ;;  %9280 = vmatpush1.bf16.msra.mxu0 %v9903_v6  ;;  %v2510_v6 = vsel %vm1036_vm0, %v8537_v21, 0.0 }
 0x3d4   :  { %9026 = vmatprep.subr.bf16.mxu1 %v9904_v18  ;;  %9282 = vmatprep.subr.bf16.mxu0 %v9907_v3  ;;  %v2129_v18 = vsel %vm1036_vm0, %v8284_v34, 0.0  ;;  %v2917_v34 = vmul.f32 0.0625, %v13198_v30 }
 0x3d5   :  { %2556 = vadd.xlane.f32.xlu1 %v2555_v46  ;;  %v8823_v46 = vld [vmem:[%s13836_s0 + $0x7b0] sm:$0xff]  }
 0x3d6   :  { %2505 = vadd.xlane.f32.xlu0 %v2504_v63  ;;  %v13277_v24 = vpop.xlane.xlu1 %2073  ;;  %v2180_v63 = vsel %vm1036_vm0, %v8317_v44, 0.0  ;;  %v8540_v3 = vunpack.c.l.bf16 %v8823_v46  ;;  %v8541_v21 = vunpack.c.h.bf16 %v8823_v46  ;;  %v8824_v44 = vld [vmem:[%s13836_s0 + $0x7b8] sm:$0xff]  }
 0x3d7   :  { %v13280_v10 = vpop.xlane.xlu0 %2022 }
 0x3d9   :  { %2175 = vadd.xlane.f32.xlu1 %v2174_v57  ;;  %v8768_v57 = vld [vmem:[%s13836_s0 + $0x5f8] sm:$0xff]  }
 0x3da   :  { %2124 = vadd.xlane.f32.xlu0 %v2123_v4  ;;  %v13286_v56 = vpop.xlane.xlu1 %2457  ;;  %v2564_v4 = vsel %vm1036_vm0, %v8573_v14, 0.0  ;;  %v8320_v49 = vunpack.c.l.bf16 %v8768_v57  ;;  %v2900_v14 = vmul.f32 0.0625, %v13202_v13  ;;  %v8289_v13 = vunpack.c.h.bf16 %v8760_v22 }
 0x3db   :  { %v13289_v36 = vpop.xlane.xlu0 %2406 }
 0x3dc   :  { %v2183_v2 = vsel %vm1036_vm0, %v8320_v49, 0.0 }
 0x3dd   :  { %2559 = vadd.xlane.f32.xlu1 %v2558_v32  ;;  %v2513_v32 = vsel %vm1036_vm0, %v8540_v3, 0.0  ;;  %v8288_v3 = vunpack.c.l.bf16 %v8760_v22 }
 0x3de   :  { %2508 = vadd.xlane.f32.xlu0 %v2507_v20  ;;  %v13295_v48 = vpop.xlane.xlu1 %2076  ;;  %v8832_v20 = vld [vmem:[%s13836_s0 + $0x7f8] sm:$0xff]  }
 0x3df   :  { %v13298_v19 = vpop.xlane.xlu0 %2025 }
 0x3e1   :  { %2178 = vadd.xlane.f32.xlu1 %v2177_v7  ;;  %v8576_v7 = vunpack.c.l.bf16 %v8832_v20 }
 0x3e2   :  { %2127 = vadd.xlane.f32.xlu0 %v2126_v5  ;;  %v13304_v0 = vpop.xlane.xlu1 %2460  ;;  %v2132_v5 = vsel %vm1036_vm0, %v8285_v58, 0.0  ;;  %v8545_v58 = vunpack.c.h.bf16 %v8824_v44 }
 0x3e3   :  { %v13307_v11 = vpop.xlane.xlu0 %2409 }
 0x3e5   :  { %2562 = vadd.xlane.f32.xlu1 %v2561_v38  ;;  %v2916_v38 = vmul.f32 0.0625, %v13143_v40  ;;  %v3045_v40 = vmul.f32 0.0625, %v13224_v54 }
 0x3e6   :  { %2511 = vadd.xlane.f32.xlu0 %v2510_v6  ;;  %v13313_v31 = vpop.xlane.xlu1 %2079  ;;  %v3044_v6 = vmul.f32 0.0625, %v13171_v39  ;;  %v8544_v39 = vunpack.c.l.bf16 %v8824_v44 }
 0x3e7   :  { %v13316_v28 = vpop.xlane.xlu0 %2028  ;;  %v6089_v30 = vrot.slane %v2916_v38, %v10281_v42  ;;  %v2135_v38 = vsel %vm1036_vm0, %v8288_v3, 0.0  ;;  %v6726_v22 = vrot.slane %v3045_v40, %v10278_v41  ;;  %v2138_v3 = vsel %vm1036_vm0, %v8289_v13, 0.0 }
 0x3e8   :  { %v3030_v13 = vmul.f32 0.0625, %v13289_v36  ;;  %v2921_v36 = vmul.f32 0.0625, %v13313_v31 }
 0x3e9   :  { %2181 = vadd.xlane.f32.xlu1 %v2180_v63  ;;  %v8321_v63 = vunpack.c.h.bf16 %v8768_v57  ;;  %v3028_v57 = vmul.f32 0.0625, %v13227_v50 }
 0x3ea   :  { %2130 = vadd.xlane.f32.xlu0 %v2129_v18  ;;  %v13322_v9 = vpop.xlane.xlu1 %2463  ;;  %v2567_v18 = vsel %vm1036_vm0, %v8576_v7, 0.0  ;;  %v2918_v7 = vmul.f32 0.0625, %v13246_v52  ;;  %v2519_v52 = vsel %vm1036_vm0, %v8544_v39, 0.0 }
 0x3eb   :  { %v13325_v55 = vpop.xlane.xlu0 %2412  ;;  %v2186_v54 = vsel %vm1036_vm0, %v8321_v63, 0.0  ;;  %v2522_v63 = vsel %vm1036_vm0, %v8545_v58, 0.0  ;;  %v2902_v58 = vmul.f32 0.0625, %v13280_v10  ;;  %v2903_v10 = vmul.f32 0.0625, %v13298_v19 }
 0x3ec   :  { %v6099_v40 = vrot.slane %v2918_v7, %v10302_v1 }
 0x3ed   :  { %2565 = vadd.xlane.f32.xlu1 %v2564_v4  ;;  %v8577_v4 = vunpack.c.h.bf16 %v8832_v20  ;;  %v6010_v20 = vrot.slane %v2900_v14, %v10281_v42  ;;  %v6090_v14 = vsel %vm4412_vm6, %v6089_v30, %v13120_v59 }
 0x3ee   :  { %2514 = vadd.xlane.f32.xlu0 %v2513_v32  ;;  %v13331_v12 = vpop.xlane.xlu1 %2082  ;;  %v2516_v32 = vsel %vm1036_vm0, %v8541_v21, 0.0  ;;  %v2901_v21 = vmul.f32 0.0625, %v13249_v53  ;;  %v6642_v53 = vrot.slane %v3028_v57, %v10281_v42 }
 0x3ef   :  { %v13334_v51 = vpop.xlane.xlu0 %2031  ;;  %v2570_v50 = vsel %vm1036_vm0, %v8577_v4, 0.0  ;;  %v6011_v39 = vsel %vm4412_vm6, %v6010_v20, %v13184_v35  ;;  %vm13935_vm0 = vmmov %vm13934_vm4  ;;  %v3031_v20 = vmul.f32 0.0625, %v13307_v11  ;;  %v3049_v11 = vmul.f32 0.0625, %v13322_v9 }
 0x3f0   :  { %v6015_v59 = vrot.slane %v2901_v21, %v10278_v41  ;;  %v6643_v35 = vsel %vm4412_vm6, %v6642_v53, %v13216_v29  ;;  %vm13936_vm5 = vmmov %vm13935_vm0  ;;  %v6020_v21 = vrot.slane %v2902_v58, %v10302_v1 }
 0x3f1   :  { %2184 = vadd.xlane.f32.xlu1 %v2183_v2  ;;  %v6721_v2 = vrot.slane %v3044_v6, %v10281_v42  ;;  %v3046_v6 = vmul.f32 0.0625, %v13262_v27 }
 0x3f2   :  { %2133 = vadd.xlane.f32.xlu0 %v2132_v5  ;;  %v13347_v46 = vpop.xlane.xlu1 %2466  ;;  %v6094_v5 = vrot.slane %v2917_v34, %v10278_v41 }
 0x3f3   :  { %v13351_v49 = vpop.xlane.xlu0 %2415  ;;  %v6722_v4 = vsel %vm4412_vm6, %v6721_v2, %v13148_v8  ;;  %v6731_v57 = vrot.slane %v3046_v6, %v10302_v1 }
 0x3f4   :  { %v6095_v27 = vsel %vm13934_vm4, %v6094_v5, %v6090_v14  ;;  %v6727_v8 = vsel %vm13935_vm0, %v6726_v22, %v6722_v4  ;;  %v6652_v22 = vrot.slane %v3030_v13, %v10302_v1  ;;  %vm13937_vm4 = vmmov %vm13935_vm0  ;;  %v6025_v14 = vrot.slane %v2903_v10, %v10296_v61 }
 0x3f5   :  { %2568 = vadd.xlane.f32.xlu1 %v2567_v18  ;;  %v3029_v18 = vmul.f32 0.0625, %v13265_v62  ;;  %v3047_v62 = vmul.f32 0.0625, %v13286_v56  ;;  %v3048_v56 = vmul.f32 0.0625, %v13304_v0  ;;  %v6100_v7 = vsel %vm4426_vm8, %v6099_v40, %v6095_v27 }
 0x3f6   :  { %2517 = vadd.xlane.f32.xlu0 %v2516_v32  ;;  %v2086_v44 = vpop.xlane.xlu1 %2085  ;;  %v2919_v32 = vmul.f32 0.0625, %v13277_v24  ;;  %v2920_v24 = vmul.f32 0.0625, %v13295_v48  ;;  %v6016_v48 = vsel %vm13936_vm5, %v6015_v59, %v6011_v39  ;;  %v6732_v0 = vsel %vm4426_vm8, %v6731_v57, %v6727_v8 }
 0x3f7   :  { %v13366_v34 = vpop.xlane.xlu0 %2034  ;;  %v6647_v5 = vrot.slane %v3029_v18, %v10278_v41  ;;  %v6736_v29 = vrot.slane %v3047_v62, %v10296_v61  ;;  %v6741_v53 = vrot.slane %v3048_v56, %v10319_v23  ;;  %v2922_v18 = vmul.f32 0.0625, %v13331_v12 }
 0x3f8   :  { %v6109_v6 = vrot.slane %v2920_v24, %v10319_v23  ;;  %v6114_v4 = vrot.slane %v2921_v36, %v10313_v17  ;;  %v2923_v27 = vmul.f32 0.0625, %v2086_v44  ;;  %v6021_v40 = vsel %vm4426_vm8, %v6020_v21, %v6016_v48 }
 0x3f9   :  { %2187 = vadd.xlane.f32.xlu1 %v2186_v54  ;;  %v6104_v54 = vrot.slane %v2919_v32, %v10296_v61  ;;  %v6737_v9 = vsel %vm4433_vm9, %v6736_v29, %v6732_v0  ;;  %v6746_v62 = vrot.slane %v3049_v11, %v10313_v17  ;;  %v3032_v8 = vmul.f32 0.0625, %v13325_v55 }
 0x3fa   :  { %2136 = vadd.xlane.f32.xlu0 %v2135_v38  ;;  %v2470_v30 = vpop.xlane.xlu1 %2469  ;;  %v2904_v38 = vmul.f32 0.0625, %v13316_v28  ;;  %v6026_v44 = vsel %vm4433_vm9, %v6025_v14, %v6021_v40  ;;  %v6119_v13 = vrot.slane %v2922_v18, %v10336_v43  ;;  %v3050_v24 = vmul.f32 0.0625, %v13347_v46 }
 0x3fb   :  { %v2419_v2 = vpop.xlane.xlu0 %2418  ;;  %v6105_v28 = vsel %vm4433_vm9, %v6104_v54, %v6100_v7  ;;  %v3051_v10 = vmul.f32 0.0625, %v2470_v30  ;;  %v2905_v55 = vmul.f32 0.0625, %v13334_v51  ;;  %v6662_v48 = vrot.slane %v3032_v8, %v10319_v23 }
 0x3fc   :  { %v6030_v32 = vrot.slane %v2904_v38, %v10319_v23  ;;  %v6110_v12 = vsel %vm4440_vm10, %v6109_v6, %v6105_v28  ;;  %v3033_v46 = vmul.f32 0.0625, %v13351_v49  ;;  %v6751_v30 = vrot.slane %v3050_v24, %v10336_v43 }
 0x3fd   :  { %2571 = vadd.xlane.f32.xlu1 %v2570_v50  ;;  %v6648_v50 = vsel %vm13937_vm4, %v6647_v5, %v6643_v35  ;;  %v6115_v35 = vsel %vm4447_vm11, %v6114_v4, %v6110_v12  ;;  %v6124_v5 = vrot.slane %v2923_v27, %v10330_v37  ;;  %v3034_v0 = vmul.f32 0.0625, %v2419_v2 }
 0x3fe   :  { %2520 = vadd.xlane.f32.xlu0 %v2519_v52  ;;  %v2089_v19 = vpop.xlane.xlu1 %2088  ;;  %v6657_v52 = vrot.slane %v3031_v20, %v10296_v61  ;;  %v6653_v58 = vsel %vm4426_vm8, %v6652_v22, %v6648_v50  ;;  %v6031_v56 = vsel %vm4440_vm10, %v6030_v32, %v6026_v44  ;;  %v6120_v38 = vsel %vm4454_vm12, %v6119_v13, %v6115_v35  ;;  %v13938_v32 = vld [vmem:[#allocation18_spill] sm:$0xff] }
 0x3ff   :  { %v2038_v31 = vpop.xlane.xlu0 %2037  ;;  %v2924_v39 = vmul.f32 0.0625, %v2089_v19  ;;  %v2906_v19 = vmul.f32 0.0625, %v13366_v34  ;;  %v6125_v51 = vsel %vm4461_vm13, %v6124_v5, %v6120_v38  ;;  %v6756_v22 = vrot.slane %v3051_v10, %v10330_v37 }
 0x400   :  { %v6035_v50 = vrot.slane %v2905_v55, %v10313_v17  ;;  %v2907_v14 = vmul.f32 0.0625, %v2038_v31  ;;  %v6667_v28 = vrot.slane %v3033_v46, %v10313_v17  ;;  %v6672_v40 = vrot.slane %v3034_v0, %v10336_v43 }
 0x401   :  { %2523 = vadd.xlane.f32.xlu1 %v2522_v63  ;;  %v6742_v63 = vsel %vm4440_vm10, %v6741_v53, %v6737_v9  ;;  %v6129_v7 = vrot.slane %v2924_v39, %v13915_v60  ;;  %v6040_v39 = vrot.slane %v2906_v19, %v10336_v43  ;;  %vm13944_vm0 = vcmask 392512  }
 0x402   :  { %2139 = vadd.xlane.f32.xlu0 %v2138_v3  ;;  %v2473_v59 = vpop.xlane.xlu1 %2472  ;;  %v6658_v3 = vsel %vm4433_vm9, %v6657_v52, %v6653_v58  ;;  %v6747_v36 = vsel %vm4447_vm11, %v6746_v62, %v6742_v63  ;;  %v6045_v8 = vrot.slane %v2907_v14, %v10330_v37  ;;  %v6036_v55 = vsel %vm4447_vm11, %v6035_v50, %v6031_v56  ;;  %vm13946_vm5 = vmmov %vm13944_vm0 }
 0x403   :  { %v2422_v57 = vpop.xlane.xlu0 %2421  ;;  %v3052_v54 = vmul.f32 0.0625, %v2473_v59  ;;  %v6130_v18 = vsel %vm4468_vm14, %v6129_v7, %v6125_v51  ;;  %v6752_v27 = vsel %vm4454_vm12, %v6751_v30, %v6747_v36  ;;  %v6663_v62 = vsel %vm4440_vm10, %v6662_v48, %v6658_v3  ;;  %v9909_v30 = vld [vmem:[%s13837_s1 + $0x700] ss:$8 sps:$4 sm:$0xff]  }
 0x404   :  { %v3035_v6 = vmul.f32 0.0625, %v2422_v57  ;;  %v6757_v59 = vsel %vm4461_vm13, %v6756_v22, %v6752_v27  ;;  %v6668_v13 = vsel %vm4447_vm11, %v6667_v28, %v6663_v62  ;;  %v6041_v36 = vsel %vm4454_vm12, %v6040_v39, %v6036_v55  ;;  %v9915_v27 = vld [vmem:[%s13837_s1 + $0x710] ss:$8 sps:$4 sm:$0xff]  }
 0x405   :  { %v6761_v49 = vrot.slane %v3052_v54, %v13915_v60  ;;  %v6673_v7 = vsel %vm4454_vm12, %v6672_v40, %v6668_v13  ;;  %v13939_v54 = vld [vmem:[#allocation26_spill] sm:$0xff]  ;;  %v9918_v13 = vld [vmem:[%s13837_s1 + $0x320] ss:$8 sps:$4 sm:$0xff]  }
 0x406   :  { %v2092_v20 = vpop.xlane.xlu1 %2091  ;;  %v6677_v58 = vrot.slane %v3035_v6, %v10330_v37  ;;  %v9906_v6 = vld [vmem:[%s13837_s1 + $0x300] ss:$8 sps:$4 sm:$0xff]  }
 0x407   :  { %v2925_v21 = vmul.f32 0.0625, %v2092_v20  ;;  %v2041_v29 = vpop.xlane.xlu0 %2040  ;;  %v6762_v63 = vsel %vm4468_vm14, %v6761_v49, %v6757_v59  ;;  %v13940_v49 = vld [vmem:[#allocation25_spill] sm:$0xff] }
 0x408   :  { %v2908_v52 = vmul.f32 0.0625, %v2041_v29  ;;  %v6678_v48 = vsel %vm4461_vm13, %v6677_v58, %v6673_v7  ;;  %v9916_v58 = vld [vmem:[%s13837_s1 + $0x324] ss:$8 sps:$4 sm:$0xff]  }
 0x409   :  { %v6134_v11 = vrot.slane %v2925_v21, %v13916_v16  ;;  %v6046_v21 = vsel %vm4461_vm13, %v6045_v8, %v6041_v36  ;;  %v9924_v36 = vld [vmem:[%s13837_s1 + $0x330] ss:$8 sps:$4 sm:$0xff]  }
 0x40a   :  { %v2476_v53 = vpop.xlane.xlu1 %2475  ;;  %v6050_v24 = vrot.slane %v2908_v52, %v13915_v60  ;;  %v13941_v52 = vld [vmem:[#allocation17_spill] sm:$0xff] }
 0x40b   :  { %v3053_v34 = vmul.f32 0.0625, %v2476_v53  ;;  %v2425_v2 = vpop.xlane.xlu0 %2424  ;;  %v6135_v4 = vsel %vm4475_vm15, %v6134_v11, %v6130_v18  ;;  %v9913_v11 = vld [vmem:[%s13837_s1 + $0x714] ss:$8 sps:$4 sm:$0xff]  }
 0x40c   :  { %v3036_v9 = vmul.f32 0.0625, %v2425_v2  ;;  %v6932_v31 = vsel %vm6926_vm7, %v6135_v4, %v13938_v32  ;;  %v6051_v19 = vsel %vm4468_vm14, %v6050_v24, %v6046_v21  ;;  %v9910_v18 = vld [vmem:[%s13837_s1 + $0x314] ss:$8 sps:$4 sm:$0xff]   ;;  %v9912_v32 = vld [vmem:[%s13837_s1 + $0x310] ss:$8 sps:$4 sm:$0xff]  }
 0x40d   :  { %v6766_v12 = vrot.slane %v3053_v34, %v13916_v16  ;;  %7165 = vmatprep.mubr.f32.mxu1 %v6932_v31  ;;  %v9919_v31 = vld [vmem:[%s13837_s1 + $0x724] ss:$8 sps:$4 sm:$0xff]   ;;  %v9925_v24 = vld [vmem:[%s13837_s1 + $0x734] ss:$8 sps:$4 sm:$0xff]  }
 0x40e   :  { %v6682_v57 = vrot.slane %v3036_v9, %v13915_v60  ;;  %v2428_v44 = vpop.xlane.xlu1 %2427 }
 0x40f   :  { %v3037_v35 = vmul.f32 0.0625, %v2428_v44  ;;  %v2044_v5 = vpop.xlane.xlu0 %2043  ;;  %v6767_v10 = vsel %vm4475_vm15, %v6766_v12, %v6762_v63 }
 0x410   :  { %v2909_v3 = vmul.f32 0.0625, %v2044_v5  ;;  %v6940_v20 = vsel %vm6926_vm7, %v6767_v10, %v13939_v54  ;;  %v6683_v29 = vsel %vm4468_vm14, %v6682_v57, %v6678_v48  ;;  %v9921_v57 = vld [vmem:[%s13837_s1 + $0x720] ss:$8 sps:$4 sm:$0xff]   ;;  %v9922_v10 = vld [vmem:[%s13837_s1 + $0x334] ss:$8 sps:$4 sm:$0xff]  }
 0x411   :  { %v6687_v46 = vrot.slane %v3037_v35, %v13916_v16  ;;  %7449 = vmatprep.mubr.f32.mxu0 %v6940_v20  ;;  %v9927_v54 = vld [vmem:[%s13837_s1 + $0x730] ss:$8 sps:$4 sm:$0xff]   ;;  %v9931_v48 = vld [vmem:[%s13837_s1 + $0x744] ss:$8 sps:$4 sm:$0xff]  }
 0x412   :  { %v6055_v38 = vrot.slane %v2909_v3, %v13916_v16  ;;  %v2146_v56 = vpop.xlane.xlu1 %2145 }
 0x413   :  { %v2943_v0 = vmul.f32 0.0625, %v2146_v56  ;;  %v2143_v51 = vpop.xlane.xlu0 %2142  ;;  %v6688_v22 = vsel %vm4475_vm15, %v6687_v46, %v6683_v29  ;;  %v9928_v29 = vld [vmem:[%s13837_s1 + $0x344] ss:$8 sps:$4 sm:$0xff]  }
 0x414   :  { %v2942_v50 = vmul.f32 0.0625, %v2143_v51  ;;  %v6056_v14 = vsel %vm4475_vm15, %v6055_v38, %v6051_v19  ;;  %v6939_v53 = vsel %vm6926_vm7, %v6688_v22, %v13940_v49  ;;  %v9933_v19 = vld [vmem:[%s13837_s1 + $0x740] ss:$8 sps:$4 sm:$0xff]  }
 0x415   :  { %v6222_v28 = vrot.slane %v2943_v0, %v13924_v45  ;;  %v6931_v34 = vsel %vm6926_vm7, %v6056_v14, %v13941_v52  ;;  %7450 = vmatmul.mubr.f32.vlgmr.msra.gmra.mrb[0].mxu0 %v6939_v53  ;;  %v9930_v22 = vld [vmem:[%s13837_s1 + $0x340] ss:$8 sps:$4 sm:$0xff]   ;;  %v9934_v14 = vld [vmem:[%s13837_s1 + $0x354] ss:$8 sps:$4 sm:$0xff]   ;;  %v9939_v52 = vld [vmem:[%s13837_s1 + $0x750] ss:$8 sps:$4 sm:$0xff]  }
 0x416   :  { %v6218_v2 = vrot.slane %v2942_v50, %v13925_v25  ;;  %7166 = vmatmul.mubr.f32.vlgmr.msra.gmra.mrb[0].mxu1 %v6931_v34  ;;  %v2530_v4 = vpop.xlane.xlu1 %2529  ;;  %9284 = vmatpush1.bf16.msra.mxu0 %v9909_v30 }
 0x417   :  { %v3071_v40 = vmul.f32 0.0625, %v2530_v4  ;;  %v2527_v9 = vpop.xlane.xlu0 %2526  ;;  %9028 = vmatpush1.bf16.msra.mxu1 %v9906_v6  ;;  %9286 = vmatprep.subr.bf16.mxu0 %v9913_v11  ;;  %v9937_v6 = vld [vmem:[%s13837_s1 + $0x754] ss:$8 sps:$4 sm:$0xff]  }
 0x418   :  { %v6223_v39 = vsel %vm4377_vm1, %v6222_v28, %v6218_v2  ;;  %v3070_v59 = vmul.f32 0.0625, %v2527_v9  ;;  %9030 = vmatprep.subr.bf16.mxu1 %v9910_v18  ;;  %v9940_v9 = vld [vmem:[%s13837_s1 + $0x364] ss:$8 sps:$4 sm:$0xff]  }
 0x419   :  { %v6854_v12 = vrot.slane %v3071_v40, %v13924_v45 }
 0x41a   :  { %v6850_v62 = vrot.slane %v3070_v59, %v13925_v25  ;;  %v2098_v8 = vpop.xlane.xlu1 %2097  ;;  %9288 = vmatpush1.bf16.msra.mxu0 %v9915_v27  ;;  %v9936_v27 = vld [vmem:[%s13837_s1 + $0x350] ss:$8 sps:$4 sm:$0xff]   ;;  %v9945_v59 = vld [vmem:[%s13837_s1 + $0x760] ss:$8 sps:$4 sm:$0xff]  }
 0x41b   :  { %v2927_v44 = vmul.f32 0.0625, %v2098_v8  ;;  %v2095_v63 = vpop.xlane.xlu0 %2094  ;;  %9032 = vmatpush1.bf16.msra.mxu1 %v9912_v32  ;;  %9290 = vmatprep.subr.bf16.mxu0 %v9919_v31  ;;  %v9942_v8 = vld [vmem:[%s13837_s1 + $0x360] ss:$8 sps:$4 sm:$0xff]  }
 0x41c   :  { %v6855_v35 = vsel %vm4377_vm1, %v6854_v12, %v6850_v62  ;;  %v2926_v5 = vmul.f32 0.0625, %v2095_v63  ;;  %9034 = vmatprep.subr.bf16.mxu1 %v9916_v58 }
 0x41d   :  { %v6143_v55 = vrot.slane %v2927_v44, %v13924_v45 }
 0x41e   :  { %v6139_v7 = vrot.slane %v2926_v5, %v13925_v25  ;;  %v2479_v3 = vpop.xlane.xlu1 %2478  ;;  %9292 = vmatpush1.bf16.msra.mxu0 %v9921_v57  ;;  %v9949_v57 = vld [vmem:[%s13837_s1 + $0x774] ss:$8 sps:$4 sm:$0xff]  }
 0x41f   :  { %v2149_v20 = vpop.xlane.xlu0 %2148  ;;  %9036 = vmatpush1.bf16.msra.mxu1 %v9918_v13  ;;  %9294 = vmatprep.subr.bf16.mxu0 %v9925_v24  ;;  %v3054_v38 = vmul.f32 0.0625, %v2479_v3  ;;  %v9946_v13 = vld [vmem:[%s13837_s1 + $0x374] ss:$8 sps:$4 sm:$0xff]  }
 0x420   :  { %v6144_v46 = vsel %vm4377_vm1, %v6143_v55, %v6139_v7  ;;  %v2944_v21 = vmul.f32 0.0625, %v2149_v20  ;;  %9038 = vmatprep.subr.bf16.mxu1 %v9922_v10  ;;  %v9951_v10 = vld [vmem:[%s13837_s1 + $0x770] ss:$8 sps:$4 sm:$0xff]  }
 0x421   :  { %v6771_v53 = vrot.slane %v3054_v38, %v13925_v25  ;;  %v9957_v38 = vld [vmem:[%s13837_s1 + $0x780] ss:$8 sps:$4 sm:$0xff]  }
 0x422   :  { %v6227_v56 = vrot.slane %v2944_v21, %v13926_v15  ;;  %v2533_v30 = vpop.xlane.xlu1 %2532  ;;  %9296 = vmatpush1.bf16.msra.mxu0 %v9927_v54  ;;  %v9948_v54 = vld [vmem:[%s13837_s1 + $0x370] ss:$8 sps:$4 sm:$0xff]  }
 0x423   :  { %v3072_v0 = vmul.f32 0.0625, %v2533_v30  ;;  %v2482_v51 = vpop.xlane.xlu0 %2481  ;;  %9040 = vmatpush1.bf16.msra.mxu1 %v9924_v36  ;;  %9298 = vmatprep.subr.bf16.mxu0 %v9931_v48  ;;  %v9952_v48 = vld [vmem:[%s13837_s1 + $0x384] ss:$8 sps:$4 sm:$0xff]  }
 0x424   :  { %v6228_v11 = vsel %vm4384_vm2, %v6227_v56, %v6223_v39  ;;  %v3055_v50 = vmul.f32 0.0625, %v2482_v51  ;;  %9042 = vmatprep.subr.bf16.mxu1 %v9928_v29  ;;  %v9961_v51 = vld [vmem:[%s13837_s1 + $0x794] ss:$8 sps:$4 sm:$0xff]  }
 0x425   :  { %v6859_v49 = vrot.slane %v3072_v0, %v13926_v15  ;;  %v9954_v0 = vld [vmem:[%s13837_s1 + $0x380] ss:$8 sps:$4 sm:$0xff]  }
 0x426   :  { %v6775_v18 = vrot.slane %v3055_v50, %v13924_v45  ;;  %v2152_v28 = vpop.xlane.xlu1 %2151  ;;  %9300 = vmatpush1.bf16.msra.mxu0 %v9933_v19  ;;  %v9943_v45 = vld [vmem:[%s13837_s1 + $0x764] ss:$8 sps:$4 sm:$0xff]  }
 0x427   :  { %v6860_v34 = vsel %vm4384_vm2, %v6859_v49, %v6855_v35  ;;  %v2945_v2 = vmul.f32 0.0625, %v2152_v28  ;;  %v2101_v4 = vpop.xlane.xlu0 %2100  ;;  %9044 = vmatpush1.bf16.msra.mxu1 %v9930_v22  ;;  %9302 = vmatprep.subr.bf16.mxu0 %v9937_v6 }
 0x428   :  { %v6776_v25 = vsel %vm4377_vm1, %v6775_v18, %v6771_v53  ;;  %v2928_v40 = vmul.f32 0.0625, %v2101_v4  ;;  %9046 = vmatprep.subr.bf16.mxu1 %v9934_v14  ;;  %vm13942_vm1 = vcmask 326912   ;;  %v9963_v53 = vld [vmem:[%s13837_s1 + $0x790] ss:$8 sps:$4 sm:$0xff]  }
 0x429   :  { %v6232_v32 = vrot.slane %v2945_v2, %v13927_v33  ;;  %vm13947_vm4 = vmmov %vm13942_vm1 }
 0x42a   :  { %v6148_v31 = vrot.slane %v2928_v40, %v13926_v15  ;;  %v2536_v39 = vpop.xlane.xlu1 %2535  ;;  %9304 = vmatpush1.bf16.msra.mxu0 %v9939_v52 }
 0x42b   :  { %v6233_v58 = vsel %vm4391_vm3, %v6232_v32, %v6228_v11  ;;  %v3073_v12 = vmul.f32 0.0625, %v2536_v39  ;;  %v2485_v62 = vpop.xlane.xlu0 %2484  ;;  %9048 = vmatpush1.bf16.msra.mxu1 %v9936_v27  ;;  %9306 = vmatprep.subr.bf16.mxu0 %v9943_v45  ;;  %v9958_v11 = vld [vmem:[%s13837_s1 + $0x394] ss:$8 sps:$4 sm:$0xff]   ;;  %v9964_v27 = vld [vmem:[%s13837_s1 + $0x3a4] ss:$8 sps:$4 sm:$0xff]  }
 0x42c   :  { %v6149_v44 = vsel %vm4384_vm2, %v6148_v31, %v6144_v46  ;;  %v3056_v63 = vmul.f32 0.0625, %v2485_v62  ;;  %9050 = vmatprep.subr.bf16.mxu1 %v9940_v9  ;;  %v9969_v9 = vld [vmem:[%s13837_s1 + $0x7a0] ss:$8 sps:$4 sm:$0xff]  }
 0x42d   :  { %v6864_v24 = vrot.slane %v3073_v12, %v13927_v33 }
 0x42e   :  { %v6780_v35 = vrot.slane %v3056_v63, %v13926_v15  ;;  %v2155_v5 = vpop.xlane.xlu1 %2154  ;;  %9308 = vmatpush1.bf16.msra.mxu0 %v9945_v59  ;;  %v9955_v15 = vld [vmem:[%s13837_s1 + $0x784] ss:$8 sps:$4 sm:$0xff]   ;;  %v9966_v59 = vld [vmem:[%s13837_s1 + $0x3a0] ss:$8 sps:$4 sm:$0xff]  }
 0x42f   :  { %v6865_v55 = vsel %vm4391_vm3, %v6864_v24, %v6860_v34  ;;  %v2946_v7 = vmul.f32 0.0625, %v2155_v5  ;;  %v2104_v3 = vpop.xlane.xlu0 %2103  ;;  %9052 = vmatpush1.bf16.msra.mxu1 %v9942_v8  ;;  %9310 = vmatprep.subr.bf16.mxu0 %v9949_v57  ;;  %v9960_v34 = vld [vmem:[%s13837_s1 + $0x390] ss:$8 sps:$4 sm:$0xff]   ;;  %v9970_v8 = vld [vmem:[%s13837_s1 + $0x3b4] ss:$8 sps:$4 sm:$0xff]  }
 0x430   :  { %v6781_v20 = vsel %vm4384_vm2, %v6780_v35, %v6776_v25  ;;  %v2929_v36 = vmul.f32 0.0625, %v2104_v3  ;;  %9054 = vmatprep.subr.bf16.mxu1 %v9946_v13  ;;  %vm13943_vm2 = vmmov %vm13942_vm1  ;;  %v9975_v13 = vld [vmem:[%s13837_s1 + $0x7b0] ss:$8 sps:$4 sm:$0xff]  }
 0x431   :  { %v6237_v46 = vrot.slane %v2946_v7, %v13928_v26  ;;  %v9972_v5 = vld [vmem:[%s13837_s1 + $0x3b0] ss:$8 sps:$4 sm:$0xff]   ;;  %v9976_v7 = vld [vmem:[%s13837_s1 + $0x3c4] ss:$8 sps:$4 sm:$0xff]  }
 0x432   :  { %v6153_v21 = vrot.slane %v2929_v36, %v13927_v33  ;;  %v2539_v29 = vpop.xlane.xlu1 %2538  ;;  %9312 = vmatpush1.bf16.msra.mxu0 %v9951_v10  ;;  %v9978_v36 = vld [vmem:[%s13837_s1 + $0x3c0] ss:$8 sps:$4 sm:$0xff]  }
 0x433   :  { %v6238_v56 = vsel %vm13942_vm1, %v6237_v46, %v6233_v58  ;;  %v3074_v30 = vmul.f32 0.0625, %v2539_v29  ;;  %v2488_v19 = vpop.xlane.xlu0 %2487  ;;  %9056 = vmatpush1.bf16.msra.mxu1 %v9948_v54  ;;  %9314 = vmatprep.subr.bf16.mxu0 %v9955_v15  ;;  %v9973_v58 = vld [vmem:[%s13837_s1 + $0x7b4] ss:$8 sps:$4 sm:$0xff]   ;;  %v9981_v15 = vld [vmem:[%s13837_s1 + $0x7c0] ss:$8 sps:$4 sm:$0xff]  }
 0x434   :  { %v6154_v22 = vsel %vm4391_vm3, %v6153_v21, %v6149_v44  ;;  %v3057_v6 = vmul.f32 0.0625, %v2488_v19  ;;  %9058 = vmatprep.subr.bf16.mxu1 %v9952_v48  ;;  %v9985_v48 = vld [vmem:[%s13837_s1 + $0x7d4] ss:$8 sps:$4 sm:$0xff]  }
 0x435   :  { %v6869_v50 = vrot.slane %v3074_v30, %v13928_v26  ;;  %v9982_v29 = vld [vmem:[%s13837_s1 + $0x3d4] ss:$8 sps:$4 sm:$0xff]   ;;  %v9987_v30 = vld [vmem:[%s13837_s1 + $0x7d0] ss:$8 sps:$4 sm:$0xff]  }
 0x436   :  { %v6785_v14 = vrot.slane %v3057_v6, %v13927_v33  ;;  %v2158_v49 = vpop.xlane.xlu1 %2157  ;;  %9316 = vmatpush1.bf16.msra.mxu0 %v9957_v38  ;;  %v9967_v33 = vld [vmem:[%s13837_s1 + $0x7a4] ss:$8 sps:$4 sm:$0xff]  }
 0x437   :  { %v6870_v18 = vsel %vm13943_vm2, %v6869_v50, %v6865_v55  ;;  %v2947_v28 = vmul.f32 0.0625, %v2158_v49  ;;  %v2107_v52 = vpop.xlane.xlu0 %2106  ;;  %9060 = vmatpush1.bf16.msra.mxu1 %v9954_v0  ;;  %9318 = vmatprep.subr.bf16.mxu0 %v9961_v51  ;;  %v9984_v0 = vld [vmem:[%s13837_s1 + $0x3d0] ss:$8 sps:$4 sm:$0xff]   ;;  %v9991_v51 = vld [vmem:[%s13837_s1 + $0x7e4] ss:$8 sps:$4 sm:$0xff]   ;;  %vm13949_vm2 = vmmov %vm13944_vm0 }
 0x438   :  { %v6786_v2 = vsel %vm4391_vm3, %v6785_v14, %v6781_v20  ;;  %v2930_v4 = vmul.f32 0.0625, %v2107_v52  ;;  %9062 = vmatprep.subr.bf16.mxu1 %v9958_v11  ;;  %vm13945_vm3 = vmmov %vm13942_vm1  ;;  %v9993_v11 = vld [vmem:[%s13837_s1 + $0x7e0] ss:$8 sps:$4 sm:$0xff]   ;;  %v9997_v49 = vld [vmem:[%s13837_s1 + $0x7f4] ss:$8 sps:$4 sm:$0xff]  }
 0x439   :  { %v6242_v45 = vrot.slane %v2947_v28, %v13931_v47  ;;  %vm13948_vm1 = vmmov %vm13944_vm0  ;;  %v9990_v14 = vld [vmem:[%s13837_s1 + $0x3e0] ss:$8 sps:$4 sm:$0xff]   ;;  %v9999_v28 = vld [vmem:[%s13837_s1 + $0x7f0] ss:$8 sps:$4 sm:$0xff]  }
 0x43a   :  { %v6158_v25 = vrot.slane %v2930_v4, %v13928_v26  ;;  %v2542_v40 = vpop.xlane.xlu1 %2541  ;;  %9320 = vmatpush1.bf16.msra.mxu0 %v9963_v53  ;;  %v9994_v53 = vld [vmem:[%s13837_s1 + $0x3f4] ss:$8 sps:$4 sm:$0xff]  }
 0x43b   :  { %v13634_v32 = vsel %vm13944_vm0, %v6242_v45, %v6238_v56  ;;  %v3075_v31 = vmul.f32 0.0625, %v2542_v40  ;;  %v2491_v39 = vpop.xlane.xlu0 %2490  ;;  %9064 = vmatpush1.bf16.msra.mxu1 %v9960_v34  ;;  %9322 = vmatprep.subr.bf16.mxu0 %v9967_v33  ;;  %v9996_v34 = vld [vmem:[%s13837_s1 + $0x3f0] ss:$8 sps:$4 sm:$0xff]   ;;  %vm13950_vm0 = vcmask 523712  }
 0x43c   :  { %v6159_v12 = vsel %vm13945_vm3, %v6158_v25, %v6154_v22  ;;  %v3058_v62 = vmul.f32 0.0625, %v2491_v39  ;;  %9066 = vmatprep.subr.bf16.mxu1 %v9964_v27  ;;  %vm13951_vm3 = vmmov %vm13950_vm0 }
 0x43d   :  { %v6874_v57 = vrot.slane %v3075_v31, %v13931_v47 }
 0x43e   :  { %v6790_v44 = vrot.slane %v3058_v62, %v13928_v26  ;;  %v13648_v63 = vpop.xlane.xlu1 %2160  ;;  %9324 = vmatpush1.bf16.msra.mxu0 %v9969_v9  ;;  %v9979_v26 = vld [vmem:[%s13837_s1 + $0x7c4] ss:$8 sps:$4 sm:$0xff]  }
 0x43f   :  { %v13654_v24 = vsel %vm13946_vm5, %v6874_v57, %v6870_v18  ;;  %v2110_v35 = vpop.xlane.xlu0 %2109  ;;  %9068 = vmatpush1.bf16.msra.mxu1 %v9966_v59  ;;  %9326 = vmatprep.subr.bf16.mxu0 %v9973_v58  ;;  %vm13952_vm5 = vmmov %vm13950_vm0 }
 0x440   :  { %v6791_v10 = vsel %vm13947_vm4, %v6790_v44, %v6786_v2  ;;  %v2931_v55 = vmul.f32 0.0625, %v2110_v35  ;;  %9070 = vmatprep.subr.bf16.mxu1 %v9970_v8  ;;  %v2948_v44 = vmul.f32 0.0625, %v13648_v63 }
 0x442   :  { %v6163_v3 = vrot.slane %v2931_v55, %v13931_v47  ;;  %v2545_v54 = vpop.xlane.xlu1 %2544  ;;  %9328 = vmatpush1.bf16.msra.mxu0 %v9975_v13 }
 0x443   :  { %v2494_v20 = vpop.xlane.xlu0 %2493  ;;  %9072 = vmatpush1.bf16.msra.mxu1 %v9972_v5  ;;  %9330 = vmatprep.subr.bf16.mxu0 %v9979_v26  ;;  %v3076_v13 = vmul.f32 0.0625, %v2545_v54 }
 0x444   :  { %v13677_v46 = vsel %vm13948_vm1, %v6163_v3, %v6159_v12  ;;  %v3059_v21 = vmul.f32 0.0625, %v2494_v20  ;;  %9074 = vmatprep.subr.bf16.mxu1 %v9976_v7  ;;  %v6247_v7 = vrot.slane %v2948_v44, %v10281_v42 }
 0x446   :  { %v6795_v38 = vrot.slane %v3059_v21, %v13931_v47  ;;  %v2164_v56 = vpop.xlane.xlu1 %2163  ;;  %9332 = vmatpush1.bf16.msra.mxu0 %v9981_v15  ;;  %v9988_v47 = vld [vmem:[%s13837_s1 + $0x3e4] ss:$8 sps:$4 sm:$0xff]   ;;  %v6879_v15 = vrot.slane %v3076_v13, %v10281_v42  ;;  %s10024_s1 = smov [#allocation2]  }
 0x447   :  { %v2113_v19 = vpop.xlane.xlu0 %2112  ;;  %9076 = vmatpush1.bf16.msra.mxu1 %v9978_v36  ;;  %9334 = vmatprep.subr.bf16.mxu0 %v9985_v48  ;;  %v2949_v35 = vmul.f32 0.0625, %v2164_v56  ;;  %v6248_v56 = vsel %vm4412_vm6, %v6247_v7, %v13634_v32  ;;  %s7545_s20 = sshll.u32 %s10024_s1, 4  ;;  %s7546_s20 = int_to_ptr.vmem [resolvable:$true] %s7545_s20 }
 0x448   :  { %v13693_v22 = vsel %vm13949_vm2, %v6795_v38, %v6791_v10  ;;  %9078 = vmatprep.subr.bf16.mxu1 %v9982_v29  ;;  %v2932_v5 = vmul.f32 0.0625, %v2113_v19  ;;  %s10000_s21 = scalar_lea.vmem %s7546_s20, 64  ;;  %p10005_p1 = scmp.lt.s32.totalorder %s7546_s20, %s7546_s20 }
 0x449   :  { %v6252_v20 = vrot.slane %v2949_v35, %v10278_v41  ;;  %p10001_p0 = scmp.ne.s32.totalorder %s7546_s20, %s10000_s21  ;;  %p10006_p2 = scmp.lt.s32.totalorder %s10000_s21, %s10000_s21 }
 0x44a   :  { %v2548_v6 = vpop.xlane.xlu1 %2547  ;;  %9336 = vmatpush1.bf16.msra.mxu0 %v9987_v30  ;;  %v6168_v48 = vrot.slane %v2932_v5, %v10281_v42 }
 0x44b   :  { %v2497_v50 = vpop.xlane.xlu0 %2496  ;;  %9080 = vmatpush1.bf16.msra.mxu1 %v9984_v0  ;;  %9338 = vmatprep.subr.bf16.mxu0 %v9991_v51  ;;  %v3077_v10 = vmul.f32 0.0625, %v2548_v6  ;;  %v6880_v0 = vsel %vm4412_vm6, %v6879_v15, %v13654_v24  ;;  %v6253_v51 = vsel %vm13950_vm0, %v6252_v20, %v6248_v56  ;;  %p10007_p3 = por %p10006_p2, %p10005_p1 }
 0x44c   :  { %9082 = vmatprep.subr.bf16.mxu1 %v9988_v47  ;;  %v3060_v3 = vmul.f32 0.0625, %v2497_v50 }
 0x44d   :  { %v6884_v54 = vrot.slane %v3077_v10, %v10278_v41  ;;  %p10008_p4 = pnand %p10007_p3, %p10001_p0 }
 0x44e   :  { %v2167_v18 = vpop.xlane.xlu1 %2166  ;;  %9340 = vmatpush1.bf16.msra.mxu0 %v9993_v11  ;;  %v6800_v30 = vrot.slane %v3060_v3, %v10281_v42  ;;  %v6169_v11 = vsel %vm4412_vm6, %v6168_v48, %v13677_v46 }
 0x44f   :  { %v2116_v52 = vpop.xlane.xlu0 %2115  ;;  %9084 = vmatpush1.bf16.msra.mxu1 %v9990_v14  ;;  %9342 = vmatprep.subr.bf16.mxu0 %v9997_v49  ;;  %v2950_v36 = vmul.f32 0.0625, %v2167_v18  ;;  %v6885_v32 = vsel %vm13951_vm3, %v6884_v54, %v6880_v0 }
 0x450   :  { %9086 = vmatprep.subr.bf16.mxu1 %v9994_v53  ;;  %v2933_v21 = vmul.f32 0.0625, %v2116_v52  ;;  %v6801_v52 = vsel %vm4412_vm6, %v6800_v30, %v13693_v22  ;;  %vm13953_vm6 = vmmov %vm13950_vm0 }
 0x451   :  { %v6257_v47 = vrot.slane %v2950_v36, %v10302_v1 }
 0x452   :  { %v2551_v33 = vpop.xlane.xlu1 %2550  ;;  %9344 = vmatpush1.bf16.msra.mxu0 %v9999_v28  ;;  %v6173_v50 = vrot.slane %v2933_v21, %v10278_v41 }
 0x453   :  { %v2500_v2 = vpop.xlane.xlu0 %2499  ;;  %9088 = vmatpush1.bf16.msra.mxu1 %v9996_v34  ;;  %v3078_v29 = vmul.f32 0.0625, %v2551_v33  ;;  %v6258_v46 = vsel %vm4426_vm8, %v6257_v47, %v6253_v51 }
 0x454   :  { %v3061_v19 = vmul.f32 0.0625, %v2500_v2  ;;  %v6174_v44 = vsel %vm13952_vm5, %v6173_v50, %v6169_v11 }
 0x455   :  { %v6889_v42 = vrot.slane %v3078_v29, %v10302_v1 }
 0x456   :  { %v2170_v4 = vpop.xlane.xlu1 %2169  ;;  %v6805_v34 = vrot.slane %v3061_v19, %v10278_v41 }
 0x457   :  { %v2119_v27 = vpop.xlane.xlu0 %2118  ;;  %v2951_v6 = vmul.f32 0.0625, %v2170_v4  ;;  %v6890_v22 = vsel %vm4426_vm8, %v6889_v42, %v6885_v32 }
 0x458   :  { %v2934_v14 = vmul.f32 0.0625, %v2119_v27  ;;  %v6806_v10 = vsel %vm13953_vm6, %v6805_v34, %v6801_v52 }
 0x459   :  { %v6262_v4 = vrot.slane %v2951_v6, %v10296_v61 }
 0x45a   :  { %v2554_v45 = vpop.xlane.xlu1 %2553  ;;  %v6178_v13 = vrot.slane %v2934_v14, %v10302_v1 }
 0x45b   :  { %v2503_v25 = vpop.xlane.xlu0 %2502  ;;  %v3079_v49 = vmul.f32 0.0625, %v2554_v45  ;;  %v6263_v3 = vsel %vm4433_vm9, %v6262_v4, %v6258_v46 }
 0x45c   :  { %v3062_v18 = vmul.f32 0.0625, %v2503_v25 }
 0x45d   :  { %v6894_v25 = vrot.slane %v3079_v49, %v10296_v61 }
 0x45e   :  { %v2173_v40 = vpop.xlane.xlu1 %2172  ;;  %v6810_v41 = vrot.slane %v3062_v18, %v10302_v1  ;;  %v6179_v1 = vsel %vm4426_vm8, %v6178_v13, %v6174_v44 }
 0x45f   :  { %v2122_v9 = vpop.xlane.xlu0 %2121  ;;  %v2952_v28 = vmul.f32 0.0625, %v2173_v40  ;;  %v6895_v36 = vsel %vm4433_vm9, %v6894_v25, %v6890_v22 }
 0x460   :  { %v2935_v33 = vmul.f32 0.0625, %v2122_v9  ;;  %v6811_v54 = vsel %vm4426_vm8, %v6810_v41, %v6806_v10 }
 0x461   :  { %v6267_v9 = vrot.slane %v2952_v28, %v10319_v23 }
 0x462   :  { %v2557_v31 = vpop.xlane.xlu1 %2556 }
 0x463   :  { %v2506_v39 = vpop.xlane.xlu0 %2505  ;;  %v3080_v2 = vmul.f32 0.0625, %v2557_v31  ;;  %v6268_v29 = vsel %vm4440_vm10, %v6267_v9, %v6263_v3 }
 0x464   :  { %v3063_v27 = vmul.f32 0.0625, %v2506_v39  ;;  %v6183_v39 = vrot.slane %v2935_v33, %v10296_v61 }
 0x466   :  { %v2176_v59 = vpop.xlane.xlu1 %2175  ;;  %v6184_v30 = vsel %vm4433_vm9, %v6183_v39, %v6179_v1 }
 0x467   :  { %v2125_v58 = vpop.xlane.xlu0 %2124  ;;  %v2953_v45 = vmul.f32 0.0625, %v2176_v59  ;;  %v6899_v59 = vrot.slane %v3080_v2, %v10319_v23 }
 0x468   :  { %v2936_v40 = vmul.f32 0.0625, %v2125_v58  ;;  %v6815_v58 = vrot.slane %v3063_v27, %v10296_v61 }
 0x469   :  { %v6272_v15 = vrot.slane %v2953_v45, %v10313_v17 }
 0x46a   :  { %v2560_v12 = vpop.xlane.xlu1 %2559  ;;  %v6816_v51 = vsel %vm4433_vm9, %v6815_v58, %v6811_v54 }
 0x46b   :  { %v13716_v62 = vpop.xlane.xlu0 %2508  ;;  %v3081_v31 = vmul.f32 0.0625, %v2560_v12  ;;  %v6188_v12 = vrot.slane %v2936_v40, %v10319_v23  ;;  %v6273_v47 = vsel %vm4447_vm11, %v6272_v15, %v6268_v29 }
 0x46c   :  { %v3064_v56 = vmul.f32 0.0625, %v13716_v62 }
 0x46d   :  { %v6189_v50 = vsel %vm4440_vm10, %v6188_v12, %v6184_v30 }
 0x46e   :  { %v2179_v8 = vpop.xlane.xlu1 %2178  ;;  %v6820_v18 = vrot.slane %v3064_v56, %v10319_v23 }
 0x46f   :  { %v13718_v57 = vpop.xlane.xlu0 %2127  ;;  %v2954_v7 = vmul.f32 0.0625, %v2179_v8  ;;  %v6904_v8 = vrot.slane %v3081_v31, %v10313_v17  ;;  %v13954_v31 = vld [vmem:[#allocation20_spill] sm:$0xff] }
 0x470   :  { %v2937_v62 = vmul.f32 0.0625, %v13718_v57 }
 0x471   :  { %v6277_v19 = vrot.slane %v2954_v7, %v10336_v43  ;;  %v6821_v7 = vsel %vm4440_vm10, %v6820_v18, %v6816_v51 }
 0x472   :  { %v13721_v26 = vpop.xlane.xlu1 %2562  ;;  %v6193_v23 = vrot.slane %v2937_v62, %v10313_v17 }
 0x473   :  { %v13723_v55 = vpop.xlane.xlu0 %2511  ;;  %v3082_v0 = vmul.f32 0.0625, %v13721_v26  ;;  %v6278_v34 = vsel %vm4454_vm12, %v6277_v19, %v6273_v47 }
 0x474   :  { %v3065_v26 = vmul.f32 0.0625, %v13723_v55 }
 0x476   :  { %v2182_v63 = vpop.xlane.xlu1 %2181  ;;  %v6825_v25 = vrot.slane %v3065_v26, %v10313_v17 }
 0x477   :  { %v13730_v38 = vpop.xlane.xlu0 %2130  ;;  %v2955_v20 = vmul.f32 0.0625, %v2182_v63  ;;  %v6900_v63 = vsel %vm4440_vm10, %v6899_v59, %v6895_v36 }
 0x478   :  { %v6905_v42 = vsel %vm4447_vm11, %v6904_v8, %v6900_v63  ;;  %v2938_v33 = vmul.f32 0.0625, %v13730_v38  ;;  %v6826_v1 = vsel %vm4447_vm11, %v6825_v25, %v6821_v7  ;;  %v13955_v8 = vld [vmem:[#allocation28_spill] sm:$0xff] }
 0x479   :  { %v6282_v6 = vrot.slane %v2955_v20, %v10330_v37 }
 0x47a   :  { %v2566_v53 = vpop.xlane.xlu1 %2565  ;;  %v6198_v10 = vrot.slane %v2938_v33, %v10336_v43 }
 0x47b   :  { %v2515_v24 = vpop.xlane.xlu0 %2514  ;;  %v3083_v11 = vmul.f32 0.0625, %v2566_v53  ;;  %v6909_v53 = vrot.slane %v3082_v0, %v10336_v43  ;;  %v6283_v57 = vsel %vm4461_vm13, %v6282_v6, %v6278_v34  ;;  %v13956_v6 = vld [vmem:[#allocation27_spill] sm:$0xff] }
 0x47c   :  { %v3066_v2 = vmul.f32 0.0625, %v2515_v24 }
 0x47d   :  { %v6914_v46 = vrot.slane %v3083_v11, %v10330_v37  ;;  %v6910_v22 = vsel %vm4454_vm12, %v6909_v53, %v6905_v42 }
 0x47e   :  { %v2185_v35 = vpop.xlane.xlu1 %2184  ;;  %v6830_v41 = vrot.slane %v3066_v2, %v10336_v43 }
 0x47f   :  { %v2134_v5 = vpop.xlane.xlu0 %2133  ;;  %v2956_v48 = vmul.f32 0.0625, %v2185_v35  ;;  %v6915_v39 = vsel %vm4461_vm13, %v6914_v46, %v6910_v22 }
 0x480   :  { %v2939_v45 = vmul.f32 0.0625, %v2134_v5  ;;  %v6831_v54 = vsel %vm4454_vm12, %v6830_v41, %v6826_v1 }
 0x481   :  { %v6287_v14 = vrot.slane %v2956_v48, %v13915_v60 }
 0x482   :  { %v2569_v21 = vpop.xlane.xlu1 %2568  ;;  %v6203_v3 = vrot.slane %v2939_v45, %v10330_v37 }
 0x483   :  { %v2518_v61 = vpop.xlane.xlu0 %2517  ;;  %v3084_v49 = vmul.f32 0.0625, %v2569_v21  ;;  %v6288_v13 = vsel %vm4468_vm14, %v6287_v14, %v6283_v57  ;;  %v6194_v21 = vsel %vm4447_vm11, %v6193_v23, %v6189_v50  ;;  %v13957_v50 = vld [vmem:[#allocation19_spill] sm:$0xff] }
 0x484   :  { %v3067_v4 = vmul.f32 0.0625, %v2518_v61  ;;  %v6199_v56 = vsel %vm4454_vm12, %v6198_v10, %v6194_v21 }
 0x485   :  { %v6919_v55 = vrot.slane %v3084_v49, %v13915_v60 }
 0x486   :  { %v2188_v32 = vpop.xlane.xlu1 %2187  ;;  %v6835_v59 = vrot.slane %v3067_v4, %v10330_v37 }
 0x487   :  { %v2957_v28 = vmul.f32 0.0625, %v2188_v32  ;;  %v2137_v52 = vpop.xlane.xlu0 %2136  ;;  %v6920_v20 = vsel %vm4468_vm14, %v6919_v55, %v6915_v39 }
 0x488   :  { %v2940_v40 = vmul.f32 0.0625, %v2137_v52  ;;  %v6836_v61 = vsel %vm4461_vm13, %v6835_v59, %v6831_v54 }
 0x489   :  { %v6292_v27 = vrot.slane %v2957_v28, %v13916_v16 }
 0x48a   :  { %v2572_v44 = vpop.xlane.xlu1 %2571  ;;  %v6208_v43 = vrot.slane %v2940_v40, %v13915_v60 }
 0x48b   :  { %v3085_v38 = vmul.f32 0.0625, %v2572_v44  ;;  %v2521_v24 = vpop.xlane.xlu0 %2520  ;;  %v6293_v35 = vsel %vm4475_vm15, %v6292_v27, %v6288_v13 }
 0x48c   :  { %v3068_v9 = vmul.f32 0.0625, %v2521_v24  ;;  %v6934_v5 = vsel %vm6926_vm7, %v6293_v35, %v13954_v31 }
 0x48d   :  { %v6924_v17 = vrot.slane %v3085_v38, %v13916_v16  ;;  %7236 = vmatprep.mubr.f32.mxu1 %v6934_v5 }
 0x48e   :  { %v6840_v58 = vrot.slane %v3068_v9, %v13915_v60  ;;  %v2524_v15 = vpop.xlane.xlu1 %2523  ;;  %v6204_v60 = vsel %vm4461_vm13, %v6203_v3, %v6199_v56 }
 0x48f   :  { %v3069_v36 = vmul.f32 0.0625, %v2524_v15  ;;  %v2140_v12 = vpop.xlane.xlu0 %2139  ;;  %v6925_v48 = vsel %vm4475_vm15, %v6924_v17, %v6920_v20  ;;  %v6209_v0 = vsel %vm4468_vm14, %v6208_v43, %v6204_v60 }
 0x490   :  { %v2941_v29 = vmul.f32 0.0625, %v2140_v12  ;;  %v6942_v37 = vsel %vm6926_vm7, %v6925_v48, %v13955_v8  ;;  %v6841_v63 = vsel %vm4468_vm14, %v6840_v58, %v6836_v61 }
 0x491   :  { %v6845_v30 = vrot.slane %v3069_v36, %v13916_v16  ;;  %7520 = vmatprep.mubr.f32.mxu0 %v6942_v37 }
 0x492   :  { %v6213_v19 = vrot.slane %v2941_v29, %v13916_v16 }
 0x493   :  { %v6846_v51 = vsel %vm4475_vm15, %v6845_v30, %v6841_v63 }
 0x494   :  { %v6214_v47 = vsel %vm4475_vm15, %v6213_v19, %v6209_v0  ;;  %v6941_v11 = vsel %vm6926_vm7, %v6846_v51, %v13956_v6 }
 0x495   :  { %v6933_v62 = vsel %vm6926_vm7, %v6214_v47, %v13957_v50  ;;  %7521 = vmatmul.mubr.f32.vlgmr.msra.gmra.mrb[0].mxu0 %v6941_v11 }
 0x496   :  { %7237 = vmatmul.mubr.f32.vlgmr.msra.gmra.mrb[0].mxu1 %v6933_v62 }
 0x568   :  { %v7522_v14 = vpop.f32.mrb[0].mxu0 }
 0x569   :  { %v7238_v49 = vpop.f32.mrb[0].mxu1  ;;  %v7524_v32 = vpop.f32.mrb[1].mxu0 }
 0x56a   :  { %v9345_v42 = vadd.f32 %v7522_v14, %v7238_v49  ;;  %v7240_v18 = vpop.f32.mrb[1].mxu1 }
 0x56b   :  { %v9346_v16 = vadd.f32 %v7524_v32, %v7240_v18 }
 0x56d   :  { %v7529_v26 = vcombine.low %v9345_v42, %v9346_v16 }
 0x56f   :  { %7553 = vst.sshfl [vmem:[#allocation2] sm:$0x33 pattern:$0x76325410] %v7529_v26 }
 0x570   :  { %10011 = shalt.err (!%p10008_p4)
}
 0x571   :  { %s10012_s24 = scalar_lea.hbm %s13838_s2, 64 }
 0x572   :  { %p10013_p5 = scmp.ne.s32.totalorder %s13838_s2, %s10012_s24  ;;  %p10016_p6 = scmp.lt.u32.totalorder %s10012_s24, %s13838_s2 }
 0x574   :  { %p10018_p7 = pnand %p10016_p6, %p10013_p5 }
 0x576   :  { %10021 = shalt.err (!%p10018_p7)
}
 0x577   :  { %7548 = dma.vmem_to_hbm [thread:$0]  %s7546_s20, 64, %s13838_s2, [#allocation3]  }
 0x578   :  { %10022 = dma.done.wait [#allocation3], 64  }
 0x579   :  { %10023 = vsyncadd [#allocation3], 4294967232 }
 0x57a   :  { %7552 = vsyncpa [#allocation3], 1 }

</bundles_post_ra>
